<compile_context>
chip_gen: v5e
topology: v5e:2x2
jax: 0.10.0
libtpu: 0.0.40
codegen_flags: <defaults>
</compile_context>

<pallas_src>
import numpy as np
import jax
import jax.numpy as jnp
from jax import lax
from jax.experimental import pallas as pl
from jax.experimental.pallas import tpu as pltpu

INPUT_SIZE = 1
NUM_HIDDEN = 9
NUM_LAYERS = 1
H_PAD = 128  # hidden dim padded to one full lane width (padding is exact: tanh(0)=0)
DOT_PRECISION = lax.Precision.HIGHEST  # TODO(synk): try HIGH and re-validate 1e-5


def rnn_kernel(x_ref, par_ref, whhT_ref, y_ref, hid_ref, hs_ref):
    """x:(S,1), packed params:(8,128), whhT:(128,128) -> y:(S,1), hid:(1,128)."""
    seq = x_ref.shape[0]

    wih = par_ref[0:1, :]            # (1,128)  W_ih column, zero padded
    b = par_ref[1:2, :]              # (1,128)  b_ih + b_hh, zero padded
    wout = par_ref[2:3, :]           # (1,128)  Linear weight row, zero padded
    bout = par_ref[3:4, 0:1]         # (1,1)    Linear bias

    # Input contribution + bias for every timestep in one vectorized pass:
    # (S,1)*(1,128)+(1,128) -> (S,128).  Kept as a traced value (~4 vregs).
    pre = x_ref[...] * wih + b

    whhT = whhT_ref[...]             # loop-invariant MXU RHS, loaded once (16 vregs)

    h = jnp.zeros((1, H_PAD), jnp.float32)
    for t in range(seq):             # fully unrolled; all indices static
        pre_h = jnp.dot(h, whhT, preferred_element_type=jnp.float32,
                        precision=DOT_PRECISION)                    # (1,128)
        h = jnp.tanh(pre_h + pre[t:t + 1, :])                       # (1,128)
        # Lane-dense single-sublane store; off the h critical path.
        hs_ref[pl.ds(t, 1), :] = h

    hid_ref[...] = h                                                # (1,128)

    # Epilogue Linear(9,1) over all timesteps at once.
    hs = hs_ref[...]                                                # (S,128)
    y_ref[...] = jnp.sum(hs * wout, axis=-1, keepdims=True) + bout  # (S,1)


def init_params(key):
    # PyTorch default init: U(-1/sqrt(hidden), 1/sqrt(hidden)) for RNN and Linear.
    bound = 1.0 / np.sqrt(NUM_HIDDEN)
    keys = jax.random.split(key, 6)
    u = lambda kk, shape: jax.random.uniform(kk, shape, jnp.float32, -bound, bound)
    return dict(
        weight_ih=u(keys[0], (NUM_HIDDEN, INPUT_SIZE)),
        weight_hh=u(keys[1], (NUM_HIDDEN, NUM_HIDDEN)),
        bias_ih=u(keys[2], (NUM_HIDDEN,)),
        bias_hh=u(keys[3], (NUM_HIDDEN,)),
        out_weight=u(keys[4], (1, NUM_HIDDEN)),
        out_bias=u(keys[5], (1,)),
    )


def pack_params(params):
    """Lane-pad + pack weights once, outside the per-call path.

    Row 0: W_ih[:,0]   Row 1: b_ih + b_hh   Row 2: W_out[0]   Row 3, lane 0: b_out
    """
    H = NUM_HIDDEN
    small = jnp.zeros((8, H_PAD), jnp.float32)
    small = small.at[0, :H].set(params["weight_ih"][:, 0])
    small = small.at[1, :H].set(params["bias_ih"] + params["bias_hh"])
    small = small.at[2, :H].set(params["out_weight"][0, :])
    small = small.at[3, 0].set(params["out_bias"][0])
    whhT = jnp.zeros((H_PAD, H_PAD), jnp.float32).at[:H, :H].set(
        params["weight_hh"].T)
    return dict(small=small, whhT=whhT)


@jax.jit
def rnnnet_forward(x, packed):
    """Pallas implementation of rnnnet.forward(x, None) -> (y, hidden)."""
    seq, batch, inp = x.shape
    assert batch == 1 and inp == INPUT_SIZE

    x2 = x.reshape(seq, 1).astype(jnp.float32)

    vmem = pl.BlockSpec(memory_space=pltpu.MemorySpace.VMEM)  # whole array in VMEM
    y2, hid_p = pl.pallas_call(
        rnn_kernel,
        out_shape=(jax.ShapeDtypeStruct((seq, 1), jnp.float32),
                   jax.ShapeDtypeStruct((1, H_PAD), jnp.float32)),
        in_specs=[vmem, vmem, vmem],
        out_specs=(vmem, vmem),
        scratch_shapes=[pltpu.VMEM((seq, H_PAD), jnp.float32)],  # per-step h rows
    )(x2, packed["small"], packed["whhT"])

    y = y2.reshape(seq, 1, 1)
    hidden = hid_p[:, :NUM_HIDDEN].reshape(NUM_LAYERS, 1, NUM_HIDDEN)
    # TODO(synk): hidden.detach() is an autograd concept; forward-only here.
    return y, hidden


def ref_forward(x, p):
    """Pure-JAX reference of PyTorch nn.RNN(1, 9, 1) + Linear(9, 1) in f32."""
    def step(h, xt):
        h = jnp.tanh(xt * p["weight_ih"][:, 0]               # input_size == 1
                     + p["bias_ih"]
                     + jnp.dot(h, p["weight_hh"].T, precision=lax.Precision.HIGHEST)
                     + p["bias_hh"])
        return h, h
    h0 = jnp.zeros((1, NUM_HIDDEN), jnp.float32)
    hT, hs = lax.scan(step, h0, x)                            # hs: (seq, 1, H)
    y = jnp.sum(hs * p["out_weight"][0], axis=-1, keepdims=True) + p["out_bias"]
    return y, hT.reshape(NUM_LAYERS, 1, NUM_HIDDEN)


if __name__ == "__main__":
    # Same input as the PyTorch script: sin(t + cos(t)), first 30 samples.
    N = 500
    seqlength = 30
    t = jnp.linspace(0.0, 30.0 * np.pi, N)
    data = jnp.sin(t + jnp.cos(t))
    x = data[:seqlength].reshape(seqlength, 1, 1).astype(jnp.float32)

    params = init_params(jax.random.PRNGKey(0))
    packed = pack_params(params)          # padded/packed once, reused per call

    y, hidden = rnnnet_forward(x, packed)
    y = jax.block_until_ready(y)
    hidden = jax.block_until_ready(hidden)

    y_ref, hidden_ref = ref_forward(x, params)
    np.testing.assert_allclose(np.asarray(y), np.asarray(y_ref), rtol=1e-5, atol=1e-5)
    np.testing.assert_allclose(np.asarray(hidden), np.asarray(hidden_ref),
                               rtol=1e-5, atol=1e-5)

    assert y.shape == (seqlength, 1, 1)
    assert hidden.shape == (NUM_LAYERS, 1, NUM_HIDDEN)
    print("KERNEL_OK")
</pallas_src>

<mosaic_0001>
module attributes {stable_mosaic.version = 11 : i64} {
  func.func @rnn_kernel(%arg0: memref<30x1xf32, #tpu.memory_space<vmem>>, %arg1: memref<8x128xf32, #tpu.memory_space<vmem>>, %arg2: memref<128x128xf32, #tpu.memory_space<vmem>>, %arg3: memref<30x1xf32, #tpu.memory_space<vmem>>, %arg4: memref<1x128xf32, #tpu.memory_space<vmem>>, %arg5: memref<30x128xf32, #tpu.memory_space<vmem>>) attributes {dimension_semantics = [], scalar_prefetch = 0 : i64, scratch_operands = 1 : i64, tpu.core_type = #tpu.core_type<tc>} {
    %c0 = arith.constant 0 : index
    %c0_0 = arith.constant 0 : index
    %0 = vector.load %arg1[%c0, %c0_0] : memref<8x128xf32, #tpu.memory_space<vmem>>, vector<1x128xf32>
    %c1 = arith.constant 1 : index
    %c0_1 = arith.constant 0 : index
    %1 = vector.load %arg1[%c1, %c0_1] : memref<8x128xf32, #tpu.memory_space<vmem>>, vector<1x128xf32>
    %c2 = arith.constant 2 : index
    %c0_2 = arith.constant 0 : index
    %2 = vector.load %arg1[%c2, %c0_2] : memref<8x128xf32, #tpu.memory_space<vmem>>, vector<1x128xf32>
    %c3 = arith.constant 3 : index
    %c0_3 = arith.constant 0 : index
    %3 = vector.load %arg1[%c3, %c0_3] : memref<8x128xf32, #tpu.memory_space<vmem>>, vector<1x1xf32>
    %c0_4 = arith.constant 0 : index
    %c0_5 = arith.constant 0 : index
    %4 = vector.load %arg0[%c0_4, %c0_5] : memref<30x1xf32, #tpu.memory_space<vmem>>, vector<30x1xf32>
    %5 = vector.broadcast %4 : vector<30x1xf32> to vector<30x128xf32>
    %6 = vector.broadcast %0 : vector<1x128xf32> to vector<30x128xf32>
    %7 = arith.mulf %5, %6 : vector<30x128xf32>
    %8 = vector.broadcast %1 : vector<1x128xf32> to vector<30x128xf32>
    %9 = arith.addf %7, %8 : vector<30x128xf32>
    %c0_6 = arith.constant 0 : index
    %c0_7 = arith.constant 0 : index
    %10 = vector.load %arg2[%c0_6, %c0_7] : memref<128x128xf32, #tpu.memory_space<vmem>>, vector<128x128xf32>
    %cst = arith.constant 0.000000e+00 : f32
    %11 = vector.broadcast %cst : f32 to vector<1x128xf32>
    %cst_8 = arith.constant dense<0.000000e+00> : vector<1x128xf32>
    %12 = tpu.matmul %11, %10, %cst_8 {dimension_numbers = #tpu.dot_dimension_numbers<[1], [0], [0], [1], [0, 0, 1, 1], [], []>, precision = #tpu.contract_precision<fp32>} : vector<1x128xf32>, vector<128x128xf32>, vector<1x128xf32> -> vector<1x128xf32>
    %13 = vector.extract_strided_slice %9 {offsets = [0, 0], sizes = [1, 128], strides = [1, 1]} : vector<30x128xf32> to vector<1x128xf32>
    %14 = arith.addf %12, %13 : vector<1x128xf32>
    %15 = math.tanh %14 : vector<1x128xf32>
    %c0_9 = arith.constant 0 : index
    %c0_10 = arith.constant 0 : index
    %16 = vector.load %arg5[%c0_9, %c0_10] : memref<30x128xf32, #tpu.memory_space<vmem>>, vector<1x128xf32>
    tpu.vector_store %arg5[%c0_9, %c0_10], %15 {strides = array<i32>} : memref<30x128xf32, #tpu.memory_space<vmem>>, vector<1x128xf32>,
    %cst_11 = arith.constant dense<0.000000e+00> : vector<1x128xf32>
    %17 = tpu.matmul %15, %10, %cst_11 {dimension_numbers = #tpu.dot_dimension_numbers<[1], [0], [0], [1], [0, 0, 1, 1], [], []>, precision = #tpu.contract_precision<fp32>} : vector<1x128xf32>, vector<128x128xf32>, vector<1x128xf32> -> vector<1x128xf32>
    %18 = vector.extract_strided_slice %9 {offsets = [1, 0], sizes = [1, 128], strides = [1, 1]} : vector<30x128xf32> to vector<1x128xf32>
    %19 = arith.addf %17, %18 : vector<1x128xf32>
    %20 = math.tanh %19 : vector<1x128xf32>
    %c1_12 = arith.constant 1 : index
    %c0_13 = arith.constant 0 : index
    %21 = vector.load %arg5[%c1_12, %c0_13] : memref<30x128xf32, #tpu.memory_space<vmem>>, vector<1x128xf32>
    tpu.vector_store %arg5[%c1_12, %c0_13], %20 {strides = array<i32>} : memref<30x128xf32, #tpu.memory_space<vmem>>, vector<1x128xf32>,
    %cst_14 = arith.constant dense<0.000000e+00> : vector<1x128xf32>
    %22 = tpu.matmul %20, %10, %cst_14 {dimension_numbers = #tpu.dot_dimension_numbers<[1], [0], [0], [1], [0, 0, 1, 1], [], []>, precision = #tpu.contract_precision<fp32>} : vector<1x128xf32>, vector<128x128xf32>, vector<1x128xf32> -> vector<1x128xf32>
    %23 = vector.extract_strided_slice %9 {offsets = [2, 0], sizes = [1, 128], strides = [1, 1]} : vector<30x128xf32> to vector<1x128xf32>
    %24 = arith.addf %22, %23 : vector<1x128xf32>
    %25 = math.tanh %24 : vector<1x128xf32>
    %c2_15 = arith.constant 2 : index
    %c0_16 = arith.constant 0 : index
    %26 = vector.load %arg5[%c2_15, %c0_16] : memref<30x128xf32, #tpu.memory_space<vmem>>, vector<1x128xf32>
    tpu.vector_store %arg5[%c2_15, %c0_16], %25 {strides = array<i32>} : memref<30x128xf32, #tpu.memory_space<vmem>>, vector<1x128xf32>,
    %cst_17 = arith.constant dense<0.000000e+00> : vector<1x128xf32>
    %27 = tpu.matmul %25, %10, %cst_17 {dimension_numbers = #tpu.dot_dimension_numbers<[1], [0], [0], [1], [0, 0, 1, 1], [], []>, precision = #tpu.contract_precision<fp32>} : vector<1x128xf32>, vector<128x128xf32>, vector<1x128xf32> -> vector<1x128xf32>
    %28 = vector.extract_strided_slice %9 {offsets = [3, 0], sizes = [1, 128], strides = [1, 1]} : vector<30x128xf32> to vector<1x128xf32>
    %29 = arith.addf %27, %28 : vector<1x128xf32>
    %30 = math.tanh %29 : vector<1x128xf32>
    %c3_18 = arith.constant 3 : index
    %c0_19 = arith.constant 0 : index
    %31 = vector.load %arg5[%c3_18, %c0_19] : memref<30x128xf32, #tpu.memory_space<vmem>>, vector<1x128xf32>
    tpu.vector_store %arg5[%c3_18, %c0_19], %30 {strides = array<i32>} : memref<30x128xf32, #tpu.memory_space<vmem>>, vector<1x128xf32>,
    %cst_20 = arith.constant dense<0.000000e+00> : vector<1x128xf32>
    %32 = tpu.matmul %30, %10, %cst_20 {dimension_numbers = #tpu.dot_dimension_numbers<[1], [0], [0], [1], [0, 0, 1, 1], [], []>, precision = #tpu.contract_precision<fp32>} : vector<1x128xf32>, vector<128x128xf32>, vector<1x128xf32> -> vector<1x128xf32>
    %33 = vector.extract_strided_slice %9 {offsets = [4, 0], sizes = [1, 128], strides = [1, 1]} : vector<30x128xf32> to vector<1x128xf32>
    %34 = arith.addf %32, %33 : vector<1x128xf32>
    %35 = math.tanh %34 : vector<1x128xf32>
    %c4 = arith.constant 4 : index
    %c0_21 = arith.constant 0 : index
    %36 = vector.load %arg5[%c4, %c0_21] : memref<30x128xf32, #tpu.memory_space<vmem>>, vector<1x128xf32>
    tpu.vector_store %arg5[%c4, %c0_21], %35 {strides = array<i32>} : memref<30x128xf32, #tpu.memory_space<vmem>>, vector<1x128xf32>,
    %cst_22 = arith.constant dense<0.000000e+00> : vector<1x128xf32>
    %37 = tpu.matmul %35, %10, %cst_22 {dimension_numbers = #tpu.dot_dimension_numbers<[1], [0], [0], [1], [0, 0, 1, 1], [], []>, precision = #tpu.contract_precision<fp32>} : vector<1x128xf32>, vector<128x128xf32>, vector<1x128xf32> -> vector<1x128xf32>
    %38 = vector.extract_strided_slice %9 {offsets = [5, 0], sizes = [1, 128], strides = [1, 1]} : vector<30x128xf32> to vector<1x128xf32>
    %39 = arith.addf %37, %38 : vector<1x128xf32>
    %40 = math.tanh %39 : vector<1x128xf32>
    %c5 = arith.constant 5 : index
    %c0_23 = arith.constant 0 : index
    %41 = vector.load %arg5[%c5, %c0_23] : memref<30x128xf32, #tpu.memory_space<vmem>>, vector<1x128xf32>
    tpu.vector_store %arg5[%c5, %c0_23], %40 {strides = array<i32>} : memref<30x128xf32, #tpu.memory_space<vmem>>, vector<1x128xf32>,
    %cst_24 = arith.constant dense<0.000000e+00> : vector<1x128xf32>
    %42 = tpu.matmul %40, %10, %cst_24 {dimension_numbers = #tpu.dot_dimension_numbers<[1], [0], [0], [1], [0, 0, 1, 1], [], []>, precision = #tpu.contract_precision<fp32>} : vector<1x128xf32>, vector<128x128xf32>, vector<1x128xf32> -> vector<1x128xf32>
    %43 = vector.extract_strided_slice %9 {offsets = [6, 0], sizes = [1, 128], strides = [1, 1]} : vector<30x128xf32> to vector<1x128xf32>
    %44 = arith.addf %42, %43 : vector<1x128xf32>
    %45 = math.tanh %44 : vector<1x128xf32>
    %c6 = arith.constant 6 : index
    %c0_25 = arith.constant 0 : index
    %46 = vector.load %arg5[%c6, %c0_25] : memref<30x128xf32, #tpu.memory_space<vmem>>, vector<1x128xf32>
    tpu.vector_store %arg5[%c6, %c0_25], %45 {strides = array<i32>} : memref<30x128xf32, #tpu.memory_space<vmem>>, vector<1x128xf32>,
    %cst_26 = arith.constant dense<0.000000e+00> : vector<1x128xf32>
    %47 = tpu.matmul %45, %10, %cst_26 {dimension_numbers = #tpu.dot_dimension_numbers<[1], [0], [0], [1], [0, 0, 1, 1], [], []>, precision = #tpu.contract_precision<fp32>} : vector<1x128xf32>, vector<128x128xf32>, vector<1x128xf32> -> vector<1x128xf32>
    %48 = vector.extract_strided_slice %9 {offsets = [7, 0], sizes = [1, 128], strides = [1, 1]} : vector<30x128xf32> to vector<1x128xf32>
    %49 = arith.addf %47, %48 : vector<1x128xf32>
    %50 = math.tanh %49 : vector<1x128xf32>
    %c7 = arith.constant 7 : index
    %c0_27 = arith.constant 0 : index
    %51 = vector.load %arg5[%c7, %c0_27] : memref<30x128xf32, #tpu.memory_space<vmem>>, vector<1x128xf32>
    tpu.vector_store %arg5[%c7, %c0_27], %50 {strides = array<i32>} : memref<30x128xf32, #tpu.memory_space<vmem>>, vector<1x128xf32>,
    %cst_28 = arith.constant dense<0.000000e+00> : vector<1x128xf32>
    %52 = tpu.matmul %50, %10, %cst_28 {dimension_numbers = #tpu.dot_dimension_numbers<[1], [0], [0], [1], [0, 0, 1, 1], [], []>, precision = #tpu.contract_precision<fp32>} : vector<1x128xf32>, vector<128x128xf32>, vector<1x128xf32> -> vector<1x128xf32>
    %53 = vector.extract_strided_slice %9 {offsets = [8, 0], sizes = [1, 128], strides = [1, 1]} : vector<30x128xf32> to vector<1x128xf32>
    %54 = arith.addf %52, %53 : vector<1x128xf32>
    %55 = math.tanh %54 : vector<1x128xf32>
    %c8 = arith.constant 8 : index
    %c0_29 = arith.constant 0 : index
    %56 = vector.load %arg5[%c8, %c0_29] : memref<30x128xf32, #tpu.memory_space<vmem>>, vector<1x128xf32>
    tpu.vector_store %arg5[%c8, %c0_29], %55 {strides = array<i32>} : memref<30x128xf32, #tpu.memory_space<vmem>>, vector<1x128xf32>,
    %cst_30 = arith.constant dense<0.000000e+00> : vector<1x128xf32>
    %57 = tpu.matmul %55, %10, %cst_30 {dimension_numbers = #tpu.dot_dimension_numbers<[1], [0], [0], [1], [0, 0, 1, 1], [], []>, precision = #tpu.contract_precision<fp32>} : vector<1x128xf32>, vector<128x128xf32>, vector<1x128xf32> -> vector<1x128xf32>
    %58 = vector.extract_strided_slice %9 {offsets = [9, 0], sizes = [1, 128], strides = [1, 1]} : vector<30x128xf32> to vector<1x128xf32>
    %59 = arith.addf %57, %58 : vector<1x128xf32>
    %60 = math.tanh %59 : vector<1x128xf32>
    %c9 = arith.constant 9 : index
    %c0_31 = arith.constant 0 : index
    %61 = vector.load %arg5[%c9, %c0_31] : memref<30x128xf32, #tpu.memory_space<vmem>>, vector<1x128xf32>
    tpu.vector_store %arg5[%c9, %c0_31], %60 {strides = array<i32>} : memref<30x128xf32, #tpu.memory_space<vmem>>, vector<1x128xf32>,
    %cst_32 = arith.constant dense<0.000000e+00> : vector<1x128xf32>
    %62 = tpu.matmul %60, %10, %cst_32 {dimension_numbers = #tpu.dot_dimension_numbers<[1], [0], [0], [1], [0, 0, 1, 1], [], []>, precision = #tpu.contract_precision<fp32>} : vector<1x128xf32>, vector<128x128xf32>, vector<1x128xf32> -> vector<1x128xf32>
    %63 = vector.extract_strided_slice %9 {offsets = [10, 0], sizes = [1, 128], strides = [1, 1]} : vector<30x128xf32> to vector<1x128xf32>
    %64 = arith.addf %62, %63 : vector<1x128xf32>
    %65 = math.tanh %64 : vector<1x128xf32>
    %c10 = arith.constant 10 : index
    %c0_33 = arith.constant 0 : index
    %66 = vector.load %arg5[%c10, %c0_33] : memref<30x128xf32, #tpu.memory_space<vmem>>, vector<1x128xf32>
    tpu.vector_store %arg5[%c10, %c0_33], %65 {strides = array<i32>} : memref<30x128xf32, #tpu.memory_space<vmem>>, vector<1x128xf32>,
    %cst_34 = arith.constant dense<0.000000e+00> : vector<1x128xf32>
    %67 = tpu.matmul %65, %10, %cst_34 {dimension_numbers = #tpu.dot_dimension_numbers<[1], [0], [0], [1], [0, 0, 1, 1], [], []>, precision = #tpu.contract_precision<fp32>} : vector<1x128xf32>, vector<128x128xf32>, vector<1x128xf32> -> vector<1x128xf32>
    %68 = vector.extract_strided_slice %9 {offsets = [11, 0], sizes = [1, 128], strides = [1, 1]} : vector<30x128xf32> to vector<1x128xf32>
    %69 = arith.addf %67, %68 : vector<1x128xf32>
    %70 = math.tanh %69 : vector<1x128xf32>
    %c11 = arith.constant 11 : index
    %c0_35 = arith.constant 0 : index
    %71 = vector.load %arg5[%c11, %c0_35] : memref<30x128xf32, #tpu.memory_space<vmem>>, vector<1x128xf32>
    tpu.vector_store %arg5[%c11, %c0_35], %70 {strides = array<i32>} : memref<30x128xf32, #tpu.memory_space<vmem>>, vector<1x128xf32>,
    %cst_36 = arith.constant dense<0.000000e+00> : vector<1x128xf32>
    %72 = tpu.matmul %70, %10, %cst_36 {dimension_numbers = #tpu.dot_dimension_numbers<[1], [0], [0], [1], [0, 0, 1, 1], [], []>, precision = #tpu.contract_precision<fp32>} : vector<1x128xf32>, vector<128x128xf32>, vector<1x128xf32> -> vector<1x128xf32>
    %73 = vector.extract_strided_slice %9 {offsets = [12, 0], sizes = [1, 128], strides = [1, 1]} : vector<30x128xf32> to vector<1x128xf32>
    %74 = arith.addf %72, %73 : vector<1x128xf32>
    %75 = math.tanh %74 : vector<1x128xf32>
    %c12 = arith.constant 12 : index
    %c0_37 = arith.constant 0 : index
    %76 = vector.load %arg5[%c12, %c0_37] : memref<30x128xf32, #tpu.memory_space<vmem>>, vector<1x128xf32>
    tpu.vector_store %arg5[%c12, %c0_37], %75 {strides = array<i32>} : memref<30x128xf32, #tpu.memory_space<vmem>>, vector<1x128xf32>,
    %cst_38 = arith.constant dense<0.000000e+00> : vector<1x128xf32>
    %77 = tpu.matmul %75, %10, %cst_38 {dimension_numbers = #tpu.dot_dimension_numbers<[1], [0], [0], [1], [0, 0, 1, 1], [], []>, precision = #tpu.contract_precision<fp32>} : vector<1x128xf32>, vector<128x128xf32>, vector<1x128xf32> -> vector<1x128xf32>
    %78 = vector.extract_strided_slice %9 {offsets = [13, 0], sizes = [1, 128], strides = [1, 1]} : vector<30x128xf32> to vector<1x128xf32>
    %79 = arith.addf %77, %78 : vector<1x128xf32>
    %80 = math.tanh %79 : vector<1x128xf32>
    %c13 = arith.constant 13 : index
    %c0_39 = arith.constant 0 : index
    %81 = vector.load %arg5[%c13, %c0_39] : memref<30x128xf32, #tpu.memory_space<vmem>>, vector<1x128xf32>
    tpu.vector_store %arg5[%c13, %c0_39], %80 {strides = array<i32>} : memref<30x128xf32, #tpu.memory_space<vmem>>, vector<1x128xf32>,
    %cst_40 = arith.constant dense<0.000000e+00> : vector<1x128xf32>
    %82 = tpu.matmul %80, %10, %cst_40 {dimension_numbers = #tpu.dot_dimension_numbers<[1], [0], [0], [1], [0, 0, 1, 1], [], []>, precision = #tpu.contract_precision<fp32>} : vector<1x128xf32>, vector<128x128xf32>, vector<1x128xf32> -> vector<1x128xf32>
    %83 = vector.extract_strided_slice %9 {offsets = [14, 0], sizes = [1, 128], strides = [1, 1]} : vector<30x128xf32> to vector<1x128xf32>
    %84 = arith.addf %82, %83 : vector<1x128xf32>
    %85 = math.tanh %84 : vector<1x128xf32>
    %c14 = arith.constant 14 : index
    %c0_41 = arith.constant 0 : index
    %86 = vector.load %arg5[%c14, %c0_41] : memref<30x128xf32, #tpu.memory_space<vmem>>, vector<1x128xf32>
    tpu.vector_store %arg5[%c14, %c0_41], %85 {strides = array<i32>} : memref<30x128xf32, #tpu.memory_space<vmem>>, vector<1x128xf32>,
    %cst_42 = arith.constant dense<0.000000e+00> : vector<1x128xf32>
    %87 = tpu.matmul %85, %10, %cst_42 {dimension_numbers = #tpu.dot_dimension_numbers<[1], [0], [0], [1], [0, 0, 1, 1], [], []>, precision = #tpu.contract_precision<fp32>} : vector<1x128xf32>, vector<128x128xf32>, vector<1x128xf32> -> vector<1x128xf32>
    %88 = vector.extract_strided_slice %9 {offsets = [15, 0], sizes = [1, 128], strides = [1, 1]} : vector<30x128xf32> to vector<1x128xf32>
    %89 = arith.addf %87, %88 : vector<1x128xf32>
    %90 = math.tanh %89 : vector<1x128xf32>
    %c15 = arith.constant 15 : index
    %c0_43 = arith.constant 0 : index
    %91 = vector.load %arg5[%c15, %c0_43] : memref<30x128xf32, #tpu.memory_space<vmem>>, vector<1x128xf32>
    tpu.vector_store %arg5[%c15, %c0_43], %90 {strides = array<i32>} : memref<30x128xf32, #tpu.memory_space<vmem>>, vector<1x128xf32>,
    %cst_44 = arith.constant dense<0.000000e+00> : vector<1x128xf32>
    %92 = tpu.matmul %90, %10, %cst_44 {dimension_numbers = #tpu.dot_dimension_numbers<[1], [0], [0], [1], [0, 0, 1, 1], [], []>, precision = #tpu.contract_precision<fp32>} : vector<1x128xf32>, vector<128x128xf32>, vector<1x128xf32> -> vector<1x128xf32>
    %93 = vector.extract_strided_slice %9 {offsets = [16, 0], sizes = [1, 128], strides = [1, 1]} : vector<30x128xf32> to vector<1x128xf32>
    %94 = arith.addf %92, %93 : vector<1x128xf32>
    %95 = math.tanh %94 : vector<1x128xf32>
    %c16 = arith.constant 16 : index
    %c0_45 = arith.constant 0 : index
    %96 = vector.load %arg5[%c16, %c0_45] : memref<30x128xf32, #tpu.memory_space<vmem>>, vector<1x128xf32>
    tpu.vector_store %arg5[%c16, %c0_45], %95 {strides = array<i32>} : memref<30x128xf32, #tpu.memory_space<vmem>>, vector<1x128xf32>,
    %cst_46 = arith.constant dense<0.000000e+00> : vector<1x128xf32>
    %97 = tpu.matmul %95, %10, %cst_46 {dimension_numbers = #tpu.dot_dimension_numbers<[1], [0], [0], [1], [0, 0, 1, 1], [], []>, precision = #tpu.contract_precision<fp32>} : vector<1x128xf32>, vector<128x128xf32>, vector<1x128xf32> -> vector<1x128xf32>
    %98 = vector.extract_strided_slice %9 {offsets = [17, 0], sizes = [1, 128], strides = [1, 1]} : vector<30x128xf32> to vector<1x128xf32>
    %99 = arith.addf %97, %98 : vector<1x128xf32>
    %100 = math.tanh %99 : vector<1x128xf32>
    %c17 = arith.constant 17 : index
    %c0_47 = arith.constant 0 : index
    %101 = vector.load %arg5[%c17, %c0_47] : memref<30x128xf32, #tpu.memory_space<vmem>>, vector<1x128xf32>
    tpu.vector_store %arg5[%c17, %c0_47], %100 {strides = array<i32>} : memref<30x128xf32, #tpu.memory_space<vmem>>, vector<1x128xf32>,
    %cst_48 = arith.constant dense<0.000000e+00> : vector<1x128xf32>
    %102 = tpu.matmul %100, %10, %cst_48 {dimension_numbers = #tpu.dot_dimension_numbers<[1], [0], [0], [1], [0, 0, 1, 1], [], []>, precision = #tpu.contract_precision<fp32>} : vector<1x128xf32>, vector<128x128xf32>, vector<1x128xf32> -> vector<1x128xf32>
    %103 = vector.extract_strided_slice %9 {offsets = [18, 0], sizes = [1, 128], strides = [1, 1]} : vector<30x128xf32> to vector<1x128xf32>
    %104 = arith.addf %102, %103 : vector<1x128xf32>
    %105 = math.tanh %104 : vector<1x128xf32>
    %c18 = arith.constant 18 : index
    %c0_49 = arith.constant 0 : index
    %106 = vector.load %arg5[%c18, %c0_49] : memref<30x128xf32, #tpu.memory_space<vmem>>, vector<1x128xf32>
    tpu.vector_store %arg5[%c18, %c0_49], %105 {strides = array<i32>} : memref<30x128xf32, #tpu.memory_space<vmem>>, vector<1x128xf32>,
    %cst_50 = arith.constant dense<0.000000e+00> : vector<1x128xf32>
    %107 = tpu.matmul %105, %10, %cst_50 {dimension_numbers = #tpu.dot_dimension_numbers<[1], [0], [0], [1], [0, 0, 1, 1], [], []>, precision = #tpu.contract_precision<fp32>} : vector<1x128xf32>, vector<128x128xf32>, vector<1x128xf32> -> vector<1x128xf32>
    %108 = vector.extract_strided_slice %9 {offsets = [19, 0], sizes = [1, 128], strides = [1, 1]} : vector<30x128xf32> to vector<1x128xf32>
    %109 = arith.addf %107, %108 : vector<1x128xf32>
    %110 = math.tanh %109 : vector<1x128xf32>
    %c19 = arith.constant 19 : index
    %c0_51 = arith.constant 0 : index
    %111 = vector.load %arg5[%c19, %c0_51] : memref<30x128xf32, #tpu.memory_space<vmem>>, vector<1x128xf32>
    tpu.vector_store %arg5[%c19, %c0_51], %110 {strides = array<i32>} : memref<30x128xf32, #tpu.memory_space<vmem>>, vector<1x128xf32>,
    %cst_52 = arith.constant dense<0.000000e+00> : vector<1x128xf32>
    %112 = tpu.matmul %110, %10, %cst_52 {dimension_numbers = #tpu.dot_dimension_numbers<[1], [0], [0], [1], [0, 0, 1, 1], [], []>, precision = #tpu.contract_precision<fp32>} : vector<1x128xf32>, vector<128x128xf32>, vector<1x128xf32> -> vector<1x128xf32>
    %113 = vector.extract_strided_slice %9 {offsets = [20, 0], sizes = [1, 128], strides = [1, 1]} : vector<30x128xf32> to vector<1x128xf32>
    %114 = arith.addf %112, %113 : vector<1x128xf32>
    %115 = math.tanh %114 : vector<1x128xf32>
    %c20 = arith.constant 20 : index
    %c0_53 = arith.constant 0 : index
    %116 = vector.load %arg5[%c20, %c0_53] : memref<30x128xf32, #tpu.memory_space<vmem>>, vector<1x128xf32>
    tpu.vector_store %arg5[%c20, %c0_53], %115 {strides = array<i32>} : memref<30x128xf32, #tpu.memory_space<vmem>>, vector<1x128xf32>,
    %cst_54 = arith.constant dense<0.000000e+00> : vector<1x128xf32>
    %117 = tpu.matmul %115, %10, %cst_54 {dimension_numbers = #tpu.dot_dimension_numbers<[1], [0], [0], [1], [0, 0, 1, 1], [], []>, precision = #tpu.contract_precision<fp32>} : vector<1x128xf32>, vector<128x128xf32>, vector<1x128xf32> -> vector<1x128xf32>
    %118 = vector.extract_strided_slice %9 {offsets = [21, 0], sizes = [1, 128], strides = [1, 1]} : vector<30x128xf32> to vector<1x128xf32>
    %119 = arith.addf %117, %118 : vector<1x128xf32>
    %120 = math.tanh %119 : vector<1x128xf32>
    %c21 = arith.constant 21 : index
    %c0_55 = arith.constant 0 : index
    %121 = vector.load %arg5[%c21, %c0_55] : memref<30x128xf32, #tpu.memory_space<vmem>>, vector<1x128xf32>
    tpu.vector_store %arg5[%c21, %c0_55], %120 {strides = array<i32>} : memref<30x128xf32, #tpu.memory_space<vmem>>, vector<1x128xf32>,
    %cst_56 = arith.constant dense<0.000000e+00> : vector<1x128xf32>
    %122 = tpu.matmul %120, %10, %cst_56 {dimension_numbers = #tpu.dot_dimension_numbers<[1], [0], [0], [1], [0, 0, 1, 1], [], []>, precision = #tpu.contract_precision<fp32>} : vector<1x128xf32>, vector<128x128xf32>, vector<1x128xf32> -> vector<1x128xf32>
    %123 = vector.extract_strided_slice %9 {offsets = [22, 0], sizes = [1, 128], strides = [1, 1]} : vector<30x128xf32> to vector<1x128xf32>
    %124 = arith.addf %122, %123 : vector<1x128xf32>
    %125 = math.tanh %124 : vector<1x128xf32>
    %c22 = arith.constant 22 : index
    %c0_57 = arith.constant 0 : index
    %126 = vector.load %arg5[%c22, %c0_57] : memref<30x128xf32, #tpu.memory_space<vmem>>, vector<1x128xf32>
    tpu.vector_store %arg5[%c22, %c0_57], %125 {strides = array<i32>} : memref<30x128xf32, #tpu.memory_space<vmem>>, vector<1x128xf32>,
    %cst_58 = arith.constant dense<0.000000e+00> : vector<1x128xf32>
    %127 = tpu.matmul %125, %10, %cst_58 {dimension_numbers = #tpu.dot_dimension_numbers<[1], [0], [0], [1], [0, 0, 1, 1], [], []>, precision = #tpu.contract_precision<fp32>} : vector<1x128xf32>, vector<128x128xf32>, vector<1x128xf32> -> vector<1x128xf32>
    %128 = vector.extract_strided_slice %9 {offsets = [23, 0], sizes = [1, 128], strides = [1, 1]} : vector<30x128xf32> to vector<1x128xf32>
    %129 = arith.addf %127, %128 : vector<1x128xf32>
    %130 = math.tanh %129 : vector<1x128xf32>
    %c23 = arith.constant 23 : index
    %c0_59 = arith.constant 0 : index
    %131 = vector.load %arg5[%c23, %c0_59] : memref<30x128xf32, #tpu.memory_space<vmem>>, vector<1x128xf32>
    tpu.vector_store %arg5[%c23, %c0_59], %130 {strides = array<i32>} : memref<30x128xf32, #tpu.memory_space<vmem>>, vector<1x128xf32>,
    %cst_60 = arith.constant dense<0.000000e+00> : vector<1x128xf32>
    %132 = tpu.matmul %130, %10, %cst_60 {dimension_numbers = #tpu.dot_dimension_numbers<[1], [0], [0], [1], [0, 0, 1, 1], [], []>, precision = #tpu.contract_precision<fp32>} : vector<1x128xf32>, vector<128x128xf32>, vector<1x128xf32> -> vector<1x128xf32>
    %133 = vector.extract_strided_slice %9 {offsets = [24, 0], sizes = [1, 128], strides = [1, 1]} : vector<30x128xf32> to vector<1x128xf32>
    %134 = arith.addf %132, %133 : vector<1x128xf32>
    %135 = math.tanh %134 : vector<1x128xf32>
    %c24 = arith.constant 24 : index
    %c0_61 = arith.constant 0 : index
    %136 = vector.load %arg5[%c24, %c0_61] : memref<30x128xf32, #tpu.memory_space<vmem>>, vector<1x128xf32>
    tpu.vector_store %arg5[%c24, %c0_61], %135 {strides = array<i32>} : memref<30x128xf32, #tpu.memory_space<vmem>>, vector<1x128xf32>,
    %cst_62 = arith.constant dense<0.000000e+00> : vector<1x128xf32>
    %137 = tpu.matmul %135, %10, %cst_62 {dimension_numbers = #tpu.dot_dimension_numbers<[1], [0], [0], [1], [0, 0, 1, 1], [], []>, precision = #tpu.contract_precision<fp32>} : vector<1x128xf32>, vector<128x128xf32>, vector<1x128xf32> -> vector<1x128xf32>
    %138 = vector.extract_strided_slice %9 {offsets = [25, 0], sizes = [1, 128], strides = [1, 1]} : vector<30x128xf32> to vector<1x128xf32>
    %139 = arith.addf %137, %138 : vector<1x128xf32>
    %140 = math.tanh %139 : vector<1x128xf32>
    %c25 = arith.constant 25 : index
    %c0_63 = arith.constant 0 : index
    %141 = vector.load %arg5[%c25, %c0_63] : memref<30x128xf32, #tpu.memory_space<vmem>>, vector<1x128xf32>
    tpu.vector_store %arg5[%c25, %c0_63], %140 {strides = array<i32>} : memref<30x128xf32, #tpu.memory_space<vmem>>, vector<1x128xf32>,
    %cst_64 = arith.constant dense<0.000000e+00> : vector<1x128xf32>
    %142 = tpu.matmul %140, %10, %cst_64 {dimension_numbers = #tpu.dot_dimension_numbers<[1], [0], [0], [1], [0, 0, 1, 1], [], []>, precision = #tpu.contract_precision<fp32>} : vector<1x128xf32>, vector<128x128xf32>, vector<1x128xf32> -> vector<1x128xf32>
    %143 = vector.extract_strided_slice %9 {offsets = [26, 0], sizes = [1, 128], strides = [1, 1]} : vector<30x128xf32> to vector<1x128xf32>
    %144 = arith.addf %142, %143 : vector<1x128xf32>
    %145 = math.tanh %144 : vector<1x128xf32>
    %c26 = arith.constant 26 : index
    %c0_65 = arith.constant 0 : index
    %146 = vector.load %arg5[%c26, %c0_65] : memref<30x128xf32, #tpu.memory_space<vmem>>, vector<1x128xf32>
    tpu.vector_store %arg5[%c26, %c0_65], %145 {strides = array<i32>} : memref<30x128xf32, #tpu.memory_space<vmem>>, vector<1x128xf32>,
    %cst_66 = arith.constant dense<0.000000e+00> : vector<1x128xf32>
    %147 = tpu.matmul %145, %10, %cst_66 {dimension_numbers = #tpu.dot_dimension_numbers<[1], [0], [0], [1], [0, 0, 1, 1], [], []>, precision = #tpu.contract_precision<fp32>} : vector<1x128xf32>, vector<128x128xf32>, vector<1x128xf32> -> vector<1x128xf32>
    %148 = vector.extract_strided_slice %9 {offsets = [27, 0], sizes = [1, 128], strides = [1, 1]} : vector<30x128xf32> to vector<1x128xf32>
    %149 = arith.addf %147, %148 : vector<1x128xf32>
    %150 = math.tanh %149 : vector<1x128xf32>
    %c27 = arith.constant 27 : index
    %c0_67 = arith.constant 0 : index
    %151 = vector.load %arg5[%c27, %c0_67] : memref<30x128xf32, #tpu.memory_space<vmem>>, vector<1x128xf32>
    tpu.vector_store %arg5[%c27, %c0_67], %150 {strides = array<i32>} : memref<30x128xf32, #tpu.memory_space<vmem>>, vector<1x128xf32>,
    %cst_68 = arith.constant dense<0.000000e+00> : vector<1x128xf32>
    %152 = tpu.matmul %150, %10, %cst_68 {dimension_numbers = #tpu.dot_dimension_numbers<[1], [0], [0], [1], [0, 0, 1, 1], [], []>, precision = #tpu.contract_precision<fp32>} : vector<1x128xf32>, vector<128x128xf32>, vector<1x128xf32> -> vector<1x128xf32>
    %153 = vector.extract_strided_slice %9 {offsets = [28, 0], sizes = [1, 128], strides = [1, 1]} : vector<30x128xf32> to vector<1x128xf32>
    %154 = arith.addf %152, %153 : vector<1x128xf32>
    %155 = math.tanh %154 : vector<1x128xf32>
    %c28 = arith.constant 28 : index
    %c0_69 = arith.constant 0 : index
    %156 = vector.load %arg5[%c28, %c0_69] : memref<30x128xf32, #tpu.memory_space<vmem>>, vector<1x128xf32>
    tpu.vector_store %arg5[%c28, %c0_69], %155 {strides = array<i32>} : memref<30x128xf32, #tpu.memory_space<vmem>>, vector<1x128xf32>,
    %cst_70 = arith.constant dense<0.000000e+00> : vector<1x128xf32>
    %157 = tpu.matmul %155, %10, %cst_70 {dimension_numbers = #tpu.dot_dimension_numbers<[1], [0], [0], [1], [0, 0, 1, 1], [], []>, precision = #tpu.contract_precision<fp32>} : vector<1x128xf32>, vector<128x128xf32>, vector<1x128xf32> -> vector<1x128xf32>
    %158 = vector.extract_strided_slice %9 {offsets = [29, 0], sizes = [1, 128], strides = [1, 1]} : vector<30x128xf32> to vector<1x128xf32>
    %159 = arith.addf %157, %158 : vector<1x128xf32>
    %160 = math.tanh %159 : vector<1x128xf32>
    %c29 = arith.constant 29 : index
    %c0_71 = arith.constant 0 : index
    %161 = vector.load %arg5[%c29, %c0_71] : memref<30x128xf32, #tpu.memory_space<vmem>>, vector<1x128xf32>
    tpu.vector_store %arg5[%c29, %c0_71], %160 {strides = array<i32>} : memref<30x128xf32, #tpu.memory_space<vmem>>, vector<1x128xf32>,
    %c0_72 = arith.constant 0 : index
    %c0_73 = arith.constant 0 : index
    %162 = vector.load %arg4[%c0_72, %c0_73] : memref<1x128xf32, #tpu.memory_space<vmem>>, vector<1x128xf32>
    tpu.vector_store %arg4[%c0_72, %c0_73], %160 {strides = array<i32>} : memref<1x128xf32, #tpu.memory_space<vmem>>, vector<1x128xf32>,
    %c0_74 = arith.constant 0 : index
    %c0_75 = arith.constant 0 : index
    %163 = vector.load %arg5[%c0_74, %c0_75] : memref<30x128xf32, #tpu.memory_space<vmem>>, vector<30x128xf32>
    %164 = vector.broadcast %2 : vector<1x128xf32> to vector<30x128xf32>
    %165 = arith.mulf %163, %164 : vector<30x128xf32>
    %cst_76 = arith.constant dense<0.000000e+00> : vector<30xf32>
    %166 = vector.multi_reduction <add>, %165, %cst_76 [1] : vector<30x128xf32> to vector<30xf32>
    %167 = vector.shape_cast %166 : vector<30xf32> to vector<30x1xf32>
    %168 = vector.broadcast %3 : vector<1x1xf32> to vector<30x1xf32>
    %169 = arith.addf %167, %168 : vector<30x1xf32>
    %c0_77 = arith.constant 0 : index
    %c0_78 = arith.constant 0 : index
    %170 = vector.load %arg3[%c0_77, %c0_78] : memref<30x1xf32, #tpu.memory_space<vmem>>, vector<30x1xf32>
    tpu.vector_store %arg3[%c0_77, %c0_78], %169 {strides = array<i32>} : memref<30x1xf32, #tpu.memory_space<vmem>>, vector<30x1xf32>,
    return
  }
}

</mosaic_0001>

<bundles_post_ra>
// kernel: rnnnet_forward.1
= control target key start
LH: loop header
LB: loop body
LE: loop exit
PB: predicated region body
PF: predicated region fallthrough
CT: control target
= control target key end

     0   :  { %10 = vsyncpa [#allocation4], 0  ;;  %s10568_s18 = smov [#allocation3]   ;;  %s10569_s20 = smov 128   ;;  %s13797_s0 = inlined_call_operand.vmem [shape: f32[30,1], index: 0, kind: input, shape index: {}]   ;;  %s13798_s1 = inlined_call_operand.vmem [shape: f32[8,128], index: 1, kind: input, shape index: {}]   ;;  %s13799_s2 = inlined_call_operand.hbm [shape: f32[128,128], index: 2, kind: input, shape index: {}]   ;;  %s13800_s3 = inlined_call_operand.vmem [shape: f32[30,1], index: 3, kind: output, shape index: {0}]   ;;  %s13801_s4 = inlined_call_operand.vmem [shape: f32[1,128], index: 4, kind: output, shape index: {1}]  }
   0x1   :  { %s19_s17 = sshll.u32 %s13799_s2, 4  ;;  %s21_s19 = sshll.u32 %s10568_s18, 4  ;;  %s20_s17 = int_to_ptr.hbm [resolvable:$true] %s19_s17  ;;  %s22_s19 = int_to_ptr.vmem [resolvable:$true] %s21_s19 }
   0x2   :  { %s10570_s21 = smov 8  }
   0x3   :  { %27 = dma.hbm_to_vmem [thread:$0]  %s20_s17, 2048, %s22_s19, [#allocation4], %s10569_s20, %s10569_s20, %s10570_s21  }
   0x4   :  { %10566 = dma.done.wait [#allocation4], 2048  }
   0x5   :  { %10567 = vsyncadd [#allocation4], 4294965248  ;;  %v85_v0 = vld [vmem:[#allocation3 + $0x78] sm:$0xff]  ;;  %v84_v1 = vld [vmem:[#allocation3 + $0x70] sm:$0xff]  ;;  %vm10444_vm0 = vcmask 7168   ;;  %vm10435_vm1 = vcmask 1045504  }
   0x6   :  { %v83_v2 = vld [vmem:[#allocation3 + $0x68] sm:$0xff]  ;;  %v10601_v3 = vand.u32 4294901760, %v85_v0  ;;  %v10603_v4 = vand.u32 4294901760, %v84_v1  ;;  %v82_v6 = vld [vmem:[#allocation3 + $0x60] sm:$0xff]  ;;  %v81_v7 = vld [vmem:[#allocation3 + $0x58] sm:$0xff]  ;;  %vm10448_vm2 = vcmask 5120  }
   0x7   :  { %v10605_v5 = vand.u32 4294901760, %v83_v2  ;;  %v80_v8 = vld [vmem:[#allocation3 + $0x50] sm:$0xff]  ;;  %v10607_v9 = vand.u32 4294901760, %v82_v6  ;;  %v10609_v10 = vand.u32 4294901760, %v81_v7  ;;  %v79_v12 = vld [vmem:[#allocation3 + $0x48] sm:$0xff]  ;;  %v78_v13 = vld [vmem:[#allocation3 + $0x40] sm:$0xff] }
   0x8   :  { %v10611_v11 = vand.u32 4294901760, %v80_v8  ;;  %87 = vmatpush.msra.mxu0 %v10601_v3  ;;  %v10615_v14 = vsub.f32 %v85_v0, %v10601_v3  ;;  %v10618_v15 = vsub.f32 %v84_v1, %v10603_v4  ;;  %v10623_v17 = vand.u32 4294901760, %v79_v12  ;;  %275 = vmatpush.msra.mxu3 %v10601_v3  ;;  %v77_v21 = vld [vmem:[#allocation3 + $0x38] sm:$0xff]  ;;  %v76_v34 = vld [vmem:[#allocation3 + $0x30] sm:$0xff]  ;;  %v75_v35 = vld [vmem:[#allocation3 + $0x28] sm:$0xff] }
   0x9   :  { %v10621_v16 = vsub.f32 %v83_v2, %v10605_v5  ;;  %v10627_v18 = vsub.f32 %v82_v6, %v10607_v9  ;;  %v10630_v19 = vsub.f32 %v81_v7, %v10609_v10  ;;  %v10632_v20 = vand.u32 4294901760, %v78_v13  ;;  %v74_v42 = vld [vmem:[#allocation3 + $0x20] sm:$0xff]  ;;  %v73_v48 = vld [vmem:[#allocation3 + $0x18] sm:$0xff]  ;;  %v72_v54 = vld [vmem:[#allocation3 + $0x10] sm:$0xff] }
   0xa   :  { %89 = vmatpush.msra.mxu0 %v10603_v4  ;;  %v10636_v22 = vand.u32 4294901760, %v10615_v14  ;;  %v10639_v23 = vand.u32 4294901760, %v10618_v15  ;;  %v10645_v25 = vsub.f32 %v80_v8, %v10611_v11  ;;  %224 = vmatpush.msra.mxu2 %v10615_v14  ;;  %v10655_v28 = vsub.f32 %v79_v12, %v10623_v17  ;;  %v71_v60 = vld [vmem:[#allocation3 + $0x8] sm:$0xff]  ;;  %v70_v2 = vld [vmem:[#allocation3] sm:$0xff] }
   0xb   :  { %v10642_v24 = vand.u32 4294901760, %v10621_v16  ;;  %v10649_v26 = vand.u32 4294901760, %v10627_v18  ;;  %v10652_v27 = vand.u32 4294901760, %v10630_v19  ;;  %277 = vmatpush.msra.mxu3 %v10603_v4  ;;  %v10665_v32 = vand.u32 4294901760, %v77_v21 }
   0xc   :  { %v125_v29 = vsub.f32 %v10615_v14, %v10636_v22  ;;  %91 = vmatpush.msra.mxu0 %v10605_v5  ;;  %v131_v30 = vsub.f32 %v10618_v15, %v10639_v23  ;;  %227 = vmatpush.msra.mxu2 %v10618_v15  ;;  %v10669_v33 = vsub.f32 %v78_v13, %v10632_v20  ;;  %v10680_v39 = vand.u32 4294901760, %v10645_v25 }
   0xd   :  { %v137_v31 = vsub.f32 %v10621_v16, %v10642_v24  ;;  %279 = vmatpush.msra.mxu3 %v10605_v5  ;;  %v143_v38 = vsub.f32 %v10627_v18, %v10649_v26  ;;  %v149_v40 = vsub.f32 %v10630_v19, %v10652_v27  ;;  %v10686_v41 = vand.u32 4294901760, %v10655_v28 }
   0xe   :  { %v10672_v36 = vand.u32 4294901760, %v125_v29  ;;  %v10674_v37 = vand.u32 4294901760, %v131_v30  ;;  %93 = vmatpush.msra.mxu0 %v10607_v9  ;;  %230 = vmatpush.msra.mxu2 %v10621_v16  ;;  %v10693_v44 = vand.u32 4294901760, %v76_v34  ;;  %v10696_v45 = vsub.f32 %v77_v21, %v10665_v32 }
   0xf   :  { %281 = vmatpush.msra.mxu3 %v10607_v9  ;;  %v10690_v43 = vand.u32 4294901760, %v137_v31  ;;  %v10698_v46 = vand.u32 4294901760, %v75_v35  ;;  %v10701_v47 = vand.u32 4294901760, %v10669_v33  ;;  %v10706_v49 = vand.u32 4294901760, %v143_v38 }
  0x10   :  { %127 = vmatpush.msra.mxu1 %v10672_v36  ;;  %95 = vmatpush.msra.mxu0 %v10609_v10  ;;  %v155_v50 = vsub.f32 %v10645_v25, %v10680_v39  ;;  %v10712_v51 = vsub.f32 %v76_v34, %v10693_v44  ;;  %v10714_v52 = vand.u32 4294901760, %v74_v42  ;;  %v161_v53 = vsub.f32 %v10655_v28, %v10686_v41 }
  0x11   :  { %13853 = vst [vmem:[#allocation6_spill] sm:$0xff] %v10690_v43  ;;  %233 = vmatpush.msra.mxu2 %v10627_v18  ;;  %283 = vmatpush.msra.mxu3 %v10609_v10  ;;  %v10721_v55 = vand.u32 4294901760, %v149_v40  ;;  %v10725_v56 = vand.u32 4294901760, %v10696_v45  ;;  %v10728_v57 = vsub.f32 %v75_v35, %v10698_v46  ;;  %v10730_v58 = vand.u32 4294901760, %v73_v48 }
  0x12   :  { %133 = vmatpush.msra.mxu1 %v10674_v37  ;;  %13854 = vst [vmem:[#allocation7_spill] sm:$0xff] %v10706_v49  ;;  %97 = vmatpush.msra.mxu0 %v10611_v11  ;;  %v167_v59 = vsub.f32 %v10669_v33, %v10701_v47  ;;  %v10737_v61 = vand.u32 4294901760, %v155_v50  ;;  %v10741_v62 = vand.u32 4294901760, %v10712_v51  ;;  %v10744_v63 = vsub.f32 %v74_v42, %v10714_v52 }
  0x13   :  { %236 = vmatpush.msra.mxu2 %v10630_v19  ;;  %285 = vmatpush.msra.mxu3 %v10611_v11  ;;  %13855 = vst [vmem:[#allocation8_spill] sm:$0xff] %v10721_v55  ;;  %v10746_v0 = vand.u32 4294901760, %v72_v54  ;;  %v10748_v1 = vand.u32 4294901760, %v161_v53  ;;  %v173_v6 = vsub.f32 %v10696_v45, %v10725_v56  ;;  %v10757_v7 = vand.u32 4294901760, %v10728_v57 }
  0x14   :  { %139 = vmatpush.msra.mxu1 %v10690_v43  ;;  %99 = vmatpush.msra.mxu0 %v10623_v17  ;;  %13856 = vst [vmem:[#allocation9_spill] sm:$0xff] %v10728_v57  ;;  %v10760_v8 = vsub.f32 %v73_v48, %v10730_v58  ;;  %v10762_v12 = vand.u32 4294901760, %v71_v60  ;;  %v10764_v13 = vand.u32 4294901760, %v167_v59  ;;  %v179_v21 = vsub.f32 %v10712_v51, %v10741_v62 }
  0x15   :  { %239 = vmatpush.msra.mxu2 %v10645_v25  ;;  %287 = vmatpush.msra.mxu3 %v10623_v17  ;;  %13857 = vst [vmem:[#allocation10_spill] sm:$0xff] %v10737_v61  ;;  %v10773_v29 = vand.u32 4294901760, %v10744_v63  ;;  %v10776_v30 = vsub.f32 %v72_v54, %v10746_v0  ;;  %v10778_v31 = vand.u32 4294901760, %v70_v2  ;;  %v10783_v34 = vand.u32 4294901760, %v173_v6 }
  0x16   :  { %145 = vmatpush.msra.mxu1 %v10706_v49  ;;  %101 = vmatpush.msra.mxu0 %v10632_v20  ;;  %13858 = vst [vmem:[#allocation11_spill] sm:$0xff] %v10744_v63  ;;  %v185_v35 = vsub.f32 %v10728_v57, %v10757_v7  ;;  %v10789_v38 = vand.u32 4294901760, %v10760_v8  ;;  %v10792_v40 = vsub.f32 %v71_v60, %v10762_v12  ;;  %v10797_v42 = vand.u32 4294901760, %v179_v21 }
  0x17   :  { %13859 = vst [vmem:[#allocation12_spill] sm:$0xff] %v10748_v1  ;;  %242 = vmatpush.msra.mxu2 %v10655_v28  ;;  %289 = vmatpush.msra.mxu3 %v10632_v20  ;;  %v191_v48 = vsub.f32 %v10744_v63, %v10773_v29  ;;  %v10803_v50 = vand.u32 4294901760, %v10776_v30  ;;  %v10806_v53 = vsub.f32 %v70_v2, %v10778_v31 }
  0x18   :  { %151 = vmatpush.msra.mxu1 %v10721_v55  ;;  %103 = vmatpush.msra.mxu0 %v10665_v32  ;;  %13860 = vst [vmem:[#allocation13_spill] sm:$0xff] %v10760_v8  ;;  %v10811_v54 = vand.u32 4294901760, %v185_v35  ;;  %v197_v59 = vsub.f32 %v10760_v8, %v10789_v38  ;;  %v10817_v60 = vand.u32 4294901760, %v10792_v40 }
  0x19   :  { %13861 = vst [vmem:[#allocation14_spill] sm:$0xff] %v10764_v13  ;;  %245 = vmatpush.msra.mxu2 %v10669_v33  ;;  %291 = vmatpush.msra.mxu3 %v10665_v32  ;;  %v10822_v2 = vand.u32 4294901760, %v191_v48  ;;  %v203_v6 = vsub.f32 %v10776_v30, %v10803_v50  ;;  %v10828_v21 = vand.u32 4294901760, %v10806_v53 }
  0x1a   :  { %157 = vmatpush.msra.mxu1 %v10737_v61  ;;  %105 = vmatpush.msra.mxu0 %v10693_v44  ;;  %13862 = vst [vmem:[#allocation15_spill] sm:$0xff] %v10776_v30  ;;  %v10833_v35 = vand.u32 4294901760, %v197_v59  ;;  %v209_v48 = vsub.f32 %v10792_v40, %v10817_v60 }
  0x1b   :  { %248 = vmatpush.msra.mxu2 %v10696_v45  ;;  %293 = vmatpush.msra.mxu3 %v10693_v44  ;;  %13863 = vst [vmem:[#allocation16_spill] sm:$0xff] %v10783_v34 }
  0x1c   :  { %163 = vmatpush.msra.mxu1 %v10748_v1  ;;  %107 = vmatpush.msra.mxu0 %v10698_v46  ;;  %13864 = vst [vmem:[#allocation17_spill] sm:$0xff] %v10792_v40  ;;  %v10849_v59 = vand.u32 4294901760, %v209_v48 }
  0x1d   :  { %251 = vmatpush.msra.mxu2 %v10712_v51  ;;  %295 = vmatpush.msra.mxu3 %v10698_v46  ;;  %13865 = vst [vmem:[#allocation18_spill] sm:$0xff] %v10797_v42  ;;  %v13875_v48 = vld [vmem:[#allocation11_spill] sm:$0xff] }
  0x1e   :  { %169 = vmatpush.msra.mxu1 %v10764_v13  ;;  %109 = vmatpush.msra.mxu0 %v10714_v52  ;;  %13866 = vst [vmem:[#allocation19_spill] sm:$0xff] %v10806_v53 }
  0x1f   :  { %254 = vmatpush.msra.mxu2 %v10728_v57  ;;  %297 = vmatpush.msra.mxu3 %v10714_v52  ;;  %13867 = vst [vmem:[#allocation20_spill] sm:$0xff] %v10811_v54 }
  0x20   :  { %175 = vmatpush.msra.mxu1 %v10783_v34  ;;  %111 = vmatpush.msra.mxu0 %v10730_v58  ;;  %13868 = vst [vmem:[#allocation21_spill] sm:$0xff] %v10822_v2 }
  0x21   :  { %257 = vmatpush.msra.mxu2 %v10744_v63  ;;  %299 = vmatpush.msra.mxu3 %v10730_v58  ;;  %13869 = vst [vmem:[#allocation22_spill] sm:$0xff] %v10828_v21  ;;  %v10841_v63 = vand.u32 4294901760, %v203_v6  ;;  %v36_v6 = vld [vmem:[%s13797_s0] sm:$0xff] }
  0x22   :  { %181 = vmatpush.msra.mxu1 %v10797_v42  ;;  %113 = vmatpush.msra.mxu0 %v10746_v0  ;;  %13870 = vst [vmem:[#allocation23_spill] sm:$0xff] %v10833_v35 }
  0x23   :  { %260 = vmatpush.msra.mxu2 %v10760_v8  ;;  %301 = vmatpush.msra.mxu3 %v10746_v0  ;;  %13871 = vst [vmem:[#allocation24_spill] sm:$0xff] %v10841_v63  ;;  %v215_v8 = vsub.f32 %v10806_v53, %v10828_v21 }
  0x24   :  { %187 = vmatpush.msra.mxu1 %v10811_v54  ;;  %115 = vmatpush.msra.mxu0 %v10762_v12  ;;  %13872 = vst [vmem:[#allocation25_spill] sm:$0xff] %v10849_v59 }
  0x25   :  { %263 = vmatpush.msra.mxu2 %v10776_v30  ;;  %303 = vmatpush.msra.mxu3 %v10762_v12  ;;  %v13812_v30 = vmov 0   ;;  %v10858_v57 = vand.u32 4294901760, %v215_v8  ;;  %v37_v8 = vld [vmem:[%s13797_s0 + $0x8] sm:$0xff] }
  0x26   :  { %193 = vmatpush.msra.mxu1 %v10822_v2  ;;  %117 = vmatpush.msra.mxu0 %v10778_v31 }
  0x27   :  { %266 = vmatpush.msra.mxu2 %v10792_v40  ;;  %10464 = vset.pattern.permute.xlu0 %v13812_v30  ;;  %13873 = vst [vmem:[#allocation26_spill] sm:$0xff] %v10858_v57  ;;  %v10572_v40 = vmov 0.0   ;;  %v13878_v30 = vld [vmem:[#allocation17_spill] sm:$0xff] }
  0x28   :  { %313 = vmatpush.msrb.mxu0 %v10636_v22  ;;  %199 = vmatpush.msra.mxu1 %v10833_v35 }
  0x29   :  { %269 = vmatpush.msra.mxu2 %v10806_v53  ;;  %305 = vmatpush.msra.mxu3 %v10778_v31 }
  0x2a   :  { %317 = vmatpush.msrb.mxu0 %v10639_v23  ;;  %205 = vmatpush.msra.mxu1 %v10841_v63 }
  0x2b   :  { %270 = vmatmul.f32.vlgmr.msra.gmra.mxu2 %v10572_v40  ;;  %42 = vperm.xlu0 %10464, %v36_v6   ;;  %v13876_v6 = vld [vmem:[#allocation13_spill] sm:$0xff] }
  0x2c   :  { %321 = vmatpush.msrb.mxu0 %v10642_v24  ;;  %211 = vmatpush.msra.mxu1 %v10849_v59 }
  0x2d   :  { %306 = vmatmul.f32.vlgmr.msra.gmra.mxu3 %v10572_v40  ;;  %118 = vmatmul.f32.vlgmr.msra.gmra.mxu0 %v10572_v40 }
  0x2e   :  { %325 = vmatpush.msrb.mxu0 %v10649_v26  ;;  %217 = vmatpush.msra.mxu1 %v10858_v57 }
  0x2f   :  { %218 = vmatmul.f32.vlgmr.msra.gmra.mxu1 %v10572_v40  ;;  %465 = vmatpush.msrb.mxu3 %v10672_v36 }
  0x30   :  { %379 = vmatpush.msrb.mxu1 %v10601_v3  ;;  %329 = vmatpush.msrb.mxu0 %v10652_v27 }
  0x31   :  { %471 = vmatpush.msrb.mxu3 %v10674_v37  ;;  %420 = vmatpush.msrb.mxu2 %v10601_v3 }
  0x32   :  { %381 = vmatpush.msrb.mxu1 %v10603_v4  ;;  %333 = vmatpush.msrb.mxu0 %v10680_v39 }
  0x33   :  { %47 = vperm.xlu0 %10464, %v37_v8   ;;  %477 = vmatpush.msrb.mxu3 %v10690_v43  ;;  %v13877_v8 = vld [vmem:[#allocation15_spill] sm:$0xff] }
  0x34   :  { %383 = vmatpush.msrb.mxu1 %v10605_v5  ;;  %337 = vmatpush.msrb.mxu0 %v10686_v41 }
  0x35   :  { %483 = vmatpush.msrb.mxu3 %v10706_v49  ;;  %422 = vmatpush.msrb.mxu2 %v10603_v4 }
  0x36   :  { %385 = vmatpush.msrb.mxu1 %v10607_v9  ;;  %341 = vmatpush.msrb.mxu0 %v10701_v47 }
  0x37   :  { %489 = vmatpush.msrb.mxu3 %v10721_v55  ;;  %424 = vmatpush.msrb.mxu2 %v10605_v5 }
  0x38   :  { %387 = vmatpush.msrb.mxu1 %v10609_v10  ;;  %345 = vmatpush.msrb.mxu0 %v10725_v56 }
  0x39   :  { %495 = vmatpush.msrb.mxu3 %v10737_v61  ;;  %426 = vmatpush.msrb.mxu2 %v10607_v9 }
  0x3a   :  { %389 = vmatpush.msrb.mxu1 %v10611_v11  ;;  %349 = vmatpush.msrb.mxu0 %v10741_v62 }
  0x3b   :  { %501 = vmatpush.msrb.mxu3 %v10748_v1  ;;  %428 = vmatpush.msrb.mxu2 %v10609_v10 }
  0x3c   :  { %391 = vmatpush.msrb.mxu1 %v10623_v17  ;;  %353 = vmatpush.msrb.mxu0 %v10757_v7 }
  0x3d   :  { %507 = vmatpush.msrb.mxu3 %v10764_v13  ;;  %430 = vmatpush.msrb.mxu2 %v10611_v11 }
  0x3e   :  { %393 = vmatpush.msrb.mxu1 %v10632_v20  ;;  %357 = vmatpush.msrb.mxu0 %v10773_v29 }
  0x3f   :  { %513 = vmatpush.msrb.mxu3 %v10783_v34  ;;  %432 = vmatpush.msrb.mxu2 %v10623_v17 }
  0x40   :  { %395 = vmatpush.msrb.mxu1 %v10665_v32  ;;  %361 = vmatpush.msrb.mxu0 %v10789_v38 }
  0x41   :  { %519 = vmatpush.msrb.mxu3 %v10797_v42  ;;  %434 = vmatpush.msrb.mxu2 %v10632_v20 }
  0x42   :  { %397 = vmatpush.msrb.mxu1 %v10693_v44  ;;  %365 = vmatpush.msrb.mxu0 %v10803_v50 }
  0x43   :  { %525 = vmatpush.msrb.mxu3 %v10811_v54  ;;  %436 = vmatpush.msrb.mxu2 %v10665_v32 }
  0x44   :  { %399 = vmatpush.msrb.mxu1 %v10698_v46  ;;  %369 = vmatpush.msrb.mxu0 %v10817_v60 }
  0x45   :  { %531 = vmatpush.msrb.mxu3 %v10822_v2  ;;  %438 = vmatpush.msrb.mxu2 %v10693_v44 }
  0x46   :  { %401 = vmatpush.msrb.mxu1 %v10714_v52  ;;  %373 = vmatpush.msrb.mxu0 %v10828_v21 }
  0x47   :  { %374 = vmatmul.f32.vlgmr.msrb.gmra.mxu0 %v10572_v40  ;;  %537 = vmatpush.msrb.mxu3 %v10833_v35 }
  0x48   :  { %403 = vmatpush.msrb.mxu1 %v10730_v58  ;;  %563 = vmatpush.msra.mxu0 %v10615_v14 }
  0x49   :  { %543 = vmatpush.msrb.mxu3 %v10841_v63  ;;  %440 = vmatpush.msrb.mxu2 %v10698_v46 }
  0x4a   :  { %405 = vmatpush.msrb.mxu1 %v10746_v0  ;;  %566 = vmatpush.msra.mxu0 %v10618_v15 }
  0x4b   :  { %549 = vmatpush.msrb.mxu3 %v10849_v59  ;;  %442 = vmatpush.msrb.mxu2 %v10714_v52 }
  0x4c   :  { %407 = vmatpush.msrb.mxu1 %v10762_v12  ;;  %569 = vmatpush.msra.mxu0 %v10621_v16 }
  0x4d   :  { %555 = vmatpush.msrb.mxu3 %v10858_v57  ;;  %444 = vmatpush.msrb.mxu2 %v10730_v58 }
  0x4e   :  { %409 = vmatpush.msrb.mxu1 %v10778_v31  ;;  %572 = vmatpush.msra.mxu0 %v10627_v18 }
  0x4f   :  { %410 = vmatmul.f32.vlgmr.msrb.gmra.mxu1 %v10572_v40  ;;  %724 = vmatpush.msra.mxu3 %v10601_v3  ;;  %v13874_v40 = vld [vmem:[#allocation9_spill] sm:$0xff] }
  0x50   :  { %616 = vmatpush.msra.mxu1 %v10601_v3  ;;  %575 = vmatpush.msra.mxu0 %v10630_v19 }
  0x51   :  { %726 = vmatpush.msra.mxu3 %v10603_v4  ;;  %446 = vmatpush.msrb.mxu2 %v10746_v0 }
  0x52   :  { %618 = vmatpush.msra.mxu1 %v10603_v4  ;;  %578 = vmatpush.msra.mxu0 %v10645_v25 }
  0x53   :  { %728 = vmatpush.msra.mxu3 %v10605_v5  ;;  %448 = vmatpush.msrb.mxu2 %v10762_v12 }
  0x54   :  { %620 = vmatpush.msra.mxu1 %v10605_v5  ;;  %581 = vmatpush.msra.mxu0 %v10655_v28 }
  0x55   :  { %730 = vmatpush.msra.mxu3 %v10607_v9  ;;  %450 = vmatpush.msrb.mxu2 %v10778_v31 }
  0x56   :  { %622 = vmatpush.msra.mxu1 %v10607_v9  ;;  %584 = vmatpush.msra.mxu0 %v10669_v33 }
  0x57   :  { %657 = vmatpush.msra.mxu2 %v10636_v22  ;;  %732 = vmatpush.msra.mxu3 %v10609_v10 }
  0x58   :  { %624 = vmatpush.msra.mxu1 %v10609_v10  ;;  %587 = vmatpush.msra.mxu0 %v10696_v45 }
  0x59   :  { %661 = vmatpush.msra.mxu2 %v10639_v23  ;;  %734 = vmatpush.msra.mxu3 %v10611_v11 }
  0x5a   :  { %626 = vmatpush.msra.mxu1 %v10611_v11  ;;  %590 = vmatpush.msra.mxu0 %v10712_v51 }
  0x5b   :  { %665 = vmatpush.msra.mxu2 %v10642_v24  ;;  %736 = vmatpush.msra.mxu3 %v10623_v17 }
  0x5c   :  { %628 = vmatpush.msra.mxu1 %v10623_v17  ;;  %593 = vmatpush.msra.mxu0 %v13874_v40 }
  0x5d   :  { %669 = vmatpush.msra.mxu2 %v10649_v26  ;;  %738 = vmatpush.msra.mxu3 %v10632_v20 }
  0x5e   :  { %630 = vmatpush.msra.mxu1 %v10632_v20  ;;  %596 = vmatpush.msra.mxu0 %v13875_v48 }
  0x5f   :  { %673 = vmatpush.msra.mxu2 %v10652_v27  ;;  %740 = vmatpush.msra.mxu3 %v10665_v32 }
  0x60   :  { %632 = vmatpush.msra.mxu1 %v10665_v32  ;;  %599 = vmatpush.msra.mxu0 %v13876_v6 }
  0x61   :  { %677 = vmatpush.msra.mxu2 %v10680_v39  ;;  %742 = vmatpush.msra.mxu3 %v10693_v44 }
  0x62   :  { %634 = vmatpush.msra.mxu1 %v10693_v44  ;;  %602 = vmatpush.msra.mxu0 %v13877_v8 }
  0x63   :  { %681 = vmatpush.msra.mxu2 %v10686_v41  ;;  %744 = vmatpush.msra.mxu3 %v10698_v46 }
  0x64   :  { %636 = vmatpush.msra.mxu1 %v10698_v46  ;;  %605 = vmatpush.msra.mxu0 %v13878_v30 }
  0x65   :  { %685 = vmatpush.msra.mxu2 %v10701_v47  ;;  %746 = vmatpush.msra.mxu3 %v10714_v52 }
  0x66   :  { %638 = vmatpush.msra.mxu1 %v10714_v52  ;;  %608 = vmatpush.msra.mxu0 %v10806_v53  ;;  %v13879_v53 = vmov 0  }
  0x67   :  { %689 = vmatpush.msra.mxu2 %v10725_v56  ;;  %748 = vmatpush.msra.mxu3 %v10730_v58 }
  0x68   :  { %640 = vmatpush.msra.mxu1 %v10730_v58  ;;  %765 = vmatpush.msrb.mxu0 %v10601_v3 }
  0x69   :  { %693 = vmatpush.msra.mxu2 %v10741_v62  ;;  %750 = vmatpush.msra.mxu3 %v10746_v0 }
  0x6a   :  { %642 = vmatpush.msra.mxu1 %v10746_v0  ;;  %767 = vmatpush.msrb.mxu0 %v10603_v4 }
  0x6b   :  { %697 = vmatpush.msra.mxu2 %v10757_v7  ;;  %752 = vmatpush.msra.mxu3 %v10762_v12 }
  0x6c   :  { %644 = vmatpush.msra.mxu1 %v10762_v12  ;;  %769 = vmatpush.msrb.mxu0 %v10605_v5 }
  0x6d   :  { %701 = vmatpush.msra.mxu2 %v10773_v29  ;;  %754 = vmatpush.msra.mxu3 %v10778_v31 }
  0x6e   :  { %646 = vmatpush.msra.mxu1 %v10778_v31  ;;  %771 = vmatpush.msrb.mxu0 %v10607_v9 }
  0x6f   :  { %705 = vmatpush.msra.mxu2 %v10789_v38  ;;  %10465 = vset.pattern.permute.xlu1 %v13879_v53  ;;  %v10466_v53 = vld [vmem:[%s13798_s1] ss:$0 sm:$0xff] }
  0x70   :  { %810 = vmatpush.msrb.mxu1 %v10672_v36  ;;  %773 = vmatpush.msrb.mxu0 %v10609_v10 }
  0x71   :  { %709 = vmatpush.msra.mxu2 %v10803_v50 }
  0x72   :  { %816 = vmatpush.msrb.mxu1 %v10674_v37  ;;  %775 = vmatpush.msrb.mxu0 %v10611_v11 }
  0x73   :  { %713 = vmatpush.msra.mxu2 %v10817_v60 }
  0x74   :  { %822 = vmatpush.msrb.mxu1 %v10690_v43  ;;  %777 = vmatpush.msrb.mxu0 %v10623_v17 }
  0x75   :  { %717 = vmatpush.msra.mxu2 %v10828_v21 }
  0x76   :  { %828 = vmatpush.msrb.mxu1 %v10706_v49  ;;  %779 = vmatpush.msrb.mxu0 %v10632_v20 }
  0x78   :  { %834 = vmatpush.msrb.mxu1 %v10721_v55  ;;  %781 = vmatpush.msrb.mxu0 %v10665_v32 }
  0x7a   :  { %840 = vmatpush.msrb.mxu1 %v10737_v61  ;;  %783 = vmatpush.msrb.mxu0 %v10693_v44 }
  0x7c   :  { %846 = vmatpush.msrb.mxu1 %v10748_v1  ;;  %785 = vmatpush.msrb.mxu0 %v10698_v46 }
  0x7e   :  { %852 = vmatpush.msrb.mxu1 %v10764_v13  ;;  %787 = vmatpush.msrb.mxu0 %v10714_v52 }
  0x80   :  { %858 = vmatpush.msrb.mxu1 %v10783_v34  ;;  %789 = vmatpush.msrb.mxu0 %v10730_v58 }
  0x82   :  { %864 = vmatpush.msrb.mxu1 %v10797_v42  ;;  %791 = vmatpush.msrb.mxu0 %v10746_v0 }
  0x84   :  { %870 = vmatpush.msrb.mxu1 %v10811_v54  ;;  %793 = vmatpush.msrb.mxu0 %v10762_v12 }
  0x86   :  { %876 = vmatpush.msrb.mxu1 %v10822_v2  ;;  %795 = vmatpush.msrb.mxu0 %v10778_v31  ;;  %v10467_v2 = vld [vmem:[%s13798_s1 + $0x1] ss:$0 sm:$0xff] }
  0x88   :  { %882 = vmatpush.msrb.mxu1 %v10833_v35 }
  0x8a   :  { %888 = vmatpush.msrb.mxu1 %v10841_v63 }
  0x8c   :  { %894 = vmatpush.msrb.mxu1 %v10849_v59 }
  0x8e   :  { %900 = vmatpush.msrb.mxu1 %v10858_v57 }
  0x9d   :  { %v43_v54 = vpop.permute.xlu0 %42 }
  0x9e   :  { %v61_v42 = vmul.f32 %v10466_v53, %v43_v54 }
  0xa0   :  { %v11037_v34 = vadd.f32 %v10467_v2, %v61_v42 }
  0xa2   :  { %13880 = vst [vmem:[#allocation9_spill] sm:$0xff] %v11037_v34 }
  0xaa   :  { %v119_v35 = vpop.f32.mrf.mxu0 }
  0xab   :  { %v120_v13 = vadd.f32 %v119_v35, %v11037_v34  ;;  %v13889_v35 = vld [vmem:[#allocation14_spill] sm:$0xff] }
  0xac   :  { %v219_v63 = vpop.f32.mrf.mxu1 }
  0xad   :  { %v220_v1 = vadd.f32 %v219_v63, %v120_v13  ;;  %v13884_v63 = vld [vmem:[#allocation19_spill] sm:$0xff]  ;;  %v13886_v13 = vld [vmem:[#allocation8_spill] sm:$0xff] }
  0xae   :  { %v271_v59 = vpop.f32.mrf.mxu2 }
  0xaf   :  { %v272_v61 = vadd.f32 %v271_v59, %v220_v1  ;;  %v13885_v1 = vld [vmem:[#allocation7_spill] sm:$0xff]  ;;  %v13890_v59 = vld [vmem:[#allocation16_spill] sm:$0xff] }
  0xb0   :  { %v307_v57 = vpop.f32.mrf.mxu3 }
  0xb1   :  { %v308_v55 = vadd.f32 %v307_v57, %v272_v61  ;;  %v13883_v61 = vld [vmem:[#allocation22_spill] sm:$0xff] }
  0xc4   :  { %v375_v49 = vpop.f32.mrf.mxu0 }
  0xc5   :  { %v376_v21 = vadd.f32 %v375_v49, %v308_v55  ;;  %v13881_v49 = vld [vmem:[#allocation17_spill] sm:$0xff]  ;;  %v13882_v55 = vld [vmem:[#allocation6_spill] sm:$0xff] }
  0xcc   :  { %v411_v43 = vpop.f32.mrf.mxu1 }
  0xcd   :  { %v412_v30 = vadd.f32 %v411_v43, %v376_v21  ;;  %v13888_v21 = vld [vmem:[#allocation12_spill] sm:$0xff] }
  0xcf   :  { %10470 = vtanh.f32 %v412_v30  ;;  %v13887_v30 = vld [vmem:[#allocation10_spill] sm:$0xff] }
  0xd5   :  { %v10471_v54 = vpop.eup %10470 }
  0xd6   :  { %415 = vst [vmem:[#allocation2] sm:$0x1] %v10471_v54  ;;  %v451_v53 = vand.u32 4294901760, %v10471_v54 }
  0xd8   :  { %557 = vmatmul.f32.vlgmr.msrb.gmra.mxu3 %v451_v53  ;;  %v452_v42 = vsub.f32 %v10471_v54, %v451_v53  ;;  %v13891_v54 = vld [vmem:[#allocation18_spill] sm:$0xff] }
  0xd9   :  { %961 = vmatpush.msrb.mxu3 %v10601_v3 }
  0xda   :  { %611 = vmatmul.f32.vlgmr.msra.gmra.mxu0 %v452_v42  ;;  %v453_v2 = vand.u32 4294901760, %v452_v42 }
  0xdb   :  { %963 = vmatpush.msrb.mxu3 %v10603_v4  ;;  %1002 = vmatpush.msra.mxu0 %v10636_v22 }
  0xdc   :  { %650 = vmatmul.f32.vlgmr.msra.gmra.mxu1 %v453_v2  ;;  %v454_v57 = vsub.f32 %v452_v42, %v453_v2  ;;  %v13893_v42 = vld [vmem:[#allocation21_spill] sm:$0xff]  ;;  %v13894_v2 = vld [vmem:[#allocation23_spill] sm:$0xff] }
  0xdd   :  { %965 = vmatpush.msrb.mxu3 %v10605_v5  ;;  %1069 = vmatpush.msra.mxu1 %v10601_v3 }
  0xde   :  { %v455_v43 = vand.u32 4294901760, %v454_v57  ;;  %1006 = vmatpush.msra.mxu0 %v10639_v23  ;;  %v13895_v57 = vld [vmem:[#allocation24_spill] sm:$0xff] }
  0xdf   :  { %967 = vmatpush.msrb.mxu3 %v10607_v9  ;;  %1071 = vmatpush.msra.mxu1 %v10603_v4 }
  0xe0   :  { %456 = vmatmul.f32.vlgmr.msrb.gmra.mxu2 %v455_v43  ;;  %756 = vmatmul.f32.vlgmr.msra.gmra.mxu3 %v451_v53  ;;  %v13896_v43 = vld [vmem:[#allocation25_spill] sm:$0xff] }
  0xe1   :  { %908 = vmatpush.msrb.mxu2 %v10615_v14  ;;  %969 = vmatpush.msrb.mxu3 %v10609_v10 }
  0xe2   :  { %1073 = vmatpush.msra.mxu1 %v10605_v5  ;;  %1010 = vmatpush.msra.mxu0 %v10642_v24 }
  0xe3   :  { %911 = vmatpush.msrb.mxu2 %v10618_v15  ;;  %971 = vmatpush.msrb.mxu3 %v10611_v11 }
  0xe4   :  { %1075 = vmatpush.msra.mxu1 %v10607_v9  ;;  %1014 = vmatpush.msra.mxu0 %v10649_v26 }
  0xe5   :  { %914 = vmatpush.msrb.mxu2 %v10621_v16  ;;  %973 = vmatpush.msrb.mxu3 %v10623_v17 }
  0xe6   :  { %1077 = vmatpush.msra.mxu1 %v10609_v10  ;;  %1018 = vmatpush.msra.mxu0 %v10652_v27 }
  0xe7   :  { %917 = vmatpush.msrb.mxu2 %v10627_v18  ;;  %975 = vmatpush.msrb.mxu3 %v10632_v20 }
  0xe8   :  { %719 = vmatmul.f32.vlgmr.msra.gmra.mxu2 %v451_v53  ;;  %1079 = vmatpush.msra.mxu1 %v10611_v11  ;;  %v13892_v53 = vld [vmem:[#allocation20_spill] sm:$0xff] }
  0xe9   :  { %920 = vmatpush.msrb.mxu2 %v10630_v19  ;;  %977 = vmatpush.msrb.mxu3 %v10665_v32 }
  0xea   :  { %1081 = vmatpush.msra.mxu1 %v10623_v17  ;;  %1022 = vmatpush.msra.mxu0 %v10680_v39 }
  0xeb   :  { %923 = vmatpush.msrb.mxu2 %v10645_v25  ;;  %979 = vmatpush.msrb.mxu3 %v10693_v44 }
  0xec   :  { %1083 = vmatpush.msra.mxu1 %v10632_v20  ;;  %1026 = vmatpush.msra.mxu0 %v10686_v41 }
  0xed   :  { %926 = vmatpush.msrb.mxu2 %v10655_v28  ;;  %981 = vmatpush.msrb.mxu3 %v10698_v46 }
  0xee   :  { %1085 = vmatpush.msra.mxu1 %v10665_v32  ;;  %1030 = vmatpush.msra.mxu0 %v10701_v47 }
  0xef   :  { %929 = vmatpush.msrb.mxu2 %v10669_v33  ;;  %983 = vmatpush.msrb.mxu3 %v10714_v52 }
  0xf0   :  { %1087 = vmatpush.msra.mxu1 %v10693_v44  ;;  %1034 = vmatpush.msra.mxu0 %v10725_v56 }
  0xf1   :  { %932 = vmatpush.msrb.mxu2 %v10696_v45  ;;  %985 = vmatpush.msrb.mxu3 %v10730_v58 }
  0xf2   :  { %1089 = vmatpush.msra.mxu1 %v10698_v46  ;;  %1038 = vmatpush.msra.mxu0 %v10741_v62 }
  0xf3   :  { %935 = vmatpush.msrb.mxu2 %v10712_v51  ;;  %987 = vmatpush.msrb.mxu3 %v10746_v0 }
  0xf4   :  { %1091 = vmatpush.msra.mxu1 %v10714_v52  ;;  %1042 = vmatpush.msra.mxu0 %v10757_v7 }
  0xf5   :  { %938 = vmatpush.msrb.mxu2 %v13874_v40  ;;  %989 = vmatpush.msrb.mxu3 %v10762_v12 }
  0xf6   :  { %1093 = vmatpush.msra.mxu1 %v10730_v58  ;;  %1046 = vmatpush.msra.mxu0 %v10773_v29 }
  0xf7   :  { %941 = vmatpush.msrb.mxu2 %v13875_v48  ;;  %991 = vmatpush.msrb.mxu3 %v10778_v31 }
  0xf8   :  { %1095 = vmatpush.msra.mxu1 %v10746_v0  ;;  %1050 = vmatpush.msra.mxu0 %v10789_v38 }
  0xf9   :  { %944 = vmatpush.msrb.mxu2 %v13876_v6  ;;  %1155 = vmatpush.msra.mxu3 %v10672_v36 }
  0xfa   :  { %1097 = vmatpush.msra.mxu1 %v10762_v12  ;;  %1054 = vmatpush.msra.mxu0 %v10803_v50 }
  0xfb   :  { %947 = vmatpush.msrb.mxu2 %v13877_v8  ;;  %1161 = vmatpush.msra.mxu3 %v10674_v37 }
  0xfc   :  { %1099 = vmatpush.msra.mxu1 %v10778_v31  ;;  %1058 = vmatpush.msra.mxu0 %v10817_v60 }
  0xfd   :  { %950 = vmatpush.msrb.mxu2 %v13881_v49  ;;  %1167 = vmatpush.msra.mxu3 %v13882_v55 }
  0xfe   :  { %1062 = vmatpush.msra.mxu0 %v13883_v61 }
  0xff   :  { %953 = vmatpush.msrb.mxu2 %v13884_v63  ;;  %1173 = vmatpush.msra.mxu3 %v13885_v1 }
 0x101   :  { %1110 = vmatpush.msra.mxu2 %v10601_v3  ;;  %1179 = vmatpush.msra.mxu3 %v13886_v13 }
 0x103   :  { %1112 = vmatpush.msra.mxu2 %v10603_v4  ;;  %1185 = vmatpush.msra.mxu3 %v13887_v30 }
 0x105   :  { %1114 = vmatpush.msra.mxu2 %v10605_v5  ;;  %1191 = vmatpush.msra.mxu3 %v13888_v21 }
 0x107   :  { %1116 = vmatpush.msra.mxu2 %v10607_v9  ;;  %1197 = vmatpush.msra.mxu3 %v13889_v35 }
 0x109   :  { %1118 = vmatpush.msra.mxu2 %v10609_v10  ;;  %1203 = vmatpush.msra.mxu3 %v13890_v59 }
 0x10b   :  { %1120 = vmatpush.msra.mxu2 %v10611_v11  ;;  %1209 = vmatpush.msra.mxu3 %v13891_v54  ;;  %v13897_v54 = vld [vmem:[#allocation26_spill] sm:$0xff] }
 0x10d   :  { %1122 = vmatpush.msra.mxu2 %v10623_v17  ;;  %1215 = vmatpush.msra.mxu3 %v13892_v53 }
 0x10f   :  { %1124 = vmatpush.msra.mxu2 %v10632_v20  ;;  %1221 = vmatpush.msra.mxu3 %v13893_v42 }
 0x111   :  { %1126 = vmatpush.msra.mxu2 %v10665_v32  ;;  %1227 = vmatpush.msra.mxu3 %v13894_v2  ;;  %v417_v2 = vrot.slane %v11037_v34, 1 }
 0x113   :  { %1128 = vmatpush.msra.mxu2 %v10693_v44  ;;  %1233 = vmatpush.msra.mxu3 %v13895_v57 }
 0x115   :  { %1130 = vmatpush.msra.mxu2 %v10698_v46  ;;  %1239 = vmatpush.msra.mxu3 %v13896_v43 }
 0x117   :  { %1132 = vmatpush.msra.mxu2 %v10714_v52  ;;  %1245 = vmatpush.msra.mxu3 %v13897_v54 }
 0x119   :  { %1134 = vmatpush.msra.mxu2 %v10730_v58 }
 0x11b   :  { %1136 = vmatpush.msra.mxu2 %v10746_v0 }
 0x11d   :  { %1138 = vmatpush.msra.mxu2 %v10762_v12 }
 0x11f   :  { %1140 = vmatpush.msra.mxu2 %v10778_v31 }
 0x157   :  { %v612_v35 = vpop.f32.mrf.mxu0 }
 0x159   :  { %v651_v21 = vpop.f32.mrf.mxu1 }
 0x15b   :  { %v558_v42 = vpop.f32.mrf.mxu3 }
 0x163   :  { %v457_v57 = vpop.f32.mrf.mxu2  ;;  %v757_v1 = vpop.f32.mrf.mxu3 }
 0x164   :  { %v458_v53 = vadd.f32 %v457_v57, %v417_v2  ;;  %v13910_v2 = vld [vmem:[#allocation21_spill] sm:$0xff]  ;;  %v13911_v57 = vld [vmem:[#allocation23_spill] sm:$0xff] }
 0x166   :  { %v559_v59 = vadd.f32 %v558_v42, %v458_v53  ;;  %v13908_v53 = vld [vmem:[#allocation18_spill] sm:$0xff]  ;;  %v13909_v42 = vld [vmem:[#allocation20_spill] sm:$0xff] }
 0x168   :  { %v613_v43 = vadd.f32 %v612_v35, %v559_v59  ;;  %v13905_v35 = vld [vmem:[#allocation12_spill] sm:$0xff]  ;;  %v13906_v59 = vld [vmem:[#allocation14_spill] sm:$0xff] }
 0x16a   :  { %v652_v30 = vadd.f32 %v651_v21, %v613_v43  ;;  %v13912_v43 = vld [vmem:[#allocation24_spill] sm:$0xff] }
 0x16b   :  { %v720_v13 = vpop.f32.mrf.mxu2 }
 0x16c   :  { %v721_v54 = vadd.f32 %v720_v13, %v652_v30  ;;  %v13903_v13 = vld [vmem:[#allocation8_spill] sm:$0xff]  ;;  %v13904_v30 = vld [vmem:[#allocation10_spill] sm:$0xff] }
 0x16e   :  { %v758_v63 = vadd.f32 %v757_v1, %v721_v54  ;;  %v13902_v1 = vld [vmem:[#allocation7_spill] sm:$0xff]  ;;  %v13907_v54 = vld [vmem:[#allocation16_spill] sm:$0xff] }
 0x170   :  { %10472 = vtanh.f32 %v758_v63 }
 0x176   :  { %v10473_v61 = vpop.eup %10472 }
 0x177   :  { %761 = vst [vmem:[#allocation2 + $0x1] sm:$0x1] %v10473_v61  ;;  %v796_v55 = vand.u32 4294901760, %v10473_v61 }
 0x179   :  { %902 = vmatmul.f32.vlgmr.msrb.gmra.mxu1 %v796_v55  ;;  %v797_v49 = vsub.f32 %v10473_v61, %v796_v55  ;;  %v13901_v61 = vld [vmem:[#allocation19_spill] sm:$0xff] }
 0x17a   :  { %1306 = vmatpush.msrb.mxu1 %v10601_v3 }
 0x17b   :  { %956 = vmatmul.f32.vlgmr.msrb.gmra.mxu2 %v797_v49  ;;  %v798_v34 = vand.u32 4294901760, %v797_v49 }
 0x17c   :  { %1308 = vmatpush.msrb.mxu1 %v10603_v4  ;;  %1347 = vmatpush.msrb.mxu2 %v10636_v22 }
 0x17d   :  { %995 = vmatmul.f32.vlgmr.msrb.gmra.mxu3 %v798_v34  ;;  %v799_v21 = vsub.f32 %v797_v49, %v798_v34  ;;  %v13898_v34 = vld [vmem:[#allocation17_spill] sm:$0xff]  ;;  %v13899_v49 = vld [vmem:[#allocation6_spill] sm:$0xff] }
 0x17e   :  { %1310 = vmatpush.msrb.mxu1 %v10605_v5  ;;  %1414 = vmatpush.msrb.mxu3 %v10601_v3 }
 0x17f   :  { %v800_v63 = vand.u32 4294901760, %v799_v21  ;;  %1351 = vmatpush.msrb.mxu2 %v10639_v23  ;;  %v13913_v21 = vld [vmem:[#allocation25_spill] sm:$0xff] }
 0x180   :  { %1312 = vmatpush.msrb.mxu1 %v10607_v9  ;;  %1416 = vmatpush.msrb.mxu3 %v10603_v4 }
 0x181   :  { %801 = vmatmul.f32.vlgmr.msrb.gmra.mxu0 %v800_v63  ;;  %1101 = vmatmul.f32.vlgmr.msra.gmra.mxu1 %v796_v55  ;;  %v13914_v63 = vld [vmem:[#allocation26_spill] sm:$0xff] }
 0x182   :  { %1253 = vmatpush.msrb.mxu0 %v10615_v14  ;;  %1314 = vmatpush.msrb.mxu1 %v10609_v10 }
 0x183   :  { %1418 = vmatpush.msrb.mxu3 %v10605_v5  ;;  %1355 = vmatpush.msrb.mxu2 %v10642_v24 }
 0x184   :  { %1256 = vmatpush.msrb.mxu0 %v10618_v15  ;;  %1316 = vmatpush.msrb.mxu1 %v10611_v11 }
 0x185   :  { %1420 = vmatpush.msrb.mxu3 %v10607_v9  ;;  %1359 = vmatpush.msrb.mxu2 %v10649_v26 }
 0x186   :  { %1259 = vmatpush.msrb.mxu0 %v10621_v16  ;;  %1318 = vmatpush.msrb.mxu1 %v10623_v17 }
 0x187   :  { %1422 = vmatpush.msrb.mxu3 %v10609_v10  ;;  %1363 = vmatpush.msrb.mxu2 %v10652_v27 }
 0x188   :  { %1262 = vmatpush.msrb.mxu0 %v10627_v18  ;;  %1320 = vmatpush.msrb.mxu1 %v10632_v20 }
 0x189   :  { %1064 = vmatmul.f32.vlgmr.msra.gmra.mxu0 %v796_v55  ;;  %1424 = vmatpush.msrb.mxu3 %v10611_v11  ;;  %v13900_v55 = vld [vmem:[#allocation22_spill] sm:$0xff] }
 0x18a   :  { %1265 = vmatpush.msrb.mxu0 %v10630_v19  ;;  %1322 = vmatpush.msrb.mxu1 %v10665_v32 }
 0x18b   :  { %1426 = vmatpush.msrb.mxu3 %v10623_v17  ;;  %1367 = vmatpush.msrb.mxu2 %v10680_v39 }
 0x18c   :  { %1268 = vmatpush.msrb.mxu0 %v10645_v25  ;;  %1324 = vmatpush.msrb.mxu1 %v10693_v44 }
 0x18d   :  { %1428 = vmatpush.msrb.mxu3 %v10632_v20  ;;  %1371 = vmatpush.msrb.mxu2 %v10686_v41 }
 0x18e   :  { %1271 = vmatpush.msrb.mxu0 %v10655_v28  ;;  %1326 = vmatpush.msrb.mxu1 %v10698_v46 }
 0x18f   :  { %1430 = vmatpush.msrb.mxu3 %v10665_v32  ;;  %1375 = vmatpush.msrb.mxu2 %v10701_v47 }
 0x190   :  { %1274 = vmatpush.msrb.mxu0 %v10669_v33  ;;  %1328 = vmatpush.msrb.mxu1 %v10714_v52 }
 0x191   :  { %1432 = vmatpush.msrb.mxu3 %v10693_v44  ;;  %1379 = vmatpush.msrb.mxu2 %v10725_v56 }
 0x192   :  { %1277 = vmatpush.msrb.mxu0 %v10696_v45  ;;  %1330 = vmatpush.msrb.mxu1 %v10730_v58 }
 0x193   :  { %1434 = vmatpush.msrb.mxu3 %v10698_v46  ;;  %1383 = vmatpush.msrb.mxu2 %v10741_v62 }
 0x194   :  { %1280 = vmatpush.msrb.mxu0 %v10712_v51  ;;  %1332 = vmatpush.msrb.mxu1 %v10746_v0 }
 0x195   :  { %1436 = vmatpush.msrb.mxu3 %v10714_v52  ;;  %1387 = vmatpush.msrb.mxu2 %v10757_v7 }
 0x196   :  { %1283 = vmatpush.msrb.mxu0 %v13874_v40  ;;  %1334 = vmatpush.msrb.mxu1 %v10762_v12 }
 0x197   :  { %1438 = vmatpush.msrb.mxu3 %v10730_v58  ;;  %1391 = vmatpush.msrb.mxu2 %v10773_v29 }
 0x198   :  { %1286 = vmatpush.msrb.mxu0 %v13875_v48  ;;  %1336 = vmatpush.msrb.mxu1 %v10778_v31 }
 0x199   :  { %1440 = vmatpush.msrb.mxu3 %v10746_v0  ;;  %1395 = vmatpush.msrb.mxu2 %v10789_v38 }
 0x19a   :  { %1289 = vmatpush.msrb.mxu0 %v13876_v6  ;;  %1500 = vmatpush.msra.mxu1 %v10672_v36 }
 0x19b   :  { %1442 = vmatpush.msrb.mxu3 %v10762_v12  ;;  %1399 = vmatpush.msrb.mxu2 %v10803_v50 }
 0x19c   :  { %1292 = vmatpush.msrb.mxu0 %v13877_v8  ;;  %1506 = vmatpush.msra.mxu1 %v10674_v37 }
 0x19d   :  { %1444 = vmatpush.msrb.mxu3 %v10778_v31  ;;  %1403 = vmatpush.msrb.mxu2 %v10817_v60 }
 0x19e   :  { %1295 = vmatpush.msrb.mxu0 %v13898_v34  ;;  %1512 = vmatpush.msra.mxu1 %v13899_v49 }
 0x19f   :  { %1407 = vmatpush.msrb.mxu2 %v13900_v55 }
 0x1a0   :  { %1298 = vmatpush.msrb.mxu0 %v13901_v61  ;;  %1518 = vmatpush.msra.mxu1 %v13902_v1 }
 0x1a2   :  { %1455 = vmatpush.msra.mxu0 %v10601_v3  ;;  %1524 = vmatpush.msra.mxu1 %v13903_v13 }
 0x1a4   :  { %1457 = vmatpush.msra.mxu0 %v10603_v4  ;;  %1530 = vmatpush.msra.mxu1 %v13904_v30 }
 0x1a6   :  { %1459 = vmatpush.msra.mxu0 %v10605_v5  ;;  %1536 = vmatpush.msra.mxu1 %v13905_v35 }
 0x1a8   :  { %1461 = vmatpush.msra.mxu0 %v10607_v9  ;;  %1542 = vmatpush.msra.mxu1 %v13906_v59 }
 0x1aa   :  { %1463 = vmatpush.msra.mxu0 %v10609_v10  ;;  %1548 = vmatpush.msra.mxu1 %v13907_v54 }
 0x1ac   :  { %1465 = vmatpush.msra.mxu0 %v10611_v11  ;;  %1554 = vmatpush.msra.mxu1 %v13908_v53 }
 0x1ae   :  { %1467 = vmatpush.msra.mxu0 %v10623_v17  ;;  %1560 = vmatpush.msra.mxu1 %v13909_v42 }
 0x1b0   :  { %1469 = vmatpush.msra.mxu0 %v10632_v20  ;;  %1566 = vmatpush.msra.mxu1 %v13910_v2 }
 0x1b2   :  { %1471 = vmatpush.msra.mxu0 %v10665_v32  ;;  %1572 = vmatpush.msra.mxu1 %v13911_v57  ;;  %v13915_v57 = vld [vmem:[#allocation9_spill] sm:$0xff] }
 0x1b3   :  { %v762_v2 = vrot.slane %v13915_v57, 2 }
 0x1b4   :  { %1473 = vmatpush.msra.mxu0 %v10693_v44  ;;  %1578 = vmatpush.msra.mxu1 %v13912_v43 }
 0x1b6   :  { %1475 = vmatpush.msra.mxu0 %v10698_v46  ;;  %1584 = vmatpush.msra.mxu1 %v13913_v21 }
 0x1b8   :  { %1477 = vmatpush.msra.mxu0 %v10714_v52  ;;  %1590 = vmatpush.msra.mxu1 %v13914_v63 }
 0x1ba   :  { %1479 = vmatpush.msra.mxu0 %v10730_v58 }
 0x1bc   :  { %1481 = vmatpush.msra.mxu0 %v10746_v0 }
 0x1be   :  { %1483 = vmatpush.msra.mxu0 %v10762_v12 }
 0x1c0   :  { %1485 = vmatpush.msra.mxu0 %v10778_v31 }
 0x1f6   :  { %v903_v42 = vpop.f32.mrf.mxu1 }
 0x1fe   :  { %v802_v43 = vpop.f32.mrf.mxu0  ;;  %v957_v59 = vpop.f32.mrf.mxu2 }
 0x1ff   :  { %v803_v53 = vadd.f32 %v802_v43, %v762_v2  ;;  %v1102_v1 = vpop.f32.mrf.mxu1  ;;  %v13926_v2 = vld [vmem:[#allocation18_spill] sm:$0xff]  ;;  %v13928_v43 = vld [vmem:[#allocation21_spill] sm:$0xff] }
 0x200   :  { %v996_v35 = vpop.f32.mrf.mxu3 }
 0x201   :  { %v904_v54 = vadd.f32 %v903_v42, %v803_v53  ;;  %v13924_v53 = vld [vmem:[#allocation14_spill] sm:$0xff]  ;;  %v13925_v42 = vld [vmem:[#allocation16_spill] sm:$0xff] }
 0x203   :  { %v958_v21 = vadd.f32 %v957_v59, %v904_v54  ;;  %v13922_v59 = vld [vmem:[#allocation10_spill] sm:$0xff]  ;;  %v13923_v54 = vld [vmem:[#allocation12_spill] sm:$0xff] }
 0x205   :  { %v997_v30 = vadd.f32 %v996_v35, %v958_v21  ;;  %v13929_v21 = vld [vmem:[#allocation23_spill] sm:$0xff] }
 0x206   :  { %v1065_v13 = vpop.f32.mrf.mxu0 }
 0x207   :  { %v1066_v63 = vadd.f32 %v1065_v13, %v997_v30  ;;  %v13920_v13 = vld [vmem:[#allocation7_spill] sm:$0xff]  ;;  %v13921_v30 = vld [vmem:[#allocation8_spill] sm:$0xff] }
 0x209   :  { %v1103_v61 = vadd.f32 %v1102_v1, %v1066_v63  ;;  %v13919_v1 = vld [vmem:[#allocation19_spill] sm:$0xff]  ;;  %v13930_v63 = vld [vmem:[#allocation24_spill] sm:$0xff] }
 0x20b   :  { %10474 = vtanh.f32 %v1103_v61 }
 0x211   :  { %v10475_v55 = vpop.eup %10474 }
 0x212   :  { %1106 = vst [vmem:[#allocation2 + $0x2] sm:$0x1] %v10475_v55  ;;  %v1141_v49 = vand.u32 4294901760, %v10475_v55 }
 0x214   :  { %1247 = vmatmul.f32.vlgmr.msra.gmra.mxu3 %v1141_v49  ;;  %v1142_v34 = vsub.f32 %v10475_v55, %v1141_v49  ;;  %v13918_v55 = vld [vmem:[#allocation22_spill] sm:$0xff] }
 0x215   :  { %1651 = vmatpush.msra.mxu3 %v10601_v3 }
 0x216   :  { %1301 = vmatmul.f32.vlgmr.msrb.gmra.mxu0 %v1142_v34  ;;  %v1143_v57 = vand.u32 4294901760, %v1142_v34 }
 0x217   :  { %1653 = vmatpush.msra.mxu3 %v10603_v4  ;;  %1692 = vmatpush.msrb.mxu0 %v10636_v22 }
 0x218   :  { %1340 = vmatmul.f32.vlgmr.msrb.gmra.mxu1 %v1143_v57  ;;  %v1144_v35 = vsub.f32 %v1142_v34, %v1143_v57  ;;  %v13916_v34 = vld [vmem:[#allocation17_spill] sm:$0xff]  ;;  %v13927_v57 = vld [vmem:[#allocation20_spill] sm:$0xff] }
 0x219   :  { %1655 = vmatpush.msra.mxu3 %v10605_v5  ;;  %1759 = vmatpush.msrb.mxu1 %v10601_v3 }
 0x21a   :  { %v1145_v61 = vand.u32 4294901760, %v1144_v35  ;;  %1696 = vmatpush.msrb.mxu0 %v10639_v23  ;;  %v13931_v35 = vld [vmem:[#allocation25_spill] sm:$0xff] }
 0x21b   :  { %1657 = vmatpush.msra.mxu3 %v10607_v9  ;;  %1761 = vmatpush.msrb.mxu1 %v10603_v4 }
 0x21c   :  { %1146 = vmatmul.f32.vlgmr.msra.gmra.mxu2 %v1145_v61  ;;  %1446 = vmatmul.f32.vlgmr.msrb.gmra.mxu3 %v1141_v49  ;;  %v13932_v61 = vld [vmem:[#allocation26_spill] sm:$0xff] }
 0x21d   :  { %1598 = vmatpush.msra.mxu2 %v10615_v14  ;;  %1659 = vmatpush.msra.mxu3 %v10609_v10 }
 0x21e   :  { %1763 = vmatpush.msrb.mxu1 %v10605_v5  ;;  %1700 = vmatpush.msrb.mxu0 %v10642_v24 }
 0x21f   :  { %1601 = vmatpush.msra.mxu2 %v10618_v15  ;;  %1661 = vmatpush.msra.mxu3 %v10611_v11 }
 0x220   :  { %1765 = vmatpush.msrb.mxu1 %v10607_v9  ;;  %1704 = vmatpush.msrb.mxu0 %v10649_v26 }
 0x221   :  { %1604 = vmatpush.msra.mxu2 %v10621_v16  ;;  %1663 = vmatpush.msra.mxu3 %v10623_v17 }
 0x222   :  { %1767 = vmatpush.msrb.mxu1 %v10609_v10  ;;  %1708 = vmatpush.msrb.mxu0 %v10652_v27 }
 0x223   :  { %1607 = vmatpush.msra.mxu2 %v10627_v18  ;;  %1665 = vmatpush.msra.mxu3 %v10632_v20 }
 0x224   :  { %1409 = vmatmul.f32.vlgmr.msrb.gmra.mxu2 %v1141_v49  ;;  %1769 = vmatpush.msrb.mxu1 %v10611_v11  ;;  %v13917_v49 = vld [vmem:[#allocation6_spill] sm:$0xff] }
 0x225   :  { %1610 = vmatpush.msra.mxu2 %v10630_v19  ;;  %1667 = vmatpush.msra.mxu3 %v10665_v32 }
 0x226   :  { %1771 = vmatpush.msrb.mxu1 %v10623_v17  ;;  %1712 = vmatpush.msrb.mxu0 %v10680_v39 }
 0x227   :  { %1613 = vmatpush.msra.mxu2 %v10645_v25  ;;  %1669 = vmatpush.msra.mxu3 %v10693_v44 }
 0x228   :  { %1773 = vmatpush.msrb.mxu1 %v10632_v20  ;;  %1716 = vmatpush.msrb.mxu0 %v10686_v41 }
 0x229   :  { %1616 = vmatpush.msra.mxu2 %v10655_v28  ;;  %1671 = vmatpush.msra.mxu3 %v10698_v46 }
 0x22a   :  { %1775 = vmatpush.msrb.mxu1 %v10665_v32  ;;  %1720 = vmatpush.msrb.mxu0 %v10701_v47 }
 0x22b   :  { %1619 = vmatpush.msra.mxu2 %v10669_v33  ;;  %1673 = vmatpush.msra.mxu3 %v10714_v52 }
 0x22c   :  { %1777 = vmatpush.msrb.mxu1 %v10693_v44  ;;  %1724 = vmatpush.msrb.mxu0 %v10725_v56 }
 0x22d   :  { %1622 = vmatpush.msra.mxu2 %v10696_v45  ;;  %1675 = vmatpush.msra.mxu3 %v10730_v58 }
 0x22e   :  { %1779 = vmatpush.msrb.mxu1 %v10698_v46  ;;  %1728 = vmatpush.msrb.mxu0 %v10741_v62 }
 0x22f   :  { %1625 = vmatpush.msra.mxu2 %v10712_v51  ;;  %1677 = vmatpush.msra.mxu3 %v10746_v0 }
 0x230   :  { %1781 = vmatpush.msrb.mxu1 %v10714_v52  ;;  %1732 = vmatpush.msrb.mxu0 %v10757_v7 }
 0x231   :  { %1628 = vmatpush.msra.mxu2 %v13874_v40  ;;  %1679 = vmatpush.msra.mxu3 %v10762_v12 }
 0x232   :  { %1783 = vmatpush.msrb.mxu1 %v10730_v58  ;;  %1736 = vmatpush.msrb.mxu0 %v10773_v29 }
 0x233   :  { %1631 = vmatpush.msra.mxu2 %v13875_v48  ;;  %1681 = vmatpush.msra.mxu3 %v10778_v31 }
 0x234   :  { %1785 = vmatpush.msrb.mxu1 %v10746_v0  ;;  %1740 = vmatpush.msrb.mxu0 %v10789_v38 }
 0x235   :  { %1634 = vmatpush.msra.mxu2 %v13876_v6  ;;  %1845 = vmatpush.msrb.mxu3 %v10672_v36 }
 0x236   :  { %1787 = vmatpush.msrb.mxu1 %v10762_v12  ;;  %1744 = vmatpush.msrb.mxu0 %v10803_v50 }
 0x237   :  { %1637 = vmatpush.msra.mxu2 %v13877_v8  ;;  %1851 = vmatpush.msrb.mxu3 %v10674_v37 }
 0x238   :  { %1789 = vmatpush.msrb.mxu1 %v10778_v31  ;;  %1748 = vmatpush.msrb.mxu0 %v10817_v60 }
 0x239   :  { %1640 = vmatpush.msra.mxu2 %v13916_v34  ;;  %1857 = vmatpush.msrb.mxu3 %v13917_v49 }
 0x23a   :  { %1752 = vmatpush.msrb.mxu0 %v13918_v55 }
 0x23b   :  { %1643 = vmatpush.msra.mxu2 %v13919_v1  ;;  %1863 = vmatpush.msrb.mxu3 %v13920_v13 }
 0x23d   :  { %1800 = vmatpush.msrb.mxu2 %v10601_v3  ;;  %1869 = vmatpush.msrb.mxu3 %v13921_v30 }
 0x23f   :  { %1802 = vmatpush.msrb.mxu2 %v10603_v4  ;;  %1875 = vmatpush.msrb.mxu3 %v13922_v59 }
 0x241   :  { %1804 = vmatpush.msrb.mxu2 %v10605_v5  ;;  %1881 = vmatpush.msrb.mxu3 %v13923_v54 }
 0x243   :  { %1806 = vmatpush.msrb.mxu2 %v10607_v9  ;;  %1887 = vmatpush.msrb.mxu3 %v13924_v53 }
 0x245   :  { %1808 = vmatpush.msrb.mxu2 %v10609_v10  ;;  %1893 = vmatpush.msrb.mxu3 %v13925_v42 }
 0x247   :  { %1810 = vmatpush.msrb.mxu2 %v10611_v11  ;;  %1899 = vmatpush.msrb.mxu3 %v13926_v2 }
 0x249   :  { %1812 = vmatpush.msrb.mxu2 %v10623_v17  ;;  %1905 = vmatpush.msrb.mxu3 %v13927_v57 }
 0x24b   :  { %1814 = vmatpush.msrb.mxu2 %v10632_v20  ;;  %1911 = vmatpush.msrb.mxu3 %v13928_v43 }
 0x24d   :  { %1816 = vmatpush.msrb.mxu2 %v10665_v32  ;;  %1917 = vmatpush.msrb.mxu3 %v13929_v21  ;;  %v13933_v21 = vld [vmem:[#allocation9_spill] sm:$0xff] }
 0x24e   :  { %v1107_v43 = vrot.slane %v13933_v21, 3 }
 0x24f   :  { %1818 = vmatpush.msrb.mxu2 %v10693_v44  ;;  %1923 = vmatpush.msrb.mxu3 %v13930_v63 }
 0x251   :  { %1820 = vmatpush.msrb.mxu2 %v10698_v46  ;;  %1929 = vmatpush.msrb.mxu3 %v13931_v35 }
 0x253   :  { %1822 = vmatpush.msrb.mxu2 %v10714_v52  ;;  %1935 = vmatpush.msrb.mxu3 %v13932_v61 }
 0x255   :  { %1824 = vmatpush.msrb.mxu2 %v10730_v58 }
 0x257   :  { %1826 = vmatpush.msrb.mxu2 %v10746_v0 }
 0x259   :  { %1828 = vmatpush.msrb.mxu2 %v10762_v12 }
 0x25b   :  { %1830 = vmatpush.msrb.mxu2 %v10778_v31 }
 0x293   :  { %v1302_v53 = vpop.f32.mrf.mxu0 }
 0x295   :  { %v1341_v54 = vpop.f32.mrf.mxu1 }
 0x297   :  { %v1248_v57 = vpop.f32.mrf.mxu3 }
 0x29f   :  { %v1147_v63 = vpop.f32.mrf.mxu2  ;;  %v1447_v13 = vpop.f32.mrf.mxu3 }
 0x2a0   :  { %v1148_v2 = vadd.f32 %v1147_v63, %v1107_v43  ;;  %v13944_v43 = vld [vmem:[#allocation18_spill] sm:$0xff]  ;;  %v13946_v63 = vld [vmem:[#allocation21_spill] sm:$0xff] }
 0x2a2   :  { %v1249_v42 = vadd.f32 %v1248_v57, %v1148_v2  ;;  %v13942_v2 = vld [vmem:[#allocation14_spill] sm:$0xff]  ;;  %v13943_v57 = vld [vmem:[#allocation16_spill] sm:$0xff] }
 0x2a4   :  { %v1303_v35 = vadd.f32 %v1302_v53, %v1249_v42  ;;  %v13940_v53 = vld [vmem:[#allocation10_spill] sm:$0xff]  ;;  %v13941_v42 = vld [vmem:[#allocation12_spill] sm:$0xff] }
 0x2a6   :  { %v1342_v59 = vadd.f32 %v1341_v54, %v1303_v35  ;;  %v13947_v35 = vld [vmem:[#allocation23_spill] sm:$0xff] }
 0x2a7   :  { %v1410_v30 = vpop.f32.mrf.mxu2 }
 0x2a8   :  { %v1411_v61 = vadd.f32 %v1410_v30, %v1342_v59  ;;  %v13938_v30 = vld [vmem:[#allocation7_spill] sm:$0xff]  ;;  %v13939_v59 = vld [vmem:[#allocation8_spill] sm:$0xff] }
 0x2aa   :  { %v1448_v1 = vadd.f32 %v1447_v13, %v1411_v61  ;;  %v13937_v13 = vld [vmem:[#allocation19_spill] sm:$0xff]  ;;  %v13948_v61 = vld [vmem:[#allocation24_spill] sm:$0xff] }
 0x2ac   :  { %10476 = vtanh.f32 %v1448_v1 }
 0x2b2   :  { %v10477_v55 = vpop.eup %10476 }
 0x2b3   :  { %1451 = vst [vmem:[#allocation2 + $0x3] sm:$0x1] %v10477_v55  ;;  %v1486_v49 = vand.u32 4294901760, %v10477_v55 }
 0x2b5   :  { %1592 = vmatmul.f32.vlgmr.msra.gmra.mxu1 %v1486_v49  ;;  %v1487_v34 = vsub.f32 %v10477_v55, %v1486_v49  ;;  %v13936_v55 = vld [vmem:[#allocation22_spill] sm:$0xff] }
 0x2b6   :  { %1996 = vmatpush.msra.mxu1 %v10601_v3 }
 0x2b7   :  { %1646 = vmatmul.f32.vlgmr.msra.gmra.mxu2 %v1487_v34  ;;  %v1488_v21 = vand.u32 4294901760, %v1487_v34 }
 0x2b8   :  { %1998 = vmatpush.msra.mxu1 %v10603_v4  ;;  %2037 = vmatpush.msra.mxu2 %v10636_v22 }
 0x2b9   :  { %1685 = vmatmul.f32.vlgmr.msra.gmra.mxu3 %v1488_v21  ;;  %v1489_v54 = vsub.f32 %v1487_v34, %v1488_v21  ;;  %v13934_v34 = vld [vmem:[#allocation17_spill] sm:$0xff]  ;;  %v13945_v21 = vld [vmem:[#allocation20_spill] sm:$0xff] }
 0x2ba   :  { %2000 = vmatpush.msra.mxu1 %v10605_v5  ;;  %2104 = vmatpush.msra.mxu3 %v10601_v3 }
 0x2bb   :  { %v1490_v1 = vand.u32 4294901760, %v1489_v54  ;;  %2041 = vmatpush.msra.mxu2 %v10639_v23  ;;  %v13949_v54 = vld [vmem:[#allocation25_spill] sm:$0xff] }
 0x2bc   :  { %2002 = vmatpush.msra.mxu1 %v10607_v9  ;;  %2106 = vmatpush.msra.mxu3 %v10603_v4 }
 0x2bd   :  { %1491 = vmatmul.f32.vlgmr.msra.gmra.mxu0 %v1490_v1  ;;  %1791 = vmatmul.f32.vlgmr.msrb.gmra.mxu1 %v1486_v49  ;;  %v13950_v1 = vld [vmem:[#allocation26_spill] sm:$0xff] }
 0x2be   :  { %1943 = vmatpush.msra.mxu0 %v10615_v14  ;;  %2004 = vmatpush.msra.mxu1 %v10609_v10 }
 0x2bf   :  { %2108 = vmatpush.msra.mxu3 %v10605_v5  ;;  %2045 = vmatpush.msra.mxu2 %v10642_v24 }
 0x2c0   :  { %1946 = vmatpush.msra.mxu0 %v10618_v15  ;;  %2006 = vmatpush.msra.mxu1 %v10611_v11 }
 0x2c1   :  { %2110 = vmatpush.msra.mxu3 %v10607_v9  ;;  %2049 = vmatpush.msra.mxu2 %v10649_v26 }
 0x2c2   :  { %1949 = vmatpush.msra.mxu0 %v10621_v16  ;;  %2008 = vmatpush.msra.mxu1 %v10623_v17 }
 0x2c3   :  { %2112 = vmatpush.msra.mxu3 %v10609_v10  ;;  %2053 = vmatpush.msra.mxu2 %v10652_v27 }
 0x2c4   :  { %1952 = vmatpush.msra.mxu0 %v10627_v18  ;;  %2010 = vmatpush.msra.mxu1 %v10632_v20 }
 0x2c5   :  { %1754 = vmatmul.f32.vlgmr.msrb.gmra.mxu0 %v1486_v49  ;;  %2114 = vmatpush.msra.mxu3 %v10611_v11  ;;  %v13935_v49 = vld [vmem:[#allocation6_spill] sm:$0xff] }
 0x2c6   :  { %1955 = vmatpush.msra.mxu0 %v10630_v19  ;;  %2012 = vmatpush.msra.mxu1 %v10665_v32 }
 0x2c7   :  { %2116 = vmatpush.msra.mxu3 %v10623_v17  ;;  %2057 = vmatpush.msra.mxu2 %v10680_v39 }
 0x2c8   :  { %1958 = vmatpush.msra.mxu0 %v10645_v25  ;;  %2014 = vmatpush.msra.mxu1 %v10693_v44 }
 0x2c9   :  { %2118 = vmatpush.msra.mxu3 %v10632_v20  ;;  %2061 = vmatpush.msra.mxu2 %v10686_v41 }
 0x2ca   :  { %1961 = vmatpush.msra.mxu0 %v10655_v28  ;;  %2016 = vmatpush.msra.mxu1 %v10698_v46 }
 0x2cb   :  { %2120 = vmatpush.msra.mxu3 %v10665_v32  ;;  %2065 = vmatpush.msra.mxu2 %v10701_v47 }
 0x2cc   :  { %1964 = vmatpush.msra.mxu0 %v10669_v33  ;;  %2018 = vmatpush.msra.mxu1 %v10714_v52 }
 0x2cd   :  { %2122 = vmatpush.msra.mxu3 %v10693_v44  ;;  %2069 = vmatpush.msra.mxu2 %v10725_v56 }
 0x2ce   :  { %1967 = vmatpush.msra.mxu0 %v10696_v45  ;;  %2020 = vmatpush.msra.mxu1 %v10730_v58 }
 0x2cf   :  { %2124 = vmatpush.msra.mxu3 %v10698_v46  ;;  %2073 = vmatpush.msra.mxu2 %v10741_v62 }
 0x2d0   :  { %1970 = vmatpush.msra.mxu0 %v10712_v51  ;;  %2022 = vmatpush.msra.mxu1 %v10746_v0 }
 0x2d1   :  { %2126 = vmatpush.msra.mxu3 %v10714_v52  ;;  %2077 = vmatpush.msra.mxu2 %v10757_v7 }
 0x2d2   :  { %1973 = vmatpush.msra.mxu0 %v13874_v40  ;;  %2024 = vmatpush.msra.mxu1 %v10762_v12 }
 0x2d3   :  { %2128 = vmatpush.msra.mxu3 %v10730_v58  ;;  %2081 = vmatpush.msra.mxu2 %v10773_v29 }
 0x2d4   :  { %1976 = vmatpush.msra.mxu0 %v13875_v48  ;;  %2026 = vmatpush.msra.mxu1 %v10778_v31 }
 0x2d5   :  { %2130 = vmatpush.msra.mxu3 %v10746_v0  ;;  %2085 = vmatpush.msra.mxu2 %v10789_v38 }
 0x2d6   :  { %1979 = vmatpush.msra.mxu0 %v13876_v6  ;;  %2190 = vmatpush.msrb.mxu1 %v10672_v36 }
 0x2d7   :  { %2132 = vmatpush.msra.mxu3 %v10762_v12  ;;  %2089 = vmatpush.msra.mxu2 %v10803_v50 }
 0x2d8   :  { %1982 = vmatpush.msra.mxu0 %v13877_v8  ;;  %2196 = vmatpush.msrb.mxu1 %v10674_v37 }
 0x2d9   :  { %2134 = vmatpush.msra.mxu3 %v10778_v31  ;;  %2093 = vmatpush.msra.mxu2 %v10817_v60 }
 0x2da   :  { %1985 = vmatpush.msra.mxu0 %v13934_v34  ;;  %2202 = vmatpush.msrb.mxu1 %v13935_v49 }
 0x2db   :  { %2097 = vmatpush.msra.mxu2 %v13936_v55 }
 0x2dc   :  { %1988 = vmatpush.msra.mxu0 %v13937_v13  ;;  %2208 = vmatpush.msrb.mxu1 %v13938_v30 }
 0x2de   :  { %2145 = vmatpush.msrb.mxu0 %v10601_v3  ;;  %2214 = vmatpush.msrb.mxu1 %v13939_v59 }
 0x2e0   :  { %2147 = vmatpush.msrb.mxu0 %v10603_v4  ;;  %2220 = vmatpush.msrb.mxu1 %v13940_v53 }
 0x2e2   :  { %2149 = vmatpush.msrb.mxu0 %v10605_v5  ;;  %2226 = vmatpush.msrb.mxu1 %v13941_v42 }
 0x2e4   :  { %2151 = vmatpush.msrb.mxu0 %v10607_v9  ;;  %2232 = vmatpush.msrb.mxu1 %v13942_v2 }
 0x2e6   :  { %2153 = vmatpush.msrb.mxu0 %v10609_v10  ;;  %2238 = vmatpush.msrb.mxu1 %v13943_v57 }
 0x2e8   :  { %2155 = vmatpush.msrb.mxu0 %v10611_v11  ;;  %2244 = vmatpush.msrb.mxu1 %v13944_v43 }
 0x2ea   :  { %2157 = vmatpush.msrb.mxu0 %v10623_v17  ;;  %2250 = vmatpush.msrb.mxu1 %v13945_v21 }
 0x2ec   :  { %2159 = vmatpush.msrb.mxu0 %v10632_v20  ;;  %2256 = vmatpush.msrb.mxu1 %v13946_v63 }
 0x2ee   :  { %2161 = vmatpush.msrb.mxu0 %v10665_v32  ;;  %2262 = vmatpush.msrb.mxu1 %v13947_v35  ;;  %v13951_v35 = vld [vmem:[#allocation9_spill] sm:$0xff] }
 0x2ef   :  { %v1452_v63 = vrot.slane %v13951_v35, 4 }
 0x2f0   :  { %2163 = vmatpush.msrb.mxu0 %v10693_v44  ;;  %2268 = vmatpush.msrb.mxu1 %v13948_v61 }
 0x2f2   :  { %2165 = vmatpush.msrb.mxu0 %v10698_v46  ;;  %2274 = vmatpush.msrb.mxu1 %v13949_v54 }
 0x2f4   :  { %2167 = vmatpush.msrb.mxu0 %v10714_v52  ;;  %2280 = vmatpush.msrb.mxu1 %v13950_v1 }
 0x2f6   :  { %2169 = vmatpush.msrb.mxu0 %v10730_v58 }
 0x2f8   :  { %2171 = vmatpush.msrb.mxu0 %v10746_v0 }
 0x2fa   :  { %2173 = vmatpush.msrb.mxu0 %v10762_v12 }
 0x2fc   :  { %2175 = vmatpush.msrb.mxu0 %v10778_v31 }
 0x332   :  { %v1593_v21 = vpop.f32.mrf.mxu1 }
 0x33a   :  { %v1492_v61 = vpop.f32.mrf.mxu0  ;;  %v1647_v2 = vpop.f32.mrf.mxu2 }
 0x33b   :  { %v1493_v43 = vadd.f32 %v1492_v61, %v1452_v63  ;;  %v1792_v30 = vpop.f32.mrf.mxu1  ;;  %v13962_v63 = vld [vmem:[#allocation18_spill] sm:$0xff]  ;;  %v13964_v61 = vld [vmem:[#allocation21_spill] sm:$0xff] }
 0x33c   :  { %v1686_v42 = vpop.f32.mrf.mxu3 }
 0x33d   :  { %v1594_v57 = vadd.f32 %v1593_v21, %v1493_v43  ;;  %v13960_v43 = vld [vmem:[#allocation14_spill] sm:$0xff]  ;;  %v13961_v21 = vld [vmem:[#allocation16_spill] sm:$0xff] }
 0x33f   :  { %v1648_v54 = vadd.f32 %v1647_v2, %v1594_v57  ;;  %v13958_v2 = vld [vmem:[#allocation10_spill] sm:$0xff]  ;;  %v13959_v57 = vld [vmem:[#allocation12_spill] sm:$0xff] }
 0x341   :  { %v1687_v53 = vadd.f32 %v1686_v42, %v1648_v54  ;;  %v13965_v54 = vld [vmem:[#allocation23_spill] sm:$0xff] }
 0x342   :  { %v1755_v59 = vpop.f32.mrf.mxu0 }
 0x343   :  { %v1756_v1 = vadd.f32 %v1755_v59, %v1687_v53  ;;  %v13956_v59 = vld [vmem:[#allocation7_spill] sm:$0xff]  ;;  %v13957_v53 = vld [vmem:[#allocation8_spill] sm:$0xff] }
 0x345   :  { %v1793_v13 = vadd.f32 %v1792_v30, %v1756_v1  ;;  %v13955_v30 = vld [vmem:[#allocation19_spill] sm:$0xff]  ;;  %v13966_v1 = vld [vmem:[#allocation24_spill] sm:$0xff] }
 0x347   :  { %10478 = vtanh.f32 %v1793_v13 }
 0x34d   :  { %v10479_v55 = vpop.eup %10478 }
 0x34e   :  { %1796 = vst [vmem:[#allocation2 + $0x4] sm:$0x1] %v10479_v55  ;;  %v1831_v49 = vand.u32 4294901760, %v10479_v55 }
 0x350   :  { %1937 = vmatmul.f32.vlgmr.msrb.gmra.mxu3 %v1831_v49  ;;  %v1832_v34 = vsub.f32 %v10479_v55, %v1831_v49  ;;  %v13954_v55 = vld [vmem:[#allocation22_spill] sm:$0xff] }
 0x351   :  { %2341 = vmatpush.msrb.mxu3 %v10601_v3 }
 0x352   :  { %1991 = vmatmul.f32.vlgmr.msra.gmra.mxu0 %v1832_v34  ;;  %v1833_v35 = vand.u32 4294901760, %v1832_v34 }
 0x353   :  { %2343 = vmatpush.msrb.mxu3 %v10603_v4  ;;  %2382 = vmatpush.msra.mxu0 %v10636_v22 }
 0x354   :  { %2030 = vmatmul.f32.vlgmr.msra.gmra.mxu1 %v1833_v35  ;;  %v1834_v42 = vsub.f32 %v1832_v34, %v1833_v35  ;;  %v13952_v34 = vld [vmem:[#allocation17_spill] sm:$0xff]  ;;  %v13963_v35 = vld [vmem:[#allocation20_spill] sm:$0xff] }
 0x355   :  { %2345 = vmatpush.msrb.mxu3 %v10605_v5  ;;  %2449 = vmatpush.msra.mxu1 %v10601_v3 }
 0x356   :  { %v1835_v13 = vand.u32 4294901760, %v1834_v42  ;;  %2386 = vmatpush.msra.mxu0 %v10639_v23  ;;  %v13967_v42 = vld [vmem:[#allocation25_spill] sm:$0xff] }
 0x357   :  { %2347 = vmatpush.msrb.mxu3 %v10607_v9  ;;  %2451 = vmatpush.msra.mxu1 %v10603_v4 }
 0x358   :  { %1836 = vmatmul.f32.vlgmr.msrb.gmra.mxu2 %v1835_v13  ;;  %2136 = vmatmul.f32.vlgmr.msra.gmra.mxu3 %v1831_v49  ;;  %v13968_v13 = vld [vmem:[#allocation26_spill] sm:$0xff] }
 0x359   :  { %2288 = vmatpush.msrb.mxu2 %v10615_v14  ;;  %2349 = vmatpush.msrb.mxu3 %v10609_v10 }
 0x35a   :  { %2453 = vmatpush.msra.mxu1 %v10605_v5  ;;  %2390 = vmatpush.msra.mxu0 %v10642_v24 }
 0x35b   :  { %2291 = vmatpush.msrb.mxu2 %v10618_v15  ;;  %2351 = vmatpush.msrb.mxu3 %v10611_v11 }
 0x35c   :  { %2455 = vmatpush.msra.mxu1 %v10607_v9  ;;  %2394 = vmatpush.msra.mxu0 %v10649_v26 }
 0x35d   :  { %2294 = vmatpush.msrb.mxu2 %v10621_v16  ;;  %2353 = vmatpush.msrb.mxu3 %v10623_v17 }
 0x35e   :  { %2457 = vmatpush.msra.mxu1 %v10609_v10  ;;  %2398 = vmatpush.msra.mxu0 %v10652_v27 }
 0x35f   :  { %2297 = vmatpush.msrb.mxu2 %v10627_v18  ;;  %2355 = vmatpush.msrb.mxu3 %v10632_v20 }
 0x360   :  { %2099 = vmatmul.f32.vlgmr.msra.gmra.mxu2 %v1831_v49  ;;  %2459 = vmatpush.msra.mxu1 %v10611_v11  ;;  %v13953_v49 = vld [vmem:[#allocation6_spill] sm:$0xff] }
 0x361   :  { %2300 = vmatpush.msrb.mxu2 %v10630_v19  ;;  %2357 = vmatpush.msrb.mxu3 %v10665_v32 }
 0x362   :  { %2461 = vmatpush.msra.mxu1 %v10623_v17  ;;  %2402 = vmatpush.msra.mxu0 %v10680_v39 }
 0x363   :  { %2303 = vmatpush.msrb.mxu2 %v10645_v25  ;;  %2359 = vmatpush.msrb.mxu3 %v10693_v44 }
 0x364   :  { %2463 = vmatpush.msra.mxu1 %v10632_v20  ;;  %2406 = vmatpush.msra.mxu0 %v10686_v41 }
 0x365   :  { %2306 = vmatpush.msrb.mxu2 %v10655_v28  ;;  %2361 = vmatpush.msrb.mxu3 %v10698_v46 }
 0x366   :  { %2465 = vmatpush.msra.mxu1 %v10665_v32  ;;  %2410 = vmatpush.msra.mxu0 %v10701_v47 }
 0x367   :  { %2309 = vmatpush.msrb.mxu2 %v10669_v33  ;;  %2363 = vmatpush.msrb.mxu3 %v10714_v52 }
 0x368   :  { %2467 = vmatpush.msra.mxu1 %v10693_v44  ;;  %2414 = vmatpush.msra.mxu0 %v10725_v56 }
 0x369   :  { %2312 = vmatpush.msrb.mxu2 %v10696_v45  ;;  %2365 = vmatpush.msrb.mxu3 %v10730_v58 }
 0x36a   :  { %2469 = vmatpush.msra.mxu1 %v10698_v46  ;;  %2418 = vmatpush.msra.mxu0 %v10741_v62 }
 0x36b   :  { %2315 = vmatpush.msrb.mxu2 %v10712_v51  ;;  %2367 = vmatpush.msrb.mxu3 %v10746_v0 }
 0x36c   :  { %2471 = vmatpush.msra.mxu1 %v10714_v52  ;;  %2422 = vmatpush.msra.mxu0 %v10757_v7 }
 0x36d   :  { %2318 = vmatpush.msrb.mxu2 %v13874_v40  ;;  %2369 = vmatpush.msrb.mxu3 %v10762_v12 }
 0x36e   :  { %2473 = vmatpush.msra.mxu1 %v10730_v58  ;;  %2426 = vmatpush.msra.mxu0 %v10773_v29 }
 0x36f   :  { %2321 = vmatpush.msrb.mxu2 %v13875_v48  ;;  %2371 = vmatpush.msrb.mxu3 %v10778_v31 }
 0x370   :  { %2475 = vmatpush.msra.mxu1 %v10746_v0  ;;  %2430 = vmatpush.msra.mxu0 %v10789_v38 }
 0x371   :  { %2324 = vmatpush.msrb.mxu2 %v13876_v6  ;;  %2535 = vmatpush.msra.mxu3 %v10672_v36 }
 0x372   :  { %2477 = vmatpush.msra.mxu1 %v10762_v12  ;;  %2434 = vmatpush.msra.mxu0 %v10803_v50 }
 0x373   :  { %2327 = vmatpush.msrb.mxu2 %v13877_v8  ;;  %2541 = vmatpush.msra.mxu3 %v10674_v37 }
 0x374   :  { %2479 = vmatpush.msra.mxu1 %v10778_v31  ;;  %2438 = vmatpush.msra.mxu0 %v10817_v60 }
 0x375   :  { %2330 = vmatpush.msrb.mxu2 %v13952_v34  ;;  %2547 = vmatpush.msra.mxu3 %v13953_v49 }
 0x376   :  { %2442 = vmatpush.msra.mxu0 %v13954_v55 }
 0x377   :  { %2333 = vmatpush.msrb.mxu2 %v13955_v30  ;;  %2553 = vmatpush.msra.mxu3 %v13956_v59 }
 0x379   :  { %2490 = vmatpush.msra.mxu2 %v10601_v3  ;;  %2559 = vmatpush.msra.mxu3 %v13957_v53 }
 0x37b   :  { %2492 = vmatpush.msra.mxu2 %v10603_v4  ;;  %2565 = vmatpush.msra.mxu3 %v13958_v2 }
 0x37d   :  { %2494 = vmatpush.msra.mxu2 %v10605_v5  ;;  %2571 = vmatpush.msra.mxu3 %v13959_v57 }
 0x37f   :  { %2496 = vmatpush.msra.mxu2 %v10607_v9  ;;  %2577 = vmatpush.msra.mxu3 %v13960_v43 }
 0x381   :  { %2498 = vmatpush.msra.mxu2 %v10609_v10  ;;  %2583 = vmatpush.msra.mxu3 %v13961_v21 }
 0x383   :  { %2500 = vmatpush.msra.mxu2 %v10611_v11  ;;  %2589 = vmatpush.msra.mxu3 %v13962_v63 }
 0x385   :  { %2502 = vmatpush.msra.mxu2 %v10623_v17  ;;  %2595 = vmatpush.msra.mxu3 %v13963_v35 }
 0x387   :  { %2504 = vmatpush.msra.mxu2 %v10632_v20  ;;  %2601 = vmatpush.msra.mxu3 %v13964_v61 }
 0x389   :  { %2506 = vmatpush.msra.mxu2 %v10665_v32  ;;  %2607 = vmatpush.msra.mxu3 %v13965_v54  ;;  %v13969_v54 = vld [vmem:[#allocation9_spill] sm:$0xff] }
 0x38a   :  { %v1797_v61 = vrot.slane %v13969_v54, 5 }
 0x38b   :  { %2508 = vmatpush.msra.mxu2 %v10693_v44  ;;  %2613 = vmatpush.msra.mxu3 %v13966_v1 }
 0x38d   :  { %2510 = vmatpush.msra.mxu2 %v10698_v46  ;;  %2619 = vmatpush.msra.mxu3 %v13967_v42 }
 0x38f   :  { %2512 = vmatpush.msra.mxu2 %v10714_v52  ;;  %2625 = vmatpush.msra.mxu3 %v13968_v13 }
 0x391   :  { %2514 = vmatpush.msra.mxu2 %v10730_v58 }
 0x393   :  { %2516 = vmatpush.msra.mxu2 %v10746_v0 }
 0x395   :  { %2518 = vmatpush.msra.mxu2 %v10762_v12 }
 0x397   :  { %2520 = vmatpush.msra.mxu2 %v10778_v31 }
 0x3cf   :  { %v1992_v43 = vpop.f32.mrf.mxu0 }
 0x3d1   :  { %v2031_v57 = vpop.f32.mrf.mxu1 }
 0x3d3   :  { %v1938_v35 = vpop.f32.mrf.mxu3 }
 0x3db   :  { %v1837_v1 = vpop.f32.mrf.mxu2  ;;  %v2137_v59 = vpop.f32.mrf.mxu3 }
 0x3dc   :  { %v1838_v63 = vadd.f32 %v1837_v1, %v1797_v61  ;;  %v13980_v61 = vld [vmem:[#allocation18_spill] sm:$0xff]  ;;  %v13982_v1 = vld [vmem:[#allocation21_spill] sm:$0xff] }
 0x3de   :  { %v1939_v21 = vadd.f32 %v1938_v35, %v1838_v63  ;;  %v13978_v63 = vld [vmem:[#allocation14_spill] sm:$0xff]  ;;  %v13979_v35 = vld [vmem:[#allocation16_spill] sm:$0xff] }
 0x3e0   :  { %v1993_v42 = vadd.f32 %v1992_v43, %v1939_v21  ;;  %v13976_v43 = vld [vmem:[#allocation10_spill] sm:$0xff]  ;;  %v13977_v21 = vld [vmem:[#allocation12_spill] sm:$0xff] }
 0x3e2   :  { %v2032_v2 = vadd.f32 %v2031_v57, %v1993_v42  ;;  %v13983_v42 = vld [vmem:[#allocation23_spill] sm:$0xff] }
 0x3e3   :  { %v2100_v53 = vpop.f32.mrf.mxu2 }
 0x3e4   :  { %v2101_v13 = vadd.f32 %v2100_v53, %v2032_v2  ;;  %v13974_v53 = vld [vmem:[#allocation7_spill] sm:$0xff]  ;;  %v13975_v2 = vld [vmem:[#allocation8_spill] sm:$0xff] }
 0x3e6   :  { %v2138_v30 = vadd.f32 %v2137_v59, %v2101_v13  ;;  %v13973_v59 = vld [vmem:[#allocation19_spill] sm:$0xff]  ;;  %v13984_v13 = vld [vmem:[#allocation24_spill] sm:$0xff] }
 0x3e8   :  { %10480 = vtanh.f32 %v2138_v30 }
 0x3ee   :  { %v10481_v55 = vpop.eup %10480 }
 0x3ef   :  { %2141 = vst [vmem:[#allocation2 + $0x5] sm:$0x1] %v10481_v55  ;;  %v2176_v49 = vand.u32 4294901760, %v10481_v55 }
 0x3f1   :  { %2282 = vmatmul.f32.vlgmr.msrb.gmra.mxu1 %v2176_v49  ;;  %v2177_v34 = vsub.f32 %v10481_v55, %v2176_v49  ;;  %v13972_v55 = vld [vmem:[#allocation22_spill] sm:$0xff] }
 0x3f2   :  { %2686 = vmatpush.msrb.mxu1 %v10601_v3 }
 0x3f3   :  { %2336 = vmatmul.f32.vlgmr.msrb.gmra.mxu2 %v2177_v34  ;;  %v2178_v54 = vand.u32 4294901760, %v2177_v34 }
 0x3f4   :  { %2688 = vmatpush.msrb.mxu1 %v10603_v4  ;;  %2727 = vmatpush.msrb.mxu2 %v10636_v22 }
 0x3f5   :  { %2375 = vmatmul.f32.vlgmr.msrb.gmra.mxu3 %v2178_v54  ;;  %v2179_v57 = vsub.f32 %v2177_v34, %v2178_v54  ;;  %v13970_v34 = vld [vmem:[#allocation17_spill] sm:$0xff]  ;;  %v13981_v54 = vld [vmem:[#allocation20_spill] sm:$0xff] }
 0x3f6   :  { %2690 = vmatpush.msrb.mxu1 %v10605_v5  ;;  %2794 = vmatpush.msrb.mxu3 %v10601_v3 }
 0x3f7   :  { %v2180_v30 = vand.u32 4294901760, %v2179_v57  ;;  %2731 = vmatpush.msrb.mxu2 %v10639_v23  ;;  %v13985_v57 = vld [vmem:[#allocation25_spill] sm:$0xff] }
 0x3f8   :  { %2692 = vmatpush.msrb.mxu1 %v10607_v9  ;;  %2796 = vmatpush.msrb.mxu3 %v10603_v4 }
 0x3f9   :  { %2181 = vmatmul.f32.vlgmr.msrb.gmra.mxu0 %v2180_v30  ;;  %2481 = vmatmul.f32.vlgmr.msra.gmra.mxu1 %v2176_v49  ;;  %v13986_v30 = vld [vmem:[#allocation26_spill] sm:$0xff] }
 0x3fa   :  { %2633 = vmatpush.msrb.mxu0 %v10615_v14  ;;  %2694 = vmatpush.msrb.mxu1 %v10609_v10 }
 0x3fb   :  { %2798 = vmatpush.msrb.mxu3 %v10605_v5  ;;  %2735 = vmatpush.msrb.mxu2 %v10642_v24 }
 0x3fc   :  { %2636 = vmatpush.msrb.mxu0 %v10618_v15  ;;  %2696 = vmatpush.msrb.mxu1 %v10611_v11 }
 0x3fd   :  { %2800 = vmatpush.msrb.mxu3 %v10607_v9  ;;  %2739 = vmatpush.msrb.mxu2 %v10649_v26 }
 0x3fe   :  { %2639 = vmatpush.msrb.mxu0 %v10621_v16  ;;  %2698 = vmatpush.msrb.mxu1 %v10623_v17 }
 0x3ff   :  { %2802 = vmatpush.msrb.mxu3 %v10609_v10  ;;  %2743 = vmatpush.msrb.mxu2 %v10652_v27 }
 0x400   :  { %2642 = vmatpush.msrb.mxu0 %v10627_v18  ;;  %2700 = vmatpush.msrb.mxu1 %v10632_v20 }
 0x401   :  { %2444 = vmatmul.f32.vlgmr.msra.gmra.mxu0 %v2176_v49  ;;  %2804 = vmatpush.msrb.mxu3 %v10611_v11  ;;  %v13971_v49 = vld [vmem:[#allocation6_spill] sm:$0xff] }
 0x402   :  { %2645 = vmatpush.msrb.mxu0 %v10630_v19  ;;  %2702 = vmatpush.msrb.mxu1 %v10665_v32 }
 0x403   :  { %2806 = vmatpush.msrb.mxu3 %v10623_v17  ;;  %2747 = vmatpush.msrb.mxu2 %v10680_v39 }
 0x404   :  { %2648 = vmatpush.msrb.mxu0 %v10645_v25  ;;  %2704 = vmatpush.msrb.mxu1 %v10693_v44 }
 0x405   :  { %2808 = vmatpush.msrb.mxu3 %v10632_v20  ;;  %2751 = vmatpush.msrb.mxu2 %v10686_v41 }
 0x406   :  { %2651 = vmatpush.msrb.mxu0 %v10655_v28  ;;  %2706 = vmatpush.msrb.mxu1 %v10698_v46 }
 0x407   :  { %2810 = vmatpush.msrb.mxu3 %v10665_v32  ;;  %2755 = vmatpush.msrb.mxu2 %v10701_v47 }
 0x408   :  { %2654 = vmatpush.msrb.mxu0 %v10669_v33  ;;  %2708 = vmatpush.msrb.mxu1 %v10714_v52 }
 0x409   :  { %2812 = vmatpush.msrb.mxu3 %v10693_v44  ;;  %2759 = vmatpush.msrb.mxu2 %v10725_v56 }
 0x40a   :  { %2657 = vmatpush.msrb.mxu0 %v10696_v45  ;;  %2710 = vmatpush.msrb.mxu1 %v10730_v58 }
 0x40b   :  { %2814 = vmatpush.msrb.mxu3 %v10698_v46  ;;  %2763 = vmatpush.msrb.mxu2 %v10741_v62 }
 0x40c   :  { %2660 = vmatpush.msrb.mxu0 %v10712_v51  ;;  %2712 = vmatpush.msrb.mxu1 %v10746_v0 }
 0x40d   :  { %2816 = vmatpush.msrb.mxu3 %v10714_v52  ;;  %2767 = vmatpush.msrb.mxu2 %v10757_v7 }
 0x40e   :  { %2663 = vmatpush.msrb.mxu0 %v13874_v40  ;;  %2714 = vmatpush.msrb.mxu1 %v10762_v12 }
 0x40f   :  { %2818 = vmatpush.msrb.mxu3 %v10730_v58  ;;  %2771 = vmatpush.msrb.mxu2 %v10773_v29 }
 0x410   :  { %2666 = vmatpush.msrb.mxu0 %v13875_v48  ;;  %2716 = vmatpush.msrb.mxu1 %v10778_v31 }
 0x411   :  { %2820 = vmatpush.msrb.mxu3 %v10746_v0  ;;  %2775 = vmatpush.msrb.mxu2 %v10789_v38 }
 0x412   :  { %2669 = vmatpush.msrb.mxu0 %v13876_v6  ;;  %2878 = vmatpush.msra.mxu1 %v10672_v36 }
 0x413   :  { %2822 = vmatpush.msrb.mxu3 %v10762_v12  ;;  %2779 = vmatpush.msrb.mxu2 %v10803_v50 }
 0x414   :  { %2672 = vmatpush.msrb.mxu0 %v13877_v8  ;;  %2884 = vmatpush.msra.mxu1 %v10674_v37 }
 0x415   :  { %2824 = vmatpush.msrb.mxu3 %v10778_v31  ;;  %2783 = vmatpush.msrb.mxu2 %v10817_v60 }
 0x416   :  { %2675 = vmatpush.msrb.mxu0 %v13970_v34  ;;  %2890 = vmatpush.msra.mxu1 %v13971_v49 }
 0x417   :  { %2787 = vmatpush.msrb.mxu2 %v13972_v55 }
 0x418   :  { %2678 = vmatpush.msrb.mxu0 %v13973_v59  ;;  %2896 = vmatpush.msra.mxu1 %v13974_v53 }
 0x41a   :  { %2833 = vmatpush.msra.mxu0 %v10601_v3  ;;  %2902 = vmatpush.msra.mxu1 %v13975_v2 }
 0x41c   :  { %2835 = vmatpush.msra.mxu0 %v10603_v4  ;;  %2908 = vmatpush.msra.mxu1 %v13976_v43 }
 0x41e   :  { %2837 = vmatpush.msra.mxu0 %v10605_v5  ;;  %2914 = vmatpush.msra.mxu1 %v13977_v21 }
 0x420   :  { %2839 = vmatpush.msra.mxu0 %v10607_v9  ;;  %2920 = vmatpush.msra.mxu1 %v13978_v63 }
 0x422   :  { %2841 = vmatpush.msra.mxu0 %v10609_v10  ;;  %2926 = vmatpush.msra.mxu1 %v13979_v35 }
 0x424   :  { %2843 = vmatpush.msra.mxu0 %v10611_v11  ;;  %2932 = vmatpush.msra.mxu1 %v13980_v61 }
 0x426   :  { %2845 = vmatpush.msra.mxu0 %v10623_v17  ;;  %2938 = vmatpush.msra.mxu1 %v13981_v54 }
 0x428   :  { %2847 = vmatpush.msra.mxu0 %v10632_v20  ;;  %2944 = vmatpush.msra.mxu1 %v13982_v1 }
 0x42a   :  { %2849 = vmatpush.msra.mxu0 %v10665_v32  ;;  %2950 = vmatpush.msra.mxu1 %v13983_v42  ;;  %v13987_v42 = vld [vmem:[#allocation9_spill] sm:$0xff] }
 0x42b   :  { %v2142_v1 = vrot.slane %v13987_v42, 6 }
 0x42c   :  { %2851 = vmatpush.msra.mxu0 %v10693_v44  ;;  %2956 = vmatpush.msra.mxu1 %v13984_v13 }
 0x42e   :  { %2853 = vmatpush.msra.mxu0 %v10698_v46  ;;  %2962 = vmatpush.msra.mxu1 %v13985_v57 }
 0x430   :  { %2855 = vmatpush.msra.mxu0 %v10714_v52  ;;  %2968 = vmatpush.msra.mxu1 %v13986_v30 }
 0x432   :  { %2857 = vmatpush.msra.mxu0 %v10730_v58 }
 0x434   :  { %2859 = vmatpush.msra.mxu0 %v10746_v0 }
 0x436   :  { %2861 = vmatpush.msra.mxu0 %v10762_v12 }
 0x438   :  { %2863 = vmatpush.msra.mxu0 %v10778_v31 }
 0x46e   :  { %v2283_v54 = vpop.f32.mrf.mxu1 }
 0x476   :  { %v2182_v13 = vpop.f32.mrf.mxu0  ;;  %v2337_v63 = vpop.f32.mrf.mxu2 }
 0x477   :  { %v2183_v61 = vadd.f32 %v2182_v13, %v2142_v1  ;;  %v2482_v53 = vpop.f32.mrf.mxu1  ;;  %v13998_v1 = vld [vmem:[#allocation18_spill] sm:$0xff]  ;;  %v14000_v13 = vld [vmem:[#allocation21_spill] sm:$0xff] }
 0x478   :  { %v2376_v21 = vpop.f32.mrf.mxu3 }
 0x479   :  { %v2284_v35 = vadd.f32 %v2283_v54, %v2183_v61  ;;  %v13996_v61 = vld [vmem:[#allocation14_spill] sm:$0xff]  ;;  %v13997_v54 = vld [vmem:[#allocation16_spill] sm:$0xff] }
 0x47b   :  { %v2338_v57 = vadd.f32 %v2337_v63, %v2284_v35  ;;  %v13994_v63 = vld [vmem:[#allocation10_spill] sm:$0xff]  ;;  %v13995_v35 = vld [vmem:[#allocation12_spill] sm:$0xff] }
 0x47d   :  { %v2377_v43 = vadd.f32 %v2376_v21, %v2338_v57  ;;  %v14001_v57 = vld [vmem:[#allocation23_spill] sm:$0xff] }
 0x47e   :  { %v2445_v2 = vpop.f32.mrf.mxu0 }
 0x47f   :  { %v2446_v30 = vadd.f32 %v2445_v2, %v2377_v43  ;;  %v13992_v2 = vld [vmem:[#allocation7_spill] sm:$0xff]  ;;  %v13993_v43 = vld [vmem:[#allocation8_spill] sm:$0xff] }
 0x481   :  { %v2483_v59 = vadd.f32 %v2482_v53, %v2446_v30  ;;  %v13991_v53 = vld [vmem:[#allocation19_spill] sm:$0xff]  ;;  %v14002_v30 = vld [vmem:[#allocation24_spill] sm:$0xff] }
 0x483   :  { %10482 = vtanh.f32 %v2483_v59 }
 0x489   :  { %v10483_v55 = vpop.eup %10482 }
 0x48a   :  { %2486 = vst [vmem:[#allocation2 + $0x6] sm:$0x1] %v10483_v55  ;;  %v2521_v49 = vand.u32 4294901760, %v10483_v55 }
 0x48c   :  { %2627 = vmatmul.f32.vlgmr.msra.gmra.mxu3 %v2521_v49  ;;  %v2522_v34 = vsub.f32 %v10483_v55, %v2521_v49  ;;  %v13990_v55 = vld [vmem:[#allocation22_spill] sm:$0xff] }
 0x48d   :  { %3029 = vmatpush.msra.mxu3 %v10601_v3 }
 0x48e   :  { %2681 = vmatmul.f32.vlgmr.msrb.gmra.mxu0 %v2522_v34  ;;  %v2523_v42 = vand.u32 4294901760, %v2522_v34 }
 0x48f   :  { %3031 = vmatpush.msra.mxu3 %v10603_v4  ;;  %3070 = vmatpush.msrb.mxu0 %v10636_v22 }
 0x490   :  { %2720 = vmatmul.f32.vlgmr.msrb.gmra.mxu1 %v2523_v42  ;;  %v2524_v21 = vsub.f32 %v2522_v34, %v2523_v42  ;;  %v13988_v34 = vld [vmem:[#allocation17_spill] sm:$0xff]  ;;  %v13999_v42 = vld [vmem:[#allocation20_spill] sm:$0xff] }
 0x491   :  { %3033 = vmatpush.msra.mxu3 %v10605_v5  ;;  %3137 = vmatpush.msrb.mxu1 %v10601_v3 }
 0x492   :  { %v2525_v59 = vand.u32 4294901760, %v2524_v21  ;;  %3074 = vmatpush.msrb.mxu0 %v10639_v23  ;;  %v14003_v21 = vld [vmem:[#allocation25_spill] sm:$0xff] }
 0x493   :  { %3035 = vmatpush.msra.mxu3 %v10607_v9  ;;  %3139 = vmatpush.msrb.mxu1 %v10603_v4 }
 0x494   :  { %2526 = vmatmul.f32.vlgmr.msra.gmra.mxu2 %v2525_v59  ;;  %2826 = vmatmul.f32.vlgmr.msrb.gmra.mxu3 %v2521_v49  ;;  %v14004_v59 = vld [vmem:[#allocation26_spill] sm:$0xff] }
 0x495   :  { %2976 = vmatpush.msra.mxu2 %v10615_v14  ;;  %3037 = vmatpush.msra.mxu3 %v10609_v10 }
 0x496   :  { %3141 = vmatpush.msrb.mxu1 %v10605_v5  ;;  %3078 = vmatpush.msrb.mxu0 %v10642_v24 }
 0x497   :  { %2979 = vmatpush.msra.mxu2 %v10618_v15  ;;  %3039 = vmatpush.msra.mxu3 %v10611_v11 }
 0x498   :  { %3143 = vmatpush.msrb.mxu1 %v10607_v9  ;;  %3082 = vmatpush.msrb.mxu0 %v10649_v26 }
 0x499   :  { %2982 = vmatpush.msra.mxu2 %v10621_v16  ;;  %3041 = vmatpush.msra.mxu3 %v10623_v17 }
 0x49a   :  { %3145 = vmatpush.msrb.mxu1 %v10609_v10  ;;  %3086 = vmatpush.msrb.mxu0 %v10652_v27 }
 0x49b   :  { %2985 = vmatpush.msra.mxu2 %v10627_v18  ;;  %3043 = vmatpush.msra.mxu3 %v10632_v20 }
 0x49c   :  { %2789 = vmatmul.f32.vlgmr.msrb.gmra.mxu2 %v2521_v49  ;;  %3147 = vmatpush.msrb.mxu1 %v10611_v11  ;;  %v13989_v49 = vld [vmem:[#allocation6_spill] sm:$0xff] }
 0x49d   :  { %2988 = vmatpush.msra.mxu2 %v10630_v19  ;;  %3045 = vmatpush.msra.mxu3 %v10665_v32 }
 0x49e   :  { %3149 = vmatpush.msrb.mxu1 %v10623_v17  ;;  %3090 = vmatpush.msrb.mxu0 %v10680_v39 }
 0x49f   :  { %2991 = vmatpush.msra.mxu2 %v10645_v25  ;;  %3047 = vmatpush.msra.mxu3 %v10693_v44 }
 0x4a0   :  { %3151 = vmatpush.msrb.mxu1 %v10632_v20  ;;  %3094 = vmatpush.msrb.mxu0 %v10686_v41 }
 0x4a1   :  { %2994 = vmatpush.msra.mxu2 %v10655_v28  ;;  %3049 = vmatpush.msra.mxu3 %v10698_v46 }
 0x4a2   :  { %3153 = vmatpush.msrb.mxu1 %v10665_v32  ;;  %3098 = vmatpush.msrb.mxu0 %v10701_v47 }
 0x4a3   :  { %2997 = vmatpush.msra.mxu2 %v10669_v33  ;;  %3051 = vmatpush.msra.mxu3 %v10714_v52 }
 0x4a4   :  { %3155 = vmatpush.msrb.mxu1 %v10693_v44  ;;  %3102 = vmatpush.msrb.mxu0 %v10725_v56 }
 0x4a5   :  { %3000 = vmatpush.msra.mxu2 %v10696_v45  ;;  %3053 = vmatpush.msra.mxu3 %v10730_v58 }
 0x4a6   :  { %3157 = vmatpush.msrb.mxu1 %v10698_v46  ;;  %3106 = vmatpush.msrb.mxu0 %v10741_v62 }
 0x4a7   :  { %3003 = vmatpush.msra.mxu2 %v10712_v51  ;;  %3055 = vmatpush.msra.mxu3 %v10746_v0 }
 0x4a8   :  { %3159 = vmatpush.msrb.mxu1 %v10714_v52  ;;  %3110 = vmatpush.msrb.mxu0 %v10757_v7 }
 0x4a9   :  { %3006 = vmatpush.msra.mxu2 %v13874_v40  ;;  %3057 = vmatpush.msra.mxu3 %v10762_v12 }
 0x4aa   :  { %3161 = vmatpush.msrb.mxu1 %v10730_v58  ;;  %3114 = vmatpush.msrb.mxu0 %v10773_v29 }
 0x4ab   :  { %3009 = vmatpush.msra.mxu2 %v13875_v48  ;;  %3059 = vmatpush.msra.mxu3 %v10778_v31 }
 0x4ac   :  { %3163 = vmatpush.msrb.mxu1 %v10746_v0  ;;  %3118 = vmatpush.msrb.mxu0 %v10789_v38 }
 0x4ad   :  { %3012 = vmatpush.msra.mxu2 %v13876_v6  ;;  %3224 = vmatpush.msrb.mxu3 %v10672_v36 }
 0x4ae   :  { %3165 = vmatpush.msrb.mxu1 %v10762_v12  ;;  %3122 = vmatpush.msrb.mxu0 %v10803_v50 }
 0x4af   :  { %3015 = vmatpush.msra.mxu2 %v13877_v8  ;;  %3230 = vmatpush.msrb.mxu3 %v10674_v37 }
 0x4b0   :  { %3167 = vmatpush.msrb.mxu1 %v10778_v31  ;;  %3126 = vmatpush.msrb.mxu0 %v10817_v60 }
 0x4b1   :  { %3018 = vmatpush.msra.mxu2 %v13988_v34  ;;  %3236 = vmatpush.msrb.mxu3 %v13989_v49 }
 0x4b2   :  { %3130 = vmatpush.msrb.mxu0 %v13990_v55 }
 0x4b3   :  { %3021 = vmatpush.msra.mxu2 %v13991_v53  ;;  %3242 = vmatpush.msrb.mxu3 %v13992_v2 }
 0x4b5   :  { %3179 = vmatpush.msrb.mxu2 %v10601_v3  ;;  %3248 = vmatpush.msrb.mxu3 %v13993_v43 }
 0x4b7   :  { %3181 = vmatpush.msrb.mxu2 %v10603_v4  ;;  %3254 = vmatpush.msrb.mxu3 %v13994_v63 }
 0x4b9   :  { %3183 = vmatpush.msrb.mxu2 %v10605_v5  ;;  %3260 = vmatpush.msrb.mxu3 %v13995_v35 }
 0x4bb   :  { %3185 = vmatpush.msrb.mxu2 %v10607_v9  ;;  %3266 = vmatpush.msrb.mxu3 %v13996_v61 }
 0x4bd   :  { %3187 = vmatpush.msrb.mxu2 %v10609_v10  ;;  %3272 = vmatpush.msrb.mxu3 %v13997_v54 }
 0x4bf   :  { %3189 = vmatpush.msrb.mxu2 %v10611_v11  ;;  %3278 = vmatpush.msrb.mxu3 %v13998_v1 }
 0x4c1   :  { %3191 = vmatpush.msrb.mxu2 %v10623_v17  ;;  %3284 = vmatpush.msrb.mxu3 %v13999_v42 }
 0x4c3   :  { %3193 = vmatpush.msrb.mxu2 %v10632_v20  ;;  %3290 = vmatpush.msrb.mxu3 %v14000_v13 }
 0x4c5   :  { %3195 = vmatpush.msrb.mxu2 %v10665_v32  ;;  %3296 = vmatpush.msrb.mxu3 %v14001_v57  ;;  %v14005_v57 = vld [vmem:[#allocation9_spill] sm:$0xff] }
 0x4c6   :  { %v2487_v13 = vrot.slane %v14005_v57, 7 }
 0x4c7   :  { %3197 = vmatpush.msrb.mxu2 %v10693_v44  ;;  %3302 = vmatpush.msrb.mxu3 %v14002_v30 }
 0x4c9   :  { %3199 = vmatpush.msrb.mxu2 %v10698_v46  ;;  %3308 = vmatpush.msrb.mxu3 %v14003_v21 }
 0x4cb   :  { %3201 = vmatpush.msrb.mxu2 %v10714_v52  ;;  %3314 = vmatpush.msrb.mxu3 %v14004_v59 }
 0x4cd   :  { %3203 = vmatpush.msrb.mxu2 %v10730_v58 }
 0x4cf   :  { %3205 = vmatpush.msrb.mxu2 %v10746_v0 }
 0x4d1   :  { %3207 = vmatpush.msrb.mxu2 %v10762_v12 }
 0x4d3   :  { %3209 = vmatpush.msrb.mxu2 %v10778_v31 }
 0x50b   :  { %v2682_v61 = vpop.f32.mrf.mxu0 }
 0x50d   :  { %v2721_v35 = vpop.f32.mrf.mxu1 }
 0x50f   :  { %v2628_v42 = vpop.f32.mrf.mxu3 }
 0x517   :  { %v2527_v30 = vpop.f32.mrf.mxu2  ;;  %v2827_v2 = vpop.f32.mrf.mxu3 }
 0x518   :  { %v2528_v1 = vadd.f32 %v2527_v30, %v2487_v13  ;;  %v14013_v13 = vld [vmem:[#allocation12_spill] sm:$0xff]  ;;  %v14014_v30 = vld [vmem:[#allocation14_spill] sm:$0xff] }
 0x51a   :  { %v2629_v54 = vadd.f32 %v2628_v42, %v2528_v1  ;;  %v14011_v1 = vld [vmem:[#allocation8_spill] sm:$0xff]  ;;  %v14012_v42 = vld [vmem:[#allocation10_spill] sm:$0xff] }
 0x51c   :  { %v2683_v21 = vadd.f32 %v2682_v61, %v2629_v54  ;;  %v10468_v61 = vld [vmem:[%s13798_s1 + $0x2] ss:$0 sm:$0xff]  ;;  %v14010_v54 = vld [vmem:[#allocation7_spill] sm:$0xff] }
 0x51e   :  { %v2722_v63 = vadd.f32 %v2721_v35, %v2683_v21  ;;  %v14009_v35 = vld [vmem:[#allocation19_spill] sm:$0xff]  ;;  %v14015_v21 = vld [vmem:[#allocation16_spill] sm:$0xff] }
 0x51f   :  { %v2790_v43 = vpop.f32.mrf.mxu2 }
 0x520   :  { %v2791_v59 = vadd.f32 %v2790_v43, %v2722_v63  ;;  %v14008_v63 = vld [vmem:[#allocation6_spill] sm:$0xff] }
 0x522   :  { %v2828_v53 = vadd.f32 %v2827_v2, %v2791_v59  ;;  %v14016_v59 = vld [vmem:[#allocation18_spill] sm:$0xff] }
 0x524   :  { %10484 = vtanh.f32 %v2828_v53 }
 0x52a   :  { %v10485_v49 = vpop.eup %10484 }
 0x52b   :  { %2831 = vst [vmem:[#allocation2 + $0x7] sm:$0x1] %v10485_v49  ;;  %v2864_v55 = vand.u32 4294901760, %v10485_v49 }
 0x52d   :  { %2970 = vmatmul.f32.vlgmr.msra.gmra.mxu1 %v2864_v55  ;;  %v2865_v34 = vsub.f32 %v10485_v49, %v2864_v55 }
 0x52e   :  { %3375 = vmatpush.msra.mxu1 %v10601_v3 }
 0x52f   :  { %3024 = vmatmul.f32.vlgmr.msra.gmra.mxu2 %v2865_v34  ;;  %v2866_v57 = vand.u32 4294901760, %v2865_v34 }
 0x530   :  { %3377 = vmatpush.msra.mxu1 %v10603_v4  ;;  %3416 = vmatpush.msra.mxu2 %v10636_v22 }
 0x531   :  { %3063 = vmatmul.f32.vlgmr.msra.gmra.mxu3 %v2866_v57  ;;  %v2867_v2 = vsub.f32 %v2865_v34, %v2866_v57  ;;  %v14006_v34 = vld [vmem:[#allocation17_spill] sm:$0xff]  ;;  %v14017_v57 = vld [vmem:[#allocation20_spill] sm:$0xff] }
 0x532   :  { %v10420_v53 = vld [vmem:[#allocation2] sm:$0xff]  ;;  %3379 = vmatpush.msra.mxu1 %v10605_v5  ;;  %3483 = vmatpush.msra.mxu3 %v10601_v3 }
 0x533   :  { %v2868_v49 = vand.u32 4294901760, %v2867_v2  ;;  %v10425_v43 = vmul.f32 %v10468_v61, %v10420_v53  ;;  %3420 = vmatpush.msra.mxu2 %v10639_v23  ;;  %v14018_v61 = vld [vmem:[#allocation21_spill] sm:$0xff]  ;;  %v14019_v2 = vld [vmem:[#allocation23_spill] sm:$0xff]  ;;  %v14020_v53 = vld [vmem:[#allocation24_spill] sm:$0xff] }
 0x534   :  { %3381 = vmatpush.msra.mxu1 %v10607_v9  ;;  %3485 = vmatpush.msra.mxu3 %v10603_v4 }
 0x535   :  { %2869 = vmatmul.f32.vlgmr.msra.gmra.mxu0 %v2868_v49  ;;  %3169 = vmatmul.f32.vlgmr.msrb.gmra.mxu1 %v2864_v55  ;;  %v14021_v49 = vld [vmem:[#allocation25_spill] sm:$0xff] }
 0x536   :  { %10429 = vadd.xlane.f32.xlu2 %v10425_v43  ;;  %3322 = vmatpush.msra.mxu0 %v10615_v14  ;;  %v14022_v43 = vld [vmem:[#allocation26_spill] sm:$0xff] }
 0x537   :  { %3383 = vmatpush.msra.mxu1 %v10609_v10  ;;  %3487 = vmatpush.msra.mxu3 %v10605_v5 }
 0x538   :  { %3325 = vmatpush.msra.mxu0 %v10618_v15  ;;  %3424 = vmatpush.msra.mxu2 %v10642_v24 }
 0x539   :  { %3385 = vmatpush.msra.mxu1 %v10611_v11  ;;  %3489 = vmatpush.msra.mxu3 %v10607_v9 }
 0x53a   :  { %3328 = vmatpush.msra.mxu0 %v10621_v16  ;;  %3428 = vmatpush.msra.mxu2 %v10649_v26 }
 0x53b   :  { %3387 = vmatpush.msra.mxu1 %v10623_v17  ;;  %3491 = vmatpush.msra.mxu3 %v10609_v10 }
 0x53c   :  { %3331 = vmatpush.msra.mxu0 %v10627_v18  ;;  %3432 = vmatpush.msra.mxu2 %v10652_v27 }
 0x53d   :  { %3132 = vmatmul.f32.vlgmr.msrb.gmra.mxu0 %v2864_v55  ;;  %3389 = vmatpush.msra.mxu1 %v10632_v20  ;;  %v14007_v55 = vld [vmem:[#allocation22_spill] sm:$0xff] }
 0x53e   :  { %3334 = vmatpush.msra.mxu0 %v10630_v19  ;;  %3493 = vmatpush.msra.mxu3 %v10611_v11 }
 0x53f   :  { %3391 = vmatpush.msra.mxu1 %v10665_v32  ;;  %3436 = vmatpush.msra.mxu2 %v10680_v39 }
 0x540   :  { %3337 = vmatpush.msra.mxu0 %v10645_v25  ;;  %3495 = vmatpush.msra.mxu3 %v10623_v17 }
 0x541   :  { %3393 = vmatpush.msra.mxu1 %v10693_v44  ;;  %3440 = vmatpush.msra.mxu2 %v10686_v41 }
 0x542   :  { %3340 = vmatpush.msra.mxu0 %v10655_v28  ;;  %3497 = vmatpush.msra.mxu3 %v10632_v20 }
 0x543   :  { %3395 = vmatpush.msra.mxu1 %v10698_v46  ;;  %3444 = vmatpush.msra.mxu2 %v10701_v47 }
 0x544   :  { %3343 = vmatpush.msra.mxu0 %v10669_v33  ;;  %3499 = vmatpush.msra.mxu3 %v10665_v32 }
 0x545   :  { %3397 = vmatpush.msra.mxu1 %v10714_v52  ;;  %3448 = vmatpush.msra.mxu2 %v10725_v56 }
 0x546   :  { %3346 = vmatpush.msra.mxu0 %v10696_v45  ;;  %3501 = vmatpush.msra.mxu3 %v10693_v44 }
 0x547   :  { %3399 = vmatpush.msra.mxu1 %v10730_v58  ;;  %3452 = vmatpush.msra.mxu2 %v10741_v62 }
 0x548   :  { %3349 = vmatpush.msra.mxu0 %v10712_v51  ;;  %3503 = vmatpush.msra.mxu3 %v10698_v46 }
 0x549   :  { %3401 = vmatpush.msra.mxu1 %v10746_v0  ;;  %3456 = vmatpush.msra.mxu2 %v10757_v7 }
 0x54a   :  { %3352 = vmatpush.msra.mxu0 %v13874_v40  ;;  %3505 = vmatpush.msra.mxu3 %v10714_v52 }
 0x54b   :  { %3403 = vmatpush.msra.mxu1 %v10762_v12  ;;  %3460 = vmatpush.msra.mxu2 %v10773_v29 }
 0x54c   :  { %3355 = vmatpush.msra.mxu0 %v13875_v48  ;;  %3507 = vmatpush.msra.mxu3 %v10730_v58 }
 0x54d   :  { %3405 = vmatpush.msra.mxu1 %v10778_v31  ;;  %3464 = vmatpush.msra.mxu2 %v10789_v38 }
 0x54e   :  { %3358 = vmatpush.msra.mxu0 %v13876_v6  ;;  %3509 = vmatpush.msra.mxu3 %v10746_v0 }
 0x54f   :  { %3468 = vmatpush.msra.mxu2 %v10803_v50  ;;  %3569 = vmatpush.msrb.mxu1 %v10672_v36 }
 0x550   :  { %3361 = vmatpush.msra.mxu0 %v13877_v8  ;;  %3511 = vmatpush.msra.mxu3 %v10762_v12 }
 0x551   :  { %3472 = vmatpush.msra.mxu2 %v10817_v60  ;;  %3575 = vmatpush.msrb.mxu1 %v10674_v37 }
 0x552   :  { %3364 = vmatpush.msra.mxu0 %v14006_v34  ;;  %3513 = vmatpush.msra.mxu3 %v10778_v31 }
 0x553   :  { %3476 = vmatpush.msra.mxu2 %v14007_v55  ;;  %3581 = vmatpush.msrb.mxu1 %v14008_v63 }
 0x554   :  { %3367 = vmatpush.msra.mxu0 %v14009_v35 }
 0x555   :  { %3587 = vmatpush.msrb.mxu1 %v14010_v54 }
 0x556   :  { %3524 = vmatpush.msrb.mxu0 %v10601_v3 }
 0x557   :  { %3593 = vmatpush.msrb.mxu1 %v14011_v1 }
 0x558   :  { %3526 = vmatpush.msrb.mxu0 %v10603_v4 }
 0x559   :  { %3599 = vmatpush.msrb.mxu1 %v14012_v42 }
 0x55a   :  { %3528 = vmatpush.msrb.mxu0 %v10605_v5 }
 0x55b   :  { %3605 = vmatpush.msrb.mxu1 %v14013_v13 }
 0x55c   :  { %3530 = vmatpush.msrb.mxu0 %v10607_v9 }
 0x55d   :  { %3611 = vmatpush.msrb.mxu1 %v14014_v30 }
 0x55e   :  { %3532 = vmatpush.msrb.mxu0 %v10609_v10 }
 0x55f   :  { %3617 = vmatpush.msrb.mxu1 %v14015_v21 }
 0x560   :  { %3534 = vmatpush.msrb.mxu0 %v10611_v11 }
 0x561   :  { %3623 = vmatpush.msrb.mxu1 %v14016_v59  ;;  %v10531_v59 = vld [vmem:[%s13798_s1 + $0x1] ss:$0 sm:$0xff] }
 0x562   :  { %3536 = vmatpush.msrb.mxu0 %v10623_v17 }
 0x563   :  { %3629 = vmatpush.msrb.mxu1 %v14017_v57 }
 0x564   :  { %3538 = vmatpush.msrb.mxu0 %v10632_v20 }
 0x565   :  { %3635 = vmatpush.msrb.mxu1 %v14018_v61  ;;  %v48_v61 = vpop.permute.xlu0 %47 }
 0x566   :  { %3540 = vmatpush.msrb.mxu0 %v10665_v32 }
 0x567   :  { %3641 = vmatpush.msrb.mxu1 %v14019_v2 }
 0x568   :  { %3542 = vmatpush.msrb.mxu0 %v10693_v44 }
 0x569   :  { %3647 = vmatpush.msrb.mxu1 %v14020_v53  ;;  %v10469_v53 = vld [vmem:[%s13798_s1 + $0x3] ss:$0 sm:$0xff] }
 0x56a   :  { %3544 = vmatpush.msrb.mxu0 %v10698_v46 }
 0x56b   :  { %3653 = vmatpush.msrb.mxu1 %v14021_v49 }
 0x56c   :  { %3546 = vmatpush.msrb.mxu0 %v10714_v52 }
 0x56d   :  { %3659 = vmatpush.msrb.mxu1 %v14022_v43  ;;  %v10530_v43 = vld [vmem:[%s13798_s1] ss:$0 sm:$0xff] }
 0x56e   :  { %3548 = vmatpush.msrb.mxu0 %v10730_v58  ;;  %v62_v57 = vmul.f32 %v10530_v43, %v48_v61 }
 0x570   :  { %3550 = vmatpush.msrb.mxu0 %v10746_v0  ;;  %v11831_v21 = vadd.f32 %v10531_v59, %v62_v57 }
 0x572   :  { %3552 = vmatpush.msrb.mxu0 %v10762_v12  ;;  %14023 = vst [vmem:[#allocation11_spill] sm:$0xff] %v11831_v21 }
 0x574   :  { %3554 = vmatpush.msrb.mxu0 %v10778_v31 }
 0x5a9   :  { %v10430_v2 = vpop.xlane.xlu2 %10429 }
 0x5aa   :  { %v10440_v49 = vadd.f32 %v10469_v53, %v10430_v2  ;;  %v2971_v30 = vpop.f32.mrf.mxu1 }
 0x5ac   :  { %10445 = vst.msk [vmem:[%s13800_s3] sm:$0xff] %vm10444_vm0, %v10440_v49 }
 0x5b2   :  { %v2870_v13 = vpop.f32.mrf.mxu0  ;;  %v3025_v42 = vpop.f32.mrf.mxu2 }
 0x5b3   :  { %v2871_v2 = vadd.f32 %v2870_v13, %v11831_v21  ;;  %v3170_v63 = vpop.f32.mrf.mxu1  ;;  %v14029_v13 = vld [vmem:[#allocation8_spill] sm:$0xff] }
 0x5b4   :  { %v3064_v54 = vpop.f32.mrf.mxu3 }
 0x5b5   :  { %v2972_v53 = vadd.f32 %v2971_v30, %v2871_v2  ;;  %v14030_v30 = vld [vmem:[#allocation10_spill] sm:$0xff]  ;;  %v14031_v2 = vld [vmem:[#allocation12_spill] sm:$0xff] }
 0x5b7   :  { %v3026_v1 = vadd.f32 %v3025_v42, %v2972_v53  ;;  %v14028_v42 = vld [vmem:[#allocation7_spill] sm:$0xff]  ;;  %v14032_v53 = vld [vmem:[#allocation14_spill] sm:$0xff] }
 0x5b9   :  { %v3065_v49 = vadd.f32 %v3064_v54, %v3026_v1  ;;  %v14027_v1 = vld [vmem:[#allocation19_spill] sm:$0xff] }
 0x5ba   :  { %v3133_v35 = vpop.f32.mrf.mxu0 }
 0x5bb   :  { %v3134_v55 = vadd.f32 %v3133_v35, %v3065_v49  ;;  %v14026_v35 = vld [vmem:[#allocation22_spill] sm:$0xff]  ;;  %v14033_v49 = vld [vmem:[#allocation16_spill] sm:$0xff] }
 0x5bd   :  { %v3171_v34 = vadd.f32 %v3170_v63, %v3134_v55  ;;  %v14024_v55 = vld [vmem:[#allocation17_spill] sm:$0xff]  ;;  %v14025_v63 = vld [vmem:[#allocation6_spill] sm:$0xff] }
 0x5bf   :  { %10486 = vtanh.f32 %v3171_v34 }
 0x5c5   :  { %v10487_v61 = vpop.eup %10486 }
 0x5c6   :  { %3174 = vst [vmem:[#allocation2 + $0x8] sm:$0x1] %v10487_v61  ;;  %v3210_v43 = vand.u32 4294901760, %v10487_v61 }
 0x5c8   :  { %3316 = vmatmul.f32.vlgmr.msrb.gmra.mxu3 %v3210_v43  ;;  %v3211_v59 = vsub.f32 %v10487_v61, %v3210_v43  ;;  %v14034_v61 = vld [vmem:[#allocation18_spill] sm:$0xff] }
 0x5c9   :  { %3720 = vmatpush.msrb.mxu3 %v10601_v3 }
 0x5ca   :  { %3370 = vmatmul.f32.vlgmr.msra.gmra.mxu0 %v3211_v59  ;;  %v3212_v57 = vand.u32 4294901760, %v3211_v59 }
 0x5cb   :  { %3722 = vmatpush.msrb.mxu3 %v10603_v4  ;;  %3761 = vmatpush.msra.mxu0 %v10636_v22 }
 0x5cc   :  { %3409 = vmatmul.f32.vlgmr.msra.gmra.mxu1 %v3212_v57  ;;  %v3213_v54 = vsub.f32 %v3211_v59, %v3212_v57  ;;  %v14036_v59 = vld [vmem:[#allocation21_spill] sm:$0xff]  ;;  %v14037_v57 = vld [vmem:[#allocation23_spill] sm:$0xff] }
 0x5cd   :  { %3724 = vmatpush.msrb.mxu3 %v10605_v5  ;;  %3828 = vmatpush.msra.mxu1 %v10601_v3 }
 0x5ce   :  { %v3214_v34 = vand.u32 4294901760, %v3213_v54  ;;  %3765 = vmatpush.msra.mxu0 %v10639_v23  ;;  %v14038_v54 = vld [vmem:[#allocation24_spill] sm:$0xff] }
 0x5cf   :  { %3726 = vmatpush.msrb.mxu3 %v10607_v9  ;;  %3830 = vmatpush.msra.mxu1 %v10603_v4 }
 0x5d0   :  { %3215 = vmatmul.f32.vlgmr.msrb.gmra.mxu2 %v3214_v34  ;;  %3515 = vmatmul.f32.vlgmr.msra.gmra.mxu3 %v3210_v43  ;;  %v14039_v34 = vld [vmem:[#allocation25_spill] sm:$0xff] }
 0x5d1   :  { %3667 = vmatpush.msrb.mxu2 %v10615_v14  ;;  %3728 = vmatpush.msrb.mxu3 %v10609_v10 }
 0x5d2   :  { %3832 = vmatpush.msra.mxu1 %v10605_v5  ;;  %3769 = vmatpush.msra.mxu0 %v10642_v24 }
 0x5d3   :  { %3670 = vmatpush.msrb.mxu2 %v10618_v15  ;;  %3730 = vmatpush.msrb.mxu3 %v10611_v11 }
 0x5d4   :  { %3834 = vmatpush.msra.mxu1 %v10607_v9  ;;  %3773 = vmatpush.msra.mxu0 %v10649_v26 }
 0x5d5   :  { %3673 = vmatpush.msrb.mxu2 %v10621_v16  ;;  %3732 = vmatpush.msrb.mxu3 %v10623_v17 }
 0x5d6   :  { %3836 = vmatpush.msra.mxu1 %v10609_v10  ;;  %3777 = vmatpush.msra.mxu0 %v10652_v27 }
 0x5d7   :  { %3676 = vmatpush.msrb.mxu2 %v10627_v18  ;;  %3734 = vmatpush.msrb.mxu3 %v10632_v20 }
 0x5d8   :  { %3478 = vmatmul.f32.vlgmr.msra.gmra.mxu2 %v3210_v43  ;;  %3838 = vmatpush.msra.mxu1 %v10611_v11  ;;  %v14035_v43 = vld [vmem:[#allocation20_spill] sm:$0xff] }
 0x5d9   :  { %3679 = vmatpush.msrb.mxu2 %v10630_v19  ;;  %3736 = vmatpush.msrb.mxu3 %v10665_v32 }
 0x5da   :  { %3840 = vmatpush.msra.mxu1 %v10623_v17  ;;  %3781 = vmatpush.msra.mxu0 %v10680_v39 }
 0x5db   :  { %3682 = vmatpush.msrb.mxu2 %v10645_v25  ;;  %3738 = vmatpush.msrb.mxu3 %v10693_v44 }
 0x5dc   :  { %3842 = vmatpush.msra.mxu1 %v10632_v20  ;;  %3785 = vmatpush.msra.mxu0 %v10686_v41 }
 0x5dd   :  { %3685 = vmatpush.msrb.mxu2 %v10655_v28  ;;  %3740 = vmatpush.msrb.mxu3 %v10698_v46 }
 0x5de   :  { %3844 = vmatpush.msra.mxu1 %v10665_v32  ;;  %3789 = vmatpush.msra.mxu0 %v10701_v47 }
 0x5df   :  { %3688 = vmatpush.msrb.mxu2 %v10669_v33  ;;  %3742 = vmatpush.msrb.mxu3 %v10714_v52 }
 0x5e0   :  { %3846 = vmatpush.msra.mxu1 %v10693_v44  ;;  %3793 = vmatpush.msra.mxu0 %v10725_v56 }
 0x5e1   :  { %3691 = vmatpush.msrb.mxu2 %v10696_v45  ;;  %3744 = vmatpush.msrb.mxu3 %v10730_v58 }
 0x5e2   :  { %3848 = vmatpush.msra.mxu1 %v10698_v46  ;;  %3797 = vmatpush.msra.mxu0 %v10741_v62 }
 0x5e3   :  { %3694 = vmatpush.msrb.mxu2 %v10712_v51  ;;  %3746 = vmatpush.msrb.mxu3 %v10746_v0 }
 0x5e4   :  { %3850 = vmatpush.msra.mxu1 %v10714_v52  ;;  %3801 = vmatpush.msra.mxu0 %v10757_v7 }
 0x5e5   :  { %3697 = vmatpush.msrb.mxu2 %v13874_v40  ;;  %3748 = vmatpush.msrb.mxu3 %v10762_v12 }
 0x5e6   :  { %3852 = vmatpush.msra.mxu1 %v10730_v58  ;;  %3805 = vmatpush.msra.mxu0 %v10773_v29 }
 0x5e7   :  { %3700 = vmatpush.msrb.mxu2 %v13875_v48  ;;  %3750 = vmatpush.msrb.mxu3 %v10778_v31 }
 0x5e8   :  { %3854 = vmatpush.msra.mxu1 %v10746_v0  ;;  %3809 = vmatpush.msra.mxu0 %v10789_v38 }
 0x5e9   :  { %3703 = vmatpush.msrb.mxu2 %v13876_v6  ;;  %3914 = vmatpush.msra.mxu3 %v10672_v36 }
 0x5ea   :  { %3856 = vmatpush.msra.mxu1 %v10762_v12  ;;  %3813 = vmatpush.msra.mxu0 %v10803_v50 }
 0x5eb   :  { %3706 = vmatpush.msrb.mxu2 %v13877_v8  ;;  %3920 = vmatpush.msra.mxu3 %v10674_v37 }
 0x5ec   :  { %3858 = vmatpush.msra.mxu1 %v10778_v31  ;;  %3817 = vmatpush.msra.mxu0 %v10817_v60 }
 0x5ed   :  { %3709 = vmatpush.msrb.mxu2 %v14024_v55  ;;  %3926 = vmatpush.msra.mxu3 %v14025_v63 }
 0x5ee   :  { %3821 = vmatpush.msra.mxu0 %v14026_v35 }
 0x5ef   :  { %3712 = vmatpush.msrb.mxu2 %v14027_v1  ;;  %3932 = vmatpush.msra.mxu3 %v14028_v42 }
 0x5f1   :  { %3869 = vmatpush.msra.mxu2 %v10601_v3  ;;  %3938 = vmatpush.msra.mxu3 %v14029_v13 }
 0x5f3   :  { %3871 = vmatpush.msra.mxu2 %v10603_v4  ;;  %3944 = vmatpush.msra.mxu3 %v14030_v30 }
 0x5f5   :  { %3873 = vmatpush.msra.mxu2 %v10605_v5  ;;  %3950 = vmatpush.msra.mxu3 %v14031_v2 }
 0x5f7   :  { %3875 = vmatpush.msra.mxu2 %v10607_v9  ;;  %3956 = vmatpush.msra.mxu3 %v14032_v53 }
 0x5f9   :  { %3877 = vmatpush.msra.mxu2 %v10609_v10  ;;  %3962 = vmatpush.msra.mxu3 %v14033_v49 }
 0x5fb   :  { %3879 = vmatpush.msra.mxu2 %v10611_v11  ;;  %3968 = vmatpush.msra.mxu3 %v14034_v61  ;;  %v14040_v61 = vld [vmem:[#allocation26_spill] sm:$0xff] }
 0x5fd   :  { %3881 = vmatpush.msra.mxu2 %v10623_v17  ;;  %3974 = vmatpush.msra.mxu3 %v14035_v43 }
 0x5ff   :  { %3883 = vmatpush.msra.mxu2 %v10632_v20  ;;  %3980 = vmatpush.msra.mxu3 %v14036_v59 }
 0x601   :  { %3885 = vmatpush.msra.mxu2 %v10665_v32  ;;  %3986 = vmatpush.msra.mxu3 %v14037_v57  ;;  %v3176_v57 = vrot.slane %v11831_v21, 1 }
 0x603   :  { %3887 = vmatpush.msra.mxu2 %v10693_v44  ;;  %3992 = vmatpush.msra.mxu3 %v14038_v54 }
 0x605   :  { %3889 = vmatpush.msra.mxu2 %v10698_v46  ;;  %3998 = vmatpush.msra.mxu3 %v14039_v34 }
 0x607   :  { %3891 = vmatpush.msra.mxu2 %v10714_v52  ;;  %4004 = vmatpush.msra.mxu3 %v14040_v61 }
 0x609   :  { %3893 = vmatpush.msra.mxu2 %v10730_v58 }
 0x60b   :  { %3895 = vmatpush.msra.mxu2 %v10746_v0 }
 0x60d   :  { %3897 = vmatpush.msra.mxu2 %v10762_v12 }
 0x60f   :  { %3899 = vmatpush.msra.mxu2 %v10778_v31 }
 0x647   :  { %v3371_v53 = vpop.f32.mrf.mxu0 }
 0x649   :  { %v3410_v2 = vpop.f32.mrf.mxu1 }
 0x64b   :  { %v3317_v59 = vpop.f32.mrf.mxu3 }
 0x653   :  { %v3216_v54 = vpop.f32.mrf.mxu2  ;;  %v3516_v42 = vpop.f32.mrf.mxu3 }
 0x654   :  { %v3217_v43 = vadd.f32 %v3216_v54, %v3176_v57  ;;  %v14053_v57 = vld [vmem:[#allocation21_spill] sm:$0xff]  ;;  %v14054_v54 = vld [vmem:[#allocation23_spill] sm:$0xff] }
 0x656   :  { %v3318_v49 = vadd.f32 %v3317_v59, %v3217_v43  ;;  %v14051_v43 = vld [vmem:[#allocation18_spill] sm:$0xff]  ;;  %v14052_v59 = vld [vmem:[#allocation20_spill] sm:$0xff] }
 0x658   :  { %v3372_v34 = vadd.f32 %v3371_v53, %v3318_v49  ;;  %v14048_v53 = vld [vmem:[#allocation12_spill] sm:$0xff]  ;;  %v14049_v49 = vld [vmem:[#allocation14_spill] sm:$0xff] }
 0x65a   :  { %v3411_v30 = vadd.f32 %v3410_v2, %v3372_v34  ;;  %v14055_v34 = vld [vmem:[#allocation24_spill] sm:$0xff] }
 0x65b   :  { %v3479_v13 = vpop.f32.mrf.mxu2 }
 0x65c   :  { %v3480_v61 = vadd.f32 %v3479_v13, %v3411_v30  ;;  %v14046_v13 = vld [vmem:[#allocation8_spill] sm:$0xff]  ;;  %v14047_v30 = vld [vmem:[#allocation10_spill] sm:$0xff] }
 0x65e   :  { %v3517_v1 = vadd.f32 %v3516_v42, %v3480_v61  ;;  %v14045_v42 = vld [vmem:[#allocation7_spill] sm:$0xff]  ;;  %v14050_v61 = vld [vmem:[#allocation16_spill] sm:$0xff] }
 0x660   :  { %10488 = vtanh.f32 %v3517_v1 }
 0x666   :  { %v10489_v35 = vpop.eup %10488 }
 0x667   :  { %3520 = vst [vmem:[#allocation2 + $0x9] sm:$0x1] %v10489_v35  ;;  %v3555_v63 = vand.u32 4294901760, %v10489_v35 }
 0x669   :  { %3661 = vmatmul.f32.vlgmr.msrb.gmra.mxu1 %v3555_v63  ;;  %v3556_v55 = vsub.f32 %v10489_v35, %v3555_v63  ;;  %v14044_v35 = vld [vmem:[#allocation19_spill] sm:$0xff] }
 0x66a   :  { %4065 = vmatpush.msrb.mxu1 %v10601_v3 }
 0x66b   :  { %3715 = vmatmul.f32.vlgmr.msrb.gmra.mxu2 %v3556_v55  ;;  %v3557_v21 = vand.u32 4294901760, %v3556_v55 }
 0x66c   :  { %4067 = vmatpush.msrb.mxu1 %v10603_v4  ;;  %4106 = vmatpush.msrb.mxu2 %v10636_v22 }
 0x66d   :  { %3754 = vmatmul.f32.vlgmr.msrb.gmra.mxu3 %v3557_v21  ;;  %v3558_v2 = vsub.f32 %v3556_v55, %v3557_v21  ;;  %v14041_v21 = vld [vmem:[#allocation17_spill] sm:$0xff]  ;;  %v14042_v55 = vld [vmem:[#allocation6_spill] sm:$0xff] }
 0x66e   :  { %4069 = vmatpush.msrb.mxu1 %v10605_v5  ;;  %4173 = vmatpush.msrb.mxu3 %v10601_v3 }
 0x66f   :  { %v3559_v1 = vand.u32 4294901760, %v3558_v2  ;;  %4110 = vmatpush.msrb.mxu2 %v10639_v23  ;;  %v14056_v2 = vld [vmem:[#allocation25_spill] sm:$0xff] }
 0x670   :  { %4071 = vmatpush.msrb.mxu1 %v10607_v9  ;;  %4175 = vmatpush.msrb.mxu3 %v10603_v4 }
 0x671   :  { %3560 = vmatmul.f32.vlgmr.msrb.gmra.mxu0 %v3559_v1  ;;  %3860 = vmatmul.f32.vlgmr.msra.gmra.mxu1 %v3555_v63  ;;  %v14057_v1 = vld [vmem:[#allocation26_spill] sm:$0xff] }
 0x672   :  { %4012 = vmatpush.msrb.mxu0 %v10615_v14  ;;  %4073 = vmatpush.msrb.mxu1 %v10609_v10 }
 0x673   :  { %4177 = vmatpush.msrb.mxu3 %v10605_v5  ;;  %4114 = vmatpush.msrb.mxu2 %v10642_v24 }
 0x674   :  { %4015 = vmatpush.msrb.mxu0 %v10618_v15  ;;  %4075 = vmatpush.msrb.mxu1 %v10611_v11 }
 0x675   :  { %4179 = vmatpush.msrb.mxu3 %v10607_v9  ;;  %4118 = vmatpush.msrb.mxu2 %v10649_v26 }
 0x676   :  { %4018 = vmatpush.msrb.mxu0 %v10621_v16  ;;  %4077 = vmatpush.msrb.mxu1 %v10623_v17 }
 0x677   :  { %4181 = vmatpush.msrb.mxu3 %v10609_v10  ;;  %4122 = vmatpush.msrb.mxu2 %v10652_v27 }
 0x678   :  { %4021 = vmatpush.msrb.mxu0 %v10627_v18  ;;  %4079 = vmatpush.msrb.mxu1 %v10632_v20 }
 0x679   :  { %3823 = vmatmul.f32.vlgmr.msra.gmra.mxu0 %v3555_v63  ;;  %4183 = vmatpush.msrb.mxu3 %v10611_v11  ;;  %v14043_v63 = vld [vmem:[#allocation22_spill] sm:$0xff] }
 0x67a   :  { %4024 = vmatpush.msrb.mxu0 %v10630_v19  ;;  %4081 = vmatpush.msrb.mxu1 %v10665_v32 }
 0x67b   :  { %4185 = vmatpush.msrb.mxu3 %v10623_v17  ;;  %4126 = vmatpush.msrb.mxu2 %v10680_v39 }
 0x67c   :  { %4027 = vmatpush.msrb.mxu0 %v10645_v25  ;;  %4083 = vmatpush.msrb.mxu1 %v10693_v44 }
 0x67d   :  { %4187 = vmatpush.msrb.mxu3 %v10632_v20  ;;  %4130 = vmatpush.msrb.mxu2 %v10686_v41 }
 0x67e   :  { %4030 = vmatpush.msrb.mxu0 %v10655_v28  ;;  %4085 = vmatpush.msrb.mxu1 %v10698_v46 }
 0x67f   :  { %4189 = vmatpush.msrb.mxu3 %v10665_v32  ;;  %4134 = vmatpush.msrb.mxu2 %v10701_v47 }
 0x680   :  { %4033 = vmatpush.msrb.mxu0 %v10669_v33  ;;  %4087 = vmatpush.msrb.mxu1 %v10714_v52 }
 0x681   :  { %4191 = vmatpush.msrb.mxu3 %v10693_v44  ;;  %4138 = vmatpush.msrb.mxu2 %v10725_v56 }
 0x682   :  { %4036 = vmatpush.msrb.mxu0 %v10696_v45  ;;  %4089 = vmatpush.msrb.mxu1 %v10730_v58 }
 0x683   :  { %4193 = vmatpush.msrb.mxu3 %v10698_v46  ;;  %4142 = vmatpush.msrb.mxu2 %v10741_v62 }
 0x684   :  { %4039 = vmatpush.msrb.mxu0 %v10712_v51  ;;  %4091 = vmatpush.msrb.mxu1 %v10746_v0 }
 0x685   :  { %4195 = vmatpush.msrb.mxu3 %v10714_v52  ;;  %4146 = vmatpush.msrb.mxu2 %v10757_v7 }
 0x686   :  { %4042 = vmatpush.msrb.mxu0 %v13874_v40  ;;  %4093 = vmatpush.msrb.mxu1 %v10762_v12 }
 0x687   :  { %4197 = vmatpush.msrb.mxu3 %v10730_v58  ;;  %4150 = vmatpush.msrb.mxu2 %v10773_v29 }
 0x688   :  { %4045 = vmatpush.msrb.mxu0 %v13875_v48  ;;  %4095 = vmatpush.msrb.mxu1 %v10778_v31 }
 0x689   :  { %4199 = vmatpush.msrb.mxu3 %v10746_v0  ;;  %4154 = vmatpush.msrb.mxu2 %v10789_v38 }
 0x68a   :  { %4048 = vmatpush.msrb.mxu0 %v13876_v6  ;;  %4259 = vmatpush.msra.mxu1 %v10672_v36 }
 0x68b   :  { %4201 = vmatpush.msrb.mxu3 %v10762_v12  ;;  %4158 = vmatpush.msrb.mxu2 %v10803_v50 }
 0x68c   :  { %4051 = vmatpush.msrb.mxu0 %v13877_v8  ;;  %4265 = vmatpush.msra.mxu1 %v10674_v37 }
 0x68d   :  { %4203 = vmatpush.msrb.mxu3 %v10778_v31  ;;  %4162 = vmatpush.msrb.mxu2 %v10817_v60 }
 0x68e   :  { %4054 = vmatpush.msrb.mxu0 %v14041_v21  ;;  %4271 = vmatpush.msra.mxu1 %v14042_v55 }
 0x68f   :  { %4166 = vmatpush.msrb.mxu2 %v14043_v63 }
 0x690   :  { %4057 = vmatpush.msrb.mxu0 %v14044_v35  ;;  %4277 = vmatpush.msra.mxu1 %v14045_v42 }
 0x692   :  { %4214 = vmatpush.msra.mxu0 %v10601_v3  ;;  %4283 = vmatpush.msra.mxu1 %v14046_v13 }
 0x694   :  { %4216 = vmatpush.msra.mxu0 %v10603_v4  ;;  %4289 = vmatpush.msra.mxu1 %v14047_v30 }
 0x696   :  { %4218 = vmatpush.msra.mxu0 %v10605_v5  ;;  %4295 = vmatpush.msra.mxu1 %v14048_v53 }
 0x698   :  { %4220 = vmatpush.msra.mxu0 %v10607_v9  ;;  %4301 = vmatpush.msra.mxu1 %v14049_v49 }
 0x69a   :  { %4222 = vmatpush.msra.mxu0 %v10609_v10  ;;  %4307 = vmatpush.msra.mxu1 %v14050_v61 }
 0x69c   :  { %4224 = vmatpush.msra.mxu0 %v10611_v11  ;;  %4313 = vmatpush.msra.mxu1 %v14051_v43 }
 0x69e   :  { %4226 = vmatpush.msra.mxu0 %v10623_v17  ;;  %4319 = vmatpush.msra.mxu1 %v14052_v59 }
 0x6a0   :  { %4228 = vmatpush.msra.mxu0 %v10632_v20  ;;  %4325 = vmatpush.msra.mxu1 %v14053_v57 }
 0x6a2   :  { %4230 = vmatpush.msra.mxu0 %v10665_v32  ;;  %4331 = vmatpush.msra.mxu1 %v14054_v54  ;;  %v14058_v54 = vld [vmem:[#allocation11_spill] sm:$0xff] }
 0x6a3   :  { %v3521_v57 = vrot.slane %v14058_v54, 2 }
 0x6a4   :  { %4232 = vmatpush.msra.mxu0 %v10693_v44  ;;  %4337 = vmatpush.msra.mxu1 %v14055_v34 }
 0x6a6   :  { %4234 = vmatpush.msra.mxu0 %v10698_v46  ;;  %4343 = vmatpush.msra.mxu1 %v14056_v2 }
 0x6a8   :  { %4236 = vmatpush.msra.mxu0 %v10714_v52  ;;  %4349 = vmatpush.msra.mxu1 %v14057_v1 }
 0x6aa   :  { %4238 = vmatpush.msra.mxu0 %v10730_v58 }
 0x6ac   :  { %4240 = vmatpush.msra.mxu0 %v10746_v0 }
 0x6ae   :  { %4242 = vmatpush.msra.mxu0 %v10762_v12 }
 0x6b0   :  { %4244 = vmatpush.msra.mxu0 %v10778_v31 }
 0x6e6   :  { %v3662_v59 = vpop.f32.mrf.mxu1 }
 0x6ee   :  { %v3561_v34 = vpop.f32.mrf.mxu0  ;;  %v3716_v49 = vpop.f32.mrf.mxu2 }
 0x6ef   :  { %v3562_v43 = vadd.f32 %v3561_v34, %v3521_v57  ;;  %v3861_v42 = vpop.f32.mrf.mxu1  ;;  %v14069_v57 = vld [vmem:[#allocation18_spill] sm:$0xff]  ;;  %v14071_v34 = vld [vmem:[#allocation21_spill] sm:$0xff] }
 0x6f0   :  { %v3755_v53 = vpop.f32.mrf.mxu3 }
 0x6f1   :  { %v3663_v61 = vadd.f32 %v3662_v59, %v3562_v43  ;;  %v14067_v43 = vld [vmem:[#allocation14_spill] sm:$0xff]  ;;  %v14068_v59 = vld [vmem:[#allocation16_spill] sm:$0xff] }
 0x6f3   :  { %v3717_v2 = vadd.f32 %v3716_v49, %v3663_v61  ;;  %v14065_v49 = vld [vmem:[#allocation10_spill] sm:$0xff]  ;;  %v14066_v61 = vld [vmem:[#allocation12_spill] sm:$0xff] }
 0x6f5   :  { %v3756_v30 = vadd.f32 %v3755_v53, %v3717_v2  ;;  %v14072_v2 = vld [vmem:[#allocation23_spill] sm:$0xff] }
 0x6f6   :  { %v3824_v13 = vpop.f32.mrf.mxu0 }
 0x6f7   :  { %v3825_v1 = vadd.f32 %v3824_v13, %v3756_v30  ;;  %v14063_v13 = vld [vmem:[#allocation7_spill] sm:$0xff]  ;;  %v14064_v30 = vld [vmem:[#allocation8_spill] sm:$0xff] }
 0x6f9   :  { %v3862_v35 = vadd.f32 %v3861_v42, %v3825_v1  ;;  %v14062_v42 = vld [vmem:[#allocation19_spill] sm:$0xff]  ;;  %v14073_v1 = vld [vmem:[#allocation24_spill] sm:$0xff] }
 0x6fb   :  { %10490 = vtanh.f32 %v3862_v35 }
 0x701   :  { %v10491_v63 = vpop.eup %10490 }
 0x702   :  { %3865 = vst [vmem:[#allocation2 + $0xa] sm:$0x1] %v10491_v63  ;;  %v3900_v55 = vand.u32 4294901760, %v10491_v63 }
 0x704   :  { %4006 = vmatmul.f32.vlgmr.msra.gmra.mxu3 %v3900_v55  ;;  %v3901_v21 = vsub.f32 %v10491_v63, %v3900_v55  ;;  %v14061_v63 = vld [vmem:[#allocation22_spill] sm:$0xff] }
 0x705   :  { %4410 = vmatpush.msra.mxu3 %v10601_v3 }
 0x706   :  { %4060 = vmatmul.f32.vlgmr.msrb.gmra.mxu0 %v3901_v21  ;;  %v3902_v54 = vand.u32 4294901760, %v3901_v21 }
 0x707   :  { %4412 = vmatpush.msra.mxu3 %v10603_v4  ;;  %4451 = vmatpush.msrb.mxu0 %v10636_v22 }
 0x708   :  { %4099 = vmatmul.f32.vlgmr.msrb.gmra.mxu1 %v3902_v54  ;;  %v3903_v53 = vsub.f32 %v3901_v21, %v3902_v54  ;;  %v14059_v21 = vld [vmem:[#allocation17_spill] sm:$0xff]  ;;  %v14070_v54 = vld [vmem:[#allocation20_spill] sm:$0xff] }
 0x709   :  { %4414 = vmatpush.msra.mxu3 %v10605_v5  ;;  %4518 = vmatpush.msrb.mxu1 %v10601_v3 }
 0x70a   :  { %v3904_v35 = vand.u32 4294901760, %v3903_v53  ;;  %4455 = vmatpush.msrb.mxu0 %v10639_v23  ;;  %v14074_v53 = vld [vmem:[#allocation25_spill] sm:$0xff] }
 0x70b   :  { %4416 = vmatpush.msra.mxu3 %v10607_v9  ;;  %4520 = vmatpush.msrb.mxu1 %v10603_v4 }
 0x70c   :  { %3905 = vmatmul.f32.vlgmr.msra.gmra.mxu2 %v3904_v35  ;;  %4205 = vmatmul.f32.vlgmr.msrb.gmra.mxu3 %v3900_v55  ;;  %v14075_v35 = vld [vmem:[#allocation26_spill] sm:$0xff] }
 0x70d   :  { %4357 = vmatpush.msra.mxu2 %v10615_v14  ;;  %4418 = vmatpush.msra.mxu3 %v10609_v10 }
 0x70e   :  { %4522 = vmatpush.msrb.mxu1 %v10605_v5  ;;  %4459 = vmatpush.msrb.mxu0 %v10642_v24 }
 0x70f   :  { %4360 = vmatpush.msra.mxu2 %v10618_v15  ;;  %4420 = vmatpush.msra.mxu3 %v10611_v11 }
 0x710   :  { %4524 = vmatpush.msrb.mxu1 %v10607_v9  ;;  %4463 = vmatpush.msrb.mxu0 %v10649_v26 }
 0x711   :  { %4363 = vmatpush.msra.mxu2 %v10621_v16  ;;  %4422 = vmatpush.msra.mxu3 %v10623_v17 }
 0x712   :  { %4526 = vmatpush.msrb.mxu1 %v10609_v10  ;;  %4467 = vmatpush.msrb.mxu0 %v10652_v27 }
 0x713   :  { %4366 = vmatpush.msra.mxu2 %v10627_v18  ;;  %4424 = vmatpush.msra.mxu3 %v10632_v20 }
 0x714   :  { %4168 = vmatmul.f32.vlgmr.msrb.gmra.mxu2 %v3900_v55  ;;  %4528 = vmatpush.msrb.mxu1 %v10611_v11  ;;  %v14060_v55 = vld [vmem:[#allocation6_spill] sm:$0xff] }
 0x715   :  { %4369 = vmatpush.msra.mxu2 %v10630_v19  ;;  %4426 = vmatpush.msra.mxu3 %v10665_v32 }
 0x716   :  { %4530 = vmatpush.msrb.mxu1 %v10623_v17  ;;  %4471 = vmatpush.msrb.mxu0 %v10680_v39 }
 0x717   :  { %4372 = vmatpush.msra.mxu2 %v10645_v25  ;;  %4428 = vmatpush.msra.mxu3 %v10693_v44 }
 0x718   :  { %4532 = vmatpush.msrb.mxu1 %v10632_v20  ;;  %4475 = vmatpush.msrb.mxu0 %v10686_v41 }
 0x719   :  { %4375 = vmatpush.msra.mxu2 %v10655_v28  ;;  %4430 = vmatpush.msra.mxu3 %v10698_v46 }
 0x71a   :  { %4534 = vmatpush.msrb.mxu1 %v10665_v32  ;;  %4479 = vmatpush.msrb.mxu0 %v10701_v47 }
 0x71b   :  { %4378 = vmatpush.msra.mxu2 %v10669_v33  ;;  %4432 = vmatpush.msra.mxu3 %v10714_v52 }
 0x71c   :  { %4536 = vmatpush.msrb.mxu1 %v10693_v44  ;;  %4483 = vmatpush.msrb.mxu0 %v10725_v56 }
 0x71d   :  { %4381 = vmatpush.msra.mxu2 %v10696_v45  ;;  %4434 = vmatpush.msra.mxu3 %v10730_v58 }
 0x71e   :  { %4538 = vmatpush.msrb.mxu1 %v10698_v46  ;;  %4487 = vmatpush.msrb.mxu0 %v10741_v62 }
 0x71f   :  { %4384 = vmatpush.msra.mxu2 %v10712_v51  ;;  %4436 = vmatpush.msra.mxu3 %v10746_v0 }
 0x720   :  { %4540 = vmatpush.msrb.mxu1 %v10714_v52  ;;  %4491 = vmatpush.msrb.mxu0 %v10757_v7 }
 0x721   :  { %4387 = vmatpush.msra.mxu2 %v13874_v40  ;;  %4438 = vmatpush.msra.mxu3 %v10762_v12 }
 0x722   :  { %4542 = vmatpush.msrb.mxu1 %v10730_v58  ;;  %4495 = vmatpush.msrb.mxu0 %v10773_v29 }
 0x723   :  { %4390 = vmatpush.msra.mxu2 %v13875_v48  ;;  %4440 = vmatpush.msra.mxu3 %v10778_v31 }
 0x724   :  { %4544 = vmatpush.msrb.mxu1 %v10746_v0  ;;  %4499 = vmatpush.msrb.mxu0 %v10789_v38 }
 0x725   :  { %4393 = vmatpush.msra.mxu2 %v13876_v6  ;;  %4604 = vmatpush.msrb.mxu3 %v10672_v36 }
 0x726   :  { %4546 = vmatpush.msrb.mxu1 %v10762_v12  ;;  %4503 = vmatpush.msrb.mxu0 %v10803_v50 }
 0x727   :  { %4396 = vmatpush.msra.mxu2 %v13877_v8  ;;  %4610 = vmatpush.msrb.mxu3 %v10674_v37 }
 0x728   :  { %4548 = vmatpush.msrb.mxu1 %v10778_v31  ;;  %4507 = vmatpush.msrb.mxu0 %v10817_v60 }
 0x729   :  { %4399 = vmatpush.msra.mxu2 %v14059_v21  ;;  %4616 = vmatpush.msrb.mxu3 %v14060_v55 }
 0x72a   :  { %4511 = vmatpush.msrb.mxu0 %v14061_v63 }
 0x72b   :  { %4402 = vmatpush.msra.mxu2 %v14062_v42  ;;  %4622 = vmatpush.msrb.mxu3 %v14063_v13 }
 0x72d   :  { %4559 = vmatpush.msrb.mxu2 %v10601_v3  ;;  %4628 = vmatpush.msrb.mxu3 %v14064_v30 }
 0x72f   :  { %4561 = vmatpush.msrb.mxu2 %v10603_v4  ;;  %4634 = vmatpush.msrb.mxu3 %v14065_v49 }
 0x731   :  { %4563 = vmatpush.msrb.mxu2 %v10605_v5  ;;  %4640 = vmatpush.msrb.mxu3 %v14066_v61 }
 0x733   :  { %4565 = vmatpush.msrb.mxu2 %v10607_v9  ;;  %4646 = vmatpush.msrb.mxu3 %v14067_v43 }
 0x735   :  { %4567 = vmatpush.msrb.mxu2 %v10609_v10  ;;  %4652 = vmatpush.msrb.mxu3 %v14068_v59 }
 0x737   :  { %4569 = vmatpush.msrb.mxu2 %v10611_v11  ;;  %4658 = vmatpush.msrb.mxu3 %v14069_v57 }
 0x739   :  { %4571 = vmatpush.msrb.mxu2 %v10623_v17  ;;  %4664 = vmatpush.msrb.mxu3 %v14070_v54 }
 0x73b   :  { %4573 = vmatpush.msrb.mxu2 %v10632_v20  ;;  %4670 = vmatpush.msrb.mxu3 %v14071_v34 }
 0x73d   :  { %4575 = vmatpush.msrb.mxu2 %v10665_v32  ;;  %4676 = vmatpush.msrb.mxu3 %v14072_v2  ;;  %v14076_v2 = vld [vmem:[#allocation11_spill] sm:$0xff] }
 0x73e   :  { %v3866_v34 = vrot.slane %v14076_v2, 3 }
 0x73f   :  { %4577 = vmatpush.msrb.mxu2 %v10693_v44  ;;  %4682 = vmatpush.msrb.mxu3 %v14073_v1 }
 0x741   :  { %4579 = vmatpush.msrb.mxu2 %v10698_v46  ;;  %4688 = vmatpush.msrb.mxu3 %v14074_v53 }
 0x743   :  { %4581 = vmatpush.msrb.mxu2 %v10714_v52  ;;  %4694 = vmatpush.msrb.mxu3 %v14075_v35 }
 0x745   :  { %4583 = vmatpush.msrb.mxu2 %v10730_v58 }
 0x747   :  { %4585 = vmatpush.msrb.mxu2 %v10746_v0 }
 0x749   :  { %4587 = vmatpush.msrb.mxu2 %v10762_v12 }
 0x74b   :  { %4589 = vmatpush.msrb.mxu2 %v10778_v31 }
 0x783   :  { %v4061_v43 = vpop.f32.mrf.mxu0 }
 0x785   :  { %v4100_v61 = vpop.f32.mrf.mxu1 }
 0x787   :  { %v4007_v54 = vpop.f32.mrf.mxu3 }
 0x78f   :  { %v3906_v1 = vpop.f32.mrf.mxu2  ;;  %v4206_v13 = vpop.f32.mrf.mxu3 }
 0x790   :  { %v3907_v57 = vadd.f32 %v3906_v1, %v3866_v34  ;;  %v14087_v34 = vld [vmem:[#allocation18_spill] sm:$0xff]  ;;  %v14089_v1 = vld [vmem:[#allocation21_spill] sm:$0xff] }
 0x792   :  { %v4008_v59 = vadd.f32 %v4007_v54, %v3907_v57  ;;  %v14085_v57 = vld [vmem:[#allocation14_spill] sm:$0xff]  ;;  %v14086_v54 = vld [vmem:[#allocation16_spill] sm:$0xff] }
 0x794   :  { %v4062_v53 = vadd.f32 %v4061_v43, %v4008_v59  ;;  %v14083_v43 = vld [vmem:[#allocation10_spill] sm:$0xff]  ;;  %v14084_v59 = vld [vmem:[#allocation12_spill] sm:$0xff] }
 0x796   :  { %v4101_v49 = vadd.f32 %v4100_v61, %v4062_v53  ;;  %v14090_v53 = vld [vmem:[#allocation23_spill] sm:$0xff] }
 0x797   :  { %v4169_v30 = vpop.f32.mrf.mxu2 }
 0x798   :  { %v4170_v35 = vadd.f32 %v4169_v30, %v4101_v49  ;;  %v14081_v30 = vld [vmem:[#allocation7_spill] sm:$0xff]  ;;  %v14082_v49 = vld [vmem:[#allocation8_spill] sm:$0xff] }
 0x79a   :  { %v4207_v42 = vadd.f32 %v4206_v13, %v4170_v35  ;;  %v14080_v13 = vld [vmem:[#allocation19_spill] sm:$0xff]  ;;  %v14091_v35 = vld [vmem:[#allocation24_spill] sm:$0xff] }
 0x79c   :  { %10492 = vtanh.f32 %v4207_v42 }
 0x7a2   :  { %v10493_v63 = vpop.eup %10492 }
 0x7a3   :  { %4210 = vst [vmem:[#allocation2 + $0xb] sm:$0x1] %v10493_v63  ;;  %v4245_v55 = vand.u32 4294901760, %v10493_v63 }
 0x7a5   :  { %4351 = vmatmul.f32.vlgmr.msra.gmra.mxu1 %v4245_v55  ;;  %v4246_v21 = vsub.f32 %v10493_v63, %v4245_v55  ;;  %v14079_v63 = vld [vmem:[#allocation22_spill] sm:$0xff] }
 0x7a6   :  { %4755 = vmatpush.msra.mxu1 %v10601_v3 }
 0x7a7   :  { %4405 = vmatmul.f32.vlgmr.msra.gmra.mxu2 %v4246_v21  ;;  %v4247_v2 = vand.u32 4294901760, %v4246_v21 }
 0x7a8   :  { %4757 = vmatpush.msra.mxu1 %v10603_v4  ;;  %4796 = vmatpush.msra.mxu2 %v10636_v22 }
 0x7a9   :  { %4444 = vmatmul.f32.vlgmr.msra.gmra.mxu3 %v4247_v2  ;;  %v4248_v61 = vsub.f32 %v4246_v21, %v4247_v2  ;;  %v14077_v21 = vld [vmem:[#allocation17_spill] sm:$0xff]  ;;  %v14088_v2 = vld [vmem:[#allocation20_spill] sm:$0xff] }
 0x7aa   :  { %4759 = vmatpush.msra.mxu1 %v10605_v5  ;;  %4863 = vmatpush.msra.mxu3 %v10601_v3 }
 0x7ab   :  { %v4249_v42 = vand.u32 4294901760, %v4248_v61  ;;  %4800 = vmatpush.msra.mxu2 %v10639_v23  ;;  %v14092_v61 = vld [vmem:[#allocation25_spill] sm:$0xff] }
 0x7ac   :  { %4761 = vmatpush.msra.mxu1 %v10607_v9  ;;  %4865 = vmatpush.msra.mxu3 %v10603_v4 }
 0x7ad   :  { %4250 = vmatmul.f32.vlgmr.msra.gmra.mxu0 %v4249_v42  ;;  %4550 = vmatmul.f32.vlgmr.msrb.gmra.mxu1 %v4245_v55  ;;  %v14093_v42 = vld [vmem:[#allocation26_spill] sm:$0xff] }
 0x7ae   :  { %4702 = vmatpush.msra.mxu0 %v10615_v14  ;;  %4763 = vmatpush.msra.mxu1 %v10609_v10 }
 0x7af   :  { %4867 = vmatpush.msra.mxu3 %v10605_v5  ;;  %4804 = vmatpush.msra.mxu2 %v10642_v24 }
 0x7b0   :  { %4705 = vmatpush.msra.mxu0 %v10618_v15  ;;  %4765 = vmatpush.msra.mxu1 %v10611_v11 }
 0x7b1   :  { %4869 = vmatpush.msra.mxu3 %v10607_v9  ;;  %4808 = vmatpush.msra.mxu2 %v10649_v26 }
 0x7b2   :  { %4708 = vmatpush.msra.mxu0 %v10621_v16  ;;  %4767 = vmatpush.msra.mxu1 %v10623_v17 }
 0x7b3   :  { %4871 = vmatpush.msra.mxu3 %v10609_v10  ;;  %4812 = vmatpush.msra.mxu2 %v10652_v27 }
 0x7b4   :  { %4711 = vmatpush.msra.mxu0 %v10627_v18  ;;  %4769 = vmatpush.msra.mxu1 %v10632_v20 }
 0x7b5   :  { %4513 = vmatmul.f32.vlgmr.msrb.gmra.mxu0 %v4245_v55  ;;  %4873 = vmatpush.msra.mxu3 %v10611_v11  ;;  %v14078_v55 = vld [vmem:[#allocation6_spill] sm:$0xff] }
 0x7b6   :  { %4714 = vmatpush.msra.mxu0 %v10630_v19  ;;  %4771 = vmatpush.msra.mxu1 %v10665_v32 }
 0x7b7   :  { %4875 = vmatpush.msra.mxu3 %v10623_v17  ;;  %4816 = vmatpush.msra.mxu2 %v10680_v39 }
 0x7b8   :  { %4717 = vmatpush.msra.mxu0 %v10645_v25  ;;  %4773 = vmatpush.msra.mxu1 %v10693_v44 }
 0x7b9   :  { %4877 = vmatpush.msra.mxu3 %v10632_v20  ;;  %4820 = vmatpush.msra.mxu2 %v10686_v41 }
 0x7ba   :  { %4720 = vmatpush.msra.mxu0 %v10655_v28  ;;  %4775 = vmatpush.msra.mxu1 %v10698_v46 }
 0x7bb   :  { %4879 = vmatpush.msra.mxu3 %v10665_v32  ;;  %4824 = vmatpush.msra.mxu2 %v10701_v47 }
 0x7bc   :  { %4723 = vmatpush.msra.mxu0 %v10669_v33  ;;  %4777 = vmatpush.msra.mxu1 %v10714_v52 }
 0x7bd   :  { %4881 = vmatpush.msra.mxu3 %v10693_v44  ;;  %4828 = vmatpush.msra.mxu2 %v10725_v56 }
 0x7be   :  { %4726 = vmatpush.msra.mxu0 %v10696_v45  ;;  %4779 = vmatpush.msra.mxu1 %v10730_v58 }
 0x7bf   :  { %4883 = vmatpush.msra.mxu3 %v10698_v46  ;;  %4832 = vmatpush.msra.mxu2 %v10741_v62 }
 0x7c0   :  { %4729 = vmatpush.msra.mxu0 %v10712_v51  ;;  %4781 = vmatpush.msra.mxu1 %v10746_v0 }
 0x7c1   :  { %4885 = vmatpush.msra.mxu3 %v10714_v52  ;;  %4836 = vmatpush.msra.mxu2 %v10757_v7 }
 0x7c2   :  { %4732 = vmatpush.msra.mxu0 %v13874_v40  ;;  %4783 = vmatpush.msra.mxu1 %v10762_v12 }
 0x7c3   :  { %4887 = vmatpush.msra.mxu3 %v10730_v58  ;;  %4840 = vmatpush.msra.mxu2 %v10773_v29 }
 0x7c4   :  { %4735 = vmatpush.msra.mxu0 %v13875_v48  ;;  %4785 = vmatpush.msra.mxu1 %v10778_v31 }
 0x7c5   :  { %4889 = vmatpush.msra.mxu3 %v10746_v0  ;;  %4844 = vmatpush.msra.mxu2 %v10789_v38 }
 0x7c6   :  { %4738 = vmatpush.msra.mxu0 %v13876_v6  ;;  %4949 = vmatpush.msrb.mxu1 %v10672_v36 }
 0x7c7   :  { %4891 = vmatpush.msra.mxu3 %v10762_v12  ;;  %4848 = vmatpush.msra.mxu2 %v10803_v50 }
 0x7c8   :  { %4741 = vmatpush.msra.mxu0 %v13877_v8  ;;  %4955 = vmatpush.msrb.mxu1 %v10674_v37 }
 0x7c9   :  { %4893 = vmatpush.msra.mxu3 %v10778_v31  ;;  %4852 = vmatpush.msra.mxu2 %v10817_v60 }
 0x7ca   :  { %4744 = vmatpush.msra.mxu0 %v14077_v21  ;;  %4961 = vmatpush.msrb.mxu1 %v14078_v55 }
 0x7cb   :  { %4856 = vmatpush.msra.mxu2 %v14079_v63 }
 0x7cc   :  { %4747 = vmatpush.msra.mxu0 %v14080_v13  ;;  %4967 = vmatpush.msrb.mxu1 %v14081_v30 }
 0x7ce   :  { %4904 = vmatpush.msrb.mxu0 %v10601_v3  ;;  %4973 = vmatpush.msrb.mxu1 %v14082_v49 }
 0x7d0   :  { %4906 = vmatpush.msrb.mxu0 %v10603_v4  ;;  %4979 = vmatpush.msrb.mxu1 %v14083_v43 }
 0x7d2   :  { %4908 = vmatpush.msrb.mxu0 %v10605_v5  ;;  %4985 = vmatpush.msrb.mxu1 %v14084_v59 }
 0x7d4   :  { %4910 = vmatpush.msrb.mxu0 %v10607_v9  ;;  %4991 = vmatpush.msrb.mxu1 %v14085_v57 }
 0x7d6   :  { %4912 = vmatpush.msrb.mxu0 %v10609_v10  ;;  %4997 = vmatpush.msrb.mxu1 %v14086_v54 }
 0x7d8   :  { %4914 = vmatpush.msrb.mxu0 %v10611_v11  ;;  %5003 = vmatpush.msrb.mxu1 %v14087_v34 }
 0x7da   :  { %4916 = vmatpush.msrb.mxu0 %v10623_v17  ;;  %5009 = vmatpush.msrb.mxu1 %v14088_v2 }
 0x7dc   :  { %4918 = vmatpush.msrb.mxu0 %v10632_v20  ;;  %5015 = vmatpush.msrb.mxu1 %v14089_v1 }
 0x7de   :  { %4920 = vmatpush.msrb.mxu0 %v10665_v32  ;;  %5021 = vmatpush.msrb.mxu1 %v14090_v53  ;;  %v14094_v53 = vld [vmem:[#allocation11_spill] sm:$0xff] }
 0x7df   :  { %v4211_v1 = vrot.slane %v14094_v53, 4 }
 0x7e0   :  { %4922 = vmatpush.msrb.mxu0 %v10693_v44  ;;  %5027 = vmatpush.msrb.mxu1 %v14091_v35 }
 0x7e2   :  { %4924 = vmatpush.msrb.mxu0 %v10698_v46  ;;  %5033 = vmatpush.msrb.mxu1 %v14092_v61 }
 0x7e4   :  { %4926 = vmatpush.msrb.mxu0 %v10714_v52  ;;  %5039 = vmatpush.msrb.mxu1 %v14093_v42 }
 0x7e6   :  { %4928 = vmatpush.msrb.mxu0 %v10730_v58 }
 0x7e8   :  { %4930 = vmatpush.msrb.mxu0 %v10746_v0 }
 0x7ea   :  { %4932 = vmatpush.msrb.mxu0 %v10762_v12 }
 0x7ec   :  { %4934 = vmatpush.msrb.mxu0 %v10778_v31 }
 0x822   :  { %v4352_v2 = vpop.f32.mrf.mxu1 }
 0x82a   :  { %v4251_v35 = vpop.f32.mrf.mxu0  ;;  %v4406_v57 = vpop.f32.mrf.mxu2 }
 0x82b   :  { %v4252_v34 = vadd.f32 %v4251_v35, %v4211_v1  ;;  %v4551_v30 = vpop.f32.mrf.mxu1  ;;  %v14105_v1 = vld [vmem:[#allocation18_spill] sm:$0xff]  ;;  %v14107_v35 = vld [vmem:[#allocation21_spill] sm:$0xff] }
 0x82c   :  { %v4445_v59 = vpop.f32.mrf.mxu3 }
 0x82d   :  { %v4353_v54 = vadd.f32 %v4352_v2, %v4252_v34  ;;  %v14103_v34 = vld [vmem:[#allocation14_spill] sm:$0xff]  ;;  %v14104_v2 = vld [vmem:[#allocation16_spill] sm:$0xff] }
 0x82f   :  { %v4407_v61 = vadd.f32 %v4406_v57, %v4353_v54  ;;  %v14101_v57 = vld [vmem:[#allocation10_spill] sm:$0xff]  ;;  %v14102_v54 = vld [vmem:[#allocation12_spill] sm:$0xff] }
 0x831   :  { %v4446_v43 = vadd.f32 %v4445_v59, %v4407_v61  ;;  %v14108_v61 = vld [vmem:[#allocation23_spill] sm:$0xff] }
 0x832   :  { %v4514_v49 = vpop.f32.mrf.mxu0 }
 0x833   :  { %v4515_v42 = vadd.f32 %v4514_v49, %v4446_v43  ;;  %v14099_v49 = vld [vmem:[#allocation7_spill] sm:$0xff]  ;;  %v14100_v43 = vld [vmem:[#allocation8_spill] sm:$0xff] }
 0x835   :  { %v4552_v13 = vadd.f32 %v4551_v30, %v4515_v42  ;;  %v14098_v30 = vld [vmem:[#allocation19_spill] sm:$0xff]  ;;  %v14109_v42 = vld [vmem:[#allocation24_spill] sm:$0xff] }
 0x837   :  { %10494 = vtanh.f32 %v4552_v13 }
 0x83d   :  { %v10495_v63 = vpop.eup %10494 }
 0x83e   :  { %4555 = vst [vmem:[#allocation2 + $0xc] sm:$0x1] %v10495_v63  ;;  %v4590_v55 = vand.u32 4294901760, %v10495_v63 }
 0x840   :  { %4696 = vmatmul.f32.vlgmr.msrb.gmra.mxu3 %v4590_v55  ;;  %v4591_v21 = vsub.f32 %v10495_v63, %v4590_v55  ;;  %v14097_v63 = vld [vmem:[#allocation22_spill] sm:$0xff] }
 0x841   :  { %5100 = vmatpush.msrb.mxu3 %v10601_v3 }
 0x842   :  { %4750 = vmatmul.f32.vlgmr.msra.gmra.mxu0 %v4591_v21  ;;  %v4592_v53 = vand.u32 4294901760, %v4591_v21 }
 0x843   :  { %5102 = vmatpush.msrb.mxu3 %v10603_v4  ;;  %5141 = vmatpush.msra.mxu0 %v10636_v22 }
 0x844   :  { %4789 = vmatmul.f32.vlgmr.msra.gmra.mxu1 %v4592_v53  ;;  %v4593_v59 = vsub.f32 %v4591_v21, %v4592_v53  ;;  %v14095_v21 = vld [vmem:[#allocation17_spill] sm:$0xff]  ;;  %v14106_v53 = vld [vmem:[#allocation20_spill] sm:$0xff] }
 0x845   :  { %5104 = vmatpush.msrb.mxu3 %v10605_v5  ;;  %5208 = vmatpush.msra.mxu1 %v10601_v3 }
 0x846   :  { %v4594_v13 = vand.u32 4294901760, %v4593_v59  ;;  %5145 = vmatpush.msra.mxu0 %v10639_v23  ;;  %v14110_v59 = vld [vmem:[#allocation25_spill] sm:$0xff] }
 0x847   :  { %5106 = vmatpush.msrb.mxu3 %v10607_v9  ;;  %5210 = vmatpush.msra.mxu1 %v10603_v4 }
 0x848   :  { %4595 = vmatmul.f32.vlgmr.msrb.gmra.mxu2 %v4594_v13  ;;  %4895 = vmatmul.f32.vlgmr.msra.gmra.mxu3 %v4590_v55  ;;  %v14111_v13 = vld [vmem:[#allocation26_spill] sm:$0xff] }
 0x849   :  { %5047 = vmatpush.msrb.mxu2 %v10615_v14  ;;  %5108 = vmatpush.msrb.mxu3 %v10609_v10 }
 0x84a   :  { %5212 = vmatpush.msra.mxu1 %v10605_v5  ;;  %5149 = vmatpush.msra.mxu0 %v10642_v24 }
 0x84b   :  { %5050 = vmatpush.msrb.mxu2 %v10618_v15  ;;  %5110 = vmatpush.msrb.mxu3 %v10611_v11 }
 0x84c   :  { %5214 = vmatpush.msra.mxu1 %v10607_v9  ;;  %5153 = vmatpush.msra.mxu0 %v10649_v26 }
 0x84d   :  { %5053 = vmatpush.msrb.mxu2 %v10621_v16  ;;  %5112 = vmatpush.msrb.mxu3 %v10623_v17 }
 0x84e   :  { %5216 = vmatpush.msra.mxu1 %v10609_v10  ;;  %5157 = vmatpush.msra.mxu0 %v10652_v27 }
 0x84f   :  { %5056 = vmatpush.msrb.mxu2 %v10627_v18  ;;  %5114 = vmatpush.msrb.mxu3 %v10632_v20 }
 0x850   :  { %4858 = vmatmul.f32.vlgmr.msra.gmra.mxu2 %v4590_v55  ;;  %5218 = vmatpush.msra.mxu1 %v10611_v11  ;;  %v14096_v55 = vld [vmem:[#allocation6_spill] sm:$0xff] }
 0x851   :  { %5059 = vmatpush.msrb.mxu2 %v10630_v19  ;;  %5116 = vmatpush.msrb.mxu3 %v10665_v32 }
 0x852   :  { %5220 = vmatpush.msra.mxu1 %v10623_v17  ;;  %5161 = vmatpush.msra.mxu0 %v10680_v39 }
 0x853   :  { %5062 = vmatpush.msrb.mxu2 %v10645_v25  ;;  %5118 = vmatpush.msrb.mxu3 %v10693_v44 }
 0x854   :  { %5222 = vmatpush.msra.mxu1 %v10632_v20  ;;  %5165 = vmatpush.msra.mxu0 %v10686_v41 }
 0x855   :  { %5065 = vmatpush.msrb.mxu2 %v10655_v28  ;;  %5120 = vmatpush.msrb.mxu3 %v10698_v46 }
 0x856   :  { %5224 = vmatpush.msra.mxu1 %v10665_v32  ;;  %5169 = vmatpush.msra.mxu0 %v10701_v47 }
 0x857   :  { %5068 = vmatpush.msrb.mxu2 %v10669_v33  ;;  %5122 = vmatpush.msrb.mxu3 %v10714_v52 }
 0x858   :  { %5226 = vmatpush.msra.mxu1 %v10693_v44  ;;  %5173 = vmatpush.msra.mxu0 %v10725_v56 }
 0x859   :  { %5071 = vmatpush.msrb.mxu2 %v10696_v45  ;;  %5124 = vmatpush.msrb.mxu3 %v10730_v58 }
 0x85a   :  { %5228 = vmatpush.msra.mxu1 %v10698_v46  ;;  %5177 = vmatpush.msra.mxu0 %v10741_v62 }
 0x85b   :  { %5074 = vmatpush.msrb.mxu2 %v10712_v51  ;;  %5126 = vmatpush.msrb.mxu3 %v10746_v0 }
 0x85c   :  { %5230 = vmatpush.msra.mxu1 %v10714_v52  ;;  %5181 = vmatpush.msra.mxu0 %v10757_v7 }
 0x85d   :  { %5077 = vmatpush.msrb.mxu2 %v13874_v40  ;;  %5128 = vmatpush.msrb.mxu3 %v10762_v12 }
 0x85e   :  { %5232 = vmatpush.msra.mxu1 %v10730_v58  ;;  %5185 = vmatpush.msra.mxu0 %v10773_v29 }
 0x85f   :  { %5080 = vmatpush.msrb.mxu2 %v13875_v48  ;;  %5130 = vmatpush.msrb.mxu3 %v10778_v31 }
 0x860   :  { %5234 = vmatpush.msra.mxu1 %v10746_v0  ;;  %5189 = vmatpush.msra.mxu0 %v10789_v38 }
 0x861   :  { %5083 = vmatpush.msrb.mxu2 %v13876_v6  ;;  %5294 = vmatpush.msra.mxu3 %v10672_v36 }
 0x862   :  { %5236 = vmatpush.msra.mxu1 %v10762_v12  ;;  %5193 = vmatpush.msra.mxu0 %v10803_v50 }
 0x863   :  { %5086 = vmatpush.msrb.mxu2 %v13877_v8  ;;  %5300 = vmatpush.msra.mxu3 %v10674_v37 }
 0x864   :  { %5238 = vmatpush.msra.mxu1 %v10778_v31  ;;  %5197 = vmatpush.msra.mxu0 %v10817_v60 }
 0x865   :  { %5089 = vmatpush.msrb.mxu2 %v14095_v21  ;;  %5306 = vmatpush.msra.mxu3 %v14096_v55 }
 0x866   :  { %5201 = vmatpush.msra.mxu0 %v14097_v63 }
 0x867   :  { %5092 = vmatpush.msrb.mxu2 %v14098_v30  ;;  %5312 = vmatpush.msra.mxu3 %v14099_v49 }
 0x869   :  { %5249 = vmatpush.msra.mxu2 %v10601_v3  ;;  %5318 = vmatpush.msra.mxu3 %v14100_v43 }
 0x86b   :  { %5251 = vmatpush.msra.mxu2 %v10603_v4  ;;  %5324 = vmatpush.msra.mxu3 %v14101_v57 }
 0x86d   :  { %5253 = vmatpush.msra.mxu2 %v10605_v5  ;;  %5330 = vmatpush.msra.mxu3 %v14102_v54 }
 0x86f   :  { %5255 = vmatpush.msra.mxu2 %v10607_v9  ;;  %5336 = vmatpush.msra.mxu3 %v14103_v34 }
 0x871   :  { %5257 = vmatpush.msra.mxu2 %v10609_v10  ;;  %5342 = vmatpush.msra.mxu3 %v14104_v2 }
 0x873   :  { %5259 = vmatpush.msra.mxu2 %v10611_v11  ;;  %5348 = vmatpush.msra.mxu3 %v14105_v1 }
 0x875   :  { %5261 = vmatpush.msra.mxu2 %v10623_v17  ;;  %5354 = vmatpush.msra.mxu3 %v14106_v53 }
 0x877   :  { %5263 = vmatpush.msra.mxu2 %v10632_v20  ;;  %5360 = vmatpush.msra.mxu3 %v14107_v35 }
 0x879   :  { %5265 = vmatpush.msra.mxu2 %v10665_v32  ;;  %5366 = vmatpush.msra.mxu3 %v14108_v61  ;;  %v14112_v61 = vld [vmem:[#allocation11_spill] sm:$0xff] }
 0x87a   :  { %v4556_v35 = vrot.slane %v14112_v61, 5 }
 0x87b   :  { %5267 = vmatpush.msra.mxu2 %v10693_v44  ;;  %5372 = vmatpush.msra.mxu3 %v14109_v42 }
 0x87d   :  { %5269 = vmatpush.msra.mxu2 %v10698_v46  ;;  %5378 = vmatpush.msra.mxu3 %v14110_v59 }
 0x87f   :  { %5271 = vmatpush.msra.mxu2 %v10714_v52  ;;  %5384 = vmatpush.msra.mxu3 %v14111_v13 }
 0x881   :  { %5273 = vmatpush.msra.mxu2 %v10730_v58 }
 0x883   :  { %5275 = vmatpush.msra.mxu2 %v10746_v0 }
 0x885   :  { %5277 = vmatpush.msra.mxu2 %v10762_v12 }
 0x887   :  { %5279 = vmatpush.msra.mxu2 %v10778_v31 }
 0x8bf   :  { %v4751_v34 = vpop.f32.mrf.mxu0 }
 0x8c1   :  { %v4790_v54 = vpop.f32.mrf.mxu1 }
 0x8c3   :  { %v4697_v53 = vpop.f32.mrf.mxu3 }
 0x8cb   :  { %v4596_v42 = vpop.f32.mrf.mxu2  ;;  %v4896_v49 = vpop.f32.mrf.mxu3 }
 0x8cc   :  { %v4597_v1 = vadd.f32 %v4596_v42, %v4556_v35  ;;  %v14123_v35 = vld [vmem:[#allocation18_spill] sm:$0xff]  ;;  %v14125_v42 = vld [vmem:[#allocation21_spill] sm:$0xff] }
 0x8ce   :  { %v4698_v2 = vadd.f32 %v4697_v53, %v4597_v1  ;;  %v14121_v1 = vld [vmem:[#allocation14_spill] sm:$0xff]  ;;  %v14122_v53 = vld [vmem:[#allocation16_spill] sm:$0xff] }
 0x8d0   :  { %v4752_v59 = vadd.f32 %v4751_v34, %v4698_v2  ;;  %v14119_v34 = vld [vmem:[#allocation10_spill] sm:$0xff]  ;;  %v14120_v2 = vld [vmem:[#allocation12_spill] sm:$0xff] }
 0x8d2   :  { %v4791_v57 = vadd.f32 %v4790_v54, %v4752_v59  ;;  %v14126_v59 = vld [vmem:[#allocation23_spill] sm:$0xff] }
 0x8d3   :  { %v4859_v43 = vpop.f32.mrf.mxu2 }
 0x8d4   :  { %v4860_v13 = vadd.f32 %v4859_v43, %v4791_v57  ;;  %v14117_v43 = vld [vmem:[#allocation7_spill] sm:$0xff]  ;;  %v14118_v57 = vld [vmem:[#allocation8_spill] sm:$0xff] }
 0x8d6   :  { %v4897_v30 = vadd.f32 %v4896_v49, %v4860_v13  ;;  %v14116_v49 = vld [vmem:[#allocation19_spill] sm:$0xff]  ;;  %v14127_v13 = vld [vmem:[#allocation24_spill] sm:$0xff] }
 0x8d8   :  { %10496 = vtanh.f32 %v4897_v30 }
 0x8de   :  { %v10497_v63 = vpop.eup %10496 }
 0x8df   :  { %4900 = vst [vmem:[#allocation2 + $0xd] sm:$0x1] %v10497_v63  ;;  %v4935_v55 = vand.u32 4294901760, %v10497_v63 }
 0x8e1   :  { %5041 = vmatmul.f32.vlgmr.msrb.gmra.mxu1 %v4935_v55  ;;  %v4936_v21 = vsub.f32 %v10497_v63, %v4935_v55  ;;  %v14115_v63 = vld [vmem:[#allocation22_spill] sm:$0xff] }
 0x8e2   :  { %5445 = vmatpush.msrb.mxu1 %v10601_v3 }
 0x8e3   :  { %5095 = vmatmul.f32.vlgmr.msrb.gmra.mxu2 %v4936_v21  ;;  %v4937_v61 = vand.u32 4294901760, %v4936_v21 }
 0x8e4   :  { %5447 = vmatpush.msrb.mxu1 %v10603_v4  ;;  %5486 = vmatpush.msrb.mxu2 %v10636_v22 }
 0x8e5   :  { %5134 = vmatmul.f32.vlgmr.msrb.gmra.mxu3 %v4937_v61  ;;  %v4938_v54 = vsub.f32 %v4936_v21, %v4937_v61  ;;  %v14113_v21 = vld [vmem:[#allocation17_spill] sm:$0xff]  ;;  %v14124_v61 = vld [vmem:[#allocation20_spill] sm:$0xff] }
 0x8e6   :  { %5449 = vmatpush.msrb.mxu1 %v10605_v5  ;;  %5553 = vmatpush.msrb.mxu3 %v10601_v3 }
 0x8e7   :  { %v4939_v30 = vand.u32 4294901760, %v4938_v54  ;;  %5490 = vmatpush.msrb.mxu2 %v10639_v23  ;;  %v14128_v54 = vld [vmem:[#allocation25_spill] sm:$0xff] }
 0x8e8   :  { %5451 = vmatpush.msrb.mxu1 %v10607_v9  ;;  %5555 = vmatpush.msrb.mxu3 %v10603_v4 }
 0x8e9   :  { %4940 = vmatmul.f32.vlgmr.msrb.gmra.mxu0 %v4939_v30  ;;  %5240 = vmatmul.f32.vlgmr.msra.gmra.mxu1 %v4935_v55  ;;  %v14129_v30 = vld [vmem:[#allocation26_spill] sm:$0xff] }
 0x8ea   :  { %5392 = vmatpush.msrb.mxu0 %v10615_v14  ;;  %5453 = vmatpush.msrb.mxu1 %v10609_v10 }
 0x8eb   :  { %5557 = vmatpush.msrb.mxu3 %v10605_v5  ;;  %5494 = vmatpush.msrb.mxu2 %v10642_v24 }
 0x8ec   :  { %5395 = vmatpush.msrb.mxu0 %v10618_v15  ;;  %5455 = vmatpush.msrb.mxu1 %v10611_v11 }
 0x8ed   :  { %5559 = vmatpush.msrb.mxu3 %v10607_v9  ;;  %5498 = vmatpush.msrb.mxu2 %v10649_v26 }
 0x8ee   :  { %5398 = vmatpush.msrb.mxu0 %v10621_v16  ;;  %5457 = vmatpush.msrb.mxu1 %v10623_v17 }
 0x8ef   :  { %5561 = vmatpush.msrb.mxu3 %v10609_v10  ;;  %5502 = vmatpush.msrb.mxu2 %v10652_v27 }
 0x8f0   :  { %5401 = vmatpush.msrb.mxu0 %v10627_v18  ;;  %5459 = vmatpush.msrb.mxu1 %v10632_v20 }
 0x8f1   :  { %5203 = vmatmul.f32.vlgmr.msra.gmra.mxu0 %v4935_v55  ;;  %5563 = vmatpush.msrb.mxu3 %v10611_v11  ;;  %v14114_v55 = vld [vmem:[#allocation6_spill] sm:$0xff] }
 0x8f2   :  { %5404 = vmatpush.msrb.mxu0 %v10630_v19  ;;  %5461 = vmatpush.msrb.mxu1 %v10665_v32 }
 0x8f3   :  { %5565 = vmatpush.msrb.mxu3 %v10623_v17  ;;  %5506 = vmatpush.msrb.mxu2 %v10680_v39 }
 0x8f4   :  { %5407 = vmatpush.msrb.mxu0 %v10645_v25  ;;  %5463 = vmatpush.msrb.mxu1 %v10693_v44 }
 0x8f5   :  { %5567 = vmatpush.msrb.mxu3 %v10632_v20  ;;  %5510 = vmatpush.msrb.mxu2 %v10686_v41 }
 0x8f6   :  { %5410 = vmatpush.msrb.mxu0 %v10655_v28  ;;  %5465 = vmatpush.msrb.mxu1 %v10698_v46 }
 0x8f7   :  { %5569 = vmatpush.msrb.mxu3 %v10665_v32  ;;  %5514 = vmatpush.msrb.mxu2 %v10701_v47 }
 0x8f8   :  { %5413 = vmatpush.msrb.mxu0 %v10669_v33  ;;  %5467 = vmatpush.msrb.mxu1 %v10714_v52 }
 0x8f9   :  { %5571 = vmatpush.msrb.mxu3 %v10693_v44  ;;  %5518 = vmatpush.msrb.mxu2 %v10725_v56 }
 0x8fa   :  { %5416 = vmatpush.msrb.mxu0 %v10696_v45  ;;  %5469 = vmatpush.msrb.mxu1 %v10730_v58 }
 0x8fb   :  { %5573 = vmatpush.msrb.mxu3 %v10698_v46  ;;  %5522 = vmatpush.msrb.mxu2 %v10741_v62 }
 0x8fc   :  { %5419 = vmatpush.msrb.mxu0 %v10712_v51  ;;  %5471 = vmatpush.msrb.mxu1 %v10746_v0 }
 0x8fd   :  { %5575 = vmatpush.msrb.mxu3 %v10714_v52  ;;  %5526 = vmatpush.msrb.mxu2 %v10757_v7 }
 0x8fe   :  { %5422 = vmatpush.msrb.mxu0 %v13874_v40  ;;  %5473 = vmatpush.msrb.mxu1 %v10762_v12 }
 0x8ff   :  { %5577 = vmatpush.msrb.mxu3 %v10730_v58  ;;  %5530 = vmatpush.msrb.mxu2 %v10773_v29 }
 0x900   :  { %5425 = vmatpush.msrb.mxu0 %v13875_v48  ;;  %5475 = vmatpush.msrb.mxu1 %v10778_v31 }
 0x901   :  { %5579 = vmatpush.msrb.mxu3 %v10746_v0  ;;  %5534 = vmatpush.msrb.mxu2 %v10789_v38 }
 0x902   :  { %5428 = vmatpush.msrb.mxu0 %v13876_v6  ;;  %5637 = vmatpush.msra.mxu1 %v10672_v36 }
 0x903   :  { %5581 = vmatpush.msrb.mxu3 %v10762_v12  ;;  %5538 = vmatpush.msrb.mxu2 %v10803_v50 }
 0x904   :  { %5431 = vmatpush.msrb.mxu0 %v13877_v8  ;;  %5643 = vmatpush.msra.mxu1 %v10674_v37 }
 0x905   :  { %5583 = vmatpush.msrb.mxu3 %v10778_v31  ;;  %5542 = vmatpush.msrb.mxu2 %v10817_v60 }
 0x906   :  { %5434 = vmatpush.msrb.mxu0 %v14113_v21  ;;  %5649 = vmatpush.msra.mxu1 %v14114_v55 }
 0x907   :  { %5546 = vmatpush.msrb.mxu2 %v14115_v63 }
 0x908   :  { %5437 = vmatpush.msrb.mxu0 %v14116_v49  ;;  %5655 = vmatpush.msra.mxu1 %v14117_v43 }
 0x90a   :  { %5592 = vmatpush.msra.mxu0 %v10601_v3  ;;  %5661 = vmatpush.msra.mxu1 %v14118_v57 }
 0x90c   :  { %5594 = vmatpush.msra.mxu0 %v10603_v4  ;;  %5667 = vmatpush.msra.mxu1 %v14119_v34 }
 0x90e   :  { %5596 = vmatpush.msra.mxu0 %v10605_v5  ;;  %5673 = vmatpush.msra.mxu1 %v14120_v2 }
 0x910   :  { %5598 = vmatpush.msra.mxu0 %v10607_v9  ;;  %5679 = vmatpush.msra.mxu1 %v14121_v1 }
 0x912   :  { %5600 = vmatpush.msra.mxu0 %v10609_v10  ;;  %5685 = vmatpush.msra.mxu1 %v14122_v53 }
 0x914   :  { %5602 = vmatpush.msra.mxu0 %v10611_v11  ;;  %5691 = vmatpush.msra.mxu1 %v14123_v35 }
 0x916   :  { %5604 = vmatpush.msra.mxu0 %v10623_v17  ;;  %5697 = vmatpush.msra.mxu1 %v14124_v61 }
 0x918   :  { %5606 = vmatpush.msra.mxu0 %v10632_v20  ;;  %5703 = vmatpush.msra.mxu1 %v14125_v42 }
 0x91a   :  { %5608 = vmatpush.msra.mxu0 %v10665_v32  ;;  %5709 = vmatpush.msra.mxu1 %v14126_v59  ;;  %v14130_v59 = vld [vmem:[#allocation11_spill] sm:$0xff] }
 0x91b   :  { %v4901_v42 = vrot.slane %v14130_v59, 6 }
 0x91c   :  { %5610 = vmatpush.msra.mxu0 %v10693_v44  ;;  %5715 = vmatpush.msra.mxu1 %v14127_v13 }
 0x91e   :  { %5612 = vmatpush.msra.mxu0 %v10698_v46  ;;  %5721 = vmatpush.msra.mxu1 %v14128_v54 }
 0x920   :  { %5614 = vmatpush.msra.mxu0 %v10714_v52  ;;  %5727 = vmatpush.msra.mxu1 %v14129_v30 }
 0x922   :  { %5616 = vmatpush.msra.mxu0 %v10730_v58 }
 0x924   :  { %5618 = vmatpush.msra.mxu0 %v10746_v0 }
 0x926   :  { %5620 = vmatpush.msra.mxu0 %v10762_v12 }
 0x928   :  { %5622 = vmatpush.msra.mxu0 %v10778_v31 }
 0x95e   :  { %v5042_v61 = vpop.f32.mrf.mxu1 }
 0x966   :  { %v4941_v13 = vpop.f32.mrf.mxu0  ;;  %v5096_v1 = vpop.f32.mrf.mxu2 }
 0x967   :  { %v4942_v35 = vadd.f32 %v4941_v13, %v4901_v42  ;;  %v5241_v43 = vpop.f32.mrf.mxu1  ;;  %v14141_v42 = vld [vmem:[#allocation18_spill] sm:$0xff]  ;;  %v14143_v13 = vld [vmem:[#allocation21_spill] sm:$0xff] }
 0x968   :  { %v5135_v2 = vpop.f32.mrf.mxu3 }
 0x969   :  { %v5043_v53 = vadd.f32 %v5042_v61, %v4942_v35  ;;  %v14139_v35 = vld [vmem:[#allocation14_spill] sm:$0xff]  ;;  %v14140_v61 = vld [vmem:[#allocation16_spill] sm:$0xff] }
 0x96b   :  { %v5097_v54 = vadd.f32 %v5096_v1, %v5043_v53  ;;  %v14137_v1 = vld [vmem:[#allocation10_spill] sm:$0xff]  ;;  %v14138_v53 = vld [vmem:[#allocation12_spill] sm:$0xff] }
 0x96d   :  { %v5136_v34 = vadd.f32 %v5135_v2, %v5097_v54  ;;  %v14144_v54 = vld [vmem:[#allocation23_spill] sm:$0xff] }
 0x96e   :  { %v5204_v57 = vpop.f32.mrf.mxu0 }
 0x96f   :  { %v5205_v30 = vadd.f32 %v5204_v57, %v5136_v34  ;;  %v14135_v57 = vld [vmem:[#allocation7_spill] sm:$0xff]  ;;  %v14136_v34 = vld [vmem:[#allocation8_spill] sm:$0xff] }
 0x971   :  { %v5242_v49 = vadd.f32 %v5241_v43, %v5205_v30  ;;  %v14134_v43 = vld [vmem:[#allocation19_spill] sm:$0xff]  ;;  %v14145_v30 = vld [vmem:[#allocation24_spill] sm:$0xff] }
 0x973   :  { %10498 = vtanh.f32 %v5242_v49 }
 0x979   :  { %v10499_v63 = vpop.eup %10498 }
 0x97a   :  { %5245 = vst [vmem:[#allocation2 + $0xe] sm:$0x1] %v10499_v63  ;;  %v5280_v55 = vand.u32 4294901760, %v10499_v63 }
 0x97c   :  { %5386 = vmatmul.f32.vlgmr.msra.gmra.mxu3 %v5280_v55  ;;  %v5281_v21 = vsub.f32 %v10499_v63, %v5280_v55  ;;  %v14133_v63 = vld [vmem:[#allocation22_spill] sm:$0xff] }
 0x97d   :  { %5788 = vmatpush.msra.mxu3 %v10601_v3 }
 0x97e   :  { %5440 = vmatmul.f32.vlgmr.msrb.gmra.mxu0 %v5281_v21  ;;  %v5282_v59 = vand.u32 4294901760, %v5281_v21 }
 0x97f   :  { %5790 = vmatpush.msra.mxu3 %v10603_v4  ;;  %5829 = vmatpush.msrb.mxu0 %v10636_v22 }
 0x980   :  { %5479 = vmatmul.f32.vlgmr.msrb.gmra.mxu1 %v5282_v59  ;;  %v5283_v2 = vsub.f32 %v5281_v21, %v5282_v59  ;;  %v14131_v21 = vld [vmem:[#allocation17_spill] sm:$0xff]  ;;  %v14142_v59 = vld [vmem:[#allocation20_spill] sm:$0xff] }
 0x981   :  { %5792 = vmatpush.msra.mxu3 %v10605_v5  ;;  %5896 = vmatpush.msrb.mxu1 %v10601_v3 }
 0x982   :  { %v5284_v49 = vand.u32 4294901760, %v5283_v2  ;;  %5833 = vmatpush.msrb.mxu0 %v10639_v23  ;;  %v14146_v2 = vld [vmem:[#allocation25_spill] sm:$0xff] }
 0x983   :  { %5794 = vmatpush.msra.mxu3 %v10607_v9  ;;  %5898 = vmatpush.msrb.mxu1 %v10603_v4 }
 0x984   :  { %5285 = vmatmul.f32.vlgmr.msra.gmra.mxu2 %v5284_v49  ;;  %5585 = vmatmul.f32.vlgmr.msrb.gmra.mxu3 %v5280_v55  ;;  %v14147_v49 = vld [vmem:[#allocation26_spill] sm:$0xff] }
 0x985   :  { %5735 = vmatpush.msra.mxu2 %v10615_v14  ;;  %5796 = vmatpush.msra.mxu3 %v10609_v10 }
 0x986   :  { %5900 = vmatpush.msrb.mxu1 %v10605_v5  ;;  %5837 = vmatpush.msrb.mxu0 %v10642_v24 }
 0x987   :  { %5738 = vmatpush.msra.mxu2 %v10618_v15  ;;  %5798 = vmatpush.msra.mxu3 %v10611_v11 }
 0x988   :  { %5902 = vmatpush.msrb.mxu1 %v10607_v9  ;;  %5841 = vmatpush.msrb.mxu0 %v10649_v26 }
 0x989   :  { %5741 = vmatpush.msra.mxu2 %v10621_v16  ;;  %5800 = vmatpush.msra.mxu3 %v10623_v17 }
 0x98a   :  { %5904 = vmatpush.msrb.mxu1 %v10609_v10  ;;  %5845 = vmatpush.msrb.mxu0 %v10652_v27 }
 0x98b   :  { %5744 = vmatpush.msra.mxu2 %v10627_v18  ;;  %5802 = vmatpush.msra.mxu3 %v10632_v20 }
 0x98c   :  { %5548 = vmatmul.f32.vlgmr.msrb.gmra.mxu2 %v5280_v55  ;;  %5906 = vmatpush.msrb.mxu1 %v10611_v11  ;;  %v14132_v55 = vld [vmem:[#allocation6_spill] sm:$0xff] }
 0x98d   :  { %5747 = vmatpush.msra.mxu2 %v10630_v19  ;;  %5804 = vmatpush.msra.mxu3 %v10665_v32 }
 0x98e   :  { %5908 = vmatpush.msrb.mxu1 %v10623_v17  ;;  %5849 = vmatpush.msrb.mxu0 %v10680_v39 }
 0x98f   :  { %5750 = vmatpush.msra.mxu2 %v10645_v25  ;;  %5806 = vmatpush.msra.mxu3 %v10693_v44 }
 0x990   :  { %5910 = vmatpush.msrb.mxu1 %v10632_v20  ;;  %5853 = vmatpush.msrb.mxu0 %v10686_v41 }
 0x991   :  { %5753 = vmatpush.msra.mxu2 %v10655_v28  ;;  %5808 = vmatpush.msra.mxu3 %v10698_v46 }
 0x992   :  { %5912 = vmatpush.msrb.mxu1 %v10665_v32  ;;  %5857 = vmatpush.msrb.mxu0 %v10701_v47 }
 0x993   :  { %5756 = vmatpush.msra.mxu2 %v10669_v33  ;;  %5810 = vmatpush.msra.mxu3 %v10714_v52 }
 0x994   :  { %5914 = vmatpush.msrb.mxu1 %v10693_v44  ;;  %5861 = vmatpush.msrb.mxu0 %v10725_v56 }
 0x995   :  { %5759 = vmatpush.msra.mxu2 %v10696_v45  ;;  %5812 = vmatpush.msra.mxu3 %v10730_v58 }
 0x996   :  { %5916 = vmatpush.msrb.mxu1 %v10698_v46  ;;  %5865 = vmatpush.msrb.mxu0 %v10741_v62 }
 0x997   :  { %5762 = vmatpush.msra.mxu2 %v10712_v51  ;;  %5814 = vmatpush.msra.mxu3 %v10746_v0 }
 0x998   :  { %5918 = vmatpush.msrb.mxu1 %v10714_v52  ;;  %5869 = vmatpush.msrb.mxu0 %v10757_v7 }
 0x999   :  { %5765 = vmatpush.msra.mxu2 %v13874_v40  ;;  %5816 = vmatpush.msra.mxu3 %v10762_v12 }
 0x99a   :  { %5920 = vmatpush.msrb.mxu1 %v10730_v58  ;;  %5873 = vmatpush.msrb.mxu0 %v10773_v29 }
 0x99b   :  { %5768 = vmatpush.msra.mxu2 %v13875_v48  ;;  %5818 = vmatpush.msra.mxu3 %v10778_v31 }
 0x99c   :  { %5922 = vmatpush.msrb.mxu1 %v10746_v0  ;;  %5877 = vmatpush.msrb.mxu0 %v10789_v38 }
 0x99d   :  { %5771 = vmatpush.msra.mxu2 %v13876_v6  ;;  %5983 = vmatpush.msrb.mxu3 %v10672_v36 }
 0x99e   :  { %5924 = vmatpush.msrb.mxu1 %v10762_v12  ;;  %5881 = vmatpush.msrb.mxu0 %v10803_v50 }
 0x99f   :  { %5774 = vmatpush.msra.mxu2 %v13877_v8  ;;  %5989 = vmatpush.msrb.mxu3 %v10674_v37 }
 0x9a0   :  { %5926 = vmatpush.msrb.mxu1 %v10778_v31  ;;  %5885 = vmatpush.msrb.mxu0 %v10817_v60 }
 0x9a1   :  { %5777 = vmatpush.msra.mxu2 %v14131_v21  ;;  %5995 = vmatpush.msrb.mxu3 %v14132_v55 }
 0x9a2   :  { %5889 = vmatpush.msrb.mxu0 %v14133_v63 }
 0x9a3   :  { %5780 = vmatpush.msra.mxu2 %v14134_v43  ;;  %6001 = vmatpush.msrb.mxu3 %v14135_v57 }
 0x9a5   :  { %5938 = vmatpush.msrb.mxu2 %v10601_v3  ;;  %6007 = vmatpush.msrb.mxu3 %v14136_v34 }
 0x9a7   :  { %5940 = vmatpush.msrb.mxu2 %v10603_v4  ;;  %6013 = vmatpush.msrb.mxu3 %v14137_v1 }
 0x9a9   :  { %5942 = vmatpush.msrb.mxu2 %v10605_v5  ;;  %6019 = vmatpush.msrb.mxu3 %v14138_v53 }
 0x9ab   :  { %5944 = vmatpush.msrb.mxu2 %v10607_v9  ;;  %6025 = vmatpush.msrb.mxu3 %v14139_v35 }
 0x9ad   :  { %5946 = vmatpush.msrb.mxu2 %v10609_v10  ;;  %6031 = vmatpush.msrb.mxu3 %v14140_v61 }
 0x9af   :  { %5948 = vmatpush.msrb.mxu2 %v10611_v11  ;;  %6037 = vmatpush.msrb.mxu3 %v14141_v42 }
 0x9b1   :  { %5950 = vmatpush.msrb.mxu2 %v10623_v17  ;;  %6043 = vmatpush.msrb.mxu3 %v14142_v59 }
 0x9b3   :  { %5952 = vmatpush.msrb.mxu2 %v10632_v20  ;;  %6049 = vmatpush.msrb.mxu3 %v14143_v13 }
 0x9b5   :  { %5954 = vmatpush.msrb.mxu2 %v10665_v32  ;;  %6055 = vmatpush.msrb.mxu3 %v14144_v54  ;;  %v14148_v54 = vld [vmem:[#allocation11_spill] sm:$0xff] }
 0x9b6   :  { %v5246_v13 = vrot.slane %v14148_v54, 7 }
 0x9b7   :  { %5956 = vmatpush.msrb.mxu2 %v10693_v44  ;;  %6061 = vmatpush.msrb.mxu3 %v14145_v30  ;;  %v38_v30 = vld [vmem:[%s13797_s0 + $0x10] sm:$0xff] }
 0x9b8   :  { %52 = vperm.xlu1 %10465, %v38_v30  }
 0x9b9   :  { %5958 = vmatpush.msrb.mxu2 %v10698_v46  ;;  %6067 = vmatpush.msrb.mxu3 %v14146_v2 }
 0x9bb   :  { %5960 = vmatpush.msrb.mxu2 %v10714_v52  ;;  %6073 = vmatpush.msrb.mxu3 %v14147_v49  ;;  %v39_v49 = vld [vmem:[%s13797_s0 + $0x18] sm:$0x3f] }
 0x9bd   :  { %5962 = vmatpush.msrb.mxu2 %v10730_v58 }
 0x9bf   :  { %5964 = vmatpush.msrb.mxu2 %v10746_v0 }
 0x9c0   :  { %57 = vperm.xlu1 %10465, %v39_v49   ;;  %v14157_v49 = vld [vmem:[#allocation14_spill] sm:$0xff] }
 0x9c1   :  { %5966 = vmatpush.msrb.mxu2 %v10762_v12 }
 0x9c3   :  { %5968 = vmatpush.msrb.mxu2 %v10778_v31 }
 0x9fb   :  { %v5441_v35 = vpop.f32.mrf.mxu0 }
 0x9fd   :  { %v5480_v1 = vpop.f32.mrf.mxu1 }
 0x9ff   :  { %v5387_v2 = vpop.f32.mrf.mxu3 }
 0xa07   :  { %v5286_v59 = vpop.f32.mrf.mxu2  ;;  %v5586_v55 = vpop.f32.mrf.mxu3 }
 0xa08   :  { %v5287_v42 = vadd.f32 %v5286_v59, %v5246_v13  ;;  %v14155_v13 = vld [vmem:[#allocation10_spill] sm:$0xff] }
 0xa0a   :  { %v5388_v61 = vadd.f32 %v5387_v2, %v5287_v42  ;;  %v14154_v42 = vld [vmem:[#allocation8_spill] sm:$0xff] }
 0xa0b   :  { %v14156_v2 = vld [vmem:[#allocation12_spill] sm:$0xff] }
 0xa0c   :  { %v5442_v53 = vadd.f32 %v5441_v35, %v5388_v61  ;;  %v14152_v35 = vld [vmem:[#allocation19_spill] sm:$0xff] }
 0xa0d   :  { %v14153_v61 = vld [vmem:[#allocation7_spill] sm:$0xff] }
 0xa0e   :  { %v5481_v34 = vadd.f32 %v5480_v1, %v5442_v53 }
 0xa0f   :  { %v5549_v57 = vpop.f32.mrf.mxu2 }
 0xa10   :  { %v5550_v43 = vadd.f32 %v5549_v57, %v5481_v34  ;;  %v14150_v57 = vld [vmem:[#allocation22_spill] sm:$0xff] }
 0xa11   :  { %v14151_v34 = vld [vmem:[#allocation6_spill] sm:$0xff] }
 0xa12   :  { %v5587_v63 = vadd.f32 %v5586_v55, %v5550_v43 }
 0xa14   :  { %10500 = vtanh.f32 %v5587_v63  ;;  %v10532_v63 = vld [vmem:[%s13798_s1 + $0x2] ss:$0 sm:$0xff] }
 0xa1a   :  { %v10501_v30 = vpop.eup %10500 }
 0xa1b   :  { %5590 = vst [vmem:[#allocation2 + $0xf] sm:$0x1] %v10501_v30  ;;  %v5623_v54 = vand.u32 4294901760, %v10501_v30 }
 0xa1d   :  { %5729 = vmatmul.f32.vlgmr.msra.gmra.mxu1 %v5623_v54  ;;  %v5624_v21 = vsub.f32 %v10501_v30, %v5623_v54  ;;  %v14158_v30 = vld [vmem:[#allocation16_spill] sm:$0xff] }
 0xa1e   :  { %6134 = vmatpush.msra.mxu1 %v10601_v3 }
 0xa1f   :  { %5783 = vmatmul.f32.vlgmr.msra.gmra.mxu2 %v5624_v21  ;;  %v5625_v59 = vand.u32 4294901760, %v5624_v21 }
 0xa20   :  { %6136 = vmatpush.msra.mxu1 %v10603_v4  ;;  %6175 = vmatpush.msra.mxu2 %v10636_v22 }
 0xa21   :  { %5822 = vmatmul.f32.vlgmr.msra.gmra.mxu3 %v5625_v59  ;;  %v5626_v1 = vsub.f32 %v5624_v21, %v5625_v59  ;;  %v14149_v21 = vld [vmem:[#allocation17_spill] sm:$0xff]  ;;  %v14160_v59 = vld [vmem:[#allocation20_spill] sm:$0xff] }
 0xa22   :  { %v10421_v53 = vld [vmem:[#allocation2 + $0x8] sm:$0xff]  ;;  %6138 = vmatpush.msra.mxu1 %v10605_v5  ;;  %6242 = vmatpush.msra.mxu3 %v10601_v3 }
 0xa23   :  { %v5627_v55 = vand.u32 4294901760, %v5626_v1  ;;  %v10426_v43 = vmul.f32 %v10532_v63, %v10421_v53  ;;  %6179 = vmatpush.msra.mxu2 %v10639_v23  ;;  %v14161_v1 = vld [vmem:[#allocation21_spill] sm:$0xff]  ;;  %v14162_v53 = vld [vmem:[#allocation23_spill] sm:$0xff] }
 0xa24   :  { %6140 = vmatpush.msra.mxu1 %v10607_v9  ;;  %6244 = vmatpush.msra.mxu3 %v10603_v4  ;;  %v14164_v63 = vld [vmem:[#allocation25_spill] sm:$0xff] }
 0xa25   :  { %5628 = vmatmul.f32.vlgmr.msra.gmra.mxu0 %v5627_v55  ;;  %5928 = vmatmul.f32.vlgmr.msrb.gmra.mxu1 %v5623_v54  ;;  %v14163_v55 = vld [vmem:[#allocation24_spill] sm:$0xff] }
 0xa26   :  { %10431 = vadd.xlane.f32.xlu2 %v10426_v43  ;;  %6081 = vmatpush.msra.mxu0 %v10615_v14  ;;  %v14165_v43 = vld [vmem:[#allocation26_spill] sm:$0xff] }
 0xa27   :  { %6142 = vmatpush.msra.mxu1 %v10609_v10  ;;  %6246 = vmatpush.msra.mxu3 %v10605_v5 }
 0xa28   :  { %6084 = vmatpush.msra.mxu0 %v10618_v15  ;;  %6183 = vmatpush.msra.mxu2 %v10642_v24 }
 0xa29   :  { %6144 = vmatpush.msra.mxu1 %v10611_v11  ;;  %6248 = vmatpush.msra.mxu3 %v10607_v9 }
 0xa2a   :  { %6087 = vmatpush.msra.mxu0 %v10621_v16  ;;  %6187 = vmatpush.msra.mxu2 %v10649_v26 }
 0xa2b   :  { %6146 = vmatpush.msra.mxu1 %v10623_v17  ;;  %6250 = vmatpush.msra.mxu3 %v10609_v10 }
 0xa2c   :  { %6090 = vmatpush.msra.mxu0 %v10627_v18  ;;  %6191 = vmatpush.msra.mxu2 %v10652_v27 }
 0xa2d   :  { %5891 = vmatmul.f32.vlgmr.msrb.gmra.mxu0 %v5623_v54  ;;  %6148 = vmatpush.msra.mxu1 %v10632_v20  ;;  %v14159_v54 = vld [vmem:[#allocation18_spill] sm:$0xff] }
 0xa2e   :  { %6093 = vmatpush.msra.mxu0 %v10630_v19  ;;  %6252 = vmatpush.msra.mxu3 %v10611_v11 }
 0xa2f   :  { %6150 = vmatpush.msra.mxu1 %v10665_v32  ;;  %6195 = vmatpush.msra.mxu2 %v10680_v39 }
 0xa30   :  { %6096 = vmatpush.msra.mxu0 %v10645_v25  ;;  %6254 = vmatpush.msra.mxu3 %v10623_v17 }
 0xa31   :  { %6152 = vmatpush.msra.mxu1 %v10693_v44  ;;  %6199 = vmatpush.msra.mxu2 %v10686_v41 }
 0xa32   :  { %6099 = vmatpush.msra.mxu0 %v10655_v28  ;;  %6256 = vmatpush.msra.mxu3 %v10632_v20 }
 0xa33   :  { %6154 = vmatpush.msra.mxu1 %v10698_v46  ;;  %6203 = vmatpush.msra.mxu2 %v10701_v47 }
 0xa34   :  { %6102 = vmatpush.msra.mxu0 %v10669_v33  ;;  %6258 = vmatpush.msra.mxu3 %v10665_v32 }
 0xa35   :  { %6156 = vmatpush.msra.mxu1 %v10714_v52  ;;  %6207 = vmatpush.msra.mxu2 %v10725_v56 }
 0xa36   :  { %6105 = vmatpush.msra.mxu0 %v10696_v45  ;;  %6260 = vmatpush.msra.mxu3 %v10693_v44 }
 0xa37   :  { %6158 = vmatpush.msra.mxu1 %v10730_v58  ;;  %6211 = vmatpush.msra.mxu2 %v10741_v62 }
 0xa38   :  { %6108 = vmatpush.msra.mxu0 %v10712_v51  ;;  %6262 = vmatpush.msra.mxu3 %v10698_v46 }
 0xa39   :  { %6160 = vmatpush.msra.mxu1 %v10746_v0  ;;  %6215 = vmatpush.msra.mxu2 %v10757_v7 }
 0xa3a   :  { %6111 = vmatpush.msra.mxu0 %v13874_v40  ;;  %6264 = vmatpush.msra.mxu3 %v10714_v52 }
 0xa3b   :  { %6162 = vmatpush.msra.mxu1 %v10762_v12  ;;  %6219 = vmatpush.msra.mxu2 %v10773_v29 }
 0xa3c   :  { %6114 = vmatpush.msra.mxu0 %v13875_v48  ;;  %6266 = vmatpush.msra.mxu3 %v10730_v58 }
 0xa3d   :  { %6164 = vmatpush.msra.mxu1 %v10778_v31  ;;  %6223 = vmatpush.msra.mxu2 %v10789_v38 }
 0xa3e   :  { %6117 = vmatpush.msra.mxu0 %v13876_v6  ;;  %6268 = vmatpush.msra.mxu3 %v10746_v0 }
 0xa3f   :  { %6227 = vmatpush.msra.mxu2 %v10803_v50  ;;  %6328 = vmatpush.msrb.mxu1 %v10672_v36 }
 0xa40   :  { %6120 = vmatpush.msra.mxu0 %v13877_v8  ;;  %6270 = vmatpush.msra.mxu3 %v10762_v12 }
 0xa41   :  { %6231 = vmatpush.msra.mxu2 %v10817_v60  ;;  %6334 = vmatpush.msrb.mxu1 %v10674_v37 }
 0xa42   :  { %6123 = vmatpush.msra.mxu0 %v14149_v21  ;;  %6272 = vmatpush.msra.mxu3 %v10778_v31 }
 0xa43   :  { %6235 = vmatpush.msra.mxu2 %v14150_v57  ;;  %6340 = vmatpush.msrb.mxu1 %v14151_v34 }
 0xa44   :  { %6126 = vmatpush.msra.mxu0 %v14152_v35 }
 0xa45   :  { %6346 = vmatpush.msrb.mxu1 %v14153_v61 }
 0xa46   :  { %6283 = vmatpush.msrb.mxu0 %v10601_v3 }
 0xa47   :  { %6352 = vmatpush.msrb.mxu1 %v14154_v42 }
 0xa48   :  { %6285 = vmatpush.msrb.mxu0 %v10603_v4 }
 0xa49   :  { %6358 = vmatpush.msrb.mxu1 %v14155_v13 }
 0xa4a   :  { %6287 = vmatpush.msrb.mxu0 %v10605_v5 }
 0xa4b   :  { %6364 = vmatpush.msrb.mxu1 %v14156_v2 }
 0xa4c   :  { %6289 = vmatpush.msrb.mxu0 %v10607_v9 }
 0xa4d   :  { %6370 = vmatpush.msrb.mxu1 %v14157_v49 }
 0xa4e   :  { %6291 = vmatpush.msrb.mxu0 %v10609_v10 }
 0xa4f   :  { %6376 = vmatpush.msrb.mxu1 %v14158_v30 }
 0xa50   :  { %6293 = vmatpush.msrb.mxu0 %v10611_v11 }
 0xa51   :  { %6382 = vmatpush.msrb.mxu1 %v14159_v54  ;;  %v10535_v54 = vld [vmem:[%s13798_s1 + $0x1] ss:$0 sm:$0xff] }
 0xa52   :  { %6295 = vmatpush.msrb.mxu0 %v10623_v17 }
 0xa53   :  { %6388 = vmatpush.msrb.mxu1 %v14160_v59 }
 0xa54   :  { %6297 = vmatpush.msrb.mxu0 %v10632_v20 }
 0xa55   :  { %6394 = vmatpush.msrb.mxu1 %v14161_v1  ;;  %v53_v1 = vpop.permute.xlu1 %52 }
 0xa56   :  { %6299 = vmatpush.msrb.mxu0 %v10665_v32 }
 0xa57   :  { %6400 = vmatpush.msrb.mxu1 %v14162_v53 }
 0xa58   :  { %6301 = vmatpush.msrb.mxu0 %v10693_v44 }
 0xa59   :  { %6406 = vmatpush.msrb.mxu1 %v14163_v55  ;;  %v10533_v55 = vld [vmem:[%s13798_s1 + $0x3] ss:$0 sm:$0xff] }
 0xa5a   :  { %6303 = vmatpush.msrb.mxu0 %v10698_v46 }
 0xa5b   :  { %6412 = vmatpush.msrb.mxu1 %v14164_v63  ;;  %v10534_v63 = vld [vmem:[%s13798_s1] ss:$0 sm:$0xff] }
 0xa5c   :  { %6305 = vmatpush.msrb.mxu0 %v10714_v52 }
 0xa5d   :  { %6418 = vmatpush.msrb.mxu1 %v14165_v43  ;;  %v63_v43 = vmul.f32 %v10534_v63, %v53_v1 }
 0xa5e   :  { %6307 = vmatpush.msrb.mxu0 %v10730_v58 }
 0xa5f   :  { %v12631_v30 = vadd.f32 %v10535_v54, %v63_v43 }
 0xa60   :  { %6309 = vmatpush.msrb.mxu0 %v10746_v0 }
 0xa61   :  { %14166 = vst [vmem:[#allocation13_spill] sm:$0xff] %v12631_v30 }
 0xa62   :  { %6311 = vmatpush.msrb.mxu0 %v10762_v12 }
 0xa64   :  { %6313 = vmatpush.msrb.mxu0 %v10778_v31 }
 0xa99   :  { %v10432_v53 = vpop.xlane.xlu2 %10431 }
 0xa9a   :  { %v10441_v59 = vadd.f32 %v10533_v55, %v10432_v53  ;;  %v5730_v49 = vpop.f32.mrf.mxu1 }
 0xa9c   :  { %10446 = vst.msk [vmem:[%s13800_s3 + $0x8] sm:$0xff] %vm10444_vm0, %v10441_v59 }
 0xaa2   :  { %v5629_v2 = vpop.f32.mrf.mxu0  ;;  %v5784_v13 = vpop.f32.mrf.mxu2 }
 0xaa3   :  { %v5630_v53 = vadd.f32 %v5629_v2, %v12631_v30  ;;  %v5929_v57 = vpop.f32.mrf.mxu1  ;;  %v14172_v2 = vld [vmem:[#allocation8_spill] sm:$0xff] }
 0xaa4   :  { %v5823_v61 = vpop.f32.mrf.mxu3 }
 0xaa5   :  { %v5731_v55 = vadd.f32 %v5730_v49, %v5630_v53  ;;  %v14173_v49 = vld [vmem:[#allocation10_spill] sm:$0xff]  ;;  %v14174_v53 = vld [vmem:[#allocation12_spill] sm:$0xff] }
 0xaa7   :  { %v5785_v42 = vadd.f32 %v5784_v13, %v5731_v55  ;;  %v14171_v13 = vld [vmem:[#allocation7_spill] sm:$0xff]  ;;  %v14175_v55 = vld [vmem:[#allocation14_spill] sm:$0xff] }
 0xaa9   :  { %v5824_v1 = vadd.f32 %v5823_v61, %v5785_v42  ;;  %v14170_v42 = vld [vmem:[#allocation19_spill] sm:$0xff] }
 0xaaa   :  { %v5892_v63 = vpop.f32.mrf.mxu0 }
 0xaab   :  { %v5893_v35 = vadd.f32 %v5892_v63, %v5824_v1  ;;  %v14176_v1 = vld [vmem:[#allocation16_spill] sm:$0xff]  ;;  %v14177_v63 = vld [vmem:[#allocation18_spill] sm:$0xff] }
 0xaad   :  { %v5930_v34 = vadd.f32 %v5929_v57, %v5893_v35  ;;  %v14169_v35 = vld [vmem:[#allocation22_spill] sm:$0xff] }
 0xaaf   :  { %10502 = vtanh.f32 %v5930_v34  ;;  %v14168_v34 = vld [vmem:[#allocation6_spill] sm:$0xff] }
 0xab5   :  { %v10503_v59 = vpop.eup %10502 }
 0xab6   :  { %5933 = vst [vmem:[#allocation2 + $0x10] sm:$0x1] %v10503_v59  ;;  %v5969_v21 = vand.u32 4294901760, %v10503_v59 }
 0xab8   :  { %6075 = vmatmul.f32.vlgmr.msrb.gmra.mxu3 %v5969_v21  ;;  %v5970_v54 = vsub.f32 %v10503_v59, %v5969_v21  ;;  %v14178_v59 = vld [vmem:[#allocation20_spill] sm:$0xff] }
 0xab9   :  { %6479 = vmatpush.msrb.mxu3 %v10601_v3 }
 0xaba   :  { %6129 = vmatmul.f32.vlgmr.msra.gmra.mxu0 %v5970_v54  ;;  %v5971_v43 = vand.u32 4294901760, %v5970_v54 }
 0xabb   :  { %6481 = vmatpush.msrb.mxu3 %v10603_v4  ;;  %6520 = vmatpush.msra.mxu0 %v10636_v22 }
 0xabc   :  { %6168 = vmatmul.f32.vlgmr.msra.gmra.mxu1 %v5971_v43  ;;  %v5972_v61 = vsub.f32 %v5970_v54, %v5971_v43  ;;  %v14179_v54 = vld [vmem:[#allocation21_spill] sm:$0xff]  ;;  %v14180_v43 = vld [vmem:[#allocation23_spill] sm:$0xff] }
 0xabd   :  { %6483 = vmatpush.msrb.mxu3 %v10605_v5  ;;  %6587 = vmatpush.msra.mxu1 %v10601_v3 }
 0xabe   :  { %v5973_v57 = vand.u32 4294901760, %v5972_v61  ;;  %6524 = vmatpush.msra.mxu0 %v10639_v23  ;;  %v14181_v61 = vld [vmem:[#allocation24_spill] sm:$0xff] }
 0xabf   :  { %6485 = vmatpush.msrb.mxu3 %v10607_v9  ;;  %6589 = vmatpush.msra.mxu1 %v10603_v4 }
 0xac0   :  { %5974 = vmatmul.f32.vlgmr.msrb.gmra.mxu2 %v5973_v57  ;;  %6274 = vmatmul.f32.vlgmr.msra.gmra.mxu3 %v5969_v21  ;;  %v14182_v57 = vld [vmem:[#allocation25_spill] sm:$0xff] }
 0xac1   :  { %6426 = vmatpush.msrb.mxu2 %v10615_v14  ;;  %6487 = vmatpush.msrb.mxu3 %v10609_v10 }
 0xac2   :  { %6591 = vmatpush.msra.mxu1 %v10605_v5  ;;  %6528 = vmatpush.msra.mxu0 %v10642_v24 }
 0xac3   :  { %6429 = vmatpush.msrb.mxu2 %v10618_v15  ;;  %6489 = vmatpush.msrb.mxu3 %v10611_v11 }
 0xac4   :  { %6593 = vmatpush.msra.mxu1 %v10607_v9  ;;  %6532 = vmatpush.msra.mxu0 %v10649_v26 }
 0xac5   :  { %6432 = vmatpush.msrb.mxu2 %v10621_v16  ;;  %6491 = vmatpush.msrb.mxu3 %v10623_v17 }
 0xac6   :  { %6595 = vmatpush.msra.mxu1 %v10609_v10  ;;  %6536 = vmatpush.msra.mxu0 %v10652_v27 }
 0xac7   :  { %6435 = vmatpush.msrb.mxu2 %v10627_v18  ;;  %6493 = vmatpush.msrb.mxu3 %v10632_v20 }
 0xac8   :  { %6237 = vmatmul.f32.vlgmr.msra.gmra.mxu2 %v5969_v21  ;;  %6597 = vmatpush.msra.mxu1 %v10611_v11  ;;  %v14167_v21 = vld [vmem:[#allocation17_spill] sm:$0xff] }
 0xac9   :  { %6438 = vmatpush.msrb.mxu2 %v10630_v19  ;;  %6495 = vmatpush.msrb.mxu3 %v10665_v32 }
 0xaca   :  { %6599 = vmatpush.msra.mxu1 %v10623_v17  ;;  %6540 = vmatpush.msra.mxu0 %v10680_v39 }
 0xacb   :  { %6441 = vmatpush.msrb.mxu2 %v10645_v25  ;;  %6497 = vmatpush.msrb.mxu3 %v10693_v44 }
 0xacc   :  { %6601 = vmatpush.msra.mxu1 %v10632_v20  ;;  %6544 = vmatpush.msra.mxu0 %v10686_v41 }
 0xacd   :  { %6444 = vmatpush.msrb.mxu2 %v10655_v28  ;;  %6499 = vmatpush.msrb.mxu3 %v10698_v46 }
 0xace   :  { %6603 = vmatpush.msra.mxu1 %v10665_v32  ;;  %6548 = vmatpush.msra.mxu0 %v10701_v47 }
 0xacf   :  { %6447 = vmatpush.msrb.mxu2 %v10669_v33  ;;  %6501 = vmatpush.msrb.mxu3 %v10714_v52 }
 0xad0   :  { %6605 = vmatpush.msra.mxu1 %v10693_v44  ;;  %6552 = vmatpush.msra.mxu0 %v10725_v56 }
 0xad1   :  { %6450 = vmatpush.msrb.mxu2 %v10696_v45  ;;  %6503 = vmatpush.msrb.mxu3 %v10730_v58 }
 0xad2   :  { %6607 = vmatpush.msra.mxu1 %v10698_v46  ;;  %6556 = vmatpush.msra.mxu0 %v10741_v62 }
 0xad3   :  { %6453 = vmatpush.msrb.mxu2 %v10712_v51  ;;  %6505 = vmatpush.msrb.mxu3 %v10746_v0 }
 0xad4   :  { %6609 = vmatpush.msra.mxu1 %v10714_v52  ;;  %6560 = vmatpush.msra.mxu0 %v10757_v7 }
 0xad5   :  { %6456 = vmatpush.msrb.mxu2 %v13874_v40  ;;  %6507 = vmatpush.msrb.mxu3 %v10762_v12 }
 0xad6   :  { %6611 = vmatpush.msra.mxu1 %v10730_v58  ;;  %6564 = vmatpush.msra.mxu0 %v10773_v29 }
 0xad7   :  { %6459 = vmatpush.msrb.mxu2 %v13875_v48  ;;  %6509 = vmatpush.msrb.mxu3 %v10778_v31 }
 0xad8   :  { %6613 = vmatpush.msra.mxu1 %v10746_v0  ;;  %6568 = vmatpush.msra.mxu0 %v10789_v38 }
 0xad9   :  { %6462 = vmatpush.msrb.mxu2 %v13876_v6  ;;  %6673 = vmatpush.msra.mxu3 %v10672_v36 }
 0xada   :  { %6615 = vmatpush.msra.mxu1 %v10762_v12  ;;  %6572 = vmatpush.msra.mxu0 %v10803_v50 }
 0xadb   :  { %6465 = vmatpush.msrb.mxu2 %v13877_v8  ;;  %6679 = vmatpush.msra.mxu3 %v10674_v37 }
 0xadc   :  { %6617 = vmatpush.msra.mxu1 %v10778_v31  ;;  %6576 = vmatpush.msra.mxu0 %v10817_v60 }
 0xadd   :  { %6468 = vmatpush.msrb.mxu2 %v14167_v21  ;;  %6685 = vmatpush.msra.mxu3 %v14168_v34 }
 0xade   :  { %6580 = vmatpush.msra.mxu0 %v14169_v35 }
 0xadf   :  { %6471 = vmatpush.msrb.mxu2 %v14170_v42  ;;  %6691 = vmatpush.msra.mxu3 %v14171_v13 }
 0xae1   :  { %6628 = vmatpush.msra.mxu2 %v10601_v3  ;;  %6697 = vmatpush.msra.mxu3 %v14172_v2 }
 0xae3   :  { %6630 = vmatpush.msra.mxu2 %v10603_v4  ;;  %6703 = vmatpush.msra.mxu3 %v14173_v49 }
 0xae5   :  { %6632 = vmatpush.msra.mxu2 %v10605_v5  ;;  %6709 = vmatpush.msra.mxu3 %v14174_v53 }
 0xae7   :  { %6634 = vmatpush.msra.mxu2 %v10607_v9  ;;  %6715 = vmatpush.msra.mxu3 %v14175_v55 }
 0xae9   :  { %6636 = vmatpush.msra.mxu2 %v10609_v10  ;;  %6721 = vmatpush.msra.mxu3 %v14176_v1 }
 0xaeb   :  { %6638 = vmatpush.msra.mxu2 %v10611_v11  ;;  %6727 = vmatpush.msra.mxu3 %v14177_v63  ;;  %v14183_v63 = vld [vmem:[#allocation26_spill] sm:$0xff] }
 0xaed   :  { %6640 = vmatpush.msra.mxu2 %v10623_v17  ;;  %6733 = vmatpush.msra.mxu3 %v14178_v59 }
 0xaef   :  { %6642 = vmatpush.msra.mxu2 %v10632_v20  ;;  %6739 = vmatpush.msra.mxu3 %v14179_v54 }
 0xaf1   :  { %6644 = vmatpush.msra.mxu2 %v10665_v32  ;;  %6745 = vmatpush.msra.mxu3 %v14180_v43  ;;  %v5935_v43 = vrot.slane %v12631_v30, 1 }
 0xaf3   :  { %6646 = vmatpush.msra.mxu2 %v10693_v44  ;;  %6751 = vmatpush.msra.mxu3 %v14181_v61 }
 0xaf5   :  { %6648 = vmatpush.msra.mxu2 %v10698_v46  ;;  %6757 = vmatpush.msra.mxu3 %v14182_v57 }
 0xaf7   :  { %6650 = vmatpush.msra.mxu2 %v10714_v52  ;;  %6763 = vmatpush.msra.mxu3 %v14183_v63 }
 0xaf9   :  { %6652 = vmatpush.msra.mxu2 %v10730_v58 }
 0xafb   :  { %6654 = vmatpush.msra.mxu2 %v10746_v0 }
 0xafd   :  { %6656 = vmatpush.msra.mxu2 %v10762_v12 }
 0xaff   :  { %6658 = vmatpush.msra.mxu2 %v10778_v31 }
 0xb37   :  { %v6130_v55 = vpop.f32.mrf.mxu0 }
 0xb39   :  { %v6169_v53 = vpop.f32.mrf.mxu1 }
 0xb3b   :  { %v6076_v54 = vpop.f32.mrf.mxu3 }
 0xb43   :  { %v5975_v61 = vpop.f32.mrf.mxu2  ;;  %v6275_v13 = vpop.f32.mrf.mxu3 }
 0xb44   :  { %v5976_v59 = vadd.f32 %v5975_v61, %v5935_v43  ;;  %v14196_v43 = vld [vmem:[#allocation21_spill] sm:$0xff]  ;;  %v14197_v61 = vld [vmem:[#allocation23_spill] sm:$0xff] }
 0xb46   :  { %v6077_v1 = vadd.f32 %v6076_v54, %v5976_v59  ;;  %v14194_v59 = vld [vmem:[#allocation18_spill] sm:$0xff]  ;;  %v14195_v54 = vld [vmem:[#allocation20_spill] sm:$0xff] }
 0xb48   :  { %v6131_v57 = vadd.f32 %v6130_v55, %v6077_v1  ;;  %v14191_v55 = vld [vmem:[#allocation12_spill] sm:$0xff]  ;;  %v14192_v1 = vld [vmem:[#allocation14_spill] sm:$0xff] }
 0xb4a   :  { %v6170_v49 = vadd.f32 %v6169_v53, %v6131_v57  ;;  %v14198_v57 = vld [vmem:[#allocation24_spill] sm:$0xff] }
 0xb4b   :  { %v6238_v2 = vpop.f32.mrf.mxu2 }
 0xb4c   :  { %v6239_v63 = vadd.f32 %v6238_v2, %v6170_v49  ;;  %v14189_v2 = vld [vmem:[#allocation8_spill] sm:$0xff]  ;;  %v14190_v49 = vld [vmem:[#allocation10_spill] sm:$0xff] }
 0xb4e   :  { %v6276_v42 = vadd.f32 %v6275_v13, %v6239_v63  ;;  %v14188_v13 = vld [vmem:[#allocation7_spill] sm:$0xff]  ;;  %v14193_v63 = vld [vmem:[#allocation16_spill] sm:$0xff] }
 0xb50   :  { %10504 = vtanh.f32 %v6276_v42 }
 0xb56   :  { %v10505_v35 = vpop.eup %10504 }
 0xb57   :  { %6279 = vst [vmem:[#allocation2 + $0x11] sm:$0x1] %v10505_v35  ;;  %v6314_v34 = vand.u32 4294901760, %v10505_v35 }
 0xb59   :  { %6420 = vmatmul.f32.vlgmr.msrb.gmra.mxu1 %v6314_v34  ;;  %v6315_v21 = vsub.f32 %v10505_v35, %v6314_v34  ;;  %v14187_v35 = vld [vmem:[#allocation19_spill] sm:$0xff] }
 0xb5a   :  { %6824 = vmatpush.msrb.mxu1 %v10601_v3 }
 0xb5b   :  { %6474 = vmatmul.f32.vlgmr.msrb.gmra.mxu2 %v6315_v21  ;;  %v6316_v30 = vand.u32 4294901760, %v6315_v21 }
 0xb5c   :  { %6826 = vmatpush.msrb.mxu1 %v10603_v4  ;;  %6865 = vmatpush.msrb.mxu2 %v10636_v22 }
 0xb5d   :  { %6513 = vmatmul.f32.vlgmr.msrb.gmra.mxu3 %v6316_v30  ;;  %v6317_v53 = vsub.f32 %v6315_v21, %v6316_v30  ;;  %v14184_v30 = vld [vmem:[#allocation17_spill] sm:$0xff]  ;;  %v14185_v21 = vld [vmem:[#allocation6_spill] sm:$0xff] }
 0xb5e   :  { %6828 = vmatpush.msrb.mxu1 %v10605_v5  ;;  %6932 = vmatpush.msrb.mxu3 %v10601_v3 }
 0xb5f   :  { %v6318_v42 = vand.u32 4294901760, %v6317_v53  ;;  %6869 = vmatpush.msrb.mxu2 %v10639_v23  ;;  %v14199_v53 = vld [vmem:[#allocation25_spill] sm:$0xff] }
 0xb60   :  { %6830 = vmatpush.msrb.mxu1 %v10607_v9  ;;  %6934 = vmatpush.msrb.mxu3 %v10603_v4 }
 0xb61   :  { %6319 = vmatmul.f32.vlgmr.msrb.gmra.mxu0 %v6318_v42  ;;  %6619 = vmatmul.f32.vlgmr.msra.gmra.mxu1 %v6314_v34  ;;  %v14200_v42 = vld [vmem:[#allocation26_spill] sm:$0xff] }
 0xb62   :  { %6771 = vmatpush.msrb.mxu0 %v10615_v14  ;;  %6832 = vmatpush.msrb.mxu1 %v10609_v10 }
 0xb63   :  { %6936 = vmatpush.msrb.mxu3 %v10605_v5  ;;  %6873 = vmatpush.msrb.mxu2 %v10642_v24 }
 0xb64   :  { %6774 = vmatpush.msrb.mxu0 %v10618_v15  ;;  %6834 = vmatpush.msrb.mxu1 %v10611_v11 }
 0xb65   :  { %6938 = vmatpush.msrb.mxu3 %v10607_v9  ;;  %6877 = vmatpush.msrb.mxu2 %v10649_v26 }
 0xb66   :  { %6777 = vmatpush.msrb.mxu0 %v10621_v16  ;;  %6836 = vmatpush.msrb.mxu1 %v10623_v17 }
 0xb67   :  { %6940 = vmatpush.msrb.mxu3 %v10609_v10  ;;  %6881 = vmatpush.msrb.mxu2 %v10652_v27 }
 0xb68   :  { %6780 = vmatpush.msrb.mxu0 %v10627_v18  ;;  %6838 = vmatpush.msrb.mxu1 %v10632_v20 }
 0xb69   :  { %6582 = vmatmul.f32.vlgmr.msra.gmra.mxu0 %v6314_v34  ;;  %6942 = vmatpush.msrb.mxu3 %v10611_v11  ;;  %v14186_v34 = vld [vmem:[#allocation22_spill] sm:$0xff] }
 0xb6a   :  { %6783 = vmatpush.msrb.mxu0 %v10630_v19  ;;  %6840 = vmatpush.msrb.mxu1 %v10665_v32 }
 0xb6b   :  { %6944 = vmatpush.msrb.mxu3 %v10623_v17  ;;  %6885 = vmatpush.msrb.mxu2 %v10680_v39 }
 0xb6c   :  { %6786 = vmatpush.msrb.mxu0 %v10645_v25  ;;  %6842 = vmatpush.msrb.mxu1 %v10693_v44 }
 0xb6d   :  { %6946 = vmatpush.msrb.mxu3 %v10632_v20  ;;  %6889 = vmatpush.msrb.mxu2 %v10686_v41 }
 0xb6e   :  { %6789 = vmatpush.msrb.mxu0 %v10655_v28  ;;  %6844 = vmatpush.msrb.mxu1 %v10698_v46 }
 0xb6f   :  { %6948 = vmatpush.msrb.mxu3 %v10665_v32  ;;  %6893 = vmatpush.msrb.mxu2 %v10701_v47 }
 0xb70   :  { %6792 = vmatpush.msrb.mxu0 %v10669_v33  ;;  %6846 = vmatpush.msrb.mxu1 %v10714_v52 }
 0xb71   :  { %6950 = vmatpush.msrb.mxu3 %v10693_v44  ;;  %6897 = vmatpush.msrb.mxu2 %v10725_v56 }
 0xb72   :  { %6795 = vmatpush.msrb.mxu0 %v10696_v45  ;;  %6848 = vmatpush.msrb.mxu1 %v10730_v58 }
 0xb73   :  { %6952 = vmatpush.msrb.mxu3 %v10698_v46  ;;  %6901 = vmatpush.msrb.mxu2 %v10741_v62 }
 0xb74   :  { %6798 = vmatpush.msrb.mxu0 %v10712_v51  ;;  %6850 = vmatpush.msrb.mxu1 %v10746_v0 }
 0xb75   :  { %6954 = vmatpush.msrb.mxu3 %v10714_v52  ;;  %6905 = vmatpush.msrb.mxu2 %v10757_v7 }
 0xb76   :  { %6801 = vmatpush.msrb.mxu0 %v13874_v40  ;;  %6852 = vmatpush.msrb.mxu1 %v10762_v12 }
 0xb77   :  { %6956 = vmatpush.msrb.mxu3 %v10730_v58  ;;  %6909 = vmatpush.msrb.mxu2 %v10773_v29 }
 0xb78   :  { %6804 = vmatpush.msrb.mxu0 %v13875_v48  ;;  %6854 = vmatpush.msrb.mxu1 %v10778_v31 }
 0xb79   :  { %6958 = vmatpush.msrb.mxu3 %v10746_v0  ;;  %6913 = vmatpush.msrb.mxu2 %v10789_v38 }
 0xb7a   :  { %6807 = vmatpush.msrb.mxu0 %v13876_v6  ;;  %7018 = vmatpush.msra.mxu1 %v10672_v36 }
 0xb7b   :  { %6960 = vmatpush.msrb.mxu3 %v10762_v12  ;;  %6917 = vmatpush.msrb.mxu2 %v10803_v50 }
 0xb7c   :  { %6810 = vmatpush.msrb.mxu0 %v13877_v8  ;;  %7024 = vmatpush.msra.mxu1 %v10674_v37 }
 0xb7d   :  { %6962 = vmatpush.msrb.mxu3 %v10778_v31  ;;  %6921 = vmatpush.msrb.mxu2 %v10817_v60 }
 0xb7e   :  { %6813 = vmatpush.msrb.mxu0 %v14184_v30  ;;  %7030 = vmatpush.msra.mxu1 %v14185_v21 }
 0xb7f   :  { %6925 = vmatpush.msrb.mxu2 %v14186_v34 }
 0xb80   :  { %6816 = vmatpush.msrb.mxu0 %v14187_v35  ;;  %7036 = vmatpush.msra.mxu1 %v14188_v13 }
 0xb82   :  { %6973 = vmatpush.msra.mxu0 %v10601_v3  ;;  %7042 = vmatpush.msra.mxu1 %v14189_v2 }
 0xb84   :  { %6975 = vmatpush.msra.mxu0 %v10603_v4  ;;  %7048 = vmatpush.msra.mxu1 %v14190_v49 }
 0xb86   :  { %6977 = vmatpush.msra.mxu0 %v10605_v5  ;;  %7054 = vmatpush.msra.mxu1 %v14191_v55 }
 0xb88   :  { %6979 = vmatpush.msra.mxu0 %v10607_v9  ;;  %7060 = vmatpush.msra.mxu1 %v14192_v1 }
 0xb8a   :  { %6981 = vmatpush.msra.mxu0 %v10609_v10  ;;  %7066 = vmatpush.msra.mxu1 %v14193_v63 }
 0xb8c   :  { %6983 = vmatpush.msra.mxu0 %v10611_v11  ;;  %7072 = vmatpush.msra.mxu1 %v14194_v59 }
 0xb8e   :  { %6985 = vmatpush.msra.mxu0 %v10623_v17  ;;  %7078 = vmatpush.msra.mxu1 %v14195_v54 }
 0xb90   :  { %6987 = vmatpush.msra.mxu0 %v10632_v20  ;;  %7084 = vmatpush.msra.mxu1 %v14196_v43 }
 0xb92   :  { %6989 = vmatpush.msra.mxu0 %v10665_v32  ;;  %7090 = vmatpush.msra.mxu1 %v14197_v61  ;;  %v14201_v61 = vld [vmem:[#allocation13_spill] sm:$0xff] }
 0xb93   :  { %v6280_v43 = vrot.slane %v14201_v61, 2 }
 0xb94   :  { %6991 = vmatpush.msra.mxu0 %v10693_v44  ;;  %7096 = vmatpush.msra.mxu1 %v14198_v57 }
 0xb96   :  { %6993 = vmatpush.msra.mxu0 %v10698_v46  ;;  %7102 = vmatpush.msra.mxu1 %v14199_v53 }
 0xb98   :  { %6995 = vmatpush.msra.mxu0 %v10714_v52  ;;  %7108 = vmatpush.msra.mxu1 %v14200_v42 }
 0xb9a   :  { %6997 = vmatpush.msra.mxu0 %v10730_v58 }
 0xb9c   :  { %6999 = vmatpush.msra.mxu0 %v10746_v0 }
 0xb9e   :  { %7001 = vmatpush.msra.mxu0 %v10762_v12 }
 0xba0   :  { %7003 = vmatpush.msra.mxu0 %v10778_v31 }
 0xbd6   :  { %v6421_v54 = vpop.f32.mrf.mxu1 }
 0xbde   :  { %v6320_v57 = vpop.f32.mrf.mxu0  ;;  %v6475_v1 = vpop.f32.mrf.mxu2 }
 0xbdf   :  { %v6321_v59 = vadd.f32 %v6320_v57, %v6280_v43  ;;  %v6620_v13 = vpop.f32.mrf.mxu1  ;;  %v14212_v43 = vld [vmem:[#allocation18_spill] sm:$0xff]  ;;  %v14214_v57 = vld [vmem:[#allocation21_spill] sm:$0xff] }
 0xbe0   :  { %v6514_v55 = vpop.f32.mrf.mxu3 }
 0xbe1   :  { %v6422_v63 = vadd.f32 %v6421_v54, %v6321_v59  ;;  %v14210_v59 = vld [vmem:[#allocation14_spill] sm:$0xff]  ;;  %v14211_v54 = vld [vmem:[#allocation16_spill] sm:$0xff] }
 0xbe3   :  { %v6476_v53 = vadd.f32 %v6475_v1, %v6422_v63  ;;  %v14208_v1 = vld [vmem:[#allocation10_spill] sm:$0xff]  ;;  %v14209_v63 = vld [vmem:[#allocation12_spill] sm:$0xff] }
 0xbe5   :  { %v6515_v49 = vadd.f32 %v6514_v55, %v6476_v53  ;;  %v14215_v53 = vld [vmem:[#allocation23_spill] sm:$0xff] }
 0xbe6   :  { %v6583_v2 = vpop.f32.mrf.mxu0 }
 0xbe7   :  { %v6584_v42 = vadd.f32 %v6583_v2, %v6515_v49  ;;  %v14206_v2 = vld [vmem:[#allocation7_spill] sm:$0xff]  ;;  %v14207_v49 = vld [vmem:[#allocation8_spill] sm:$0xff] }
 0xbe9   :  { %v6621_v35 = vadd.f32 %v6620_v13, %v6584_v42  ;;  %v14205_v13 = vld [vmem:[#allocation19_spill] sm:$0xff]  ;;  %v14216_v42 = vld [vmem:[#allocation24_spill] sm:$0xff] }
 0xbeb   :  { %10506 = vtanh.f32 %v6621_v35 }
 0xbf1   :  { %v10507_v34 = vpop.eup %10506 }
 0xbf2   :  { %6624 = vst [vmem:[#allocation2 + $0x12] sm:$0x1] %v10507_v34  ;;  %v6659_v21 = vand.u32 4294901760, %v10507_v34 }
 0xbf4   :  { %6765 = vmatmul.f32.vlgmr.msra.gmra.mxu3 %v6659_v21  ;;  %v6660_v30 = vsub.f32 %v10507_v34, %v6659_v21  ;;  %v14204_v34 = vld [vmem:[#allocation22_spill] sm:$0xff] }
 0xbf5   :  { %7169 = vmatpush.msra.mxu3 %v10601_v3 }
 0xbf6   :  { %6819 = vmatmul.f32.vlgmr.msrb.gmra.mxu0 %v6660_v30  ;;  %v6661_v61 = vand.u32 4294901760, %v6660_v30 }
 0xbf7   :  { %7171 = vmatpush.msra.mxu3 %v10603_v4  ;;  %7210 = vmatpush.msrb.mxu0 %v10636_v22 }
 0xbf8   :  { %6858 = vmatmul.f32.vlgmr.msrb.gmra.mxu1 %v6661_v61  ;;  %v6662_v55 = vsub.f32 %v6660_v30, %v6661_v61  ;;  %v14202_v30 = vld [vmem:[#allocation17_spill] sm:$0xff]  ;;  %v14213_v61 = vld [vmem:[#allocation20_spill] sm:$0xff] }
 0xbf9   :  { %7173 = vmatpush.msra.mxu3 %v10605_v5  ;;  %7277 = vmatpush.msrb.mxu1 %v10601_v3 }
 0xbfa   :  { %v6663_v35 = vand.u32 4294901760, %v6662_v55  ;;  %7214 = vmatpush.msrb.mxu0 %v10639_v23  ;;  %v14217_v55 = vld [vmem:[#allocation25_spill] sm:$0xff] }
 0xbfb   :  { %7175 = vmatpush.msra.mxu3 %v10607_v9  ;;  %7279 = vmatpush.msrb.mxu1 %v10603_v4 }
 0xbfc   :  { %6664 = vmatmul.f32.vlgmr.msra.gmra.mxu2 %v6663_v35  ;;  %6964 = vmatmul.f32.vlgmr.msrb.gmra.mxu3 %v6659_v21  ;;  %v14218_v35 = vld [vmem:[#allocation26_spill] sm:$0xff] }
 0xbfd   :  { %7116 = vmatpush.msra.mxu2 %v10615_v14  ;;  %7177 = vmatpush.msra.mxu3 %v10609_v10 }
 0xbfe   :  { %7281 = vmatpush.msrb.mxu1 %v10605_v5  ;;  %7218 = vmatpush.msrb.mxu0 %v10642_v24 }
 0xbff   :  { %7119 = vmatpush.msra.mxu2 %v10618_v15  ;;  %7179 = vmatpush.msra.mxu3 %v10611_v11 }
 0xc00   :  { %7283 = vmatpush.msrb.mxu1 %v10607_v9  ;;  %7222 = vmatpush.msrb.mxu0 %v10649_v26 }
 0xc01   :  { %7122 = vmatpush.msra.mxu2 %v10621_v16  ;;  %7181 = vmatpush.msra.mxu3 %v10623_v17 }
 0xc02   :  { %7285 = vmatpush.msrb.mxu1 %v10609_v10  ;;  %7226 = vmatpush.msrb.mxu0 %v10652_v27 }
 0xc03   :  { %7125 = vmatpush.msra.mxu2 %v10627_v18  ;;  %7183 = vmatpush.msra.mxu3 %v10632_v20 }
 0xc04   :  { %6927 = vmatmul.f32.vlgmr.msrb.gmra.mxu2 %v6659_v21  ;;  %7287 = vmatpush.msrb.mxu1 %v10611_v11  ;;  %v14203_v21 = vld [vmem:[#allocation6_spill] sm:$0xff] }
 0xc05   :  { %7128 = vmatpush.msra.mxu2 %v10630_v19  ;;  %7185 = vmatpush.msra.mxu3 %v10665_v32 }
 0xc06   :  { %7289 = vmatpush.msrb.mxu1 %v10623_v17  ;;  %7230 = vmatpush.msrb.mxu0 %v10680_v39 }
 0xc07   :  { %7131 = vmatpush.msra.mxu2 %v10645_v25  ;;  %7187 = vmatpush.msra.mxu3 %v10693_v44 }
 0xc08   :  { %7291 = vmatpush.msrb.mxu1 %v10632_v20  ;;  %7234 = vmatpush.msrb.mxu0 %v10686_v41 }
 0xc09   :  { %7134 = vmatpush.msra.mxu2 %v10655_v28  ;;  %7189 = vmatpush.msra.mxu3 %v10698_v46 }
 0xc0a   :  { %7293 = vmatpush.msrb.mxu1 %v10665_v32  ;;  %7238 = vmatpush.msrb.mxu0 %v10701_v47 }
 0xc0b   :  { %7137 = vmatpush.msra.mxu2 %v10669_v33  ;;  %7191 = vmatpush.msra.mxu3 %v10714_v52 }
 0xc0c   :  { %7295 = vmatpush.msrb.mxu1 %v10693_v44  ;;  %7242 = vmatpush.msrb.mxu0 %v10725_v56 }
 0xc0d   :  { %7140 = vmatpush.msra.mxu2 %v10696_v45  ;;  %7193 = vmatpush.msra.mxu3 %v10730_v58 }
 0xc0e   :  { %7297 = vmatpush.msrb.mxu1 %v10698_v46  ;;  %7246 = vmatpush.msrb.mxu0 %v10741_v62 }
 0xc0f   :  { %7143 = vmatpush.msra.mxu2 %v10712_v51  ;;  %7195 = vmatpush.msra.mxu3 %v10746_v0 }
 0xc10   :  { %7299 = vmatpush.msrb.mxu1 %v10714_v52  ;;  %7250 = vmatpush.msrb.mxu0 %v10757_v7 }
 0xc11   :  { %7146 = vmatpush.msra.mxu2 %v13874_v40  ;;  %7197 = vmatpush.msra.mxu3 %v10762_v12 }
 0xc12   :  { %7301 = vmatpush.msrb.mxu1 %v10730_v58  ;;  %7254 = vmatpush.msrb.mxu0 %v10773_v29 }
 0xc13   :  { %7149 = vmatpush.msra.mxu2 %v13875_v48  ;;  %7199 = vmatpush.msra.mxu3 %v10778_v31 }
 0xc14   :  { %7303 = vmatpush.msrb.mxu1 %v10746_v0  ;;  %7258 = vmatpush.msrb.mxu0 %v10789_v38 }
 0xc15   :  { %7152 = vmatpush.msra.mxu2 %v13876_v6  ;;  %7363 = vmatpush.msrb.mxu3 %v10672_v36 }
 0xc16   :  { %7305 = vmatpush.msrb.mxu1 %v10762_v12  ;;  %7262 = vmatpush.msrb.mxu0 %v10803_v50 }
 0xc17   :  { %7155 = vmatpush.msra.mxu2 %v13877_v8  ;;  %7369 = vmatpush.msrb.mxu3 %v10674_v37 }
 0xc18   :  { %7307 = vmatpush.msrb.mxu1 %v10778_v31  ;;  %7266 = vmatpush.msrb.mxu0 %v10817_v60 }
 0xc19   :  { %7158 = vmatpush.msra.mxu2 %v14202_v30  ;;  %7375 = vmatpush.msrb.mxu3 %v14203_v21 }
 0xc1a   :  { %7270 = vmatpush.msrb.mxu0 %v14204_v34 }
 0xc1b   :  { %7161 = vmatpush.msra.mxu2 %v14205_v13  ;;  %7381 = vmatpush.msrb.mxu3 %v14206_v2 }
 0xc1d   :  { %7318 = vmatpush.msrb.mxu2 %v10601_v3  ;;  %7387 = vmatpush.msrb.mxu3 %v14207_v49 }
 0xc1f   :  { %7320 = vmatpush.msrb.mxu2 %v10603_v4  ;;  %7393 = vmatpush.msrb.mxu3 %v14208_v1 }
 0xc21   :  { %7322 = vmatpush.msrb.mxu2 %v10605_v5  ;;  %7399 = vmatpush.msrb.mxu3 %v14209_v63 }
 0xc23   :  { %7324 = vmatpush.msrb.mxu2 %v10607_v9  ;;  %7405 = vmatpush.msrb.mxu3 %v14210_v59 }
 0xc25   :  { %7326 = vmatpush.msrb.mxu2 %v10609_v10  ;;  %7411 = vmatpush.msrb.mxu3 %v14211_v54 }
 0xc27   :  { %7328 = vmatpush.msrb.mxu2 %v10611_v11  ;;  %7417 = vmatpush.msrb.mxu3 %v14212_v43 }
 0xc29   :  { %7330 = vmatpush.msrb.mxu2 %v10623_v17  ;;  %7423 = vmatpush.msrb.mxu3 %v14213_v61 }
 0xc2b   :  { %7332 = vmatpush.msrb.mxu2 %v10632_v20  ;;  %7429 = vmatpush.msrb.mxu3 %v14214_v57 }
 0xc2d   :  { %7334 = vmatpush.msrb.mxu2 %v10665_v32  ;;  %7435 = vmatpush.msrb.mxu3 %v14215_v53  ;;  %v14219_v53 = vld [vmem:[#allocation13_spill] sm:$0xff] }
 0xc2e   :  { %v6625_v57 = vrot.slane %v14219_v53, 3 }
 0xc2f   :  { %7336 = vmatpush.msrb.mxu2 %v10693_v44  ;;  %7441 = vmatpush.msrb.mxu3 %v14216_v42 }
 0xc31   :  { %7338 = vmatpush.msrb.mxu2 %v10698_v46  ;;  %7447 = vmatpush.msrb.mxu3 %v14217_v55 }
 0xc33   :  { %7340 = vmatpush.msrb.mxu2 %v10714_v52  ;;  %7453 = vmatpush.msrb.mxu3 %v14218_v35 }
 0xc35   :  { %7342 = vmatpush.msrb.mxu2 %v10730_v58 }
 0xc37   :  { %7344 = vmatpush.msrb.mxu2 %v10746_v0 }
 0xc39   :  { %7346 = vmatpush.msrb.mxu2 %v10762_v12 }
 0xc3b   :  { %7348 = vmatpush.msrb.mxu2 %v10778_v31 }
 0xc73   :  { %v6820_v59 = vpop.f32.mrf.mxu0 }
 0xc75   :  { %v6859_v63 = vpop.f32.mrf.mxu1 }
 0xc77   :  { %v6766_v61 = vpop.f32.mrf.mxu3 }
 0xc7f   :  { %v6665_v42 = vpop.f32.mrf.mxu2  ;;  %v6965_v2 = vpop.f32.mrf.mxu3 }
 0xc80   :  { %v6666_v43 = vadd.f32 %v6665_v42, %v6625_v57  ;;  %v14230_v57 = vld [vmem:[#allocation18_spill] sm:$0xff]  ;;  %v14232_v42 = vld [vmem:[#allocation21_spill] sm:$0xff] }
 0xc82   :  { %v6767_v54 = vadd.f32 %v6766_v61, %v6666_v43  ;;  %v14228_v43 = vld [vmem:[#allocation14_spill] sm:$0xff]  ;;  %v14229_v61 = vld [vmem:[#allocation16_spill] sm:$0xff] }
 0xc84   :  { %v6821_v55 = vadd.f32 %v6820_v59, %v6767_v54  ;;  %v14226_v59 = vld [vmem:[#allocation10_spill] sm:$0xff]  ;;  %v14227_v54 = vld [vmem:[#allocation12_spill] sm:$0xff] }
 0xc86   :  { %v6860_v1 = vadd.f32 %v6859_v63, %v6821_v55  ;;  %v14233_v55 = vld [vmem:[#allocation23_spill] sm:$0xff] }
 0xc87   :  { %v6928_v49 = vpop.f32.mrf.mxu2 }
 0xc88   :  { %v6929_v35 = vadd.f32 %v6928_v49, %v6860_v1  ;;  %v14224_v49 = vld [vmem:[#allocation7_spill] sm:$0xff]  ;;  %v14225_v1 = vld [vmem:[#allocation8_spill] sm:$0xff] }
 0xc8a   :  { %v6966_v13 = vadd.f32 %v6965_v2, %v6929_v35  ;;  %v14223_v2 = vld [vmem:[#allocation19_spill] sm:$0xff]  ;;  %v14234_v35 = vld [vmem:[#allocation24_spill] sm:$0xff] }
 0xc8c   :  { %10508 = vtanh.f32 %v6966_v13 }
 0xc92   :  { %v10509_v34 = vpop.eup %10508 }
 0xc93   :  { %6969 = vst [vmem:[#allocation2 + $0x13] sm:$0x1] %v10509_v34  ;;  %v7004_v21 = vand.u32 4294901760, %v10509_v34 }
 0xc95   :  { %7110 = vmatmul.f32.vlgmr.msra.gmra.mxu1 %v7004_v21  ;;  %v7005_v30 = vsub.f32 %v10509_v34, %v7004_v21  ;;  %v14222_v34 = vld [vmem:[#allocation22_spill] sm:$0xff] }
 0xc96   :  { %7514 = vmatpush.msra.mxu1 %v10601_v3 }
 0xc97   :  { %7164 = vmatmul.f32.vlgmr.msra.gmra.mxu2 %v7005_v30  ;;  %v7006_v53 = vand.u32 4294901760, %v7005_v30 }
 0xc98   :  { %7516 = vmatpush.msra.mxu1 %v10603_v4  ;;  %7555 = vmatpush.msra.mxu2 %v10636_v22 }
 0xc99   :  { %7203 = vmatmul.f32.vlgmr.msra.gmra.mxu3 %v7006_v53  ;;  %v7007_v63 = vsub.f32 %v7005_v30, %v7006_v53  ;;  %v14220_v30 = vld [vmem:[#allocation17_spill] sm:$0xff]  ;;  %v14231_v53 = vld [vmem:[#allocation20_spill] sm:$0xff] }
 0xc9a   :  { %7518 = vmatpush.msra.mxu1 %v10605_v5  ;;  %7622 = vmatpush.msra.mxu3 %v10601_v3 }
 0xc9b   :  { %v7008_v13 = vand.u32 4294901760, %v7007_v63  ;;  %7559 = vmatpush.msra.mxu2 %v10639_v23  ;;  %v14235_v63 = vld [vmem:[#allocation25_spill] sm:$0xff] }
 0xc9c   :  { %7520 = vmatpush.msra.mxu1 %v10607_v9  ;;  %7624 = vmatpush.msra.mxu3 %v10603_v4 }
 0xc9d   :  { %7009 = vmatmul.f32.vlgmr.msra.gmra.mxu0 %v7008_v13  ;;  %7309 = vmatmul.f32.vlgmr.msrb.gmra.mxu1 %v7004_v21  ;;  %v14236_v13 = vld [vmem:[#allocation26_spill] sm:$0xff] }
 0xc9e   :  { %7461 = vmatpush.msra.mxu0 %v10615_v14  ;;  %7522 = vmatpush.msra.mxu1 %v10609_v10 }
 0xc9f   :  { %7626 = vmatpush.msra.mxu3 %v10605_v5  ;;  %7563 = vmatpush.msra.mxu2 %v10642_v24 }
 0xca0   :  { %7464 = vmatpush.msra.mxu0 %v10618_v15  ;;  %7524 = vmatpush.msra.mxu1 %v10611_v11 }
 0xca1   :  { %7628 = vmatpush.msra.mxu3 %v10607_v9  ;;  %7567 = vmatpush.msra.mxu2 %v10649_v26 }
 0xca2   :  { %7467 = vmatpush.msra.mxu0 %v10621_v16  ;;  %7526 = vmatpush.msra.mxu1 %v10623_v17 }
 0xca3   :  { %7630 = vmatpush.msra.mxu3 %v10609_v10  ;;  %7571 = vmatpush.msra.mxu2 %v10652_v27 }
 0xca4   :  { %7470 = vmatpush.msra.mxu0 %v10627_v18  ;;  %7528 = vmatpush.msra.mxu1 %v10632_v20 }
 0xca5   :  { %7272 = vmatmul.f32.vlgmr.msrb.gmra.mxu0 %v7004_v21  ;;  %7632 = vmatpush.msra.mxu3 %v10611_v11  ;;  %v14221_v21 = vld [vmem:[#allocation6_spill] sm:$0xff] }
 0xca6   :  { %7473 = vmatpush.msra.mxu0 %v10630_v19  ;;  %7530 = vmatpush.msra.mxu1 %v10665_v32 }
 0xca7   :  { %7634 = vmatpush.msra.mxu3 %v10623_v17  ;;  %7575 = vmatpush.msra.mxu2 %v10680_v39 }
 0xca8   :  { %7476 = vmatpush.msra.mxu0 %v10645_v25  ;;  %7532 = vmatpush.msra.mxu1 %v10693_v44 }
 0xca9   :  { %7636 = vmatpush.msra.mxu3 %v10632_v20  ;;  %7579 = vmatpush.msra.mxu2 %v10686_v41 }
 0xcaa   :  { %7479 = vmatpush.msra.mxu0 %v10655_v28  ;;  %7534 = vmatpush.msra.mxu1 %v10698_v46 }
 0xcab   :  { %7638 = vmatpush.msra.mxu3 %v10665_v32  ;;  %7583 = vmatpush.msra.mxu2 %v10701_v47 }
 0xcac   :  { %7482 = vmatpush.msra.mxu0 %v10669_v33  ;;  %7536 = vmatpush.msra.mxu1 %v10714_v52 }
 0xcad   :  { %7640 = vmatpush.msra.mxu3 %v10693_v44  ;;  %7587 = vmatpush.msra.mxu2 %v10725_v56 }
 0xcae   :  { %7485 = vmatpush.msra.mxu0 %v10696_v45  ;;  %7538 = vmatpush.msra.mxu1 %v10730_v58 }
 0xcaf   :  { %7642 = vmatpush.msra.mxu3 %v10698_v46  ;;  %7591 = vmatpush.msra.mxu2 %v10741_v62 }
 0xcb0   :  { %7488 = vmatpush.msra.mxu0 %v10712_v51  ;;  %7540 = vmatpush.msra.mxu1 %v10746_v0 }
 0xcb1   :  { %7644 = vmatpush.msra.mxu3 %v10714_v52  ;;  %7595 = vmatpush.msra.mxu2 %v10757_v7 }
 0xcb2   :  { %7491 = vmatpush.msra.mxu0 %v13874_v40  ;;  %7542 = vmatpush.msra.mxu1 %v10762_v12 }
 0xcb3   :  { %7646 = vmatpush.msra.mxu3 %v10730_v58  ;;  %7599 = vmatpush.msra.mxu2 %v10773_v29 }
 0xcb4   :  { %7494 = vmatpush.msra.mxu0 %v13875_v48  ;;  %7544 = vmatpush.msra.mxu1 %v10778_v31 }
 0xcb5   :  { %7648 = vmatpush.msra.mxu3 %v10746_v0  ;;  %7603 = vmatpush.msra.mxu2 %v10789_v38 }
 0xcb6   :  { %7497 = vmatpush.msra.mxu0 %v13876_v6  ;;  %7708 = vmatpush.msrb.mxu1 %v10672_v36 }
 0xcb7   :  { %7650 = vmatpush.msra.mxu3 %v10762_v12  ;;  %7607 = vmatpush.msra.mxu2 %v10803_v50 }
 0xcb8   :  { %7500 = vmatpush.msra.mxu0 %v13877_v8  ;;  %7714 = vmatpush.msrb.mxu1 %v10674_v37 }
 0xcb9   :  { %7652 = vmatpush.msra.mxu3 %v10778_v31  ;;  %7611 = vmatpush.msra.mxu2 %v10817_v60 }
 0xcba   :  { %7503 = vmatpush.msra.mxu0 %v14220_v30  ;;  %7720 = vmatpush.msrb.mxu1 %v14221_v21 }
 0xcbb   :  { %7615 = vmatpush.msra.mxu2 %v14222_v34 }
 0xcbc   :  { %7506 = vmatpush.msra.mxu0 %v14223_v2  ;;  %7726 = vmatpush.msrb.mxu1 %v14224_v49 }
 0xcbe   :  { %7663 = vmatpush.msrb.mxu0 %v10601_v3  ;;  %7732 = vmatpush.msrb.mxu1 %v14225_v1 }
 0xcc0   :  { %7665 = vmatpush.msrb.mxu0 %v10603_v4  ;;  %7738 = vmatpush.msrb.mxu1 %v14226_v59 }
 0xcc2   :  { %7667 = vmatpush.msrb.mxu0 %v10605_v5  ;;  %7744 = vmatpush.msrb.mxu1 %v14227_v54 }
 0xcc4   :  { %7669 = vmatpush.msrb.mxu0 %v10607_v9  ;;  %7750 = vmatpush.msrb.mxu1 %v14228_v43 }
 0xcc6   :  { %7671 = vmatpush.msrb.mxu0 %v10609_v10  ;;  %7756 = vmatpush.msrb.mxu1 %v14229_v61 }
 0xcc8   :  { %7673 = vmatpush.msrb.mxu0 %v10611_v11  ;;  %7762 = vmatpush.msrb.mxu1 %v14230_v57 }
 0xcca   :  { %7675 = vmatpush.msrb.mxu0 %v10623_v17  ;;  %7768 = vmatpush.msrb.mxu1 %v14231_v53 }
 0xccc   :  { %7677 = vmatpush.msrb.mxu0 %v10632_v20  ;;  %7774 = vmatpush.msrb.mxu1 %v14232_v42 }
 0xcce   :  { %7679 = vmatpush.msrb.mxu0 %v10665_v32  ;;  %7780 = vmatpush.msrb.mxu1 %v14233_v55  ;;  %v14237_v55 = vld [vmem:[#allocation13_spill] sm:$0xff] }
 0xccf   :  { %v6970_v42 = vrot.slane %v14237_v55, 4 }
 0xcd0   :  { %7681 = vmatpush.msrb.mxu0 %v10693_v44  ;;  %7786 = vmatpush.msrb.mxu1 %v14234_v35 }
 0xcd2   :  { %7683 = vmatpush.msrb.mxu0 %v10698_v46  ;;  %7792 = vmatpush.msrb.mxu1 %v14235_v63 }
 0xcd4   :  { %7685 = vmatpush.msrb.mxu0 %v10714_v52  ;;  %7798 = vmatpush.msrb.mxu1 %v14236_v13 }
 0xcd6   :  { %7687 = vmatpush.msrb.mxu0 %v10730_v58 }
 0xcd8   :  { %7689 = vmatpush.msrb.mxu0 %v10746_v0 }
 0xcda   :  { %7691 = vmatpush.msrb.mxu0 %v10762_v12 }
 0xcdc   :  { %7693 = vmatpush.msrb.mxu0 %v10778_v31 }
 0xd12   :  { %v7111_v53 = vpop.f32.mrf.mxu1 }
 0xd1a   :  { %v7010_v35 = vpop.f32.mrf.mxu0  ;;  %v7165_v43 = vpop.f32.mrf.mxu2 }
 0xd1b   :  { %v7011_v57 = vadd.f32 %v7010_v35, %v6970_v42  ;;  %v7310_v49 = vpop.f32.mrf.mxu1  ;;  %v14248_v42 = vld [vmem:[#allocation18_spill] sm:$0xff]  ;;  %v14250_v35 = vld [vmem:[#allocation21_spill] sm:$0xff] }
 0xd1c   :  { %v7204_v54 = vpop.f32.mrf.mxu3 }
 0xd1d   :  { %v7112_v61 = vadd.f32 %v7111_v53, %v7011_v57  ;;  %v14246_v57 = vld [vmem:[#allocation14_spill] sm:$0xff]  ;;  %v14247_v53 = vld [vmem:[#allocation16_spill] sm:$0xff] }
 0xd1f   :  { %v7166_v63 = vadd.f32 %v7165_v43, %v7112_v61  ;;  %v14244_v43 = vld [vmem:[#allocation10_spill] sm:$0xff]  ;;  %v14245_v61 = vld [vmem:[#allocation12_spill] sm:$0xff] }
 0xd21   :  { %v7205_v59 = vadd.f32 %v7204_v54, %v7166_v63  ;;  %v14251_v63 = vld [vmem:[#allocation23_spill] sm:$0xff] }
 0xd22   :  { %v7273_v1 = vpop.f32.mrf.mxu0 }
 0xd23   :  { %v7274_v13 = vadd.f32 %v7273_v1, %v7205_v59  ;;  %v14242_v1 = vld [vmem:[#allocation7_spill] sm:$0xff]  ;;  %v14243_v59 = vld [vmem:[#allocation8_spill] sm:$0xff] }
 0xd25   :  { %v7311_v2 = vadd.f32 %v7310_v49, %v7274_v13  ;;  %v14241_v49 = vld [vmem:[#allocation19_spill] sm:$0xff]  ;;  %v14252_v13 = vld [vmem:[#allocation24_spill] sm:$0xff] }
 0xd27   :  { %10510 = vtanh.f32 %v7311_v2 }
 0xd2d   :  { %v10511_v34 = vpop.eup %10510 }
 0xd2e   :  { %7314 = vst [vmem:[#allocation2 + $0x14] sm:$0x1] %v10511_v34  ;;  %v7349_v21 = vand.u32 4294901760, %v10511_v34 }
 0xd30   :  { %7455 = vmatmul.f32.vlgmr.msrb.gmra.mxu3 %v7349_v21  ;;  %v7350_v30 = vsub.f32 %v10511_v34, %v7349_v21  ;;  %v14240_v34 = vld [vmem:[#allocation22_spill] sm:$0xff] }
 0xd31   :  { %7859 = vmatpush.msrb.mxu3 %v10601_v3 }
 0xd32   :  { %7509 = vmatmul.f32.vlgmr.msra.gmra.mxu0 %v7350_v30  ;;  %v7351_v55 = vand.u32 4294901760, %v7350_v30 }
 0xd33   :  { %7861 = vmatpush.msrb.mxu3 %v10603_v4  ;;  %7900 = vmatpush.msra.mxu0 %v10636_v22 }
 0xd34   :  { %7548 = vmatmul.f32.vlgmr.msra.gmra.mxu1 %v7351_v55  ;;  %v7352_v54 = vsub.f32 %v7350_v30, %v7351_v55  ;;  %v14238_v30 = vld [vmem:[#allocation17_spill] sm:$0xff]  ;;  %v14249_v55 = vld [vmem:[#allocation20_spill] sm:$0xff] }
 0xd35   :  { %7863 = vmatpush.msrb.mxu3 %v10605_v5  ;;  %7967 = vmatpush.msra.mxu1 %v10601_v3 }
 0xd36   :  { %v7353_v2 = vand.u32 4294901760, %v7352_v54  ;;  %7904 = vmatpush.msra.mxu0 %v10639_v23  ;;  %v14253_v54 = vld [vmem:[#allocation25_spill] sm:$0xff] }
 0xd37   :  { %7865 = vmatpush.msrb.mxu3 %v10607_v9  ;;  %7969 = vmatpush.msra.mxu1 %v10603_v4 }
 0xd38   :  { %7354 = vmatmul.f32.vlgmr.msrb.gmra.mxu2 %v7353_v2  ;;  %7654 = vmatmul.f32.vlgmr.msra.gmra.mxu3 %v7349_v21  ;;  %v14254_v2 = vld [vmem:[#allocation26_spill] sm:$0xff] }
 0xd39   :  { %7806 = vmatpush.msrb.mxu2 %v10615_v14  ;;  %7867 = vmatpush.msrb.mxu3 %v10609_v10 }
 0xd3a   :  { %7971 = vmatpush.msra.mxu1 %v10605_v5  ;;  %7908 = vmatpush.msra.mxu0 %v10642_v24 }
 0xd3b   :  { %7809 = vmatpush.msrb.mxu2 %v10618_v15  ;;  %7869 = vmatpush.msrb.mxu3 %v10611_v11 }
 0xd3c   :  { %7973 = vmatpush.msra.mxu1 %v10607_v9  ;;  %7912 = vmatpush.msra.mxu0 %v10649_v26 }
 0xd3d   :  { %7812 = vmatpush.msrb.mxu2 %v10621_v16  ;;  %7871 = vmatpush.msrb.mxu3 %v10623_v17 }
 0xd3e   :  { %7975 = vmatpush.msra.mxu1 %v10609_v10  ;;  %7916 = vmatpush.msra.mxu0 %v10652_v27 }
 0xd3f   :  { %7815 = vmatpush.msrb.mxu2 %v10627_v18  ;;  %7873 = vmatpush.msrb.mxu3 %v10632_v20 }
 0xd40   :  { %7617 = vmatmul.f32.vlgmr.msra.gmra.mxu2 %v7349_v21  ;;  %7977 = vmatpush.msra.mxu1 %v10611_v11  ;;  %v14239_v21 = vld [vmem:[#allocation6_spill] sm:$0xff] }
 0xd41   :  { %7818 = vmatpush.msrb.mxu2 %v10630_v19  ;;  %7875 = vmatpush.msrb.mxu3 %v10665_v32 }
 0xd42   :  { %7979 = vmatpush.msra.mxu1 %v10623_v17  ;;  %7920 = vmatpush.msra.mxu0 %v10680_v39 }
 0xd43   :  { %7821 = vmatpush.msrb.mxu2 %v10645_v25  ;;  %7877 = vmatpush.msrb.mxu3 %v10693_v44 }
 0xd44   :  { %7981 = vmatpush.msra.mxu1 %v10632_v20  ;;  %7924 = vmatpush.msra.mxu0 %v10686_v41 }
 0xd45   :  { %7824 = vmatpush.msrb.mxu2 %v10655_v28  ;;  %7879 = vmatpush.msrb.mxu3 %v10698_v46 }
 0xd46   :  { %7983 = vmatpush.msra.mxu1 %v10665_v32  ;;  %7928 = vmatpush.msra.mxu0 %v10701_v47 }
 0xd47   :  { %7827 = vmatpush.msrb.mxu2 %v10669_v33  ;;  %7881 = vmatpush.msrb.mxu3 %v10714_v52 }
 0xd48   :  { %7985 = vmatpush.msra.mxu1 %v10693_v44  ;;  %7932 = vmatpush.msra.mxu0 %v10725_v56 }
 0xd49   :  { %7830 = vmatpush.msrb.mxu2 %v10696_v45  ;;  %7883 = vmatpush.msrb.mxu3 %v10730_v58 }
 0xd4a   :  { %7987 = vmatpush.msra.mxu1 %v10698_v46  ;;  %7936 = vmatpush.msra.mxu0 %v10741_v62 }
 0xd4b   :  { %7833 = vmatpush.msrb.mxu2 %v10712_v51  ;;  %7885 = vmatpush.msrb.mxu3 %v10746_v0 }
 0xd4c   :  { %7989 = vmatpush.msra.mxu1 %v10714_v52  ;;  %7940 = vmatpush.msra.mxu0 %v10757_v7 }
 0xd4d   :  { %7836 = vmatpush.msrb.mxu2 %v13874_v40  ;;  %7887 = vmatpush.msrb.mxu3 %v10762_v12 }
 0xd4e   :  { %7991 = vmatpush.msra.mxu1 %v10730_v58  ;;  %7944 = vmatpush.msra.mxu0 %v10773_v29 }
 0xd4f   :  { %7839 = vmatpush.msrb.mxu2 %v13875_v48  ;;  %7889 = vmatpush.msrb.mxu3 %v10778_v31 }
 0xd50   :  { %7993 = vmatpush.msra.mxu1 %v10746_v0  ;;  %7948 = vmatpush.msra.mxu0 %v10789_v38 }
 0xd51   :  { %7842 = vmatpush.msrb.mxu2 %v13876_v6  ;;  %8053 = vmatpush.msra.mxu3 %v10672_v36 }
 0xd52   :  { %7995 = vmatpush.msra.mxu1 %v10762_v12  ;;  %7952 = vmatpush.msra.mxu0 %v10803_v50 }
 0xd53   :  { %7845 = vmatpush.msrb.mxu2 %v13877_v8  ;;  %8059 = vmatpush.msra.mxu3 %v10674_v37 }
 0xd54   :  { %7997 = vmatpush.msra.mxu1 %v10778_v31  ;;  %7956 = vmatpush.msra.mxu0 %v10817_v60 }
 0xd55   :  { %7848 = vmatpush.msrb.mxu2 %v14238_v30  ;;  %8065 = vmatpush.msra.mxu3 %v14239_v21 }
 0xd56   :  { %7960 = vmatpush.msra.mxu0 %v14240_v34 }
 0xd57   :  { %7851 = vmatpush.msrb.mxu2 %v14241_v49  ;;  %8071 = vmatpush.msra.mxu3 %v14242_v1 }
 0xd59   :  { %8008 = vmatpush.msra.mxu2 %v10601_v3  ;;  %8077 = vmatpush.msra.mxu3 %v14243_v59 }
 0xd5b   :  { %8010 = vmatpush.msra.mxu2 %v10603_v4  ;;  %8083 = vmatpush.msra.mxu3 %v14244_v43 }
 0xd5d   :  { %8012 = vmatpush.msra.mxu2 %v10605_v5  ;;  %8089 = vmatpush.msra.mxu3 %v14245_v61 }
 0xd5f   :  { %8014 = vmatpush.msra.mxu2 %v10607_v9  ;;  %8095 = vmatpush.msra.mxu3 %v14246_v57 }
 0xd61   :  { %8016 = vmatpush.msra.mxu2 %v10609_v10  ;;  %8101 = vmatpush.msra.mxu3 %v14247_v53 }
 0xd63   :  { %8018 = vmatpush.msra.mxu2 %v10611_v11  ;;  %8107 = vmatpush.msra.mxu3 %v14248_v42 }
 0xd65   :  { %8020 = vmatpush.msra.mxu2 %v10623_v17  ;;  %8113 = vmatpush.msra.mxu3 %v14249_v55 }
 0xd67   :  { %8022 = vmatpush.msra.mxu2 %v10632_v20  ;;  %8119 = vmatpush.msra.mxu3 %v14250_v35 }
 0xd69   :  { %8024 = vmatpush.msra.mxu2 %v10665_v32  ;;  %8125 = vmatpush.msra.mxu3 %v14251_v63  ;;  %v14255_v63 = vld [vmem:[#allocation13_spill] sm:$0xff] }
 0xd6a   :  { %v7315_v35 = vrot.slane %v14255_v63, 5 }
 0xd6b   :  { %8026 = vmatpush.msra.mxu2 %v10693_v44  ;;  %8131 = vmatpush.msra.mxu3 %v14252_v13 }
 0xd6d   :  { %8028 = vmatpush.msra.mxu2 %v10698_v46  ;;  %8137 = vmatpush.msra.mxu3 %v14253_v54 }
 0xd6f   :  { %8030 = vmatpush.msra.mxu2 %v10714_v52  ;;  %8143 = vmatpush.msra.mxu3 %v14254_v2 }
 0xd71   :  { %8032 = vmatpush.msra.mxu2 %v10730_v58 }
 0xd73   :  { %8034 = vmatpush.msra.mxu2 %v10746_v0 }
 0xd75   :  { %8036 = vmatpush.msra.mxu2 %v10762_v12 }
 0xd77   :  { %8038 = vmatpush.msra.mxu2 %v10778_v31 }
 0xdaf   :  { %v7510_v57 = vpop.f32.mrf.mxu0 }
 0xdb1   :  { %v7549_v61 = vpop.f32.mrf.mxu1 }
 0xdb3   :  { %v7456_v55 = vpop.f32.mrf.mxu3 }
 0xdbb   :  { %v7355_v13 = vpop.f32.mrf.mxu2  ;;  %v7655_v1 = vpop.f32.mrf.mxu3 }
 0xdbc   :  { %v7356_v42 = vadd.f32 %v7355_v13, %v7315_v35  ;;  %v14266_v35 = vld [vmem:[#allocation18_spill] sm:$0xff]  ;;  %v14268_v13 = vld [vmem:[#allocation21_spill] sm:$0xff] }
 0xdbe   :  { %v7457_v53 = vadd.f32 %v7456_v55, %v7356_v42  ;;  %v14264_v42 = vld [vmem:[#allocation14_spill] sm:$0xff]  ;;  %v14265_v55 = vld [vmem:[#allocation16_spill] sm:$0xff] }
 0xdc0   :  { %v7511_v54 = vadd.f32 %v7510_v57, %v7457_v53  ;;  %v14262_v57 = vld [vmem:[#allocation10_spill] sm:$0xff]  ;;  %v14263_v53 = vld [vmem:[#allocation12_spill] sm:$0xff] }
 0xdc2   :  { %v7550_v43 = vadd.f32 %v7549_v61, %v7511_v54  ;;  %v14269_v54 = vld [vmem:[#allocation23_spill] sm:$0xff] }
 0xdc3   :  { %v7618_v59 = vpop.f32.mrf.mxu2 }
 0xdc4   :  { %v7619_v2 = vadd.f32 %v7618_v59, %v7550_v43  ;;  %v14260_v59 = vld [vmem:[#allocation7_spill] sm:$0xff]  ;;  %v14261_v43 = vld [vmem:[#allocation8_spill] sm:$0xff] }
 0xdc6   :  { %v7656_v49 = vadd.f32 %v7655_v1, %v7619_v2  ;;  %v14259_v1 = vld [vmem:[#allocation19_spill] sm:$0xff]  ;;  %v14270_v2 = vld [vmem:[#allocation24_spill] sm:$0xff] }
 0xdc8   :  { %10512 = vtanh.f32 %v7656_v49 }
 0xdce   :  { %v10513_v34 = vpop.eup %10512 }
 0xdcf   :  { %7659 = vst [vmem:[#allocation2 + $0x15] sm:$0x1] %v10513_v34  ;;  %v7694_v21 = vand.u32 4294901760, %v10513_v34 }
 0xdd1   :  { %7800 = vmatmul.f32.vlgmr.msrb.gmra.mxu1 %v7694_v21  ;;  %v7695_v30 = vsub.f32 %v10513_v34, %v7694_v21  ;;  %v14258_v34 = vld [vmem:[#allocation22_spill] sm:$0xff] }
 0xdd2   :  { %8204 = vmatpush.msrb.mxu1 %v10601_v3 }
 0xdd3   :  { %7854 = vmatmul.f32.vlgmr.msrb.gmra.mxu2 %v7695_v30  ;;  %v7696_v63 = vand.u32 4294901760, %v7695_v30 }
 0xdd4   :  { %8206 = vmatpush.msrb.mxu1 %v10603_v4  ;;  %8245 = vmatpush.msrb.mxu2 %v10636_v22 }
 0xdd5   :  { %7893 = vmatmul.f32.vlgmr.msrb.gmra.mxu3 %v7696_v63  ;;  %v7697_v61 = vsub.f32 %v7695_v30, %v7696_v63  ;;  %v14256_v30 = vld [vmem:[#allocation17_spill] sm:$0xff]  ;;  %v14267_v63 = vld [vmem:[#allocation20_spill] sm:$0xff] }
 0xdd6   :  { %8208 = vmatpush.msrb.mxu1 %v10605_v5  ;;  %8312 = vmatpush.msrb.mxu3 %v10601_v3 }
 0xdd7   :  { %v7698_v49 = vand.u32 4294901760, %v7697_v61  ;;  %8249 = vmatpush.msrb.mxu2 %v10639_v23  ;;  %v14271_v61 = vld [vmem:[#allocation25_spill] sm:$0xff] }
 0xdd8   :  { %8210 = vmatpush.msrb.mxu1 %v10607_v9  ;;  %8314 = vmatpush.msrb.mxu3 %v10603_v4 }
 0xdd9   :  { %7699 = vmatmul.f32.vlgmr.msrb.gmra.mxu0 %v7698_v49  ;;  %7999 = vmatmul.f32.vlgmr.msra.gmra.mxu1 %v7694_v21  ;;  %v14272_v49 = vld [vmem:[#allocation26_spill] sm:$0xff] }
 0xdda   :  { %8151 = vmatpush.msrb.mxu0 %v10615_v14  ;;  %8212 = vmatpush.msrb.mxu1 %v10609_v10 }
 0xddb   :  { %8316 = vmatpush.msrb.mxu3 %v10605_v5  ;;  %8253 = vmatpush.msrb.mxu2 %v10642_v24 }
 0xddc   :  { %8154 = vmatpush.msrb.mxu0 %v10618_v15  ;;  %8214 = vmatpush.msrb.mxu1 %v10611_v11 }
 0xddd   :  { %8318 = vmatpush.msrb.mxu3 %v10607_v9  ;;  %8257 = vmatpush.msrb.mxu2 %v10649_v26 }
 0xdde   :  { %8157 = vmatpush.msrb.mxu0 %v10621_v16  ;;  %8216 = vmatpush.msrb.mxu1 %v10623_v17 }
 0xddf   :  { %8320 = vmatpush.msrb.mxu3 %v10609_v10  ;;  %8261 = vmatpush.msrb.mxu2 %v10652_v27 }
 0xde0   :  { %8160 = vmatpush.msrb.mxu0 %v10627_v18  ;;  %8218 = vmatpush.msrb.mxu1 %v10632_v20 }
 0xde1   :  { %7962 = vmatmul.f32.vlgmr.msra.gmra.mxu0 %v7694_v21  ;;  %8322 = vmatpush.msrb.mxu3 %v10611_v11  ;;  %v14257_v21 = vld [vmem:[#allocation6_spill] sm:$0xff] }
 0xde2   :  { %8163 = vmatpush.msrb.mxu0 %v10630_v19  ;;  %8220 = vmatpush.msrb.mxu1 %v10665_v32 }
 0xde3   :  { %8324 = vmatpush.msrb.mxu3 %v10623_v17  ;;  %8265 = vmatpush.msrb.mxu2 %v10680_v39 }
 0xde4   :  { %8166 = vmatpush.msrb.mxu0 %v10645_v25  ;;  %8222 = vmatpush.msrb.mxu1 %v10693_v44 }
 0xde5   :  { %8326 = vmatpush.msrb.mxu3 %v10632_v20  ;;  %8269 = vmatpush.msrb.mxu2 %v10686_v41 }
 0xde6   :  { %8169 = vmatpush.msrb.mxu0 %v10655_v28  ;;  %8224 = vmatpush.msrb.mxu1 %v10698_v46 }
 0xde7   :  { %8328 = vmatpush.msrb.mxu3 %v10665_v32  ;;  %8273 = vmatpush.msrb.mxu2 %v10701_v47 }
 0xde8   :  { %8172 = vmatpush.msrb.mxu0 %v10669_v33  ;;  %8226 = vmatpush.msrb.mxu1 %v10714_v52 }
 0xde9   :  { %8330 = vmatpush.msrb.mxu3 %v10693_v44  ;;  %8277 = vmatpush.msrb.mxu2 %v10725_v56 }
 0xdea   :  { %8175 = vmatpush.msrb.mxu0 %v10696_v45  ;;  %8228 = vmatpush.msrb.mxu1 %v10730_v58 }
 0xdeb   :  { %8332 = vmatpush.msrb.mxu3 %v10698_v46  ;;  %8281 = vmatpush.msrb.mxu2 %v10741_v62 }
 0xdec   :  { %8178 = vmatpush.msrb.mxu0 %v10712_v51  ;;  %8230 = vmatpush.msrb.mxu1 %v10746_v0 }
 0xded   :  { %8334 = vmatpush.msrb.mxu3 %v10714_v52  ;;  %8285 = vmatpush.msrb.mxu2 %v10757_v7 }
 0xdee   :  { %8181 = vmatpush.msrb.mxu0 %v13874_v40  ;;  %8232 = vmatpush.msrb.mxu1 %v10762_v12 }
 0xdef   :  { %8336 = vmatpush.msrb.mxu3 %v10730_v58  ;;  %8289 = vmatpush.msrb.mxu2 %v10773_v29 }
 0xdf0   :  { %8184 = vmatpush.msrb.mxu0 %v13875_v48  ;;  %8234 = vmatpush.msrb.mxu1 %v10778_v31 }
 0xdf1   :  { %8338 = vmatpush.msrb.mxu3 %v10746_v0  ;;  %8293 = vmatpush.msrb.mxu2 %v10789_v38 }
 0xdf2   :  { %8187 = vmatpush.msrb.mxu0 %v13876_v6  ;;  %8396 = vmatpush.msra.mxu1 %v10672_v36 }
 0xdf3   :  { %8340 = vmatpush.msrb.mxu3 %v10762_v12  ;;  %8297 = vmatpush.msrb.mxu2 %v10803_v50 }
 0xdf4   :  { %8190 = vmatpush.msrb.mxu0 %v13877_v8  ;;  %8402 = vmatpush.msra.mxu1 %v10674_v37 }
 0xdf5   :  { %8342 = vmatpush.msrb.mxu3 %v10778_v31  ;;  %8301 = vmatpush.msrb.mxu2 %v10817_v60 }
 0xdf6   :  { %8193 = vmatpush.msrb.mxu0 %v14256_v30  ;;  %8408 = vmatpush.msra.mxu1 %v14257_v21 }
 0xdf7   :  { %8305 = vmatpush.msrb.mxu2 %v14258_v34 }
 0xdf8   :  { %8196 = vmatpush.msrb.mxu0 %v14259_v1  ;;  %8414 = vmatpush.msra.mxu1 %v14260_v59 }
 0xdfa   :  { %8351 = vmatpush.msra.mxu0 %v10601_v3  ;;  %8420 = vmatpush.msra.mxu1 %v14261_v43 }
 0xdfc   :  { %8353 = vmatpush.msra.mxu0 %v10603_v4  ;;  %8426 = vmatpush.msra.mxu1 %v14262_v57 }
 0xdfe   :  { %8355 = vmatpush.msra.mxu0 %v10605_v5  ;;  %8432 = vmatpush.msra.mxu1 %v14263_v53 }
 0xe00   :  { %8357 = vmatpush.msra.mxu0 %v10607_v9  ;;  %8438 = vmatpush.msra.mxu1 %v14264_v42 }
 0xe02   :  { %8359 = vmatpush.msra.mxu0 %v10609_v10  ;;  %8444 = vmatpush.msra.mxu1 %v14265_v55 }
 0xe04   :  { %8361 = vmatpush.msra.mxu0 %v10611_v11  ;;  %8450 = vmatpush.msra.mxu1 %v14266_v35 }
 0xe06   :  { %8363 = vmatpush.msra.mxu0 %v10623_v17  ;;  %8456 = vmatpush.msra.mxu1 %v14267_v63 }
 0xe08   :  { %8365 = vmatpush.msra.mxu0 %v10632_v20  ;;  %8462 = vmatpush.msra.mxu1 %v14268_v13 }
 0xe0a   :  { %8367 = vmatpush.msra.mxu0 %v10665_v32  ;;  %8468 = vmatpush.msra.mxu1 %v14269_v54  ;;  %v14273_v54 = vld [vmem:[#allocation13_spill] sm:$0xff] }
 0xe0b   :  { %v7660_v13 = vrot.slane %v14273_v54, 6 }
 0xe0c   :  { %8369 = vmatpush.msra.mxu0 %v10693_v44  ;;  %8474 = vmatpush.msra.mxu1 %v14270_v2 }
 0xe0e   :  { %8371 = vmatpush.msra.mxu0 %v10698_v46  ;;  %8480 = vmatpush.msra.mxu1 %v14271_v61 }
 0xe10   :  { %8373 = vmatpush.msra.mxu0 %v10714_v52  ;;  %8486 = vmatpush.msra.mxu1 %v14272_v49 }
 0xe12   :  { %8375 = vmatpush.msra.mxu0 %v10730_v58 }
 0xe14   :  { %8377 = vmatpush.msra.mxu0 %v10746_v0 }
 0xe16   :  { %8379 = vmatpush.msra.mxu0 %v10762_v12 }
 0xe18   :  { %8381 = vmatpush.msra.mxu0 %v10778_v31 }
 0xe4e   :  { %v7801_v63 = vpop.f32.mrf.mxu1 }
 0xe56   :  { %v7700_v2 = vpop.f32.mrf.mxu0  ;;  %v7855_v42 = vpop.f32.mrf.mxu2 }
 0xe57   :  { %v7701_v35 = vadd.f32 %v7700_v2, %v7660_v13  ;;  %v8000_v59 = vpop.f32.mrf.mxu1  ;;  %v14284_v13 = vld [vmem:[#allocation18_spill] sm:$0xff]  ;;  %v14286_v2 = vld [vmem:[#allocation21_spill] sm:$0xff] }
 0xe58   :  { %v7894_v53 = vpop.f32.mrf.mxu3 }
 0xe59   :  { %v7802_v55 = vadd.f32 %v7801_v63, %v7701_v35  ;;  %v14282_v35 = vld [vmem:[#allocation14_spill] sm:$0xff]  ;;  %v14283_v63 = vld [vmem:[#allocation16_spill] sm:$0xff] }
 0xe5b   :  { %v7856_v61 = vadd.f32 %v7855_v42, %v7802_v55  ;;  %v14280_v42 = vld [vmem:[#allocation10_spill] sm:$0xff]  ;;  %v14281_v55 = vld [vmem:[#allocation12_spill] sm:$0xff] }
 0xe5d   :  { %v7895_v57 = vadd.f32 %v7894_v53, %v7856_v61  ;;  %v14287_v61 = vld [vmem:[#allocation23_spill] sm:$0xff] }
 0xe5e   :  { %v7963_v43 = vpop.f32.mrf.mxu0 }
 0xe5f   :  { %v7964_v49 = vadd.f32 %v7963_v43, %v7895_v57  ;;  %v14278_v43 = vld [vmem:[#allocation7_spill] sm:$0xff]  ;;  %v14279_v57 = vld [vmem:[#allocation8_spill] sm:$0xff] }
 0xe61   :  { %v8001_v1 = vadd.f32 %v8000_v59, %v7964_v49  ;;  %v14277_v59 = vld [vmem:[#allocation19_spill] sm:$0xff]  ;;  %v14288_v49 = vld [vmem:[#allocation24_spill] sm:$0xff] }
 0xe63   :  { %10514 = vtanh.f32 %v8001_v1 }
 0xe69   :  { %v10515_v34 = vpop.eup %10514 }
 0xe6a   :  { %8004 = vst [vmem:[#allocation2 + $0x16] sm:$0x1] %v10515_v34  ;;  %v8039_v21 = vand.u32 4294901760, %v10515_v34 }
 0xe6c   :  { %8145 = vmatmul.f32.vlgmr.msra.gmra.mxu3 %v8039_v21  ;;  %v8040_v30 = vsub.f32 %v10515_v34, %v8039_v21  ;;  %v14276_v34 = vld [vmem:[#allocation22_spill] sm:$0xff] }
 0xe6d   :  { %8547 = vmatpush.msra.mxu3 %v10601_v3 }
 0xe6e   :  { %8199 = vmatmul.f32.vlgmr.msrb.gmra.mxu0 %v8040_v30  ;;  %v8041_v54 = vand.u32 4294901760, %v8040_v30 }
 0xe6f   :  { %8549 = vmatpush.msra.mxu3 %v10603_v4  ;;  %8588 = vmatpush.msrb.mxu0 %v10636_v22 }
 0xe70   :  { %8238 = vmatmul.f32.vlgmr.msrb.gmra.mxu1 %v8041_v54  ;;  %v8042_v53 = vsub.f32 %v8040_v30, %v8041_v54  ;;  %v14274_v30 = vld [vmem:[#allocation17_spill] sm:$0xff]  ;;  %v14285_v54 = vld [vmem:[#allocation20_spill] sm:$0xff] }
 0xe71   :  { %8551 = vmatpush.msra.mxu3 %v10605_v5  ;;  %8655 = vmatpush.msrb.mxu1 %v10601_v3 }
 0xe72   :  { %v8043_v1 = vand.u32 4294901760, %v8042_v53  ;;  %8592 = vmatpush.msrb.mxu0 %v10639_v23  ;;  %v14289_v53 = vld [vmem:[#allocation25_spill] sm:$0xff] }
 0xe73   :  { %8553 = vmatpush.msra.mxu3 %v10607_v9  ;;  %8657 = vmatpush.msrb.mxu1 %v10603_v4 }
 0xe74   :  { %8044 = vmatmul.f32.vlgmr.msra.gmra.mxu2 %v8043_v1  ;;  %8344 = vmatmul.f32.vlgmr.msrb.gmra.mxu3 %v8039_v21  ;;  %v14290_v1 = vld [vmem:[#allocation26_spill] sm:$0xff] }
 0xe75   :  { %8494 = vmatpush.msra.mxu2 %v10615_v14  ;;  %8555 = vmatpush.msra.mxu3 %v10609_v10 }
 0xe76   :  { %8659 = vmatpush.msrb.mxu1 %v10605_v5  ;;  %8596 = vmatpush.msrb.mxu0 %v10642_v24 }
 0xe77   :  { %8497 = vmatpush.msra.mxu2 %v10618_v15  ;;  %8557 = vmatpush.msra.mxu3 %v10611_v11 }
 0xe78   :  { %8661 = vmatpush.msrb.mxu1 %v10607_v9  ;;  %8600 = vmatpush.msrb.mxu0 %v10649_v26 }
 0xe79   :  { %8500 = vmatpush.msra.mxu2 %v10621_v16  ;;  %8559 = vmatpush.msra.mxu3 %v10623_v17 }
 0xe7a   :  { %8663 = vmatpush.msrb.mxu1 %v10609_v10  ;;  %8604 = vmatpush.msrb.mxu0 %v10652_v27 }
 0xe7b   :  { %8503 = vmatpush.msra.mxu2 %v10627_v18  ;;  %8561 = vmatpush.msra.mxu3 %v10632_v20 }
 0xe7c   :  { %8307 = vmatmul.f32.vlgmr.msrb.gmra.mxu2 %v8039_v21  ;;  %8665 = vmatpush.msrb.mxu1 %v10611_v11  ;;  %v14275_v21 = vld [vmem:[#allocation6_spill] sm:$0xff] }
 0xe7d   :  { %8506 = vmatpush.msra.mxu2 %v10630_v19  ;;  %8563 = vmatpush.msra.mxu3 %v10665_v32 }
 0xe7e   :  { %8667 = vmatpush.msrb.mxu1 %v10623_v17  ;;  %8608 = vmatpush.msrb.mxu0 %v10680_v39 }
 0xe7f   :  { %8509 = vmatpush.msra.mxu2 %v10645_v25  ;;  %8565 = vmatpush.msra.mxu3 %v10693_v44 }
 0xe80   :  { %8669 = vmatpush.msrb.mxu1 %v10632_v20  ;;  %8612 = vmatpush.msrb.mxu0 %v10686_v41 }
 0xe81   :  { %8512 = vmatpush.msra.mxu2 %v10655_v28  ;;  %8567 = vmatpush.msra.mxu3 %v10698_v46 }
 0xe82   :  { %8671 = vmatpush.msrb.mxu1 %v10665_v32  ;;  %8616 = vmatpush.msrb.mxu0 %v10701_v47 }
 0xe83   :  { %8515 = vmatpush.msra.mxu2 %v10669_v33  ;;  %8569 = vmatpush.msra.mxu3 %v10714_v52 }
 0xe84   :  { %8673 = vmatpush.msrb.mxu1 %v10693_v44  ;;  %8620 = vmatpush.msrb.mxu0 %v10725_v56 }
 0xe85   :  { %8518 = vmatpush.msra.mxu2 %v10696_v45  ;;  %8571 = vmatpush.msra.mxu3 %v10730_v58 }
 0xe86   :  { %8675 = vmatpush.msrb.mxu1 %v10698_v46  ;;  %8624 = vmatpush.msrb.mxu0 %v10741_v62 }
 0xe87   :  { %8521 = vmatpush.msra.mxu2 %v10712_v51  ;;  %8573 = vmatpush.msra.mxu3 %v10746_v0 }
 0xe88   :  { %8677 = vmatpush.msrb.mxu1 %v10714_v52  ;;  %8628 = vmatpush.msrb.mxu0 %v10757_v7 }
 0xe89   :  { %8524 = vmatpush.msra.mxu2 %v13874_v40  ;;  %8575 = vmatpush.msra.mxu3 %v10762_v12 }
 0xe8a   :  { %8679 = vmatpush.msrb.mxu1 %v10730_v58  ;;  %8632 = vmatpush.msrb.mxu0 %v10773_v29 }
 0xe8b   :  { %8527 = vmatpush.msra.mxu2 %v13875_v48  ;;  %8577 = vmatpush.msra.mxu3 %v10778_v31 }
 0xe8c   :  { %8681 = vmatpush.msrb.mxu1 %v10746_v0  ;;  %8636 = vmatpush.msrb.mxu0 %v10789_v38 }
 0xe8d   :  { %8530 = vmatpush.msra.mxu2 %v13876_v6  ;;  %8742 = vmatpush.msrb.mxu3 %v10672_v36 }
 0xe8e   :  { %8683 = vmatpush.msrb.mxu1 %v10762_v12  ;;  %8640 = vmatpush.msrb.mxu0 %v10803_v50 }
 0xe8f   :  { %8533 = vmatpush.msra.mxu2 %v13877_v8  ;;  %8748 = vmatpush.msrb.mxu3 %v10674_v37 }
 0xe90   :  { %8685 = vmatpush.msrb.mxu1 %v10778_v31  ;;  %8644 = vmatpush.msrb.mxu0 %v10817_v60 }
 0xe91   :  { %8536 = vmatpush.msra.mxu2 %v14274_v30  ;;  %8754 = vmatpush.msrb.mxu3 %v14275_v21 }
 0xe92   :  { %8648 = vmatpush.msrb.mxu0 %v14276_v34 }
 0xe93   :  { %8539 = vmatpush.msra.mxu2 %v14277_v59  ;;  %8760 = vmatpush.msrb.mxu3 %v14278_v43 }
 0xe95   :  { %8697 = vmatpush.msrb.mxu2 %v10601_v3  ;;  %8766 = vmatpush.msrb.mxu3 %v14279_v57 }
 0xe97   :  { %8699 = vmatpush.msrb.mxu2 %v10603_v4  ;;  %8772 = vmatpush.msrb.mxu3 %v14280_v42 }
 0xe99   :  { %8701 = vmatpush.msrb.mxu2 %v10605_v5  ;;  %8778 = vmatpush.msrb.mxu3 %v14281_v55 }
 0xe9b   :  { %8703 = vmatpush.msrb.mxu2 %v10607_v9  ;;  %8784 = vmatpush.msrb.mxu3 %v14282_v35 }
 0xe9d   :  { %8705 = vmatpush.msrb.mxu2 %v10609_v10  ;;  %8790 = vmatpush.msrb.mxu3 %v14283_v63 }
 0xe9f   :  { %8707 = vmatpush.msrb.mxu2 %v10611_v11  ;;  %8796 = vmatpush.msrb.mxu3 %v14284_v13 }
 0xea1   :  { %8709 = vmatpush.msrb.mxu2 %v10623_v17  ;;  %8802 = vmatpush.msrb.mxu3 %v14285_v54 }
 0xea3   :  { %8711 = vmatpush.msrb.mxu2 %v10632_v20  ;;  %8808 = vmatpush.msrb.mxu3 %v14286_v2 }
 0xea5   :  { %8713 = vmatpush.msrb.mxu2 %v10665_v32  ;;  %8814 = vmatpush.msrb.mxu3 %v14287_v61  ;;  %v14291_v61 = vld [vmem:[#allocation13_spill] sm:$0xff] }
 0xea6   :  { %v8005_v2 = vrot.slane %v14291_v61, 7 }
 0xea7   :  { %8715 = vmatpush.msrb.mxu2 %v10693_v44  ;;  %8820 = vmatpush.msrb.mxu3 %v14288_v49 }
 0xea9   :  { %8717 = vmatpush.msrb.mxu2 %v10698_v46  ;;  %8826 = vmatpush.msrb.mxu3 %v14289_v53 }
 0xeab   :  { %8719 = vmatpush.msrb.mxu2 %v10714_v52  ;;  %8832 = vmatpush.msrb.mxu3 %v14290_v1 }
 0xead   :  { %8721 = vmatpush.msrb.mxu2 %v10730_v58 }
 0xeaf   :  { %8723 = vmatpush.msrb.mxu2 %v10746_v0 }
 0xeb1   :  { %8725 = vmatpush.msrb.mxu2 %v10762_v12 }
 0xeb3   :  { %8727 = vmatpush.msrb.mxu2 %v10778_v31 }
 0xeeb   :  { %v8200_v35 = vpop.f32.mrf.mxu0 }
 0xeed   :  { %v8239_v55 = vpop.f32.mrf.mxu1 }
 0xeef   :  { %v8146_v54 = vpop.f32.mrf.mxu3 }
 0xef7   :  { %v8045_v49 = vpop.f32.mrf.mxu2  ;;  %v8345_v43 = vpop.f32.mrf.mxu3 }
 0xef8   :  { %v8046_v13 = vadd.f32 %v8045_v49, %v8005_v2  ;;  %v14299_v2 = vld [vmem:[#allocation12_spill] sm:$0xff]  ;;  %v14300_v49 = vld [vmem:[#allocation14_spill] sm:$0xff] }
 0xefa   :  { %v8147_v63 = vadd.f32 %v8146_v54, %v8046_v13  ;;  %v14297_v13 = vld [vmem:[#allocation8_spill] sm:$0xff]  ;;  %v14298_v54 = vld [vmem:[#allocation10_spill] sm:$0xff] }
 0xefc   :  { %v8201_v53 = vadd.f32 %v8200_v35, %v8147_v63  ;;  %v14296_v63 = vld [vmem:[#allocation7_spill] sm:$0xff] }
 0xefe   :  { %v8240_v42 = vadd.f32 %v8239_v55, %v8201_v53  ;;  %v14301_v53 = vld [vmem:[#allocation16_spill] sm:$0xff] }
 0xeff   :  { %v8308_v57 = vpop.f32.mrf.mxu2 }
 0xf00   :  { %v8309_v1 = vadd.f32 %v8308_v57, %v8240_v42  ;;  %v14294_v57 = vld [vmem:[#allocation6_spill] sm:$0xff]  ;;  %v14295_v42 = vld [vmem:[#allocation19_spill] sm:$0xff] }
 0xf02   :  { %v8346_v59 = vadd.f32 %v8345_v43, %v8309_v1  ;;  %v14302_v1 = vld [vmem:[#allocation18_spill] sm:$0xff] }
 0xf04   :  { %10516 = vtanh.f32 %v8346_v59 }
 0xf0a   :  { %v10517_v21 = vpop.eup %10516 }
 0xf0b   :  { %8349 = vst [vmem:[#allocation2 + $0x17] sm:$0x1] %v10517_v21  ;;  %v8382_v34 = vand.u32 4294901760, %v10517_v21 }
 0xf0d   :  { %8488 = vmatmul.f32.vlgmr.msra.gmra.mxu1 %v8382_v34  ;;  %v8383_v30 = vsub.f32 %v10517_v21, %v8382_v34  ;;  %v10536_v21 = vld [vmem:[%s13798_s1 + $0x2] ss:$0 sm:$0xff] }
 0xf0e   :  { %8893 = vmatpush.msra.mxu1 %v10601_v3 }
 0xf0f   :  { %8542 = vmatmul.f32.vlgmr.msra.gmra.mxu2 %v8383_v30  ;;  %v8384_v61 = vand.u32 4294901760, %v8383_v30 }
 0xf10   :  { %8895 = vmatpush.msra.mxu1 %v10603_v4  ;;  %8934 = vmatpush.msra.mxu2 %v10636_v22 }
 0xf11   :  { %8581 = vmatmul.f32.vlgmr.msra.gmra.mxu3 %v8384_v61  ;;  %v8385_v55 = vsub.f32 %v8383_v30, %v8384_v61  ;;  %v14292_v30 = vld [vmem:[#allocation17_spill] sm:$0xff]  ;;  %v14303_v61 = vld [vmem:[#allocation20_spill] sm:$0xff] }
 0xf12   :  { %v10422_v35 = vld [vmem:[#allocation2 + $0x10] sm:$0xff]  ;;  %8897 = vmatpush.msra.mxu1 %v10605_v5  ;;  %9001 = vmatpush.msra.mxu3 %v10601_v3 }
 0xf13   :  { %v8386_v59 = vand.u32 4294901760, %v8385_v55  ;;  %v10427_v43 = vmul.f32 %v10536_v21, %v10422_v35  ;;  %8938 = vmatpush.msra.mxu2 %v10639_v23  ;;  %v14304_v55 = vld [vmem:[#allocation21_spill] sm:$0xff]  ;;  %v14305_v35 = vld [vmem:[#allocation23_spill] sm:$0xff] }
 0xf14   :  { %8899 = vmatpush.msra.mxu1 %v10607_v9  ;;  %9003 = vmatpush.msra.mxu3 %v10603_v4  ;;  %v14307_v21 = vld [vmem:[#allocation25_spill] sm:$0xff] }
 0xf15   :  { %8387 = vmatmul.f32.vlgmr.msra.gmra.mxu0 %v8386_v59  ;;  %8687 = vmatmul.f32.vlgmr.msrb.gmra.mxu1 %v8382_v34  ;;  %v14306_v59 = vld [vmem:[#allocation24_spill] sm:$0xff] }
 0xf16   :  { %10433 = vadd.xlane.f32.xlu0 %v10427_v43  ;;  %8840 = vmatpush.msra.mxu0 %v10615_v14  ;;  %v14308_v43 = vld [vmem:[#allocation26_spill] sm:$0xff] }
 0xf17   :  { %8901 = vmatpush.msra.mxu1 %v10609_v10  ;;  %9005 = vmatpush.msra.mxu3 %v10605_v5 }
 0xf18   :  { %8843 = vmatpush.msra.mxu0 %v10618_v15  ;;  %8942 = vmatpush.msra.mxu2 %v10642_v24 }
 0xf19   :  { %8903 = vmatpush.msra.mxu1 %v10611_v11  ;;  %9007 = vmatpush.msra.mxu3 %v10607_v9 }
 0xf1a   :  { %8846 = vmatpush.msra.mxu0 %v10621_v16  ;;  %8946 = vmatpush.msra.mxu2 %v10649_v26 }
 0xf1b   :  { %8905 = vmatpush.msra.mxu1 %v10623_v17  ;;  %9009 = vmatpush.msra.mxu3 %v10609_v10 }
 0xf1c   :  { %8849 = vmatpush.msra.mxu0 %v10627_v18  ;;  %8950 = vmatpush.msra.mxu2 %v10652_v27 }
 0xf1d   :  { %8650 = vmatmul.f32.vlgmr.msrb.gmra.mxu0 %v8382_v34  ;;  %8907 = vmatpush.msra.mxu1 %v10632_v20  ;;  %v14293_v34 = vld [vmem:[#allocation22_spill] sm:$0xff] }
 0xf1e   :  { %8852 = vmatpush.msra.mxu0 %v10630_v19  ;;  %9011 = vmatpush.msra.mxu3 %v10611_v11 }
 0xf1f   :  { %8909 = vmatpush.msra.mxu1 %v10665_v32  ;;  %8954 = vmatpush.msra.mxu2 %v10680_v39 }
 0xf20   :  { %8855 = vmatpush.msra.mxu0 %v10645_v25  ;;  %9013 = vmatpush.msra.mxu3 %v10623_v17 }
 0xf21   :  { %8911 = vmatpush.msra.mxu1 %v10693_v44  ;;  %8958 = vmatpush.msra.mxu2 %v10686_v41 }
 0xf22   :  { %8858 = vmatpush.msra.mxu0 %v10655_v28  ;;  %9015 = vmatpush.msra.mxu3 %v10632_v20 }
 0xf23   :  { %8913 = vmatpush.msra.mxu1 %v10698_v46  ;;  %8962 = vmatpush.msra.mxu2 %v10701_v47 }
 0xf24   :  { %8861 = vmatpush.msra.mxu0 %v10669_v33  ;;  %9017 = vmatpush.msra.mxu3 %v10665_v32 }
 0xf25   :  { %8915 = vmatpush.msra.mxu1 %v10714_v52  ;;  %8966 = vmatpush.msra.mxu2 %v10725_v56 }
 0xf26   :  { %8864 = vmatpush.msra.mxu0 %v10696_v45  ;;  %9019 = vmatpush.msra.mxu3 %v10693_v44 }
 0xf27   :  { %8917 = vmatpush.msra.mxu1 %v10730_v58  ;;  %8970 = vmatpush.msra.mxu2 %v10741_v62 }
 0xf28   :  { %8867 = vmatpush.msra.mxu0 %v10712_v51  ;;  %9021 = vmatpush.msra.mxu3 %v10698_v46 }
 0xf29   :  { %8919 = vmatpush.msra.mxu1 %v10746_v0  ;;  %8974 = vmatpush.msra.mxu2 %v10757_v7 }
 0xf2a   :  { %8870 = vmatpush.msra.mxu0 %v13874_v40  ;;  %9023 = vmatpush.msra.mxu3 %v10714_v52 }
 0xf2b   :  { %8921 = vmatpush.msra.mxu1 %v10762_v12  ;;  %8978 = vmatpush.msra.mxu2 %v10773_v29 }
 0xf2c   :  { %8873 = vmatpush.msra.mxu0 %v13875_v48  ;;  %9025 = vmatpush.msra.mxu3 %v10730_v58 }
 0xf2d   :  { %8923 = vmatpush.msra.mxu1 %v10778_v31  ;;  %8982 = vmatpush.msra.mxu2 %v10789_v38 }
 0xf2e   :  { %8876 = vmatpush.msra.mxu0 %v13876_v6  ;;  %9027 = vmatpush.msra.mxu3 %v10746_v0 }
 0xf2f   :  { %8986 = vmatpush.msra.mxu2 %v10803_v50  ;;  %9087 = vmatpush.msrb.mxu1 %v10672_v36 }
 0xf30   :  { %8879 = vmatpush.msra.mxu0 %v13877_v8  ;;  %9029 = vmatpush.msra.mxu3 %v10762_v12 }
 0xf31   :  { %8990 = vmatpush.msra.mxu2 %v10817_v60  ;;  %9093 = vmatpush.msrb.mxu1 %v10674_v37 }
 0xf32   :  { %8882 = vmatpush.msra.mxu0 %v14292_v30  ;;  %9031 = vmatpush.msra.mxu3 %v10778_v31 }
 0xf33   :  { %8994 = vmatpush.msra.mxu2 %v14293_v34  ;;  %9099 = vmatpush.msrb.mxu1 %v14294_v57 }
 0xf34   :  { %8885 = vmatpush.msra.mxu0 %v14295_v42 }
 0xf35   :  { %9105 = vmatpush.msrb.mxu1 %v14296_v63 }
 0xf36   :  { %9042 = vmatpush.msrb.mxu0 %v10601_v3 }
 0xf37   :  { %9111 = vmatpush.msrb.mxu1 %v14297_v13 }
 0xf38   :  { %9044 = vmatpush.msrb.mxu0 %v10603_v4 }
 0xf39   :  { %9117 = vmatpush.msrb.mxu1 %v14298_v54 }
 0xf3a   :  { %9046 = vmatpush.msrb.mxu0 %v10605_v5 }
 0xf3b   :  { %9123 = vmatpush.msrb.mxu1 %v14299_v2 }
 0xf3c   :  { %9048 = vmatpush.msrb.mxu0 %v10607_v9 }
 0xf3d   :  { %9129 = vmatpush.msrb.mxu1 %v14300_v49 }
 0xf3e   :  { %9050 = vmatpush.msrb.mxu0 %v10609_v10 }
 0xf3f   :  { %9135 = vmatpush.msrb.mxu1 %v14301_v53 }
 0xf40   :  { %9052 = vmatpush.msrb.mxu0 %v10611_v11 }
 0xf41   :  { %9141 = vmatpush.msrb.mxu1 %v14302_v1  ;;  %v10539_v1 = vld [vmem:[%s13798_s1 + $0x1] ss:$0 sm:$0xff] }
 0xf42   :  { %9054 = vmatpush.msrb.mxu0 %v10623_v17 }
 0xf43   :  { %9147 = vmatpush.msrb.mxu1 %v14303_v61 }
 0xf44   :  { %9056 = vmatpush.msrb.mxu0 %v10632_v20 }
 0xf45   :  { %9153 = vmatpush.msrb.mxu1 %v14304_v55  ;;  %v58_v55 = vpop.permute.xlu1 %57 }
 0xf46   :  { %9058 = vmatpush.msrb.mxu0 %v10665_v32 }
 0xf47   :  { %9159 = vmatpush.msrb.mxu1 %v14305_v35 }
 0xf48   :  { %9060 = vmatpush.msrb.mxu0 %v10693_v44 }
 0xf49   :  { %9165 = vmatpush.msrb.mxu1 %v14306_v59  ;;  %v10537_v59 = vld [vmem:[%s13798_s1 + $0x3] ss:$0 sm:$0xff] }
 0xf4a   :  { %9062 = vmatpush.msrb.mxu0 %v10698_v46 }
 0xf4b   :  { %9171 = vmatpush.msrb.mxu1 %v14307_v21 }
 0xf4c   :  { %9064 = vmatpush.msrb.mxu0 %v10714_v52 }
 0xf4d   :  { %9177 = vmatpush.msrb.mxu1 %v14308_v43  ;;  %v10538_v43 = vld [vmem:[%s13798_s1] ss:$0 sm:$0xff] }
 0xf4e   :  { %9066 = vmatpush.msrb.mxu0 %v10730_v58  ;;  %v64_v21 = vmul.f32 %v10538_v43, %v58_v55 }
 0xf50   :  { %9068 = vmatpush.msrb.mxu0 %v10746_v0  ;;  %v13425_v53 = vadd.f32 %v10539_v1, %v64_v21 }
 0xf52   :  { %9070 = vmatpush.msrb.mxu0 %v10762_v12  ;;  %14309 = vst [vmem:[#allocation15_spill] sm:$0xff] %v13425_v53 }
 0xf54   :  { %9072 = vmatpush.msrb.mxu0 %v10778_v31 }
 0xf89   :  { %v10434_v35 = vpop.xlane.xlu0 %10433 }
 0xf8a   :  { %v10442_v61 = vadd.f32 %v10537_v59, %v10434_v35  ;;  %v8489_v49 = vpop.f32.mrf.mxu1 }
 0xf8c   :  { %10447 = vst.msk [vmem:[%s13800_s3 + $0x10] sm:$0xff] %vm10444_vm0, %v10442_v61 }
 0xf92   :  { %v8388_v2 = vpop.f32.mrf.mxu0  ;;  %v8543_v54 = vpop.f32.mrf.mxu2 }
 0xf93   :  { %v8389_v35 = vadd.f32 %v8388_v2, %v13425_v53  ;;  %v8688_v57 = vpop.f32.mrf.mxu1  ;;  %v14315_v2 = vld [vmem:[#allocation8_spill] sm:$0xff] }
 0xf94   :  { %v8582_v63 = vpop.f32.mrf.mxu3 }
 0xf95   :  { %v8490_v59 = vadd.f32 %v8489_v49, %v8389_v35  ;;  %v14316_v49 = vld [vmem:[#allocation10_spill] sm:$0xff]  ;;  %v14317_v35 = vld [vmem:[#allocation12_spill] sm:$0xff] }
 0xf97   :  { %v8544_v13 = vadd.f32 %v8543_v54, %v8490_v59  ;;  %v14314_v54 = vld [vmem:[#allocation7_spill] sm:$0xff]  ;;  %v14318_v59 = vld [vmem:[#allocation14_spill] sm:$0xff] }
 0xf99   :  { %v8583_v61 = vadd.f32 %v8582_v63, %v8544_v13  ;;  %v14313_v13 = vld [vmem:[#allocation19_spill] sm:$0xff] }
 0xf9a   :  { %v8651_v42 = vpop.f32.mrf.mxu0 }
 0xf9b   :  { %v8652_v34 = vadd.f32 %v8651_v42, %v8583_v61  ;;  %v14312_v42 = vld [vmem:[#allocation22_spill] sm:$0xff]  ;;  %v14319_v61 = vld [vmem:[#allocation16_spill] sm:$0xff] }
 0xf9d   :  { %v8689_v30 = vadd.f32 %v8688_v57, %v8652_v34  ;;  %v14310_v34 = vld [vmem:[#allocation17_spill] sm:$0xff]  ;;  %v14311_v57 = vld [vmem:[#allocation6_spill] sm:$0xff] }
 0xf9f   :  { %10518 = vtanh.f32 %v8689_v30 }
 0xfa5   :  { %v10519_v55 = vpop.eup %10518 }
 0xfa6   :  { %8692 = vst [vmem:[#allocation2 + $0x18] sm:$0x1] %v10519_v55  ;;  %v8728_v43 = vand.u32 4294901760, %v10519_v55 }
 0xfa8   :  { %8834 = vmatmul.f32.vlgmr.msrb.gmra.mxu3 %v8728_v43  ;;  %v8729_v1 = vsub.f32 %v10519_v55, %v8728_v43  ;;  %v14320_v55 = vld [vmem:[#allocation18_spill] sm:$0xff] }
 0xfa9   :  { %9238 = vmatpush.msrb.mxu3 %v10601_v3 }
 0xfaa   :  { %8888 = vmatmul.f32.vlgmr.msra.gmra.mxu0 %v8729_v1  ;;  %v8730_v21 = vand.u32 4294901760, %v8729_v1 }
 0xfab   :  { %9240 = vmatpush.msrb.mxu3 %v10603_v4  ;;  %9279 = vmatpush.msra.mxu0 %v10636_v22 }
 0xfac   :  { %8927 = vmatmul.f32.vlgmr.msra.gmra.mxu1 %v8730_v21  ;;  %v8731_v63 = vsub.f32 %v8729_v1, %v8730_v21  ;;  %v14322_v1 = vld [vmem:[#allocation21_spill] sm:$0xff]  ;;  %v14323_v21 = vld [vmem:[#allocation23_spill] sm:$0xff] }
 0xfad   :  { %9242 = vmatpush.msrb.mxu3 %v10605_v5  ;;  %9346 = vmatpush.msra.mxu1 %v10601_v3 }
 0xfae   :  { %v8732_v30 = vand.u32 4294901760, %v8731_v63  ;;  %9283 = vmatpush.msra.mxu0 %v10639_v23  ;;  %v14324_v63 = vld [vmem:[#allocation24_spill] sm:$0xff] }
 0xfaf   :  { %9244 = vmatpush.msrb.mxu3 %v10607_v9  ;;  %9348 = vmatpush.msra.mxu1 %v10603_v4 }
 0xfb0   :  { %8733 = vmatmul.f32.vlgmr.msrb.gmra.mxu2 %v8732_v30  ;;  %9033 = vmatmul.f32.vlgmr.msra.gmra.mxu3 %v8728_v43  ;;  %v14325_v30 = vld [vmem:[#allocation25_spill] sm:$0xff] }
 0xfb1   :  { %9185 = vmatpush.msrb.mxu2 %v10615_v14  ;;  %9246 = vmatpush.msrb.mxu3 %v10609_v10 }
 0xfb2   :  { %9350 = vmatpush.msra.mxu1 %v10605_v5  ;;  %9287 = vmatpush.msra.mxu0 %v10642_v24 }
 0xfb3   :  { %9188 = vmatpush.msrb.mxu2 %v10618_v15  ;;  %9248 = vmatpush.msrb.mxu3 %v10611_v11 }
 0xfb4   :  { %9352 = vmatpush.msra.mxu1 %v10607_v9  ;;  %9291 = vmatpush.msra.mxu0 %v10649_v26 }
 0xfb5   :  { %9191 = vmatpush.msrb.mxu2 %v10621_v16  ;;  %9250 = vmatpush.msrb.mxu3 %v10623_v17 }
 0xfb6   :  { %9354 = vmatpush.msra.mxu1 %v10609_v10  ;;  %9295 = vmatpush.msra.mxu0 %v10652_v27 }
 0xfb7   :  { %9194 = vmatpush.msrb.mxu2 %v10627_v18  ;;  %9252 = vmatpush.msrb.mxu3 %v10632_v20 }
 0xfb8   :  { %8996 = vmatmul.f32.vlgmr.msra.gmra.mxu2 %v8728_v43  ;;  %9356 = vmatpush.msra.mxu1 %v10611_v11  ;;  %v14321_v43 = vld [vmem:[#allocation20_spill] sm:$0xff] }
 0xfb9   :  { %9197 = vmatpush.msrb.mxu2 %v10630_v19  ;;  %9254 = vmatpush.msrb.mxu3 %v10665_v32 }
 0xfba   :  { %9358 = vmatpush.msra.mxu1 %v10623_v17  ;;  %9299 = vmatpush.msra.mxu0 %v10680_v39 }
 0xfbb   :  { %9200 = vmatpush.msrb.mxu2 %v10645_v25  ;;  %9256 = vmatpush.msrb.mxu3 %v10693_v44 }
 0xfbc   :  { %9360 = vmatpush.msra.mxu1 %v10632_v20  ;;  %9303 = vmatpush.msra.mxu0 %v10686_v41 }
 0xfbd   :  { %9203 = vmatpush.msrb.mxu2 %v10655_v28  ;;  %9258 = vmatpush.msrb.mxu3 %v10698_v46 }
 0xfbe   :  { %9362 = vmatpush.msra.mxu1 %v10665_v32  ;;  %9307 = vmatpush.msra.mxu0 %v10701_v47 }
 0xfbf   :  { %9206 = vmatpush.msrb.mxu2 %v10669_v33  ;;  %9260 = vmatpush.msrb.mxu3 %v10714_v52 }
 0xfc0   :  { %9364 = vmatpush.msra.mxu1 %v10693_v44  ;;  %9311 = vmatpush.msra.mxu0 %v10725_v56 }
 0xfc1   :  { %9209 = vmatpush.msrb.mxu2 %v10696_v45  ;;  %9262 = vmatpush.msrb.mxu3 %v10730_v58 }
 0xfc2   :  { %9366 = vmatpush.msra.mxu1 %v10698_v46  ;;  %9315 = vmatpush.msra.mxu0 %v10741_v62 }
 0xfc3   :  { %9212 = vmatpush.msrb.mxu2 %v10712_v51  ;;  %9264 = vmatpush.msrb.mxu3 %v10746_v0 }
 0xfc4   :  { %9368 = vmatpush.msra.mxu1 %v10714_v52  ;;  %9319 = vmatpush.msra.mxu0 %v10757_v7 }
 0xfc5   :  { %9215 = vmatpush.msrb.mxu2 %v13874_v40  ;;  %9266 = vmatpush.msrb.mxu3 %v10762_v12 }
 0xfc6   :  { %9370 = vmatpush.msra.mxu1 %v10730_v58  ;;  %9323 = vmatpush.msra.mxu0 %v10773_v29 }
 0xfc7   :  { %9218 = vmatpush.msrb.mxu2 %v13875_v48  ;;  %9268 = vmatpush.msrb.mxu3 %v10778_v31 }
 0xfc8   :  { %9372 = vmatpush.msra.mxu1 %v10746_v0  ;;  %9327 = vmatpush.msra.mxu0 %v10789_v38 }
 0xfc9   :  { %9221 = vmatpush.msrb.mxu2 %v13876_v6  ;;  %9432 = vmatpush.msra.mxu3 %v10672_v36 }
 0xfca   :  { %9374 = vmatpush.msra.mxu1 %v10762_v12  ;;  %9331 = vmatpush.msra.mxu0 %v10803_v50 }
 0xfcb   :  { %9224 = vmatpush.msrb.mxu2 %v13877_v8  ;;  %9438 = vmatpush.msra.mxu3 %v10674_v37 }
 0xfcc   :  { %9376 = vmatpush.msra.mxu1 %v10778_v31  ;;  %9335 = vmatpush.msra.mxu0 %v10817_v60 }
 0xfcd   :  { %9227 = vmatpush.msrb.mxu2 %v14310_v34  ;;  %9444 = vmatpush.msra.mxu3 %v14311_v57 }
 0xfce   :  { %9339 = vmatpush.msra.mxu0 %v14312_v42 }
 0xfcf   :  { %9230 = vmatpush.msrb.mxu2 %v14313_v13  ;;  %9450 = vmatpush.msra.mxu3 %v14314_v54 }
 0xfd1   :  { %9387 = vmatpush.msra.mxu2 %v10601_v3  ;;  %9456 = vmatpush.msra.mxu3 %v14315_v2 }
 0xfd3   :  { %9389 = vmatpush.msra.mxu2 %v10603_v4  ;;  %9462 = vmatpush.msra.mxu3 %v14316_v49 }
 0xfd5   :  { %9391 = vmatpush.msra.mxu2 %v10605_v5  ;;  %9468 = vmatpush.msra.mxu3 %v14317_v35 }
 0xfd7   :  { %9393 = vmatpush.msra.mxu2 %v10607_v9  ;;  %9474 = vmatpush.msra.mxu3 %v14318_v59 }
 0xfd9   :  { %9395 = vmatpush.msra.mxu2 %v10609_v10  ;;  %9480 = vmatpush.msra.mxu3 %v14319_v61 }
 0xfdb   :  { %9397 = vmatpush.msra.mxu2 %v10611_v11  ;;  %9486 = vmatpush.msra.mxu3 %v14320_v55  ;;  %v14326_v55 = vld [vmem:[#allocation26_spill] sm:$0xff] }
 0xfdd   :  { %9399 = vmatpush.msra.mxu2 %v10623_v17  ;;  %9492 = vmatpush.msra.mxu3 %v14321_v43 }
 0xfdf   :  { %9401 = vmatpush.msra.mxu2 %v10632_v20  ;;  %9498 = vmatpush.msra.mxu3 %v14322_v1 }
 0xfe1   :  { %9403 = vmatpush.msra.mxu2 %v10665_v32  ;;  %9504 = vmatpush.msra.mxu3 %v14323_v21  ;;  %v8694_v21 = vrot.slane %v13425_v53, 1 }
 0xfe3   :  { %9405 = vmatpush.msra.mxu2 %v10693_v44  ;;  %9510 = vmatpush.msra.mxu3 %v14324_v63 }
 0xfe5   :  { %9407 = vmatpush.msra.mxu2 %v10698_v46  ;;  %9516 = vmatpush.msra.mxu3 %v14325_v30 }
 0xfe7   :  { %9409 = vmatpush.msra.mxu2 %v10714_v52  ;;  %9522 = vmatpush.msra.mxu3 %v14326_v55 }
 0xfe9   :  { %9411 = vmatpush.msra.mxu2 %v10730_v58 }
 0xfeb   :  { %9413 = vmatpush.msra.mxu2 %v10746_v0 }
 0xfed   :  { %9415 = vmatpush.msra.mxu2 %v10762_v12 }
 0xfef   :  { %9417 = vmatpush.msra.mxu2 %v10778_v31 }
0x1027   :  { %v8889_v59 = vpop.f32.mrf.mxu0 }
0x1029   :  { %v8928_v35 = vpop.f32.mrf.mxu1 }
0x102b   :  { %v8835_v1 = vpop.f32.mrf.mxu3 }
0x1033   :  { %v8734_v63 = vpop.f32.mrf.mxu2  ;;  %v9034_v54 = vpop.f32.mrf.mxu3 }
0x1034   :  { %v8735_v43 = vadd.f32 %v8734_v63, %v8694_v21  ;;  %v14339_v21 = vld [vmem:[#allocation21_spill] sm:$0xff]  ;;  %v14340_v63 = vld [vmem:[#allocation23_spill] sm:$0xff] }
0x1036   :  { %v8836_v61 = vadd.f32 %v8835_v1, %v8735_v43  ;;  %v14337_v43 = vld [vmem:[#allocation18_spill] sm:$0xff]  ;;  %v14338_v1 = vld [vmem:[#allocation20_spill] sm:$0xff] }
0x1038   :  { %v8890_v30 = vadd.f32 %v8889_v59, %v8836_v61  ;;  %v14334_v59 = vld [vmem:[#allocation12_spill] sm:$0xff]  ;;  %v14335_v61 = vld [vmem:[#allocation14_spill] sm:$0xff] }
0x103a   :  { %v8929_v49 = vadd.f32 %v8928_v35, %v8890_v30  ;;  %v14341_v30 = vld [vmem:[#allocation24_spill] sm:$0xff] }
0x103b   :  { %v8997_v2 = vpop.f32.mrf.mxu2 }
0x103c   :  { %v8998_v55 = vadd.f32 %v8997_v2, %v8929_v49  ;;  %v14332_v2 = vld [vmem:[#allocation8_spill] sm:$0xff]  ;;  %v14333_v49 = vld [vmem:[#allocation10_spill] sm:$0xff] }
0x103e   :  { %v9035_v13 = vadd.f32 %v9034_v54, %v8998_v55  ;;  %v14331_v54 = vld [vmem:[#allocation7_spill] sm:$0xff]  ;;  %v14336_v55 = vld [vmem:[#allocation16_spill] sm:$0xff] }
0x1040   :  { %10520 = vtanh.f32 %v9035_v13 }
0x1046   :  { %v10521_v42 = vpop.eup %10520 }
0x1047   :  { %9038 = vst [vmem:[#allocation2 + $0x19] sm:$0x1] %v10521_v42  ;;  %v9073_v57 = vand.u32 4294901760, %v10521_v42 }
0x1049   :  { %9179 = vmatmul.f32.vlgmr.msrb.gmra.mxu1 %v9073_v57  ;;  %v9074_v34 = vsub.f32 %v10521_v42, %v9073_v57  ;;  %v14330_v42 = vld [vmem:[#allocation19_spill] sm:$0xff] }
0x104a   :  { %9583 = vmatpush.msrb.mxu1 %v10601_v3 }
0x104b   :  { %9233 = vmatmul.f32.vlgmr.msrb.gmra.mxu2 %v9074_v34  ;;  %v9075_v53 = vand.u32 4294901760, %v9074_v34 }
0x104c   :  { %9585 = vmatpush.msrb.mxu1 %v10603_v4  ;;  %9624 = vmatpush.msrb.mxu2 %v10636_v22 }
0x104d   :  { %9272 = vmatmul.f32.vlgmr.msrb.gmra.mxu3 %v9075_v53  ;;  %v9076_v35 = vsub.f32 %v9074_v34, %v9075_v53  ;;  %v14327_v53 = vld [vmem:[#allocation17_spill] sm:$0xff]  ;;  %v14328_v34 = vld [vmem:[#allocation6_spill] sm:$0xff] }
0x104e   :  { %9587 = vmatpush.msrb.mxu1 %v10605_v5  ;;  %9691 = vmatpush.msrb.mxu3 %v10601_v3 }
0x104f   :  { %v9077_v13 = vand.u32 4294901760, %v9076_v35  ;;  %9628 = vmatpush.msrb.mxu2 %v10639_v23  ;;  %v14342_v35 = vld [vmem:[#allocation25_spill] sm:$0xff] }
0x1050   :  { %9589 = vmatpush.msrb.mxu1 %v10607_v9  ;;  %9693 = vmatpush.msrb.mxu3 %v10603_v4 }
0x1051   :  { %9078 = vmatmul.f32.vlgmr.msrb.gmra.mxu0 %v9077_v13  ;;  %9378 = vmatmul.f32.vlgmr.msra.gmra.mxu1 %v9073_v57  ;;  %v14343_v13 = vld [vmem:[#allocation26_spill] sm:$0xff] }
0x1052   :  { %9530 = vmatpush.msrb.mxu0 %v10615_v14  ;;  %9591 = vmatpush.msrb.mxu1 %v10609_v10 }
0x1053   :  { %9695 = vmatpush.msrb.mxu3 %v10605_v5  ;;  %9632 = vmatpush.msrb.mxu2 %v10642_v24 }
0x1054   :  { %9533 = vmatpush.msrb.mxu0 %v10618_v15  ;;  %9593 = vmatpush.msrb.mxu1 %v10611_v11 }
0x1055   :  { %9697 = vmatpush.msrb.mxu3 %v10607_v9  ;;  %9636 = vmatpush.msrb.mxu2 %v10649_v26 }
0x1056   :  { %9536 = vmatpush.msrb.mxu0 %v10621_v16  ;;  %9595 = vmatpush.msrb.mxu1 %v10623_v17 }
0x1057   :  { %9699 = vmatpush.msrb.mxu3 %v10609_v10  ;;  %9640 = vmatpush.msrb.mxu2 %v10652_v27 }
0x1058   :  { %9539 = vmatpush.msrb.mxu0 %v10627_v18  ;;  %9597 = vmatpush.msrb.mxu1 %v10632_v20 }
0x1059   :  { %9341 = vmatmul.f32.vlgmr.msra.gmra.mxu0 %v9073_v57  ;;  %9701 = vmatpush.msrb.mxu3 %v10611_v11  ;;  %v14329_v57 = vld [vmem:[#allocation22_spill] sm:$0xff] }
0x105a   :  { %9542 = vmatpush.msrb.mxu0 %v10630_v19  ;;  %9599 = vmatpush.msrb.mxu1 %v10665_v32 }
0x105b   :  { %9703 = vmatpush.msrb.mxu3 %v10623_v17  ;;  %9644 = vmatpush.msrb.mxu2 %v10680_v39 }
0x105c   :  { %9545 = vmatpush.msrb.mxu0 %v10645_v25  ;;  %9601 = vmatpush.msrb.mxu1 %v10693_v44 }
0x105d   :  { %9705 = vmatpush.msrb.mxu3 %v10632_v20  ;;  %9648 = vmatpush.msrb.mxu2 %v10686_v41 }
0x105e   :  { %9548 = vmatpush.msrb.mxu0 %v10655_v28  ;;  %9603 = vmatpush.msrb.mxu1 %v10698_v46 }
0x105f   :  { %9707 = vmatpush.msrb.mxu3 %v10665_v32  ;;  %9652 = vmatpush.msrb.mxu2 %v10701_v47 }
0x1060   :  { %9551 = vmatpush.msrb.mxu0 %v10669_v33  ;;  %9605 = vmatpush.msrb.mxu1 %v10714_v52 }
0x1061   :  { %9709 = vmatpush.msrb.mxu3 %v10693_v44  ;;  %9656 = vmatpush.msrb.mxu2 %v10725_v56 }
0x1062   :  { %9554 = vmatpush.msrb.mxu0 %v10696_v45  ;;  %9607 = vmatpush.msrb.mxu1 %v10730_v58 }
0x1063   :  { %9711 = vmatpush.msrb.mxu3 %v10698_v46  ;;  %9660 = vmatpush.msrb.mxu2 %v10741_v62 }
0x1064   :  { %9557 = vmatpush.msrb.mxu0 %v10712_v51  ;;  %9609 = vmatpush.msrb.mxu1 %v10746_v0 }
0x1065   :  { %9713 = vmatpush.msrb.mxu3 %v10714_v52  ;;  %9664 = vmatpush.msrb.mxu2 %v10757_v7 }
0x1066   :  { %9560 = vmatpush.msrb.mxu0 %v13874_v40  ;;  %9611 = vmatpush.msrb.mxu1 %v10762_v12 }
0x1067   :  { %9715 = vmatpush.msrb.mxu3 %v10730_v58  ;;  %9668 = vmatpush.msrb.mxu2 %v10773_v29 }
0x1068   :  { %9563 = vmatpush.msrb.mxu0 %v13875_v48  ;;  %9613 = vmatpush.msrb.mxu1 %v10778_v31 }
0x1069   :  { %9717 = vmatpush.msrb.mxu3 %v10746_v0  ;;  %9672 = vmatpush.msrb.mxu2 %v10789_v38 }
0x106a   :  { %9566 = vmatpush.msrb.mxu0 %v13876_v6  ;;  %9777 = vmatpush.msra.mxu1 %v10672_v36 }
0x106b   :  { %9719 = vmatpush.msrb.mxu3 %v10762_v12  ;;  %9676 = vmatpush.msrb.mxu2 %v10803_v50 }
0x106c   :  { %9569 = vmatpush.msrb.mxu0 %v13877_v8  ;;  %9783 = vmatpush.msra.mxu1 %v10674_v37 }
0x106d   :  { %9721 = vmatpush.msrb.mxu3 %v10778_v31  ;;  %9680 = vmatpush.msrb.mxu2 %v10817_v60 }
0x106e   :  { %9572 = vmatpush.msrb.mxu0 %v14327_v53  ;;  %9789 = vmatpush.msra.mxu1 %v14328_v34 }
0x106f   :  { %9684 = vmatpush.msrb.mxu2 %v14329_v57 }
0x1070   :  { %9575 = vmatpush.msrb.mxu0 %v14330_v42  ;;  %9795 = vmatpush.msra.mxu1 %v14331_v54 }
0x1072   :  { %9732 = vmatpush.msra.mxu0 %v10601_v3  ;;  %9801 = vmatpush.msra.mxu1 %v14332_v2 }
0x1074   :  { %9734 = vmatpush.msra.mxu0 %v10603_v4  ;;  %9807 = vmatpush.msra.mxu1 %v14333_v49 }
0x1076   :  { %9736 = vmatpush.msra.mxu0 %v10605_v5  ;;  %9813 = vmatpush.msra.mxu1 %v14334_v59 }
0x1078   :  { %9738 = vmatpush.msra.mxu0 %v10607_v9  ;;  %9819 = vmatpush.msra.mxu1 %v14335_v61 }
0x107a   :  { %9740 = vmatpush.msra.mxu0 %v10609_v10  ;;  %9825 = vmatpush.msra.mxu1 %v14336_v55 }
0x107c   :  { %9742 = vmatpush.msra.mxu0 %v10611_v11  ;;  %9831 = vmatpush.msra.mxu1 %v14337_v43 }
0x107e   :  { %9744 = vmatpush.msra.mxu0 %v10623_v17  ;;  %9837 = vmatpush.msra.mxu1 %v14338_v1 }
0x1080   :  { %9746 = vmatpush.msra.mxu0 %v10632_v20  ;;  %9843 = vmatpush.msra.mxu1 %v14339_v21 }
0x1082   :  { %9748 = vmatpush.msra.mxu0 %v10665_v32  ;;  %9849 = vmatpush.msra.mxu1 %v14340_v63  ;;  %v14344_v63 = vld [vmem:[#allocation15_spill] sm:$0xff] }
0x1083   :  { %v9039_v21 = vrot.slane %v14344_v63, 2 }
0x1084   :  { %9750 = vmatpush.msra.mxu0 %v10693_v44  ;;  %9855 = vmatpush.msra.mxu1 %v14341_v30 }
0x1086   :  { %9752 = vmatpush.msra.mxu0 %v10698_v46  ;;  %9861 = vmatpush.msra.mxu1 %v14342_v35 }
0x1088   :  { %9754 = vmatpush.msra.mxu0 %v10714_v52  ;;  %9867 = vmatpush.msra.mxu1 %v14343_v13 }
0x108a   :  { %9756 = vmatpush.msra.mxu0 %v10730_v58 }
0x108c   :  { %9758 = vmatpush.msra.mxu0 %v10746_v0 }
0x108e   :  { %9760 = vmatpush.msra.mxu0 %v10762_v12 }
0x1090   :  { %9762 = vmatpush.msra.mxu0 %v10778_v31 }
0x10c6   :  { %v9180_v1 = vpop.f32.mrf.mxu1 }
0x10ce   :  { %v9079_v30 = vpop.f32.mrf.mxu0  ;;  %v9234_v61 = vpop.f32.mrf.mxu2 }
0x10cf   :  { %v9080_v43 = vadd.f32 %v9079_v30, %v9039_v21  ;;  %v9379_v54 = vpop.f32.mrf.mxu1  ;;  %v14357_v21 = vld [vmem:[#allocation21_spill] sm:$0xff]  ;;  %v14359_v30 = vld [vmem:[#allocation24_spill] sm:$0xff] }
0x10d0   :  { %v9273_v59 = vpop.f32.mrf.mxu3 }
0x10d1   :  { %v9181_v55 = vadd.f32 %v9180_v1, %v9080_v43  ;;  %v14355_v43 = vld [vmem:[#allocation18_spill] sm:$0xff]  ;;  %v14356_v1 = vld [vmem:[#allocation20_spill] sm:$0xff] }
0x10d3   :  { %v9235_v35 = vadd.f32 %v9234_v61, %v9181_v55  ;;  %v14353_v61 = vld [vmem:[#allocation14_spill] sm:$0xff]  ;;  %v14354_v55 = vld [vmem:[#allocation16_spill] sm:$0xff] }
0x10d5   :  { %v9274_v49 = vadd.f32 %v9273_v59, %v9235_v35  ;;  %v14360_v35 = vld [vmem:[#allocation25_spill] sm:$0xff] }
0x10d6   :  { %v9342_v2 = vpop.f32.mrf.mxu0 }
0x10d7   :  { %v9343_v13 = vadd.f32 %v9342_v2, %v9274_v49  ;;  %v14350_v2 = vld [vmem:[#allocation8_spill] sm:$0xff] }
0x10d8   :  { %v14352_v49 = vld [vmem:[#allocation12_spill] sm:$0xff] }
0x10d9   :  { %v9380_v42 = vadd.f32 %v9379_v54, %v9343_v13  ;;  %v14348_v54 = vld [vmem:[#allocation19_spill] sm:$0xff]  ;;  %v14361_v13 = vld [vmem:[#allocation26_spill] sm:$0xff] }
0x10db   :  { %10522 = vtanh.f32 %v9380_v42 }
0x10e1   :  { %v10523_v57 = vpop.eup %10522 }
0x10e2   :  { %9383 = vst [vmem:[#allocation2 + $0x1a] sm:$0x1] %v10523_v57  ;;  %v9418_v34 = vand.u32 4294901760, %v10523_v57 }
0x10e4   :  { %9524 = vmatmul.f32.vlgmr.msra.gmra.mxu3 %v9418_v34  ;;  %v9419_v53 = vsub.f32 %v10523_v57, %v9418_v34  ;;  %v14347_v57 = vld [vmem:[#allocation22_spill] sm:$0xff] }
0x10e5   :  { %9928 = vmatpush.msra.mxu3 %v10601_v3 }
0x10e6   :  { %9578 = vmatmul.f32.vlgmr.msrb.gmra.mxu0 %v9419_v53  ;;  %v9420_v63 = vand.u32 4294901760, %v9419_v53 }
0x10e7   :  { %9930 = vmatpush.msra.mxu3 %v10603_v4  ;;  %9969 = vmatpush.msrb.mxu0 %v10636_v22 }
0x10e8   :  { %9617 = vmatmul.f32.vlgmr.msrb.gmra.mxu1 %v9420_v63  ;;  %v9421_v59 = vsub.f32 %v9419_v53, %v9420_v63  ;;  %v14345_v53 = vld [vmem:[#allocation17_spill] sm:$0xff]  ;;  %v14358_v63 = vld [vmem:[#allocation23_spill] sm:$0xff] }
0x10e9   :  { %9932 = vmatpush.msra.mxu3 %v10605_v5  ;;  %10036 = vmatpush.msrb.mxu1 %v10601_v3 }
0x10ea   :  { %v9422_v42 = vand.u32 4294901760, %v9421_v59  ;;  %9973 = vmatpush.msrb.mxu0 %v10639_v23  ;;  %v14362_v59 = vld [vmem:[#allocation15_spill] sm:$0xff] }
0x10eb   :  { %9934 = vmatpush.msra.mxu3 %v10607_v9  ;;  %10038 = vmatpush.msrb.mxu1 %v10603_v4 }
0x10ec   :  { %9423 = vmatmul.f32.vlgmr.msra.gmra.mxu2 %v9422_v42  ;;  %9723 = vmatmul.f32.vlgmr.msrb.gmra.mxu3 %v9418_v34  ;;  %v9384_v42 = vrot.slane %v14362_v59, 3 }
0x10ed   :  { %9875 = vmatpush.msra.mxu2 %v10615_v14  ;;  %9936 = vmatpush.msra.mxu3 %v10609_v10 }
0x10ee   :  { %10040 = vmatpush.msrb.mxu1 %v10605_v5  ;;  %9977 = vmatpush.msrb.mxu0 %v10642_v24 }
0x10ef   :  { %9878 = vmatpush.msra.mxu2 %v10618_v15  ;;  %9938 = vmatpush.msra.mxu3 %v10611_v11 }
0x10f0   :  { %10042 = vmatpush.msrb.mxu1 %v10607_v9  ;;  %9981 = vmatpush.msrb.mxu0 %v10649_v26 }
0x10f1   :  { %9881 = vmatpush.msra.mxu2 %v10621_v16  ;;  %9940 = vmatpush.msra.mxu3 %v10623_v17 }
0x10f2   :  { %10044 = vmatpush.msrb.mxu1 %v10609_v10  ;;  %9985 = vmatpush.msrb.mxu0 %v10652_v27 }
0x10f3   :  { %9884 = vmatpush.msra.mxu2 %v10627_v18  ;;  %9942 = vmatpush.msra.mxu3 %v10632_v20 }
0x10f4   :  { %9686 = vmatmul.f32.vlgmr.msrb.gmra.mxu2 %v9418_v34  ;;  %10046 = vmatpush.msrb.mxu1 %v10611_v11  ;;  %v14346_v34 = vld [vmem:[#allocation6_spill] sm:$0xff] }
0x10f5   :  { %9887 = vmatpush.msra.mxu2 %v10630_v19  ;;  %9944 = vmatpush.msra.mxu3 %v10665_v32 }
0x10f6   :  { %10048 = vmatpush.msrb.mxu1 %v10623_v17  ;;  %9989 = vmatpush.msrb.mxu0 %v10680_v39 }
0x10f7   :  { %9890 = vmatpush.msra.mxu2 %v10645_v25  ;;  %9946 = vmatpush.msra.mxu3 %v10693_v44 }
0x10f8   :  { %10050 = vmatpush.msrb.mxu1 %v10632_v20  ;;  %9993 = vmatpush.msrb.mxu0 %v10686_v41 }
0x10f9   :  { %9893 = vmatpush.msra.mxu2 %v10655_v28  ;;  %9948 = vmatpush.msra.mxu3 %v10698_v46 }
0x10fa   :  { %10052 = vmatpush.msrb.mxu1 %v10665_v32  ;;  %9997 = vmatpush.msrb.mxu0 %v10701_v47 }
0x10fb   :  { %9896 = vmatpush.msra.mxu2 %v10669_v33  ;;  %9950 = vmatpush.msra.mxu3 %v10714_v52 }
0x10fc   :  { %10054 = vmatpush.msrb.mxu1 %v10693_v44  ;;  %10001 = vmatpush.msrb.mxu0 %v10725_v56 }
0x10fd   :  { %9899 = vmatpush.msra.mxu2 %v10696_v45  ;;  %9952 = vmatpush.msra.mxu3 %v10730_v58 }
0x10fe   :  { %10056 = vmatpush.msrb.mxu1 %v10698_v46  ;;  %10005 = vmatpush.msrb.mxu0 %v10741_v62 }
0x10ff   :  { %9902 = vmatpush.msra.mxu2 %v10712_v51  ;;  %9954 = vmatpush.msra.mxu3 %v10746_v0 }
0x1100   :  { %10058 = vmatpush.msrb.mxu1 %v10714_v52  ;;  %10009 = vmatpush.msrb.mxu0 %v10757_v7 }
0x1101   :  { %9905 = vmatpush.msra.mxu2 %v13874_v40  ;;  %9956 = vmatpush.msra.mxu3 %v10762_v12 }
0x1102   :  { %10060 = vmatpush.msrb.mxu1 %v10730_v58  ;;  %10013 = vmatpush.msrb.mxu0 %v10773_v29 }
0x1103   :  { %9908 = vmatpush.msra.mxu2 %v13875_v48  ;;  %9958 = vmatpush.msra.mxu3 %v10778_v31 }
0x1104   :  { %10062 = vmatpush.msrb.mxu1 %v10746_v0  ;;  %10017 = vmatpush.msrb.mxu0 %v10789_v38 }
0x1105   :  { %9911 = vmatpush.msra.mxu2 %v13876_v6  ;;  %10122 = vmatpush.msrb.mxu3 %v10672_v36  ;;  %v14349_v36 = vld [vmem:[#allocation7_spill] sm:$0xff] }
0x1106   :  { %10064 = vmatpush.msrb.mxu1 %v10762_v12  ;;  %10021 = vmatpush.msrb.mxu0 %v10803_v50 }
0x1107   :  { %9914 = vmatpush.msra.mxu2 %v13877_v8  ;;  %10128 = vmatpush.msrb.mxu3 %v10674_v37  ;;  %v14351_v37 = vld [vmem:[#allocation10_spill] sm:$0xff] }
0x1108   :  { %10066 = vmatpush.msrb.mxu1 %v10778_v31  ;;  %10025 = vmatpush.msrb.mxu0 %v10817_v60 }
0x1109   :  { %9917 = vmatpush.msra.mxu2 %v14345_v53  ;;  %10134 = vmatpush.msrb.mxu3 %v14346_v34 }
0x110a   :  { %10029 = vmatpush.msrb.mxu0 %v14347_v57 }
0x110b   :  { %9920 = vmatpush.msra.mxu2 %v14348_v54  ;;  %10140 = vmatpush.msrb.mxu3 %v14349_v36 }
0x110d   :  { %10077 = vmatpush.msrb.mxu2 %v10601_v3  ;;  %10146 = vmatpush.msrb.mxu3 %v14350_v2 }
0x110f   :  { %10079 = vmatpush.msrb.mxu2 %v10603_v4  ;;  %10152 = vmatpush.msrb.mxu3 %v14351_v37 }
0x1111   :  { %10081 = vmatpush.msrb.mxu2 %v10605_v5  ;;  %10158 = vmatpush.msrb.mxu3 %v14352_v49 }
0x1113   :  { %10083 = vmatpush.msrb.mxu2 %v10607_v9  ;;  %10164 = vmatpush.msrb.mxu3 %v14353_v61 }
0x1115   :  { %10085 = vmatpush.msrb.mxu2 %v10609_v10  ;;  %10170 = vmatpush.msrb.mxu3 %v14354_v55 }
0x1117   :  { %10087 = vmatpush.msrb.mxu2 %v10611_v11  ;;  %10176 = vmatpush.msrb.mxu3 %v14355_v43 }
0x1119   :  { %10089 = vmatpush.msrb.mxu2 %v10623_v17  ;;  %10182 = vmatpush.msrb.mxu3 %v14356_v1 }
0x111b   :  { %10091 = vmatpush.msrb.mxu2 %v10632_v20  ;;  %10188 = vmatpush.msrb.mxu3 %v14357_v21 }
0x111d   :  { %10093 = vmatpush.msrb.mxu2 %v10665_v32  ;;  %10194 = vmatpush.msrb.mxu3 %v14358_v63 }
0x111f   :  { %10095 = vmatpush.msrb.mxu2 %v10693_v44  ;;  %10200 = vmatpush.msrb.mxu3 %v14359_v30 }
0x1121   :  { %10097 = vmatpush.msrb.mxu2 %v10698_v46  ;;  %10206 = vmatpush.msrb.mxu3 %v14360_v35 }
0x1123   :  { %10099 = vmatpush.msrb.mxu2 %v10714_v52  ;;  %10212 = vmatpush.msrb.mxu3 %v14361_v13 }
0x1125   :  { %10101 = vmatpush.msrb.mxu2 %v10730_v58 }
0x1127   :  { %10103 = vmatpush.msrb.mxu2 %v10746_v0 }
0x1129   :  { %10105 = vmatpush.msrb.mxu2 %v10762_v12 }
0x112b   :  { %10107 = vmatpush.msrb.mxu2 %v10778_v31 }
0x1163   :  { %v9579_v49 = vpop.f32.mrf.mxu0 }
0x1165   :  { %v9618_v55 = vpop.f32.mrf.mxu1 }
0x1167   :  { %v9525_v34 = vpop.f32.mrf.mxu3 }
0x116f   :  { %v9424_v36 = vpop.f32.mrf.mxu2  ;;  %v9724_v63 = vpop.f32.mrf.mxu3 }
0x1170   :  { %v9425_v2 = vadd.f32 %v9424_v36, %v9384_v42 }
0x1172   :  { %v9526_v37 = vadd.f32 %v9525_v34, %v9425_v2 }
0x1174   :  { %v9580_v61 = vadd.f32 %v9579_v49, %v9526_v37 }
0x1176   :  { %v9619_v43 = vadd.f32 %v9618_v55, %v9580_v61 }
0x1177   :  { %v9687_v1 = vpop.f32.mrf.mxu2 }
0x1178   :  { %v9688_v21 = vadd.f32 %v9687_v1, %v9619_v43 }
0x117a   :  { %v9725_v30 = vadd.f32 %v9724_v63, %v9688_v21 }
0x117c   :  { %10524 = vtanh.f32 %v9725_v30 }
0x1182   :  { %v10525_v35 = vpop.eup %10524 }
0x1183   :  { %9728 = vst [vmem:[#allocation2 + $0x1b] sm:$0x1] %v10525_v35  ;;  %v9763_v13 = vand.u32 4294901760, %v10525_v35 }
0x1185   :  { %9869 = vmatmul.f32.vlgmr.msra.gmra.mxu1 %v9763_v13  ;;  %v9764_v54 = vsub.f32 %v10525_v35, %v9763_v13 }
0x1186   :  { %10273 = vmatpush.msra.mxu1 %v10601_v3 }
0x1187   :  { %9923 = vmatmul.f32.vlgmr.msra.gmra.mxu2 %v9764_v54  ;;  %v9765_v59 = vand.u32 4294901760, %v9764_v54 }
0x1188   :  { %10275 = vmatpush.msra.mxu1 %v10603_v4  ;;  %10314 = vmatpush.msra.mxu2 %v10636_v22 }
0x1189   :  { %9962 = vmatmul.f32.vlgmr.msra.gmra.mxu3 %v9765_v59  ;;  %v9766_v42 = vsub.f32 %v9764_v54, %v9765_v59 }
0x118a   :  { %10277 = vmatpush.msra.mxu1 %v10605_v5  ;;  %10381 = vmatpush.msra.mxu3 %v10601_v3  ;;  %v14363_v3 = vld [vmem:[#allocation19_spill] sm:$0xff] }
0x118b   :  { %v9767_v34 = vand.u32 4294901760, %v9766_v42  ;;  %10318 = vmatpush.msra.mxu2 %v10639_v23 }
0x118c   :  { %10279 = vmatpush.msra.mxu1 %v10607_v9  ;;  %10383 = vmatpush.msra.mxu3 %v10603_v4  ;;  %v14364_v4 = vld [vmem:[#allocation15_spill] sm:$0xff] }
0x118d   :  { %9768 = vmatmul.f32.vlgmr.msra.gmra.mxu0 %v9767_v34  ;;  %10068 = vmatmul.f32.vlgmr.msrb.gmra.mxu1 %v9763_v13 }
0x118e   :  { %10220 = vmatpush.msra.mxu0 %v10615_v14  ;;  %10281 = vmatpush.msra.mxu1 %v10609_v10 }
0x118f   :  { %10385 = vmatpush.msra.mxu3 %v10605_v5  ;;  %10322 = vmatpush.msra.mxu2 %v10642_v24  ;;  %v9729_v5 = vrot.slane %v14364_v4, 4 }
0x1190   :  { %10223 = vmatpush.msra.mxu0 %v10618_v15  ;;  %10283 = vmatpush.msra.mxu1 %v10611_v11 }
0x1191   :  { %10387 = vmatpush.msra.mxu3 %v10607_v9  ;;  %10326 = vmatpush.msra.mxu2 %v10649_v26 }
0x1192   :  { %10226 = vmatpush.msra.mxu0 %v10621_v16  ;;  %10285 = vmatpush.msra.mxu1 %v10623_v17 }
0x1193   :  { %10389 = vmatpush.msra.mxu3 %v10609_v10  ;;  %10330 = vmatpush.msra.mxu2 %v10652_v27 }
0x1194   :  { %10229 = vmatpush.msra.mxu0 %v10627_v18  ;;  %10287 = vmatpush.msra.mxu1 %v10632_v20 }
0x1195   :  { %10031 = vmatmul.f32.vlgmr.msrb.gmra.mxu0 %v9763_v13  ;;  %10391 = vmatpush.msra.mxu3 %v10611_v11 }
0x1196   :  { %10232 = vmatpush.msra.mxu0 %v10630_v19  ;;  %10289 = vmatpush.msra.mxu1 %v10665_v32 }
0x1197   :  { %10393 = vmatpush.msra.mxu3 %v10623_v17  ;;  %10334 = vmatpush.msra.mxu2 %v10680_v39 }
0x1198   :  { %10235 = vmatpush.msra.mxu0 %v10645_v25  ;;  %10291 = vmatpush.msra.mxu1 %v10693_v44 }
0x1199   :  { %10395 = vmatpush.msra.mxu3 %v10632_v20  ;;  %10338 = vmatpush.msra.mxu2 %v10686_v41 }
0x119a   :  { %10238 = vmatpush.msra.mxu0 %v10655_v28  ;;  %10293 = vmatpush.msra.mxu1 %v10698_v46 }
0x119b   :  { %10397 = vmatpush.msra.mxu3 %v10665_v32  ;;  %10342 = vmatpush.msra.mxu2 %v10701_v47 }
0x119c   :  { %10241 = vmatpush.msra.mxu0 %v10669_v33  ;;  %10295 = vmatpush.msra.mxu1 %v10714_v52  ;;  %v10074_v33 = vrot.slane %v14364_v4, 5 }
0x119d   :  { %10399 = vmatpush.msra.mxu3 %v10693_v44  ;;  %10346 = vmatpush.msra.mxu2 %v10725_v56 }
0x119e   :  { %10244 = vmatpush.msra.mxu0 %v10696_v45  ;;  %10297 = vmatpush.msra.mxu1 %v10730_v58 }
0x119f   :  { %10401 = vmatpush.msra.mxu3 %v10698_v46  ;;  %10350 = vmatpush.msra.mxu2 %v10741_v62 }
0x11a0   :  { %10247 = vmatpush.msra.mxu0 %v10712_v51  ;;  %10299 = vmatpush.msra.mxu1 %v10746_v0 }
0x11a1   :  { %10403 = vmatpush.msra.mxu3 %v10714_v52  ;;  %10354 = vmatpush.msra.mxu2 %v10757_v7 }
0x11a2   :  { %10250 = vmatpush.msra.mxu0 %v13874_v40  ;;  %10301 = vmatpush.msra.mxu1 %v10762_v12 }
0x11a3   :  { %10405 = vmatpush.msra.mxu3 %v10730_v58  ;;  %10358 = vmatpush.msra.mxu2 %v10773_v29  ;;  %v10540_v29 = vld [vmem:[%s13798_s1 + $0x2] ss:$0 sm:$0xff] }
0x11a4   :  { %10253 = vmatpush.msra.mxu0 %v13875_v48  ;;  %10303 = vmatpush.msra.mxu1 %v10778_v31 }
0x11a5   :  { %10407 = vmatpush.msra.mxu3 %v10746_v0  ;;  %10362 = vmatpush.msra.mxu2 %v10789_v38 }
0x11a6   :  { %10256 = vmatpush.msra.mxu0 %v13876_v6 }
0x11a7   :  { %10409 = vmatpush.msra.mxu3 %v10762_v12  ;;  %10366 = vmatpush.msra.mxu2 %v10803_v50 }
0x11a8   :  { %10259 = vmatpush.msra.mxu0 %v13877_v8 }
0x11a9   :  { %10411 = vmatpush.msra.mxu3 %v10778_v31  ;;  %10370 = vmatpush.msra.mxu2 %v10817_v60  ;;  %v10541_v60 = vld [vmem:[%s13798_s1 + $0x3] ss:$0 sm:$0xff] }
0x11aa   :  { %10262 = vmatpush.msra.mxu0 %v14345_v53 }
0x11ab   :  { %10374 = vmatpush.msra.mxu2 %v14347_v57 }
0x11ac   :  { %10265 = vmatpush.msra.mxu0 %v14363_v3 }
0x1202   :  { %v9870_v9 = vpop.f32.mrf.mxu1 }
0x120a   :  { %v9769_v10 = vpop.f32.mrf.mxu0  ;;  %v9924_v15 = vpop.f32.mrf.mxu2 }
0x120b   :  { %v9770_v11 = vadd.f32 %v9769_v10, %v9729_v5  ;;  %v10069_v22 = vpop.f32.mrf.mxu1 }
0x120c   :  { %v9963_v17 = vpop.f32.mrf.mxu3 }
0x120d   :  { %v9871_v14 = vadd.f32 %v9870_v9, %v9770_v11 }
0x120f   :  { %v9925_v16 = vadd.f32 %v9924_v15, %v9871_v14 }
0x1211   :  { %v9964_v18 = vadd.f32 %v9963_v17, %v9925_v16 }
0x1212   :  { %v10032_v19 = vpop.f32.mrf.mxu0 }
0x1213   :  { %v10033_v20 = vadd.f32 %v10032_v19, %v9964_v18 }
0x1215   :  { %v10070_v23 = vadd.f32 %v10069_v22, %v10033_v20 }
0x1217   :  { %10526 = vtanh.f32 %v10070_v23 }
0x121d   :  { %v10527_v24 = vpop.eup %10526 }
0x121e   :  { %10073 = vst [vmem:[#allocation2 + $0x1c] sm:$0x1] %v10527_v24  ;;  %v10108_v25 = vand.u32 4294901760, %v10527_v24 }
0x1220   :  { %10214 = vmatmul.f32.vlgmr.msrb.gmra.mxu3 %v10108_v25  ;;  %v10109_v26 = vsub.f32 %v10527_v24, %v10108_v25 }
0x1222   :  { %10268 = vmatmul.f32.vlgmr.msra.gmra.mxu0 %v10109_v26  ;;  %v10110_v27 = vand.u32 4294901760, %v10109_v26 }
0x1224   :  { %10307 = vmatmul.f32.vlgmr.msra.gmra.mxu1 %v10110_v27  ;;  %v10111_v28 = vsub.f32 %v10109_v26, %v10110_v27 }
0x1226   :  { %v10112_v32 = vand.u32 4294901760, %v10111_v28 }
0x1228   :  { %10113 = vmatmul.f32.vlgmr.msrb.gmra.mxu2 %v10112_v32  ;;  %10413 = vmatmul.f32.vlgmr.msra.gmra.mxu3 %v10108_v25 }
0x1230   :  { %10376 = vmatmul.f32.vlgmr.msra.gmra.mxu2 %v10108_v25 }
0x129f   :  { %v10269_v46 = vpop.f32.mrf.mxu0 }
0x12a1   :  { %v10308_v51 = vpop.f32.mrf.mxu1 }
0x12a3   :  { %v10215_v39 = vpop.f32.mrf.mxu3 }
0x12ab   :  { %v10114_v41 = vpop.f32.mrf.mxu2  ;;  %v10414_v62 = vpop.f32.mrf.mxu3 }
0x12ac   :  { %v10115_v44 = vadd.f32 %v10114_v41, %v10074_v33 }
0x12ae   :  { %v10216_v45 = vadd.f32 %v10215_v39, %v10115_v44 }
0x12b0   :  { %v10270_v47 = vadd.f32 %v10269_v46, %v10216_v45 }
0x12b2   :  { %v10309_v52 = vadd.f32 %v10308_v51, %v10270_v47 }
0x12b3   :  { %v10377_v56 = vpop.f32.mrf.mxu2 }
0x12b4   :  { %v10378_v58 = vadd.f32 %v10377_v56, %v10309_v52 }
0x12b6   :  { %v10415_v0 = vadd.f32 %v10414_v62, %v10378_v58 }
0x12b8   :  { %10528 = vtanh.f32 %v10415_v0 }
0x12be   :  { %v10529_v7 = vpop.eup %10528 }
0x12bf   :  { %10418 = vst [vmem:[#allocation2 + $0x1d] sm:$0x1] %v10529_v7 }
0x12c0   :  { %10419 = vst [vmem:[%s13801_s4] sm:$0x1] %v10529_v7 }
0x12c6   :  { %v10423_v12 = vld [vmem:[#allocation2 + $0x18] sm:$0x3f] }
0x12c7   :  { %v10428_v31 = vmul.f32 %v10540_v29, %v10423_v12 }
0x12c9   :  { %v10436_v38 = vsel %vm10435_vm1, %v10428_v31, 0.0 }
0x12ca   :  { %10437 = vadd.xlane.f32.xlu1 %v10436_v38 }
0x133d   :  { %v10438_v50 = vpop.xlane.xlu1 %10437 }
0x133e   :  { %v10443_v40 = vadd.f32 %v10541_v60, %v10438_v50 }
0x1340   :  { %10449 = vst.msk [vmem:[%s13800_s3 + $0x18] sm:$0x3f] %vm10448_vm2, %v10443_v40 }
0x1341   :  { %10458 = vsyncpa [#allocation4], 1 }

</bundles_post_ra>
